<compile_context>
chip_gen: v6e
topology: v6e:2x2x1
jax: 0.10.0
libtpu: 0.0.40
codegen_flags: <defaults>
</compile_context>

<pallas_src>
import math
import functools

import jax
import jax.numpy as jnp
from jax.experimental import pallas as pl
from jax.experimental.pallas import tpu as pltpu

BF16 = jnp.bfloat16


def _default_vmem_limit():
    """Derive a safe scoped-VMEM limit from the hardware (v5e/v6e: 64 MiB,
    v7x: 32 MiB); fall back to 32 MiB if the query is unavailable."""
    try:
        info = pltpu.get_tpu_info()
        cap = int(getattr(info, "vmem_capacity_bytes", 0))
        if cap > 0:
            return max(32 * 1024 * 1024, min(cap // 2, 64 * 1024 * 1024))
    except Exception:
        pass
    return 32 * 1024 * 1024


VMEM_LIMIT = _default_vmem_limit()


def _round_up(x, m):
    return ((x + m - 1) // m) * m


def _tile_rows(M, cap=512):
    """Row-block size (multiple of 8) and padded row count."""
    tm = min(cap, _round_up(M, 8))
    return tm, _round_up(M, tm)


def _pick_rows(n, cap=512):
    """Largest multiple-of-8 divisor of n that is <= cap; else n (full dim)."""
    cap = min(cap, n)
    d = cap - (cap % 8)
    while d >= 8:
        if n % d == 0:
            return d
        d -= 8
    return n


def _cparams(*sems):
    return pltpu.CompilerParams(dimension_semantics=sems,
                                vmem_limit_bytes=VMEM_LIMIT)


# ----------------------------------------------------------------------------
# Row-tiled dense kernels (bf16 MXU operands, f32 accumulation, out_dtype knob)
# ----------------------------------------------------------------------------

def _dense_kernel(x_ref, w_ref, b_ref, o_ref, *, act):
    y = jnp.dot(x_ref[...], w_ref[...], preferred_element_type=jnp.float32)
    y = y + b_ref[...]
    if act == "relu":
        y = jnp.maximum(y, 0.0)
    o_ref[...] = y.astype(o_ref.dtype)


def pallas_dense(x, w, b, act="none", out_dtype=jnp.float32, tm_cap=512):
    """y = act(x @ w + b); x:(M,K) w:(K,N) b:(N,).  Row-tiled, parallel grid."""
    M, K = x.shape
    N = w.shape[1]
    tm, Mp = _tile_rows(M, tm_cap)
    xb = x.astype(BF16)
    if Mp != M:
        xb = jnp.pad(xb, ((0, Mp - M), (0, 0)))
    y = pl.pallas_call(
        functools.partial(_dense_kernel, act=act),
        out_shape=jax.ShapeDtypeStruct((Mp, N), out_dtype),
        grid=(Mp // tm,),
        in_specs=[
            pl.BlockSpec((tm, K), lambda i: (i, 0)),
            pl.BlockSpec((K, N), lambda i: (0, 0)),
            pl.BlockSpec((1, N), lambda i: (0, 0)),
        ],
        out_specs=pl.BlockSpec((tm, N), lambda i: (i, 0)),
        compiler_params=_cparams("parallel"),
    )(xb, w.astype(BF16), b.reshape(1, N).astype(jnp.float32))
    return y[:M] if Mp != M else y


def _dense_ln_relu_kernel(x_ref, w_ref, b_ref, g_ref, be_ref, o_ref, *, eps):
    y = jnp.dot(x_ref[...], w_ref[...], preferred_element_type=jnp.float32)
    y = y + b_ref[...]
    mu = jnp.mean(y, axis=-1, keepdims=True)
    var = jnp.mean((y - mu) ** 2, axis=-1, keepdims=True)
    y = (y - mu) * jax.lax.rsqrt(var + eps)
    o_ref[...] = jnp.maximum(y * g_ref[...] + be_ref[...], 0.0).astype(o_ref.dtype)


def pallas_dense_ln_relu(x, w, b, g, beta, eps=1e-5, out_dtype=jnp.float32,
                         tm_cap=512):
    M, K = x.shape
    N = w.shape[1]
    tm, Mp = _tile_rows(M, tm_cap)
    xb = x.astype(BF16)
    if Mp != M:
        xb = jnp.pad(xb, ((0, Mp - M), (0, 0)))
    y = pl.pallas_call(
        functools.partial(_dense_ln_relu_kernel, eps=eps),
        out_shape=jax.ShapeDtypeStruct((Mp, N), out_dtype),
        grid=(Mp // tm,),
        in_specs=[
            pl.BlockSpec((tm, K), lambda i: (i, 0)),
            pl.BlockSpec((K, N), lambda i: (0, 0)),
            pl.BlockSpec((1, N), lambda i: (0, 0)),
            pl.BlockSpec((1, N), lambda i: (0, 0)),
            pl.BlockSpec((1, N), lambda i: (0, 0)),
        ],
        out_specs=pl.BlockSpec((tm, N), lambda i: (i, 0)),
        compiler_params=_cparams("parallel"),
    )(xb, w.astype(BF16), b.reshape(1, N).astype(jnp.float32),
      g.reshape(1, N).astype(jnp.float32), beta.reshape(1, N).astype(jnp.float32))
    return y[:M] if Mp != M else y


# ----------------------------------------------------------------------------
# Channels-first ("transposed") dense kernels: output (Cout, M) with the huge
# M dimension as the lane axis -> unmasked full-width vector stores.
# ----------------------------------------------------------------------------

def _dense_T_kernel(w_ref, p_ref, b_ref, o_ref, *, act):
    y = jnp.dot(w_ref[...], p_ref[...], preferred_element_type=jnp.float32)
    y = y + b_ref[...]
    if act == "relu":
        y = jnp.maximum(y, 0.0)
    o_ref[...] = y.astype(o_ref.dtype)


def _dense_T_res_kernel(w_ref, p_ref, b_ref, r_ref, o_ref):
    y = jnp.dot(w_ref[...], p_ref[...], preferred_element_type=jnp.float32)
    o_ref[...] = jnp.maximum(y + b_ref[...] + r_ref[...], 0.0).astype(o_ref.dtype)


def pallas_dense_T(w, pT, b, act="none", out_dtype=BF16, res=None, tn_cap=2048):
    """act(w @ pT + b [+ res]); w:(Cout,K) pT:(K,M) -> (Cout,M) lane-dense."""
    Cout, K = w.shape
    M = pT.shape[1]
    tn = min(tn_cap, _round_up(M, 128))
    Mp = _round_up(M, tn)
    pTb = pT.astype(BF16)
    if Mp != M:
        pTb = jnp.pad(pTb, ((0, 0), (0, Mp - M)))
    args = [w.astype(BF16), pTb, b.reshape(Cout, 1).astype(jnp.float32)]
    in_specs = [
        pl.BlockSpec((Cout, K), lambda i: (0, 0)),
        pl.BlockSpec((K, tn), lambda i: (0, i)),
        pl.BlockSpec((Cout, 1), lambda i: (0, 0)),
    ]
    if res is None:
        kern = functools.partial(_dense_T_kernel, act=act)
    else:
        kern = _dense_T_res_kernel
        rf = res.astype(jnp.float32)
        if Mp != M:
            rf = jnp.pad(rf, ((0, 0), (0, Mp - M)))
        args.append(rf)
        in_specs.append(pl.BlockSpec((Cout, tn), lambda i: (0, i)))
    y = pl.pallas_call(
        kern,
        out_shape=jax.ShapeDtypeStruct((Cout, Mp), out_dtype),
        grid=(Mp // tn,),
        in_specs=in_specs,
        out_specs=pl.BlockSpec((Cout, tn), lambda i: (0, i)),
        compiler_params=_cparams("parallel"),
    )(*args)
    return y[:, :M] if Mp != M else y


def _im2col1d_T(x_cbl, K, stride, pad):
    """x:(Cin,B,Lin) -> patches (Cin*K, B*Lout), Lout.  Channels-first."""
    Cin, B, Lin = x_cbl.shape
    xp = jnp.pad(x_cbl, ((0, 0), (0, 0), (pad, pad)))
    Lout = (Lin + 2 * pad - K) // stride + 1
    idx = jnp.arange(Lout)[:, None] * stride + jnp.arange(K)[None, :]
    pat = xp[:, :, idx].transpose(0, 3, 1, 2)        # (Cin, K, B, Lout)
    return pat.reshape(Cin * K, B * Lout), Lout
# TODO(synk): generate the K-tap shifted reads inside the kernel via pl.ds on a
# padded (Cin, B*Lp) input to avoid the im2col HBM round trip for huge windows.


def conv1d_cf(x_cbl, w, b, *, stride, pad, act="relu", res_cbl=None):
    """Channels-first Conv1d (+folded BN) [+fused residual add] + ReLU."""
    Cin, B, Lin = x_cbl.shape
    Cout, _, K = w.shape
    pat, Lout = _im2col1d_T(x_cbl, K, stride, pad)
    wm = w.reshape(Cout, Cin * K)
    res = None if res_cbl is None else res_cbl.reshape(Cout, B * Lout)
    y = pallas_dense_T(wm, pat, b, act=act, out_dtype=BF16, res=res)
    return y.reshape(Cout, B, Lout)


def maxpool_cf(x, k):
    C, B, Lx = x.shape
    return x.reshape(C, B, Lx // k, k).max(axis=-1)


# ----------------------------------------------------------------------------
# DIFFormer layer = three Pallas kernels
#   Q1 (parallel) : fused QKV (+vsum folded into extra weight cols) projection
#   Q2 (arbitrary): tiny reduction -> scaled/masked K^T V, scaled col-sum of K
#   Q3 (parallel) : attention (+ single A@vsum GCN) + residual + LayerNorm
# ----------------------------------------------------------------------------

def _dif_qkv_kernel(x_ref, w_ref, b_ref, qkv_ref, vsum_ref, *, HC):
    y = jnp.dot(x_ref[...], w_ref[...], preferred_element_type=jnp.float32)
    y = y + b_ref[...]
    qkv_ref[...] = y[:, :3 * HC].astype(qkv_ref.dtype)
    vsum_ref[...] = y[:, 3 * HC:].astype(vsum_ref.dtype)


def pallas_dif_qkv(x, wqkv, bqkv, *, HC, C, tm):
    N = x.shape[0]
    W = 3 * HC + C
    return pl.pallas_call(
        functools.partial(_dif_qkv_kernel, HC=HC),
        out_shape=(jax.ShapeDtypeStruct((N, 3 * HC), BF16),
                   jax.ShapeDtypeStruct((N, C), BF16)),
        grid=(N // tm,),
        in_specs=[
            pl.BlockSpec((tm, C), lambda i: (i, 0)),
            pl.BlockSpec((C, W), lambda i: (0, 0)),
            pl.BlockSpec((1, W), lambda i: (0, 0)),
        ],
        out_specs=(pl.BlockSpec((tm, 3 * HC), lambda i: (i, 0)),
                   pl.BlockSpec((tm, C), lambda i: (i, 0))),
        compiler_params=_cparams("parallel"),
    )(x.astype(BF16), wqkv.astype(BF16), bqkv.reshape(1, W).astype(jnp.float32))


def _dif_reduce_kernel(qkv_ref, mask_ref, ktv_ref, ksum_ref,
                       acc_s, ks_s, qs_s, kss_s, *, HC):
    @pl.when(pl.program_id(0) == 0)
    def _init():
        acc_s[...] = jnp.zeros_like(acc_s)
        ks_s[...] = jnp.zeros_like(ks_s)
        qs_s[...] = jnp.zeros_like(qs_s)
        kss_s[...] = jnp.zeros_like(kss_s)

    q = qkv_ref[:, 0:HC]
    k = qkv_ref[:, HC:2 * HC]
    v = qkv_ref[:, 2 * HC:3 * HC]
    acc_s[...] += jax.lax.dot_general(k, v, (((0,), (0,)), ((), ())),
                                      preferred_element_type=jnp.float32)
    kf = k.astype(jnp.float32)
    qf = q.astype(jnp.float32)
    ks_s[...] += jnp.sum(kf, axis=0, keepdims=True)
    qs_s[...] += jnp.sum(qf * qf, axis=0, keepdims=True)
    kss_s[...] += jnp.sum(kf * kf, axis=0, keepdims=True)

    @pl.when(pl.program_id(0) == pl.num_programs(0) - 1)
    def _fin():
        # scale = 1 / (||Q||_F * ||K||_F), folded into ktv and ksum
        scale = jax.lax.rsqrt(jnp.sum(qs_s[...], axis=1, keepdims=True) *
                              jnp.sum(kss_s[...], axis=1, keepdims=True))
        ktv_ref[...] = (acc_s[...] * scale * mask_ref[...]).astype(ktv_ref.dtype)
        ksum_ref[...] = ks_s[...] * scale


def pallas_dif_reduce(qkv, mask_f, *, HC, tm):
    N = qkv.shape[0]
    return pl.pallas_call(
        functools.partial(_dif_reduce_kernel, HC=HC),
        out_shape=(jax.ShapeDtypeStruct((HC, HC), BF16),
                   jax.ShapeDtypeStruct((1, HC), jnp.float32)),
        grid=(N // tm,),
        in_specs=[
            pl.BlockSpec((tm, 3 * HC), lambda i: (i, 0)),
            pl.BlockSpec((HC, HC), lambda i: (0, 0)),
        ],
        out_specs=(pl.BlockSpec((HC, HC), lambda i: (0, 0)),
                   pl.BlockSpec((1, HC), lambda i: (0, 0))),
        scratch_shapes=[pltpu.VMEM((HC, HC), jnp.float32),
                        pltpu.VMEM((1, HC), jnp.float32),
                        pltpu.VMEM((1, HC), jnp.float32),
                        pltpu.VMEM((1, HC), jnp.float32)],
        compiler_params=_cparams("arbitrary"),     # cross-block reduction
    )(qkv, mask_f)


def _dif_attn_kernel(qkv_ref, x_ref, a_ref, vsum_ref, am_ref, hs_ref,
                     g_ref, b_ref, o_ref, *, HC, n_nodes, alpha, num_heads, eps):
    q = qkv_ref[:, 0:HC]
    v = qkv_ref[:, 2 * HC:3 * HC].astype(jnp.float32)

    # one lane-dense matmul against [block-diag K^T V | ksum*mask]
    nd = jnp.dot(q, am_ref[...], preferred_element_type=jnp.float32)   # (tm, 2HC)
    num = nd[:, 0:HC] + n_nodes * v
    den = nd[:, HC:2 * HC] + n_nodes
    attn = num * pl.reciprocal(den, approx=True)                       # (tm, HC)
    heads = jnp.dot(attn.astype(BF16), hs_ref[...],
                    preferred_element_type=jnp.float32)                # (tm, C)

    # GCN branch once:  A_rows @ sum_h(v_h)
    gcn = jnp.dot(a_ref[...], vsum_ref[...],
                  preferred_element_type=jnp.float32)                  # (tm, C)

    out = (alpha / num_heads) * (gcn + heads) \
        + (1.0 - alpha) * x_ref[...].astype(jnp.float32)
    mu = jnp.mean(out, axis=-1, keepdims=True)
    var = jnp.mean((out - mu) ** 2, axis=-1, keepdims=True)
    out = (out - mu) * jax.lax.rsqrt(var + eps)
    o_ref[...] = (out * g_ref[...] + b_ref[...]).astype(o_ref.dtype)


def pallas_dif_attn(qkv, x, A_bf, vsum, attn_mat, headsum, g, b,
                    *, HC, C, num_heads, tm, alpha=0.5):
    N = x.shape[0]
    kern = functools.partial(_dif_attn_kernel, HC=HC, n_nodes=float(N),
                             alpha=alpha, num_heads=num_heads, eps=1e-5)
    return pl.pallas_call(
        kern,
        out_shape=jax.ShapeDtypeStruct((N, C), BF16),
        grid=(N // tm,),
        in_specs=[
            pl.BlockSpec((tm, 3 * HC), lambda i: (i, 0)),     # Q/K/V rows
            pl.BlockSpec((tm, C), lambda i: (i, 0)),          # residual x rows
            pl.BlockSpec((tm, N), lambda i: (i, 0)),          # A row block
            pl.BlockSpec((N, C), lambda i: (0, 0)),           # full v_sum
            pl.BlockSpec((HC, 2 * HC), lambda i: (0, 0)),     # [ktv | ks_mat]
            pl.BlockSpec((HC, C), lambda i: (0, 0)),          # head-sum matrix
            pl.BlockSpec((1, C), lambda i: (0, 0)),           # LN gamma
            pl.BlockSpec((1, C), lambda i: (0, 0)),           # LN beta
        ],
        out_specs=pl.BlockSpec((tm, C), lambda i: (i, 0)),
        compiler_params=_cparams("parallel"),
    )(qkv, x.astype(BF16), A_bf, vsum, attn_mat, headsum,
      g.reshape(1, C).astype(jnp.float32), b.reshape(1, C).astype(jnp.float32))


def difformer_forward(params, x, A_bf, *, num_heads, hidden):
    df = params["difformer"]
    N = x.shape[0]
    C = hidden
    HC = num_heads * hidden
    h = pallas_dense_ln_relu(x, df["fc0_w"], df["fc0_b"], df["ln0_g"],
                             df["ln0_b"], out_dtype=BF16)

    # small constants (traced once under jit)
    mask_f = (jnp.arange(HC)[:, None] // C ==
              jnp.arange(HC)[None, :] // C).astype(jnp.float32)
    headsum = jnp.tile(jnp.eye(C, dtype=BF16), (num_heads, 1))     # (HC, C)

    tm = _pick_rows(N, 512)
    # guard the (tm, N) adjacency row stream against VMEM blowup
    cap = (VMEM_LIMIT // 6) // (2 * N)
    cap = max(8, min(512, (cap // 8) * 8))
    tm_attn = _pick_rows(N, cap)

    for lyr in df["layers"]:
        qkv, vsum = pallas_dif_qkv(h, lyr["wqkv"], lyr["bqkv"], HC=HC, C=C, tm=tm)
        ktv, ksum = pallas_dif_reduce(qkv, mask_f, HC=HC, tm=tm)
        ks_mat = (ksum.reshape(HC, 1) * mask_f).astype(BF16)
        attn_mat = jnp.concatenate([ktv, ks_mat], axis=1)          # (HC, 2HC)
        h = pallas_dif_attn(qkv, h, A_bf, vsum, attn_mat, headsum,
                            lyr["ln_g"], lyr["ln_b"],
                            HC=HC, C=C, num_heads=num_heads, tm=tm_attn)
    return pallas_dense(h, df["fcout_w"], df["fcout_b"], act="none",
                        out_dtype=BF16)


# ----------------------------------------------------------------------------
# Pairwise head: adj_conv second 3x3 conv (via halo block + 9 shifted reads),
# scale_conv (+ folded mlp[0]), mlp tail, tiled over the outer L (p) axis.
# ----------------------------------------------------------------------------

def _pair_head_kernel(h1_ref, xr_ref, xc_ref, w2_ref, b2_ref, wcol_ref, wrow_ref,
                      wadj_ref, bsc_ref, m2w_ref, m2b_ref, m3w_ref, m3b_ref,
                      o_ref, *, L, bp, C1):
    Hh = w2_ref.shape[2]
    Hb = m2w_ref.shape[1]
    p0 = pl.multiple_of(pl.program_id(1) * bp, bp)

    # adj_conv second 3x3 conv (BN folded) over the halo-padded h1 block
    acc = jnp.zeros((bp * L, Hh), jnp.float32)
    t = 0
    for dp in range(3):
        for dq in range(3):
            sl = h1_ref[0, pl.ds(p0 + dp, bp), dq:dq + L, :]      # (bp, L, C1)
            acc = acc + jnp.dot(sl.reshape(bp * L, C1), w2_ref[t],
                                preferred_element_type=jnp.float32)
            t += 1
    adj = jnp.maximum(acc + b2_ref[...], 0.0)                     # (bp*L, Hh)

    # scale_conv (1x1) with mlp[0] algebraically folded in
    xi = jnp.dot(xc_ref[0], wcol_ref[...],
                 preferred_element_type=jnp.float32)              # (L, Hh)  q-term
    xj = jnp.dot(xr_ref[0], wrow_ref[...],
                 preferred_element_type=jnp.float32)              # (bp, Hh) p-term
    a = jnp.dot(adj.astype(BF16), wadj_ref[...],
                preferred_element_type=jnp.float32)               # (bp*L, Hh)
    comb = a.reshape(bp, L, Hh) + xi[None, :, :] + xj[:, None, :] + bsc_ref[...]
    h1 = jnp.maximum(comb, 0.0).reshape(bp * L, Hh)               # relu(mlp[0])

    # mlp[1] 1x1 conv + ReLU
    h2 = jnp.dot(h1.astype(BF16), m2w_ref[...],
                 preferred_element_type=jnp.float32) + m2b_ref[...]
    h2 = jnp.maximum(h2, 0.0)                                     # (bp*L, Hb)

    # mlp[2] single-channel projection (channel reduction) + ReLU
    o = jnp.sum(h2.reshape(bp, L, Hb) * m3w_ref[...], axis=-1) + m3b_ref[...]
    o_ref[0] = jnp.maximum(o, 0.0)


def pallas_pair_head(h1p, x_nodes, hp, *, L, bp):
    B = h1p.shape[0]
    C1 = h1p.shape[-1]
    C = x_nodes.shape[-1]
    Hh = hp["w2_taps"].shape[2]
    Hb = hp["m2w"].shape[1]
    kern = functools.partial(_pair_head_kernel, L=L, bp=bp, C1=C1)
    return pl.pallas_call(
        kern,
        out_shape=jax.ShapeDtypeStruct((B, L, L), jnp.float32),
        grid=(B, L // bp),
        in_specs=[
            pl.BlockSpec((1, L + 2, L + 2, C1), lambda b, i: (b, 0, 0, 0)),
            pl.BlockSpec((1, bp, C), lambda b, i: (b, i, 0)),     # x rows (p-term)
            pl.BlockSpec((1, L, C), lambda b, i: (b, 0, 0)),      # x all  (q-term)
            pl.BlockSpec((9, C1, Hh), lambda b, i: (0, 0, 0)),
            pl.BlockSpec((1, Hh), lambda b, i: (0, 0)),
            pl.BlockSpec((C, Hh), lambda b, i: (0, 0)),
            pl.BlockSpec((C, Hh), lambda b, i: (0, 0)),
            pl.BlockSpec((Hh, Hh), lambda b, i: (0, 0)),
            pl.BlockSpec((1, Hh), lambda b, i: (0, 0)),
            pl.BlockSpec((Hh, Hb), lambda b, i: (0, 0)),
            pl.BlockSpec((1, Hb), lambda b, i: (0, 0)),
            pl.BlockSpec((1, Hb), lambda b, i: (0, 0)),
            pl.BlockSpec((1, 1), lambda b, i: (0, 0)),
        ],
        out_specs=pl.BlockSpec((1, bp, L), lambda b, i: (b, i, 0)),
        compiler_params=_cparams("parallel", "parallel"),
    )(h1p.astype(BF16), x_nodes.astype(BF16), x_nodes.astype(BF16),
      hp["w2_taps"].astype(BF16), hp["b2"].reshape(1, Hh).astype(jnp.float32),
      hp["wcol"].astype(BF16), hp["wrow"].astype(BF16), hp["wadj"].astype(BF16),
      hp["bsc"].reshape(1, Hh).astype(jnp.float32),
      hp["m2w"].astype(BF16), hp["m2b"].reshape(1, Hb).astype(jnp.float32),
      hp["m3w"].reshape(1, Hb).astype(jnp.float32),
      hp["m3b"].reshape(1, 1).astype(jnp.float32))


# ----------------------------------------------------------------------------
# Plain-JAX glue (im2col, scatter-based adjacency construction, PE)
# ----------------------------------------------------------------------------

def im2col2d_3x3(x, L):
    """x:(B,L,L,C) -> (B,L,L,9*C), patch channel order (dp, dq, cin)."""
    xp = jnp.pad(x, ((0, 0), (1, 1), (1, 1), (0, 0)))
    cols = [xp[:, dp:dp + L, dq:dq + L, :] for dp in range(3) for dq in range(3)]
    return jnp.concatenate(cols, axis=-1)


def create_adjacency_matrix(edge_index, edge_weight, B, L):
    b_idx = edge_index[0] // L
    i0 = edge_index[0] - b_idx * L
    i1 = edge_index[1] - b_idx * L
    adj = jnp.zeros((B, L, L), BF16)
    # torch index_put_ (non-accumulating); synthetic edges are unique.
    return adj.at[b_idx, i0, i1].set(edge_weight.astype(BF16))


def build_gcn_adj(edge_index, edge_weight, N):
    row, col = edge_index[0], edge_index[1]
    deg = jnp.zeros((N,), jnp.float32).at[col].add(1.0)
    d_in = 1.0 / jnp.sqrt(deg[col])
    d_out = 1.0 / jnp.sqrt(deg[row])
    val = jnp.nan_to_num(edge_weight * d_in * d_out, nan=0.0, posinf=0.0,
                         neginf=0.0)
    return jnp.zeros((N, N), BF16).at[col, row].add(val.astype(BF16))
# TODO(synk): exploit adjacency sparsity via PrefetchScalarGridSpec row offsets
# instead of streaming the dense N x N matrix for very large graphs.


def sinusoidal_pe(d_model, length):
    position = jnp.arange(length, dtype=jnp.float32)[:, None]
    div_term = jnp.exp(jnp.arange(0, d_model, 2, dtype=jnp.float32)
                       * (-math.log(10000.0) / d_model))
    ang = position * div_term
    pe = jnp.zeros((length, d_model), jnp.float32)
    pe = pe.at[:, 0::2].set(jnp.sin(ang))
    pe = pe.at[:, 1::2].set(jnp.cos(ang))
    return pe.T                                              # (d_model, L)


# ----------------------------------------------------------------------------
# Deterministic parameter construction (eval mode, BN folded)
# ----------------------------------------------------------------------------

class KeyGen:
    def __init__(self, seed=0):
        self.key = jax.random.PRNGKey(seed)

    def __call__(self):
        self.key, sub = jax.random.split(self.key)
        return sub


def fold_bn(w, b, gamma, beta, eps=1e-5):
    mean = jnp.zeros_like(b)
    var = jnp.ones_like(b)
    s = gamma / jnp.sqrt(var + eps)
    w_f = w * s.reshape((-1,) + (1,) * (w.ndim - 1))
    b_f = (b - mean) * s + beta
    return w_f, b_f


def init_params(kg, *, hidden=32, feature_dim=6, filt=5, num_heads=4,
                n_layers=2, L=16):
    def rnd(shape, scale=0.1):
        return (scale * jax.random.normal(kg(), shape)).astype(jnp.float32)

    C1 = hidden // 2
    p = {}

    def conv1d_p(cin, cout, k):
        w, b = rnd((cout, cin, k)), rnd((cout,))
        g, be = 1.0 + rnd((cout,)), rnd((cout,))
        return fold_bn(w, b, g, be)

    ws, bs = conv1d_p(feature_dim, C1, filt)
    wr1, br1 = conv1d_p(C1, C1, filt)
    wr2, br2 = conv1d_p(C1, C1, filt)
    p["conv_block"] = dict(ws=ws, bs=bs, wr1=wr1, br1=br1, wr2=wr2, br2=br2)

    p["pe"] = sinusoidal_pe(C1, L)                           # (C1, L)

    # --- DIFFormer (fused QKV weights, head-major column blocks, vsum folded)
    def lin(cin, cout):
        return rnd((cout, cin)), rnd((cout,))

    fc0_w, fc0_b = lin(hidden, hidden)
    layers = []
    for _ in range(n_layers):
        Wq, bq = lin(hidden, hidden * num_heads)
        Wk, bk = lin(hidden, hidden * num_heads)
        Wv, bv = lin(hidden, hidden * num_heads)

        def fuse(W):
            return jnp.concatenate(
                [W[h * hidden:(h + 1) * hidden, :].T for h in range(num_heads)],
                axis=1)

        wv_sum = sum(Wv[h * hidden:(h + 1) * hidden, :].T
                     for h in range(num_heads))
        bv_sum = sum(bv[h * hidden:(h + 1) * hidden] for h in range(num_heads))
        wqkv = jnp.concatenate([fuse(Wq), fuse(Wk), fuse(Wv), wv_sum], axis=1)
        bqkv = jnp.concatenate([bq, bk, bv, bv_sum])
        layers.append(dict(wqkv=wqkv, bqkv=bqkv,
                           ln_g=1.0 + rnd((hidden,)), ln_b=rnd((hidden,))))
    fcout_w, fcout_b = lin(hidden, hidden)
    p["difformer"] = dict(fc0_w=fc0_w.T, fc0_b=fc0_b,
                          ln0_g=1.0 + rnd((hidden,)), ln0_b=rnd((hidden,)),
                          layers=layers, fcout_w=fcout_w.T, fcout_b=fcout_b)

    # --- adj_conv (two 3x3 convs with BN folded)
    W1, b1 = rnd((C1, 1, 3, 3)), rnd((C1,))
    W1f, b1f = fold_bn(W1, b1, 1.0 + rnd((C1,)), rnd((C1,)))
    W2, b2 = rnd((hidden, C1, 3, 3)), rnd((hidden,))
    W2f, b2f = fold_bn(W2, b2, 1.0 + rnd((hidden,)), rnd((hidden,)))
    p["adj_conv"] = dict(w1m=W1f.transpose(2, 3, 1, 0).reshape(9, C1), b1=b1f)

    # --- scale_conv 1x1 with mlp[0] (1x1 conv) folded in algebraically
    Wsc, bsc = rnd((hidden, 3 * hidden)), rnd((hidden,))
    Wm1, bm1 = rnd((hidden, hidden)), rnd((hidden,))
    Wm2, bm2 = rnd((hidden // 2, hidden)), rnd((hidden // 2,))
    Wm3, bm3 = rnd((1, hidden // 2)), rnd((1,))
    m1w = Wm1.T                                              # (hidden, hidden)
    p["head"] = dict(
        w2_taps=W2f.transpose(2, 3, 1, 0).reshape(9, C1, hidden), b2=b2f,
        wcol=Wsc[:, 0:hidden].T @ m1w,
        wrow=Wsc[:, hidden:2 * hidden].T @ m1w,
        wadj=Wsc[:, 2 * hidden:3 * hidden].T @ m1w,
        bsc=bsc @ m1w + bm1,
        m2w=Wm2.T, m2b=bm2, m3w=Wm3, m3b=bm3)
    return p


# ----------------------------------------------------------------------------
# Forward pass (eval mode)
# ----------------------------------------------------------------------------

def graphchiar_forward(params, features, seq, edge_index, edge_attr, batch,
                       *, B, L, hidden=32, num_heads=4):
    C1 = hidden // 2
    # --- feature concat + ConvBlock (channels-first, residual add fused)
    x = jnp.concatenate([features, seq], axis=1)             # (B, 6, W)
    x_cf = jnp.transpose(x, (1, 0, 2))                       # (6, B, W)
    cb = params["conv_block"]
    h = conv1d_cf(x_cf, cb["ws"], cb["bs"], stride=2, pad=2, act="relu")
    h = maxpool_cf(h, 5)                                     # (C1, B, L)
    r = conv1d_cf(h, cb["wr1"], cb["br1"], stride=1, pad=2, act="relu")
    h = conv1d_cf(r, cb["wr2"], cb["br2"], stride=1, pad=2, res_cbl=h)

    # --- positional encoding (concatenated along channels -> hidden channels)
    pe = params["pe"].astype(BF16)                           # (C1, L)
    h = jnp.concatenate([h, jnp.broadcast_to(pe[:, None, :], (C1, B, L))], axis=0)
    nodes = jnp.transpose(h, (1, 2, 0)).reshape(B * L, hidden)  # (N, hidden) bf16

    # --- DIFFormer (input fc + LN + ReLU, layers, output fc)
    N = B * L
    edge_weight = edge_attr.astype(jnp.float32)
    A_bf = build_gcn_adj(edge_index, edge_weight, N)         # (N, N) bf16
    hdf = difformer_forward(params, nodes, A_bf, num_heads=num_heads,
                            hidden=hidden)
    x_nodes = hdf.reshape(B, L, hidden)                      # channels-last bf16

    # --- adjacency branch: first 3x3 conv as Pallas dense, halo-pad for the
    #     fused pair head (second conv + im2col stay inside the kernel)
    adj = create_adjacency_matrix(edge_index, edge_weight, B, L)   # (B,L,L) bf16
    ac = params["adj_conv"]
    p1 = im2col2d_3x3(adj[..., None], L)                     # (B, L, L, 9)
    h1 = pallas_dense(p1.reshape(B * L * L, 9), ac["w1m"], ac["b1"],
                      act="relu", out_dtype=BF16)
    h1p = jnp.pad(h1.reshape(B, L, L, C1), ((0, 0), (1, 1), (1, 1), (0, 0)))

    # --- fused pairwise head: conv2+ReLU, pair features, scale_conv(+mlp0), mlp
    bp = _pick_rows(L, 64)
    out = pallas_pair_head(h1p, x_nodes, params["head"], L=L, bp=bp)
    return out                                               # (B, L, L) f32


# ----------------------------------------------------------------------------
# Main
# ----------------------------------------------------------------------------

if __name__ == "__main__":
    # toy configuration: resolution=10, window_size=160 -> matrix_size L=16
    B, L = 2, 16
    window = 160
    hidden, num_heads = 32, 4

    kg = KeyGen(0)                                    # jax.random.PRNGKey(0)
    params = init_params(kg, hidden=hidden, feature_dim=6, filt=5,
                         num_heads=num_heads, n_layers=2, L=L)

    # inputs (data.features, data.seq, data.edge_index, data.edge_attr, data.batch)
    features = jax.random.normal(kg(), (B, 1, window), dtype=jnp.float32)
    seq_idx = jax.random.randint(kg(), (B, window), 0, 5)
    seq = jax.nn.one_hot(seq_idx, 5, axis=1).astype(jnp.float32)      # (B, 5, W)

    src, dst = [], []
    for g in range(B):
        off = g * L
        for i in range(L - 1):
            src += [off + i, off + i + 1]
            dst += [off + i + 1, off + i]
    edge_index = jnp.array([src, dst], dtype=jnp.int32)               # (2, E)
    edge_attr = jax.random.uniform(kg(), (edge_index.shape[1],),
                                   minval=0.1, maxval=1.0, dtype=jnp.float32)
    batch = jnp.repeat(jnp.arange(B, dtype=jnp.int32), L)             # (B*L,)

    fwd = jax.jit(lambda f, s, ei, ea, bt: graphchiar_forward(
        params, f, s, ei, ea, bt, B=B, L=L, hidden=hidden, num_heads=num_heads))
    out = fwd(features, seq, edge_index, edge_attr, batch)
    out = jax.block_until_ready(out)
    assert out.shape == (B, L, L), out.shape
    assert bool(jnp.all(jnp.isfinite(out)))
    print("KERNEL_OK")
</pallas_src>

<mosaic_0001>
module attributes {stable_mosaic.version = 11 : i64} {
  func.func @_dense_T_kernel(%arg0: i32, %arg1: memref<16x30xbf16, #tpu.memory_space<vmem>>, %arg2: memref<30x256xbf16, #tpu.memory_space<vmem>>, %arg3: memref<16x1xf32, #tpu.memory_space<vmem>>, %arg4: memref<16x256xbf16, #tpu.memory_space<vmem>>) attributes {dimension_semantics = [#tpu.dimension_semantics<parallel>], iteration_bounds = array<i64: 1>, scalar_prefetch = 0 : i64, scratch_operands = 0 : i64, tpu.core_type = #tpu.core_type<tc>, window_params = [{pipeline_mode = #tpu.pipeline_mode<synchronous>, transform_indices = @transform_0, window_bounds = array<i64: 16, 30>}, {transform_indices = @transform_1, window_bounds = array<i64: 30, 256>}, {pipeline_mode = #tpu.pipeline_mode<synchronous>, transform_indices = @transform_2, window_bounds = array<i64: 16, 1>}, {transform_indices = @transform_3, window_bounds = array<i64: 16, 256>}]} {
    %c0 = arith.constant 0 : index
    %c0_0 = arith.constant 0 : index
    %0 = vector.load %arg1[%c0, %c0_0] : memref<16x30xbf16, #tpu.memory_space<vmem>>, vector<16x30xbf16>
    %c0_1 = arith.constant 0 : index
    %c0_2 = arith.constant 0 : index
    %1 = vector.load %arg2[%c0_1, %c0_2] : memref<30x256xbf16, #tpu.memory_space<vmem>>, vector<30x256xbf16>
    %cst = arith.constant dense<0.000000e+00> : vector<16x256xf32>
    %2 = tpu.matmul %0, %1, %cst {dimension_numbers = #tpu.dot_dimension_numbers<[1], [0], [0], [1], [0, 0, 1, 1], [], []>} : vector<16x30xbf16>, vector<30x256xbf16>, vector<16x256xf32> -> vector<16x256xf32>
    %c0_3 = arith.constant 0 : index
    %c0_4 = arith.constant 0 : index
    %3 = vector.load %arg3[%c0_3, %c0_4] : memref<16x1xf32, #tpu.memory_space<vmem>>, vector<16x1xf32>
    %4 = vector.broadcast %3 : vector<16x1xf32> to vector<16x256xf32>
    %5 = arith.addf %2, %4 : vector<16x256xf32>
    %cst_5 = arith.constant 0.000000e+00 : f32
    %6 = vector.broadcast %cst_5 : f32 to vector<16x256xf32>
    %7 = arith.maximumf %5, %6 : vector<16x256xf32>
    %8 = arith.truncf %7 : vector<16x256xf32> to vector<16x256xbf16>
    %c0_6 = arith.constant 0 : index
    %c0_7 = arith.constant 0 : index
    %9 = vector.load %arg4[%c0_6, %c0_7] : memref<16x256xbf16, #tpu.memory_space<vmem>>, vector<16x256xbf16>
    tpu.vector_store %arg4[%c0_6, %c0_7], %8 {strides = array<i32>} : memref<16x256xbf16, #tpu.memory_space<vmem>>, vector<16x256xbf16>,
    return
  }
  func.func @transform_0(%arg0: i32) -> (i32, i32) {
    %c0_i32 = arith.constant 0 : i32
    %c0_i32_0 = arith.constant 0 : i32
    %c0_i32_1 = arith.constant 0 : i32
    return %c0_i32, %c0_i32_0 : i32, i32
  }
  func.func @transform_1(%arg0: i32) -> (i32, i32) {
    %c0_i32 = arith.constant 0 : i32
    %c0_i32_0 = arith.constant 0 : i32
    return %c0_i32, %arg0 : i32, i32
  }
  func.func @transform_2(%arg0: i32) -> (i32, i32) {
    %c0_i32 = arith.constant 0 : i32
    %c0_i32_0 = arith.constant 0 : i32
    %c0_i32_1 = arith.constant 0 : i32
    return %c0_i32, %c0_i32_0 : i32, i32
  }
  func.func @transform_3(%arg0: i32) -> (i32, i32) {
    %c0_i32 = arith.constant 0 : i32
    %c0_i32_0 = arith.constant 0 : i32
    return %c0_i32, %arg0 : i32, i32
  }
}

module attributes {stable_mosaic.version = 11 : i64} {
  func.func @_dense_T_kernel(%arg0: i32, %arg1: memref<16x80xbf16, #tpu.memory_space<vmem>>, %arg2: memref<80x128xbf16, #tpu.memory_space<vmem>>, %arg3: memref<16x1xf32, #tpu.memory_space<vmem>>, %arg4: memref<16x128xbf16, #tpu.memory_space<vmem>>) attributes {dimension_semantics = [#tpu.dimension_semantics<parallel>], iteration_bounds = array<i64: 1>, scalar_prefetch = 0 : i64, scratch_operands = 0 : i64, tpu.core_type = #tpu.core_type<tc>, window_params = [{pipeline_mode = #tpu.pipeline_mode<synchronous>, transform_indices = @transform_0, window_bounds = array<i64: 16, 80>}, {transform_indices = @transform_1, window_bounds = array<i64: 80, 128>}, {pipeline_mode = #tpu.pipeline_mode<synchronous>, transform_indices = @transform_2, window_bounds = array<i64: 16, 1>}, {transform_indices = @transform_3, window_bounds = array<i64: 16, 128>}]} {
    %c0 = arith.constant 0 : index
    %c0_0 = arith.constant 0 : index
    %0 = vector.load %arg1[%c0, %c0_0] : memref<16x80xbf16, #tpu.memory_space<vmem>>, vector<16x80xbf16>
    %c0_1 = arith.constant 0 : index
    %c0_2 = arith.constant 0 : index
    %1 = vector.load %arg2[%c0_1, %c0_2] : memref<80x128xbf16, #tpu.memory_space<vmem>>, vector<80x128xbf16>
    %cst = arith.constant dense<0.000000e+00> : vector<16x128xf32>
    %2 = tpu.matmul %0, %1, %cst {dimension_numbers = #tpu.dot_dimension_numbers<[1], [0], [0], [1], [0, 0, 1, 1], [], []>} : vector<16x80xbf16>, vector<80x128xbf16>, vector<16x128xf32> -> vector<16x128xf32>
    %c0_3 = arith.constant 0 : index
    %c0_4 = arith.constant 0 : index
    %3 = vector.load %arg3[%c0_3, %c0_4] : memref<16x1xf32, #tpu.memory_space<vmem>>, vector<16x1xf32>
    %4 = vector.broadcast %3 : vector<16x1xf32> to vector<16x128xf32>
    %5 = arith.addf %2, %4 : vector<16x128xf32>
    %cst_5 = arith.constant 0.000000e+00 : f32
    %6 = vector.broadcast %cst_5 : f32 to vector<16x128xf32>
    %7 = arith.maximumf %5, %6 : vector<16x128xf32>
    %8 = arith.truncf %7 : vector<16x128xf32> to vector<16x128xbf16>
    %c0_6 = arith.constant 0 : index
    %c0_7 = arith.constant 0 : index
    %9 = vector.load %arg4[%c0_6, %c0_7] : memref<16x128xbf16, #tpu.memory_space<vmem>>, vector<16x128xbf16>
    tpu.vector_store %arg4[%c0_6, %c0_7], %8 {strides = array<i32>} : memref<16x128xbf16, #tpu.memory_space<vmem>>, vector<16x128xbf16>,
    return
  }
  func.func @transform_0(%arg0: i32) -> (i32, i32) {
    %c0_i32 = arith.constant 0 : i32
    %c0_i32_0 = arith.constant 0 : i32
    %c0_i32_1 = arith.constant 0 : i32
    return %c0_i32, %c0_i32_0 : i32, i32
  }
  func.func @transform_1(%arg0: i32) -> (i32, i32) {
    %c0_i32 = arith.constant 0 : i32
    %c0_i32_0 = arith.constant 0 : i32
    return %c0_i32, %arg0 : i32, i32
  }
  func.func @transform_2(%arg0: i32) -> (i32, i32) {
    %c0_i32 = arith.constant 0 : i32
    %c0_i32_0 = arith.constant 0 : i32
    %c0_i32_1 = arith.constant 0 : i32
    return %c0_i32, %c0_i32_0 : i32, i32
  }
  func.func @transform_3(%arg0: i32) -> (i32, i32) {
    %c0_i32 = arith.constant 0 : i32
    %c0_i32_0 = arith.constant 0 : i32
    return %c0_i32, %arg0 : i32, i32
  }
}

module attributes {stable_mosaic.version = 11 : i64} {
  func.func @_dense_T_res_kernel(%arg0: i32, %arg1: memref<16x80xbf16, #tpu.memory_space<vmem>>, %arg2: memref<80x128xbf16, #tpu.memory_space<vmem>>, %arg3: memref<16x1xf32, #tpu.memory_space<vmem>>, %arg4: memref<16x128xf32, #tpu.memory_space<vmem>>, %arg5: memref<16x128xbf16, #tpu.memory_space<vmem>>) attributes {dimension_semantics = [#tpu.dimension_semantics<parallel>], iteration_bounds = array<i64: 1>, scalar_prefetch = 0 : i64, scratch_operands = 0 : i64, tpu.core_type = #tpu.core_type<tc>, window_params = [{pipeline_mode = #tpu.pipeline_mode<synchronous>, transform_indices = @transform_0, window_bounds = array<i64: 16, 80>}, {transform_indices = @transform_1, window_bounds = array<i64: 80, 128>}, {pipeline_mode = #tpu.pipeline_mode<synchronous>, transform_indices = @transform_2, window_bounds = array<i64: 16, 1>}, {transform_indices = @transform_3, window_bounds = array<i64: 16, 128>}, {transform_indices = @transform_4, window_bounds = array<i64: 16, 128>}]} {
    %c0 = arith.constant 0 : index
    %c0_0 = arith.constant 0 : index
    %0 = vector.load %arg1[%c0, %c0_0] : memref<16x80xbf16, #tpu.memory_space<vmem>>, vector<16x80xbf16>
    %c0_1 = arith.constant 0 : index
    %c0_2 = arith.constant 0 : index
    %1 = vector.load %arg2[%c0_1, %c0_2] : memref<80x128xbf16, #tpu.memory_space<vmem>>, vector<80x128xbf16>
    %cst = arith.constant dense<0.000000e+00> : vector<16x128xf32>
    %2 = tpu.matmul %0, %1, %cst {dimension_numbers = #tpu.dot_dimension_numbers<[1], [0], [0], [1], [0, 0, 1, 1], [], []>} : vector<16x80xbf16>, vector<80x128xbf16>, vector<16x128xf32> -> vector<16x128xf32>
    %c0_3 = arith.constant 0 : index
    %c0_4 = arith.constant 0 : index
    %3 = vector.load %arg3[%c0_3, %c0_4] : memref<16x1xf32, #tpu.memory_space<vmem>>, vector<16x1xf32>
    %4 = vector.broadcast %3 : vector<16x1xf32> to vector<16x128xf32>
    %5 = arith.addf %2, %4 : vector<16x128xf32>
    %c0_5 = arith.constant 0 : index
    %c0_6 = arith.constant 0 : index
    %6 = vector.load %arg4[%c0_5, %c0_6] : memref<16x128xf32, #tpu.memory_space<vmem>>, vector<16x128xf32>
    %7 = arith.addf %5, %6 : vector<16x128xf32>
    %cst_7 = arith.constant 0.000000e+00 : f32
    %8 = vector.broadcast %cst_7 : f32 to vector<16x128xf32>
    %9 = arith.maximumf %7, %8 : vector<16x128xf32>
    %10 = arith.truncf %9 : vector<16x128xf32> to vector<16x128xbf16>
    %c0_8 = arith.constant 0 : index
    %c0_9 = arith.constant 0 : index
    %11 = vector.load %arg5[%c0_8, %c0_9] : memref<16x128xbf16, #tpu.memory_space<vmem>>, vector<16x128xbf16>
    tpu.vector_store %arg5[%c0_8, %c0_9], %10 {strides = array<i32>} : memref<16x128xbf16, #tpu.memory_space<vmem>>, vector<16x128xbf16>,
    return
  }
  func.func @transform_0(%arg0: i32) -> (i32, i32) {
    %c0_i32 = arith.constant 0 : i32
    %c0_i32_0 = arith.constant 0 : i32
    %c0_i32_1 = arith.constant 0 : i32
    return %c0_i32, %c0_i32_0 : i32, i32
  }
  func.func @transform_1(%arg0: i32) -> (i32, i32) {
    %c0_i32 = arith.constant 0 : i32
    %c0_i32_0 = arith.constant 0 : i32
    return %c0_i32, %arg0 : i32, i32
  }
  func.func @transform_2(%arg0: i32) -> (i32, i32) {
    %c0_i32 = arith.constant 0 : i32
    %c0_i32_0 = arith.constant 0 : i32
    %c0_i32_1 = arith.constant 0 : i32
    return %c0_i32, %c0_i32_0 : i32, i32
  }
  func.func @transform_3(%arg0: i32) -> (i32, i32) {
    %c0_i32 = arith.constant 0 : i32
    %c0_i32_0 = arith.constant 0 : i32
    return %c0_i32, %arg0 : i32, i32
  }
  func.func @transform_4(%arg0: i32) -> (i32, i32) {
    %c0_i32 = arith.constant 0 : i32
    %c0_i32_0 = arith.constant 0 : i32
    return %c0_i32, %arg0 : i32, i32
  }
}

module attributes {stable_mosaic.version = 11 : i64} {
  func.func @_dif_qkv_kernel(%arg0: i32, %arg1: memref<32x32xbf16, #tpu.memory_space<vmem>>, %arg2: memref<32x416xbf16, #tpu.memory_space<vmem>>, %arg3: memref<1x416xf32, #tpu.memory_space<vmem>>, %arg4: memref<32x384xbf16, #tpu.memory_space<vmem>>, %arg5: memref<32x32xbf16, #tpu.memory_space<vmem>>) attributes {dimension_semantics = [#tpu.dimension_semantics<parallel>], iteration_bounds = array<i64: 1>, scalar_prefetch = 0 : i64, scratch_operands = 0 : i64, tpu.core_type = #tpu.core_type<tc>, window_params = [{transform_indices = @transform_0, window_bounds = array<i64: 32, 32>}, {pipeline_mode = #tpu.pipeline_mode<synchronous>, transform_indices = @transform_1, window_bounds = array<i64: 32, 416>}, {pipeline_mode = #tpu.pipeline_mode<synchronous>, transform_indices = @transform_2, window_bounds = array<i64: 1, 416>}, {transform_indices = @transform_3, window_bounds = array<i64: 32, 384>}, {transform_indices = @transform_4, window_bounds = array<i64: 32, 32>}]} {
    %c0 = arith.constant 0 : index
    %c0_0 = arith.constant 0 : index
    %0 = vector.load %arg1[%c0, %c0_0] : memref<32x32xbf16, #tpu.memory_space<vmem>>, vector<32x32xbf16>
    %c0_1 = arith.constant 0 : index
    %c0_2 = arith.constant 0 : index
    %1 = vector.load %arg2[%c0_1, %c0_2] : memref<32x416xbf16, #tpu.memory_space<vmem>>, vector<32x416xbf16>
    %cst = arith.constant dense<0.000000e+00> : vector<32x416xf32>
    %2 = tpu.matmul %0, %1, %cst {dimension_numbers = #tpu.dot_dimension_numbers<[1], [0], [0], [1], [0, 0, 1, 1], [], []>} : vector<32x32xbf16>, vector<32x416xbf16>, vector<32x416xf32> -> vector<32x416xf32>
    %c0_3 = arith.constant 0 : index
    %c0_4 = arith.constant 0 : index
    %3 = vector.load %arg3[%c0_3, %c0_4] : memref<1x416xf32, #tpu.memory_space<vmem>>, vector<1x416xf32>
    %4 = vector.broadcast %3 : vector<1x416xf32> to vector<32x416xf32>
    %5 = arith.addf %2, %4 : vector<32x416xf32>
    %6 = vector.extract_strided_slice %5 {offsets = [0, 0], sizes = [32, 384], strides = [1, 1]} : vector<32x416xf32> to vector<32x384xf32>
    %7 = arith.truncf %6 : vector<32x384xf32> to vector<32x384xbf16>
    %c0_5 = arith.constant 0 : index
    %c0_6 = arith.constant 0 : index
    %8 = vector.load %arg4[%c0_5, %c0_6] : memref<32x384xbf16, #tpu.memory_space<vmem>>, vector<32x384xbf16>
    tpu.vector_store %arg4[%c0_5, %c0_6], %7 {strides = array<i32>} : memref<32x384xbf16, #tpu.memory_space<vmem>>, vector<32x384xbf16>,
    %9 = vector.extract_strided_slice %5 {offsets = [0, 384], sizes = [32, 32], strides = [1, 1]} : vector<32x416xf32> to vector<32x32xf32>
    %10 = arith.truncf %9 : vector<32x32xf32> to vector<32x32xbf16>
    %c0_7 = arith.constant 0 : index
    %c0_8 = arith.constant 0 : index
    %11 = vector.load %arg5[%c0_7, %c0_8] : memref<32x32xbf16, #tpu.memory_space<vmem>>, vector<32x32xbf16>
    tpu.vector_store %arg5[%c0_7, %c0_8], %10 {strides = array<i32>} : memref<32x32xbf16, #tpu.memory_space<vmem>>, vector<32x32xbf16>,
    return
  }
  func.func @transform_0(%arg0: i32) -> (i32, i32) {
    %c0_i32 = arith.constant 0 : i32
    %c0_i32_0 = arith.constant 0 : i32
    return %arg0, %c0_i32 : i32, i32
  }
  func.func @transform_1(%arg0: i32) -> (i32, i32) {
    %c0_i32 = arith.constant 0 : i32
    %c0_i32_0 = arith.constant 0 : i32
    %c0_i32_1 = arith.constant 0 : i32
    return %c0_i32, %c0_i32_0 : i32, i32
  }
  func.func @transform_2(%arg0: i32) -> (i32, i32) {
    %c0_i32 = arith.constant 0 : i32
    %c0_i32_0 = arith.constant 0 : i32
    %c0_i32_1 = arith.constant 0 : i32
    return %c0_i32, %c0_i32_0 : i32, i32
  }
  func.func @transform_3(%arg0: i32) -> (i32, i32) {
    %c0_i32 = arith.constant 0 : i32
    %c0_i32_0 = arith.constant 0 : i32
    return %arg0, %c0_i32 : i32, i32
  }
  func.func @transform_4(%arg0: i32) -> (i32, i32) {
    %c0_i32 = arith.constant 0 : i32
    %c0_i32_0 = arith.constant 0 : i32
    return %arg0, %c0_i32 : i32, i32
  }
}

module attributes {stable_mosaic.version = 11 : i64} {
  func.func @_dense_ln_relu_kernel(%arg0: i32, %arg1: memref<32x32xbf16, #tpu.memory_space<vmem>>, %arg2: memref<32x32xbf16, #tpu.memory_space<vmem>>, %arg3: memref<1x32xf32, #tpu.memory_space<vmem>>, %arg4: memref<1x32xf32, #tpu.memory_space<vmem>>, %arg5: memref<1x32xf32, #tpu.memory_space<vmem>>, %arg6: memref<32x32xbf16, #tpu.memory_space<vmem>>) attributes {dimension_semantics = [#tpu.dimension_semantics<parallel>], iteration_bounds = array<i64: 1>, scalar_prefetch = 0 : i64, scratch_operands = 0 : i64, tpu.core_type = #tpu.core_type<tc>, window_params = [{transform_indices = @transform_0, window_bounds = array<i64: 32, 32>}, {pipeline_mode = #tpu.pipeline_mode<synchronous>, transform_indices = @transform_1, window_bounds = array<i64: 32, 32>}, {pipeline_mode = #tpu.pipeline_mode<synchronous>, transform_indices = @transform_2, window_bounds = array<i64: 1, 32>}, {pipeline_mode = #tpu.pipeline_mode<synchronous>, transform_indices = @transform_3, window_bounds = array<i64: 1, 32>}, {pipeline_mode = #tpu.pipeline_mode<synchronous>, transform_indices = @transform_4, window_bounds = array<i64: 1, 32>}, {transform_indices = @transform_5, window_bounds = array<i64: 32, 32>}]} {
    %c0 = arith.constant 0 : index
    %c0_0 = arith.constant 0 : index
    %0 = vector.load %arg1[%c0, %c0_0] : memref<32x32xbf16, #tpu.memory_space<vmem>>, vector<32x32xbf16>
    %c0_1 = arith.constant 0 : index
    %c0_2 = arith.constant 0 : index
    %1 = vector.load %arg2[%c0_1, %c0_2] : memref<32x32xbf16, #tpu.memory_space<vmem>>, vector<32x32xbf16>
    %cst = arith.constant dense<0.000000e+00> : vector<32x32xf32>
    %2 = tpu.matmul %0, %1, %cst {dimension_numbers = #tpu.dot_dimension_numbers<[1], [0], [0], [1], [0, 0, 1, 1], [], []>} : vector<32x32xbf16>, vector<32x32xbf16>, vector<32x32xf32> -> vector<32x32xf32>
    %c0_3 = arith.constant 0 : index
    %c0_4 = arith.constant 0 : index
    %3 = vector.load %arg3[%c0_3, %c0_4] : memref<1x32xf32, #tpu.memory_space<vmem>>, vector<1x32xf32>
    %4 = vector.broadcast %3 : vector<1x32xf32> to vector<32x32xf32>
    %5 = arith.addf %2, %4 : vector<32x32xf32>
    %cst_5 = arith.constant dense<0.000000e+00> : vector<32xf32>
    %6 = vector.multi_reduction <add>, %5, %cst_5 [1] : vector<32x32xf32> to vector<32xf32>
    %7 = vector.shape_cast %6 : vector<32xf32> to vector<32x1xf32>
    %cst_6 = arith.constant 3.200000e+01 : f32
    %8 = vector.broadcast %cst_6 : f32 to vector<32x1xf32>
    %9 = arith.divf %7, %8 : vector<32x1xf32>
    %10 = vector.broadcast %9 : vector<32x1xf32> to vector<32x32xf32>
    %11 = arith.subf %5, %10 : vector<32x32xf32>
    %12 = arith.mulf %11, %11 : vector<32x32xf32>
    %cst_7 = arith.constant dense<0.000000e+00> : vector<32xf32>
    %13 = vector.multi_reduction <add>, %12, %cst_7 [1] : vector<32x32xf32> to vector<32xf32>
    %14 = vector.shape_cast %13 : vector<32xf32> to vector<32x1xf32>
    %cst_8 = arith.constant 3.200000e+01 : f32
    %15 = vector.broadcast %cst_8 : f32 to vector<32x1xf32>
    %16 = arith.divf %14, %15 : vector<32x1xf32>
    %17 = vector.broadcast %9 : vector<32x1xf32> to vector<32x32xf32>
    %18 = arith.subf %5, %17 : vector<32x32xf32>
    %cst_9 = arith.constant 9.99999974E-6 : f32
    %19 = vector.broadcast %cst_9 : f32 to vector<32x1xf32>
    %20 = arith.addf %16, %19 : vector<32x1xf32>
    %21 = math.rsqrt %20 : vector<32x1xf32>
    %22 = vector.broadcast %21 : vector<32x1xf32> to vector<32x32xf32>
    %23 = arith.mulf %18, %22 : vector<32x32xf32>
    %c0_10 = arith.constant 0 : index
    %c0_11 = arith.constant 0 : index
    %24 = vector.load %arg4[%c0_10, %c0_11] : memref<1x32xf32, #tpu.memory_space<vmem>>, vector<1x32xf32>
    %25 = vector.broadcast %24 : vector<1x32xf32> to vector<32x32xf32>
    %26 = arith.mulf %23, %25 : vector<32x32xf32>
    %c0_12 = arith.constant 0 : index
    %c0_13 = arith.constant 0 : index
    %27 = vector.load %arg5[%c0_12, %c0_13] : memref<1x32xf32, #tpu.memory_space<vmem>>, vector<1x32xf32>
    %28 = vector.broadcast %27 : vector<1x32xf32> to vector<32x32xf32>
    %29 = arith.addf %26, %28 : vector<32x32xf32>
    %cst_14 = arith.constant 0.000000e+00 : f32
    %30 = vector.broadcast %cst_14 : f32 to vector<32x32xf32>
    %31 = arith.maximumf %29, %30 : vector<32x32xf32>
    %32 = arith.truncf %31 : vector<32x32xf32> to vector<32x32xbf16>
    %c0_15 = arith.constant 0 : index
    %c0_16 = arith.constant 0 : index
    %33 = vector.load %arg6[%c0_15, %c0_16] : memref<32x32xbf16, #tpu.memory_space<vmem>>, vector<32x32xbf16>
    tpu.vector_store %arg6[%c0_15, %c0_16], %32 {strides = array<i32>} : memref<32x32xbf16, #tpu.memory_space<vmem>>, vector<32x32xbf16>,
    return
  }
  func.func @transform_0(%arg0: i32) -> (i32, i32) {
    %c0_i32 = arith.constant 0 : i32
    %c0_i32_0 = arith.constant 0 : i32
    return %arg0, %c0_i32 : i32, i32
  }
  func.func @transform_1(%arg0: i32) -> (i32, i32) {
    %c0_i32 = arith.constant 0 : i32
    %c0_i32_0 = arith.constant 0 : i32
    %c0_i32_1 = arith.constant 0 : i32
    return %c0_i32, %c0_i32_0 : i32, i32
  }
  func.func @transform_2(%arg0: i32) -> (i32, i32) {
    %c0_i32 = arith.constant 0 : i32
    %c0_i32_0 = arith.constant 0 : i32
    %c0_i32_1 = arith.constant 0 : i32
    return %c0_i32, %c0_i32_0 : i32, i32
  }
  func.func @transform_3(%arg0: i32) -> (i32, i32) {
    %c0_i32 = arith.constant 0 : i32
    %c0_i32_0 = arith.constant 0 : i32
    %c0_i32_1 = arith.constant 0 : i32
    return %c0_i32, %c0_i32_0 : i32, i32
  }
  func.func @transform_4(%arg0: i32) -> (i32, i32) {
    %c0_i32 = arith.constant 0 : i32
    %c0_i32_0 = arith.constant 0 : i32
    %c0_i32_1 = arith.constant 0 : i32
    return %c0_i32, %c0_i32_0 : i32, i32
  }
  func.func @transform_5(%arg0: i32) -> (i32, i32) {
    %c0_i32 = arith.constant 0 : i32
    %c0_i32_0 = arith.constant 0 : i32
    return %arg0, %c0_i32 : i32, i32
  }
}

module attributes {stable_mosaic.version = 11 : i64} {
  func.func @_dif_reduce_kernel(%arg0: i32, %arg1: memref<32x384xbf16, #tpu.memory_space<vmem>>, %arg2: memref<128x128xf32, #tpu.memory_space<vmem>>, %arg3: memref<128x128xbf16, #tpu.memory_space<vmem>>, %arg4: memref<1x128xf32, #tpu.memory_space<vmem>>, %arg5: memref<128x128xf32, #tpu.memory_space<vmem>>, %arg6: memref<1x128xf32, #tpu.memory_space<vmem>>, %arg7: memref<1x128xf32, #tpu.memory_space<vmem>>, %arg8: memref<1x128xf32, #tpu.memory_space<vmem>>) attributes {dimension_semantics = [#tpu.dimension_semantics<arbitrary>], iteration_bounds = array<i64: 1>, scalar_prefetch = 0 : i64, scratch_operands = 4 : i64, tpu.core_type = #tpu.core_type<tc>, window_params = [{transform_indices = @transform_0, window_bounds = array<i64: 32, 384>}, {pipeline_mode = #tpu.pipeline_mode<synchronous>, transform_indices = @transform_1, window_bounds = array<i64: 128, 128>}, {pipeline_mode = #tpu.pipeline_mode<synchronous>, transform_indices = @transform_2, window_bounds = array<i64: 128, 128>}, {pipeline_mode = #tpu.pipeline_mode<synchronous>, transform_indices = @transform_3, window_bounds = array<i64: 1, 128>}]} {
    %c0_i32 = arith.constant 0 : i32
    %0 = arith.cmpi eq, %arg0, %c0_i32 : i32
    %1 = arith.extui %0 : i1 to i32
    %c0_i32_0 = arith.constant 0 : i32
    %2 = arith.cmpi ne, %1, %c0_i32_0 : i32
    scf.if %2 {
      %cst_25 = arith.constant 0.000000e+00 : f32
      %32 = vector.broadcast %cst_25 : f32 to vector<128x128xf32>
      %c0_26 = arith.constant 0 : index
      %c0_27 = arith.constant 0 : index
      %33 = vector.load %arg5[%c0_26, %c0_27] : memref<128x128xf32, #tpu.memory_space<vmem>>, vector<128x128xf32>
      tpu.vector_store %arg5[%c0_26, %c0_27], %32 {strides = array<i32>} : memref<128x128xf32, #tpu.memory_space<vmem>>, vector<128x128xf32>,
      %cst_28 = arith.constant 0.000000e+00 : f32
      %34 = vector.broadcast %cst_28 : f32 to vector<1x128xf32>
      %c0_29 = arith.constant 0 : index
      %c0_30 = arith.constant 0 : index
      %35 = vector.load %arg6[%c0_29, %c0_30] : memref<1x128xf32, #tpu.memory_space<vmem>>, vector<1x128xf32>
      tpu.vector_store %arg6[%c0_29, %c0_30], %34 {strides = array<i32>} : memref<1x128xf32, #tpu.memory_space<vmem>>, vector<1x128xf32>,
      %cst_31 = arith.constant 0.000000e+00 : f32
      %36 = vector.broadcast %cst_31 : f32 to vector<1x128xf32>
      %c0_32 = arith.constant 0 : index
      %c0_33 = arith.constant 0 : index
      %37 = vector.load %arg7[%c0_32, %c0_33] : memref<1x128xf32, #tpu.memory_space<vmem>>, vector<1x128xf32>
      tpu.vector_store %arg7[%c0_32, %c0_33], %36 {strides = array<i32>} : memref<1x128xf32, #tpu.memory_space<vmem>>, vector<1x128xf32>,
      %cst_34 = arith.constant 0.000000e+00 : f32
      %38 = vector.broadcast %cst_34 : f32 to vector<1x128xf32>
      %c0_35 = arith.constant 0 : index
      %c0_36 = arith.constant 0 : index
      %39 = vector.load %arg8[%c0_35, %c0_36] : memref<1x128xf32, #tpu.memory_space<vmem>>, vector<1x128xf32>
      tpu.vector_store %arg8[%c0_35, %c0_36], %38 {strides = array<i32>} : memref<1x128xf32, #tpu.memory_space<vmem>>, vector<1x128xf32>,
    } else {
    }
    %c0 = arith.constant 0 : index
    %c0_1 = arith.constant 0 : index
    %3 = vector.load %arg1[%c0, %c0_1] : memref<32x384xbf16, #tpu.memory_space<vmem>>, vector<32x128xbf16>
    %c0_2 = arith.constant 0 : index
    %c128 = arith.constant 128 : index
    %4 = vector.load %arg1[%c0_2, %c128] : memref<32x384xbf16, #tpu.memory_space<vmem>>, vector<32x128xbf16>
    %c0_3 = arith.constant 0 : index
    %c256 = arith.constant 256 : index
    %5 = vector.load %arg1[%c0_3, %c256] : memref<32x384xbf16, #tpu.memory_space<vmem>>, vector<32x128xbf16>
    %c0_4 = arith.constant 0 : index
    %c0_5 = arith.constant 0 : index
    %6 = vector.load %arg5[%c0_4, %c0_5] : memref<128x128xf32, #tpu.memory_space<vmem>>, vector<128x128xf32>
    %cst = arith.constant dense<0.000000e+00> : vector<128x128xf32>
    %7 = tpu.matmul %4, %5, %cst {dimension_numbers = #tpu.dot_dimension_numbers<[0], [0], [1], [1], [0, 1, 1, 1], [], []>} : vector<32x128xbf16>, vector<32x128xbf16>, vector<128x128xf32> -> vector<128x128xf32>
    %8 = arith.addf %6, %7 : vector<128x128xf32>
    %c0_6 = arith.constant 0 : index
    %c0_7 = arith.constant 0 : index
    %9 = vector.load %arg5[%c0_6, %c0_7] : memref<128x128xf32, #tpu.memory_space<vmem>>, vector<128x128xf32>
    tpu.vector_store %arg5[%c0_6, %c0_7], %8 {strides = array<i32>} : memref<128x128xf32, #tpu.memory_space<vmem>>, vector<128x128xf32>,
    %10 = arith.extf %4 : vector<32x128xbf16> to vector<32x128xf32>
    %11 = arith.extf %3 : vector<32x128xbf16> to vector<32x128xf32>
    %c0_8 = arith.constant 0 : index
    %c0_9 = arith.constant 0 : index
    %12 = vector.load %arg6[%c0_8, %c0_9] : memref<1x128xf32, #tpu.memory_space<vmem>>, vector<1x128xf32>
    %cst_10 = arith.constant dense<0.000000e+00> : vector<128xf32>
    %13 = vector.multi_reduction <add>, %10, %cst_10 [0] : vector<32x128xf32> to vector<128xf32>
    %14 = vector.shape_cast %13 : vector<128xf32> to vector<1x128xf32>
    %15 = arith.addf %12, %14 : vector<1x128xf32>
    %c0_11 = arith.constant 0 : index
    %c0_12 = arith.constant 0 : index
    %16 = vector.load %arg6[%c0_11, %c0_12] : memref<1x128xf32, #tpu.memory_space<vmem>>, vector<1x128xf32>
    tpu.vector_store %arg6[%c0_11, %c0_12], %15 {strides = array<i32>} : memref<1x128xf32, #tpu.memory_space<vmem>>, vector<1x128xf32>,
    %c0_13 = arith.constant 0 : index
    %c0_14 = arith.constant 0 : index
    %17 = vector.load %arg7[%c0_13, %c0_14] : memref<1x128xf32, #tpu.memory_space<vmem>>, vector<1x128xf32>
    %18 = arith.mulf %11, %11 : vector<32x128xf32>
    %cst_15 = arith.constant dense<0.000000e+00> : vector<128xf32>
    %19 = vector.multi_reduction <add>, %18, %cst_15 [0] : vector<32x128xf32> to vector<128xf32>
    %20 = vector.shape_cast %19 : vector<128xf32> to vector<1x128xf32>
    %21 = arith.addf %17, %20 : vector<1x128xf32>
    %c0_16 = arith.constant 0 : index
    %c0_17 = arith.constant 0 : index
    %22 = vector.load %arg7[%c0_16, %c0_17] : memref<1x128xf32, #tpu.memory_space<vmem>>, vector<1x128xf32>
    tpu.vector_store %arg7[%c0_16, %c0_17], %21 {strides = array<i32>} : memref<1x128xf32, #tpu.memory_space<vmem>>, vector<1x128xf32>,
    %c0_18 = arith.constant 0 : index
    %c0_19 = arith.constant 0 : index
    %23 = vector.load %arg8[%c0_18, %c0_19] : memref<1x128xf32, #tpu.memory_space<vmem>>, vector<1x128xf32>
    %24 = arith.mulf %10, %10 : vector<32x128xf32>
    %cst_20 = arith.constant dense<0.000000e+00> : vector<128xf32>
    %25 = vector.multi_reduction <add>, %24, %cst_20 [0] : vector<32x128xf32> to vector<128xf32>
    %26 = vector.shape_cast %25 : vector<128xf32> to vector<1x128xf32>
    %27 = arith.addf %23, %26 : vector<1x128xf32>
    %c0_21 = arith.constant 0 : index
    %c0_22 = arith.constant 0 : index
    %28 = vector.load %arg8[%c0_21, %c0_22] : memref<1x128xf32, #tpu.memory_space<vmem>>, vector<1x128xf32>
    tpu.vector_store %arg8[%c0_21, %c0_22], %27 {strides = array<i32>} : memref<1x128xf32, #tpu.memory_space<vmem>>, vector<1x128xf32>,
    %c0_i32_23 = arith.constant 0 : i32
    %29 = arith.cmpi eq, %arg0, %c0_i32_23 : i32
    %30 = arith.extui %29 : i1 to i32
    %c0_i32_24 = arith.constant 0 : i32
    %31 = arith.cmpi ne, %30, %c0_i32_24 : i32
    scf.if %31 {
      %c0_25 = arith.constant 0 : index
      %c0_26 = arith.constant 0 : index
      %32 = vector.load %arg7[%c0_25, %c0_26] : memref<1x128xf32, #tpu.memory_space<vmem>>, vector<1x128xf32>
      %cst_27 = arith.constant dense<0.000000e+00> : vector<1xf32>
      %33 = vector.multi_reduction <add>, %32, %cst_27 [1] : vector<1x128xf32> to vector<1xf32>
      %34 = vector.shape_cast %33 : vector<1xf32> to vector<1x1xf32>
      %c0_28 = arith.constant 0 : index
      %c0_29 = arith.constant 0 : index
      %35 = vector.load %arg8[%c0_28, %c0_29] : memref<1x128xf32, #tpu.memory_space<vmem>>, vector<1x128xf32>
      %cst_30 = arith.constant dense<0.000000e+00> : vector<1xf32>
      %36 = vector.multi_reduction <add>, %35, %cst_30 [1] : vector<1x128xf32> to vector<1xf32>
      %37 = vector.shape_cast %36 : vector<1xf32> to vector<1x1xf32>
      %38 = arith.mulf %34, %37 : vector<1x1xf32>
      %39 = math.rsqrt %38 : vector<1x1xf32>
      %c0_31 = arith.constant 0 : index
      %c0_32 = arith.constant 0 : index
      %40 = vector.load %arg5[%c0_31, %c0_32] : memref<128x128xf32, #tpu.memory_space<vmem>>, vector<128x128xf32>
      %41 = vector.broadcast %39 : vector<1x1xf32> to vector<128x128xf32>
      %42 = arith.mulf %40, %41 : vector<128x128xf32>
      %c0_33 = arith.constant 0 : index
      %c0_34 = arith.constant 0 : index
      %43 = vector.load %arg2[%c0_33, %c0_34] : memref<128x128xf32, #tpu.memory_space<vmem>>, vector<128x128xf32>
      %44 = arith.mulf %42, %43 : vector<128x128xf32>
      %45 = arith.truncf %44 : vector<128x128xf32> to vector<128x128xbf16>
      %c0_35 = arith.constant 0 : index
      %c0_36 = arith.constant 0 : index
      %46 = vector.load %arg3[%c0_35, %c0_36] : memref<128x128xbf16, #tpu.memory_space<vmem>>, vector<128x128xbf16>
      tpu.vector_store %arg3[%c0_35, %c0_36], %45 {strides = array<i32>} : memref<128x128xbf16, #tpu.memory_space<vmem>>, vector<128x128xbf16>,
      %c0_37 = arith.constant 0 : index
      %c0_38 = arith.constant 0 : index
      %47 = vector.load %arg6[%c0_37, %c0_38] : memref<1x128xf32, #tpu.memory_space<vmem>>, vector<1x128xf32>
      %48 = vector.broadcast %39 : vector<1x1xf32> to vector<1x128xf32>
      %49 = arith.mulf %47, %48 : vector<1x128xf32>
      %c0_39 = arith.constant 0 : index
      %c0_40 = arith.constant 0 : index
      %50 = vector.load %arg4[%c0_39, %c0_40] : memref<1x128xf32, #tpu.memory_space<vmem>>, vector<1x128xf32>
      tpu.vector_store %arg4[%c0_39, %c0_40], %49 {strides = array<i32>} : memref<1x128xf32, #tpu.memory_space<vmem>>, vector<1x128xf32>,
    } else {
    }
    return
  }
  func.func @transform_0(%arg0: i32) -> (i32, i32) {
    %c0_i32 = arith.constant 0 : i32
    %c0_i32_0 = arith.constant 0 : i32
    return %arg0, %c0_i32 : i32, i32
  }
  func.func @transform_1(%arg0: i32) -> (i32, i32) {
    %c0_i32 = arith.constant 0 : i32
    %c0_i32_0 = arith.constant 0 : i32
    %c0_i32_1 = arith.constant 0 : i32
    return %c0_i32, %c0_i32_0 : i32, i32
  }
  func.func @transform_2(%arg0: i32) -> (i32, i32) {
    %c0_i32 = arith.constant 0 : i32
    %c0_i32_0 = arith.constant 0 : i32
    %c0_i32_1 = arith.constant 0 : i32
    return %c0_i32, %c0_i32_0 : i32, i32
  }
  func.func @transform_3(%arg0: i32) -> (i32, i32) {
    %c0_i32 = arith.constant 0 : i32
    %c0_i32_0 = arith.constant 0 : i32
    %c0_i32_1 = arith.constant 0 : i32
    return %c0_i32, %c0_i32_0 : i32, i32
  }
}

module attributes {stable_mosaic.version = 11 : i64} {
  func.func @_dense_kernel(%arg0: i32, %arg1: memref<32x32xbf16, #tpu.memory_space<vmem>>, %arg2: memref<32x32xbf16, #tpu.memory_space<vmem>>, %arg3: memref<1x32xf32, #tpu.memory_space<vmem>>, %arg4: memref<32x32xbf16, #tpu.memory_space<vmem>>) attributes {dimension_semantics = [#tpu.dimension_semantics<parallel>], iteration_bounds = array<i64: 1>, scalar_prefetch = 0 : i64, scratch_operands = 0 : i64, tpu.core_type = #tpu.core_type<tc>, window_params = [{transform_indices = @transform_0, window_bounds = array<i64: 32, 32>}, {pipeline_mode = #tpu.pipeline_mode<synchronous>, transform_indices = @transform_1, window_bounds = array<i64: 32, 32>}, {pipeline_mode = #tpu.pipeline_mode<synchronous>, transform_indices = @transform_2, window_bounds = array<i64: 1, 32>}, {transform_indices = @transform_3, window_bounds = array<i64: 32, 32>}]} {
    %c0 = arith.constant 0 : index
    %c0_0 = arith.constant 0 : index
    %0 = vector.load %arg1[%c0, %c0_0] : memref<32x32xbf16, #tpu.memory_space<vmem>>, vector<32x32xbf16>
    %c0_1 = arith.constant 0 : index
    %c0_2 = arith.constant 0 : index
    %1 = vector.load %arg2[%c0_1, %c0_2] : memref<32x32xbf16, #tpu.memory_space<vmem>>, vector<32x32xbf16>
    %cst = arith.constant dense<0.000000e+00> : vector<32x32xf32>
    %2 = tpu.matmul %0, %1, %cst {dimension_numbers = #tpu.dot_dimension_numbers<[1], [0], [0], [1], [0, 0, 1, 1], [], []>} : vector<32x32xbf16>, vector<32x32xbf16>, vector<32x32xf32> -> vector<32x32xf32>
    %c0_3 = arith.constant 0 : index
    %c0_4 = arith.constant 0 : index
    %3 = vector.load %arg3[%c0_3, %c0_4] : memref<1x32xf32, #tpu.memory_space<vmem>>, vector<1x32xf32>
    %4 = vector.broadcast %3 : vector<1x32xf32> to vector<32x32xf32>
    %5 = arith.addf %2, %4 : vector<32x32xf32>
    %6 = arith.truncf %5 : vector<32x32xf32> to vector<32x32xbf16>
    %c0_5 = arith.constant 0 : index
    %c0_6 = arith.constant 0 : index
    %7 = vector.load %arg4[%c0_5, %c0_6] : memref<32x32xbf16, #tpu.memory_space<vmem>>, vector<32x32xbf16>
    tpu.vector_store %arg4[%c0_5, %c0_6], %6 {strides = array<i32>} : memref<32x32xbf16, #tpu.memory_space<vmem>>, vector<32x32xbf16>,
    return
  }
  func.func @transform_0(%arg0: i32) -> (i32, i32) {
    %c0_i32 = arith.constant 0 : i32
    %c0_i32_0 = arith.constant 0 : i32
    return %arg0, %c0_i32 : i32, i32
  }
  func.func @transform_1(%arg0: i32) -> (i32, i32) {
    %c0_i32 = arith.constant 0 : i32
    %c0_i32_0 = arith.constant 0 : i32
    %c0_i32_1 = arith.constant 0 : i32
    return %c0_i32, %c0_i32_0 : i32, i32
  }
  func.func @transform_2(%arg0: i32) -> (i32, i32) {
    %c0_i32 = arith.constant 0 : i32
    %c0_i32_0 = arith.constant 0 : i32
    %c0_i32_1 = arith.constant 0 : i32
    return %c0_i32, %c0_i32_0 : i32, i32
  }
  func.func @transform_3(%arg0: i32) -> (i32, i32) {
    %c0_i32 = arith.constant 0 : i32
    %c0_i32_0 = arith.constant 0 : i32
    return %arg0, %c0_i32 : i32, i32
  }
}

module attributes {stable_mosaic.version = 11 : i64} {
  func.func @_dif_attn_kernel(%arg0: i32, %arg1: memref<32x384xbf16, #tpu.memory_space<vmem>>, %arg2: memref<32x32xbf16, #tpu.memory_space<vmem>>, %arg3: memref<32x32xbf16, #tpu.memory_space<vmem>>, %arg4: memref<32x32xbf16, #tpu.memory_space<vmem>>, %arg5: memref<128x256xbf16, #tpu.memory_space<vmem>>, %arg6: memref<128x32xbf16, #tpu.memory_space<vmem>>, %arg7: memref<1x32xf32, #tpu.memory_space<vmem>>, %arg8: memref<1x32xf32, #tpu.memory_space<vmem>>, %arg9: memref<32x32xbf16, #tpu.memory_space<vmem>>) attributes {dimension_semantics = [#tpu.dimension_semantics<parallel>], iteration_bounds = array<i64: 1>, scalar_prefetch = 0 : i64, scratch_operands = 0 : i64, tpu.core_type = #tpu.core_type<tc>, window_params = [{transform_indices = @transform_0, window_bounds = array<i64: 32, 384>}, {transform_indices = @transform_1, window_bounds = array<i64: 32, 32>}, {transform_indices = @transform_2, window_bounds = array<i64: 32, 32>}, {pipeline_mode = #tpu.pipeline_mode<synchronous>, transform_indices = @transform_3, window_bounds = array<i64: 32, 32>}, {pipeline_mode = #tpu.pipeline_mode<synchronous>, transform_indices = @transform_4, window_bounds = array<i64: 128, 256>}, {pipeline_mode = #tpu.pipeline_mode<synchronous>, transform_indices = @transform_5, window_bounds = array<i64: 128, 32>}, {pipeline_mode = #tpu.pipeline_mode<synchronous>, transform_indices = @transform_6, window_bounds = array<i64: 1, 32>}, {pipeline_mode = #tpu.pipeline_mode<synchronous>, transform_indices = @transform_7, window_bounds = array<i64: 1, 32>}, {transform_indices = @transform_8, window_bounds = array<i64: 32, 32>}]} {
    %c0 = arith.constant 0 : index
    %c0_0 = arith.constant 0 : index
    %0 = vector.load %arg1[%c0, %c0_0] : memref<32x384xbf16, #tpu.memory_space<vmem>>, vector<32x128xbf16>
    %c0_1 = arith.constant 0 : index
    %c256 = arith.constant 256 : index
    %1 = vector.load %arg1[%c0_1, %c256] : memref<32x384xbf16, #tpu.memory_space<vmem>>, vector<32x128xbf16>
    %2 = arith.extf %1 : vector<32x128xbf16> to vector<32x128xf32>
    %c0_2 = arith.constant 0 : index
    %c0_3 = arith.constant 0 : index
    %3 = vector.load %arg5[%c0_2, %c0_3] : memref<128x256xbf16, #tpu.memory_space<vmem>>, vector<128x256xbf16>
    %cst = arith.constant dense<0.000000e+00> : vector<32x256xf32>
    %4 = tpu.matmul %0, %3, %cst {dimension_numbers = #tpu.dot_dimension_numbers<[1], [0], [0], [1], [0, 0, 1, 1], [], []>} : vector<32x128xbf16>, vector<128x256xbf16>, vector<32x256xf32> -> vector<32x256xf32>
    %5 = vector.extract_strided_slice %4 {offsets = [0, 0], sizes = [32, 128], strides = [1, 1]} : vector<32x256xf32> to vector<32x128xf32>
    %cst_4 = arith.constant 3.200000e+01 : f32
    %6 = vector.broadcast %cst_4 : f32 to vector<32x128xf32>
    %7 = arith.mulf %6, %2 : vector<32x128xf32>
    %8 = arith.addf %5, %7 : vector<32x128xf32>
    %9 = vector.extract_strided_slice %4 {offsets = [0, 128], sizes = [32, 128], strides = [1, 1]} : vector<32x256xf32> to vector<32x128xf32>
    %cst_5 = arith.constant 3.200000e+01 : f32
    %10 = vector.broadcast %cst_5 : f32 to vector<32x128xf32>
    %11 = arith.addf %9, %10 : vector<32x128xf32>
    %12 = tpu.reciprocal %11 {approx = true} : vector<32x128xf32> -> vector<32x128xf32>
    %13 = arith.mulf %8, %12 : vector<32x128xf32>
    %14 = arith.truncf %13 : vector<32x128xf32> to vector<32x128xbf16>
    %c0_6 = arith.constant 0 : index
    %c0_7 = arith.constant 0 : index
    %15 = vector.load %arg6[%c0_6, %c0_7] : memref<128x32xbf16, #tpu.memory_space<vmem>>, vector<128x32xbf16>
    %cst_8 = arith.constant dense<0.000000e+00> : vector<32x32xf32>
    %16 = tpu.matmul %14, %15, %cst_8 {dimension_numbers = #tpu.dot_dimension_numbers<[1], [0], [0], [1], [0, 0, 1, 1], [], []>} : vector<32x128xbf16>, vector<128x32xbf16>, vector<32x32xf32> -> vector<32x32xf32>
    %c0_9 = arith.constant 0 : index
    %c0_10 = arith.constant 0 : index
    %17 = vector.load %arg3[%c0_9, %c0_10] : memref<32x32xbf16, #tpu.memory_space<vmem>>, vector<32x32xbf16>
    %c0_11 = arith.constant 0 : index
    %c0_12 = arith.constant 0 : index
    %18 = vector.load %arg4[%c0_11, %c0_12] : memref<32x32xbf16, #tpu.memory_space<vmem>>, vector<32x32xbf16>
    %cst_13 = arith.constant dense<0.000000e+00> : vector<32x32xf32>
    %19 = tpu.matmul %17, %18, %cst_13 {dimension_numbers = #tpu.dot_dimension_numbers<[1], [0], [0], [1], [0, 0, 1, 1], [], []>} : vector<32x32xbf16>, vector<32x32xbf16>, vector<32x32xf32> -> vector<32x32xf32>
    %20 = arith.addf %19, %16 : vector<32x32xf32>
    %cst_14 = arith.constant 1.250000e-01 : f32
    %21 = vector.broadcast %cst_14 : f32 to vector<32x32xf32>
    %22 = arith.mulf %21, %20 : vector<32x32xf32>
    %c0_15 = arith.constant 0 : index
    %c0_16 = arith.constant 0 : index
    %23 = vector.load %arg2[%c0_15, %c0_16] : memref<32x32xbf16, #tpu.memory_space<vmem>>, vector<32x32xbf16>
    %24 = arith.extf %23 : vector<32x32xbf16> to vector<32x32xf32>
    %cst_17 = arith.constant 5.000000e-01 : f32
    %25 = vector.broadcast %cst_17 : f32 to vector<32x32xf32>
    %26 = arith.mulf %25, %24 : vector<32x32xf32>
    %27 = arith.addf %22, %26 : vector<32x32xf32>
    %cst_18 = arith.constant dense<0.000000e+00> : vector<32xf32>
    %28 = vector.multi_reduction <add>, %27, %cst_18 [1] : vector<32x32xf32> to vector<32xf32>
    %29 = vector.shape_cast %28 : vector<32xf32> to vector<32x1xf32>
    %cst_19 = arith.constant 3.200000e+01 : f32
    %30 = vector.broadcast %cst_19 : f32 to vector<32x1xf32>
    %31 = arith.divf %29, %30 : vector<32x1xf32>
    %32 = vector.broadcast %31 : vector<32x1xf32> to vector<32x32xf32>
    %33 = arith.subf %27, %32 : vector<32x32xf32>
    %34 = arith.mulf %33, %33 : vector<32x32xf32>
    %cst_20 = arith.constant dense<0.000000e+00> : vector<32xf32>
    %35 = vector.multi_reduction <add>, %34, %cst_20 [1] : vector<32x32xf32> to vector<32xf32>
    %36 = vector.shape_cast %35 : vector<32xf32> to vector<32x1xf32>
    %cst_21 = arith.constant 3.200000e+01 : f32
    %37 = vector.broadcast %cst_21 : f32 to vector<32x1xf32>
    %38 = arith.divf %36, %37 : vector<32x1xf32>
    %39 = vector.broadcast %31 : vector<32x1xf32> to vector<32x32xf32>
    %40 = arith.subf %27, %39 : vector<32x32xf32>
    %cst_22 = arith.constant 9.99999974E-6 : f32
    %41 = vector.broadcast %cst_22 : f32 to vector<32x1xf32>
    %42 = arith.addf %38, %41 : vector<32x1xf32>
    %43 = math.rsqrt %42 : vector<32x1xf32>
    %44 = vector.broadcast %43 : vector<32x1xf32> to vector<32x32xf32>
    %45 = arith.mulf %40, %44 : vector<32x32xf32>
    %c0_23 = arith.constant 0 : index
    %c0_24 = arith.constant 0 : index
    %46 = vector.load %arg7[%c0_23, %c0_24] : memref<1x32xf32, #tpu.memory_space<vmem>>, vector<1x32xf32>
    %47 = vector.broadcast %46 : vector<1x32xf32> to vector<32x32xf32>
    %48 = arith.mulf %45, %47 : vector<32x32xf32>
    %c0_25 = arith.constant 0 : index
    %c0_26 = arith.constant 0 : index
    %49 = vector.load %arg8[%c0_25, %c0_26] : memref<1x32xf32, #tpu.memory_space<vmem>>, vector<1x32xf32>
    %50 = vector.broadcast %49 : vector<1x32xf32> to vector<32x32xf32>
    %51 = arith.addf %48, %50 : vector<32x32xf32>
    %52 = arith.truncf %51 : vector<32x32xf32> to vector<32x32xbf16>
    %c0_27 = arith.constant 0 : index
    %c0_28 = arith.constant 0 : index
    %53 = vector.load %arg9[%c0_27, %c0_28] : memref<32x32xbf16, #tpu.memory_space<vmem>>, vector<32x32xbf16>
    tpu.vector_store %arg9[%c0_27, %c0_28], %52 {strides = array<i32>} : memref<32x32xbf16, #tpu.memory_space<vmem>>, vector<32x32xbf16>,
    return
  }
  func.func @transform_0(%arg0: i32) -> (i32, i32) {
    %c0_i32 = arith.constant 0 : i32
    %c0_i32_0 = arith.constant 0 : i32
    return %arg0, %c0_i32 : i32, i32
  }
  func.func @transform_1(%arg0: i32) -> (i32, i32) {
    %c0_i32 = arith.constant 0 : i32
    %c0_i32_0 = arith.constant 0 : i32
    return %arg0, %c0_i32 : i32, i32
  }
  func.func @transform_2(%arg0: i32) -> (i32, i32) {
    %c0_i32 = arith.constant 0 : i32
    %c0_i32_0 = arith.constant 0 : i32
    return %arg0, %c0_i32 : i32, i32
  }
  func.func @transform_3(%arg0: i32) -> (i32, i32) {
    %c0_i32 = arith.constant 0 : i32
    %c0_i32_0 = arith.constant 0 : i32
    %c0_i32_1 = arith.constant 0 : i32
    return %c0_i32, %c0_i32_0 : i32, i32
  }
  func.func @transform_4(%arg0: i32) -> (i32, i32) {
    %c0_i32 = arith.constant 0 : i32
    %c0_i32_0 = arith.constant 0 : i32
    %c0_i32_1 = arith.constant 0 : i32
    return %c0_i32, %c0_i32_0 : i32, i32
  }
  func.func @transform_5(%arg0: i32) -> (i32, i32) {
    %c0_i32 = arith.constant 0 : i32
    %c0_i32_0 = arith.constant 0 : i32
    %c0_i32_1 = arith.constant 0 : i32
    return %c0_i32, %c0_i32_0 : i32, i32
  }
  func.func @transform_6(%arg0: i32) -> (i32, i32) {
    %c0_i32 = arith.constant 0 : i32
    %c0_i32_0 = arith.constant 0 : i32
    %c0_i32_1 = arith.constant 0 : i32
    return %c0_i32, %c0_i32_0 : i32, i32
  }
  func.func @transform_7(%arg0: i32) -> (i32, i32) {
    %c0_i32 = arith.constant 0 : i32
    %c0_i32_0 = arith.constant 0 : i32
    %c0_i32_1 = arith.constant 0 : i32
    return %c0_i32, %c0_i32_0 : i32, i32
  }
  func.func @transform_8(%arg0: i32) -> (i32, i32) {
    %c0_i32 = arith.constant 0 : i32
    %c0_i32_0 = arith.constant 0 : i32
    return %arg0, %c0_i32 : i32, i32
  }
}

module attributes {stable_mosaic.version = 11 : i64} {
  func.func @_dense_kernel(%arg0: i32, %arg1: memref<512x9xbf16, #tpu.memory_space<vmem>>, %arg2: memref<9x16xbf16, #tpu.memory_space<vmem>>, %arg3: memref<1x16xf32, #tpu.memory_space<vmem>>, %arg4: memref<512x16xbf16, #tpu.memory_space<vmem>>) attributes {dimension_semantics = [#tpu.dimension_semantics<parallel>], iteration_bounds = array<i64: 1>, scalar_prefetch = 0 : i64, scratch_operands = 0 : i64, tpu.core_type = #tpu.core_type<tc>, window_params = [{transform_indices = @transform_0, window_bounds = array<i64: 512, 9>}, {pipeline_mode = #tpu.pipeline_mode<synchronous>, transform_indices = @transform_1, window_bounds = array<i64: 9, 16>}, {pipeline_mode = #tpu.pipeline_mode<synchronous>, transform_indices = @transform_2, window_bounds = array<i64: 1, 16>}, {transform_indices = @transform_3, window_bounds = array<i64: 512, 16>}]} {
    %c0 = arith.constant 0 : index
    %c0_0 = arith.constant 0 : index
    %0 = vector.load %arg1[%c0, %c0_0] : memref<512x9xbf16, #tpu.memory_space<vmem>>, vector<512x9xbf16>
    %c0_1 = arith.constant 0 : index
    %c0_2 = arith.constant 0 : index
    %1 = vector.load %arg2[%c0_1, %c0_2] : memref<9x16xbf16, #tpu.memory_space<vmem>>, vector<9x16xbf16>
    %cst = arith.constant dense<0.000000e+00> : vector<512x16xf32>
    %2 = tpu.matmul %0, %1, %cst {dimension_numbers = #tpu.dot_dimension_numbers<[1], [0], [0], [1], [0, 0, 1, 1], [], []>} : vector<512x9xbf16>, vector<9x16xbf16>, vector<512x16xf32> -> vector<512x16xf32>
    %c0_3 = arith.constant 0 : index
    %c0_4 = arith.constant 0 : index
    %3 = vector.load %arg3[%c0_3, %c0_4] : memref<1x16xf32, #tpu.memory_space<vmem>>, vector<1x16xf32>
    %4 = vector.broadcast %3 : vector<1x16xf32> to vector<512x16xf32>
    %5 = arith.addf %2, %4 : vector<512x16xf32>
    %cst_5 = arith.constant 0.000000e+00 : f32
    %6 = vector.broadcast %cst_5 : f32 to vector<512x16xf32>
    %7 = arith.maximumf %5, %6 : vector<512x16xf32>
    %8 = arith.truncf %7 : vector<512x16xf32> to vector<512x16xbf16>
    %c0_6 = arith.constant 0 : index
    %c0_7 = arith.constant 0 : index
    %9 = vector.load %arg4[%c0_6, %c0_7] : memref<512x16xbf16, #tpu.memory_space<vmem>>, vector<512x16xbf16>
    tpu.vector_store %arg4[%c0_6, %c0_7], %8 {strides = array<i32>} : memref<512x16xbf16, #tpu.memory_space<vmem>>, vector<512x16xbf16>,
    return
  }
  func.func @transform_0(%arg0: i32) -> (i32, i32) {
    %c0_i32 = arith.constant 0 : i32
    %c0_i32_0 = arith.constant 0 : i32
    return %arg0, %c0_i32 : i32, i32
  }
  func.func @transform_1(%arg0: i32) -> (i32, i32) {
    %c0_i32 = arith.constant 0 : i32
    %c0_i32_0 = arith.constant 0 : i32
    %c0_i32_1 = arith.constant 0 : i32
    return %c0_i32, %c0_i32_0 : i32, i32
  }
  func.func @transform_2(%arg0: i32) -> (i32, i32) {
    %c0_i32 = arith.constant 0 : i32
    %c0_i32_0 = arith.constant 0 : i32
    %c0_i32_1 = arith.constant 0 : i32
    return %c0_i32, %c0_i32_0 : i32, i32
  }
  func.func @transform_3(%arg0: i32) -> (i32, i32) {
    %c0_i32 = arith.constant 0 : i32
    %c0_i32_0 = arith.constant 0 : i32
    return %arg0, %c0_i32 : i32, i32
  }
}

module attributes {stable_mosaic.version = 11 : i64} {
  func.func @_pair_head_kernel(%arg0: i32, %arg1: i32, %arg2: memref<1x18x18x16xbf16, #tpu.memory_space<vmem>>, %arg3: memref<1x16x32xbf16, #tpu.memory_space<vmem>>, %arg4: memref<1x16x32xbf16, #tpu.memory_space<vmem>>, %arg5: memref<9x16x32xbf16, #tpu.memory_space<vmem>>, %arg6: memref<1x32xf32, #tpu.memory_space<vmem>>, %arg7: memref<32x32xbf16, #tpu.memory_space<vmem>>, %arg8: memref<32x32xbf16, #tpu.memory_space<vmem>>, %arg9: memref<32x32xbf16, #tpu.memory_space<vmem>>, %arg10: memref<1x32xf32, #tpu.memory_space<vmem>>, %arg11: memref<32x16xbf16, #tpu.memory_space<vmem>>, %arg12: memref<1x16xf32, #tpu.memory_space<vmem>>, %arg13: memref<1x16xf32, #tpu.memory_space<vmem>>, %arg14: memref<1x1xf32, #tpu.memory_space<vmem>>, %arg15: memref<1x16x16xf32, #tpu.memory_space<vmem>>) attributes {dimension_semantics = [#tpu.dimension_semantics<parallel>, #tpu.dimension_semantics<parallel>], iteration_bounds = array<i64: 2, 1>, scalar_prefetch = 0 : i64, scratch_operands = 0 : i64, tpu.core_type = #tpu.core_type<tc>, window_params = [{transform_indices = @transform_0, window_bounds = array<i64: 1, 18, 18, 16>}, {transform_indices = @transform_1, window_bounds = array<i64: 1, 16, 32>}, {transform_indices = @transform_2, window_bounds = array<i64: 1, 16, 32>}, {pipeline_mode = #tpu.pipeline_mode<synchronous>, transform_indices = @transform_3, window_bounds = array<i64: 9, 16, 32>}, {pipeline_mode = #tpu.pipeline_mode<synchronous>, transform_indices = @transform_4, window_bounds = array<i64: 1, 32>}, {pipeline_mode = #tpu.pipeline_mode<synchronous>, transform_indices = @transform_5, window_bounds = array<i64: 32, 32>}, {pipeline_mode = #tpu.pipeline_mode<synchronous>, transform_indices = @transform_6, window_bounds = array<i64: 32, 32>}, {pipeline_mode = #tpu.pipeline_mode<synchronous>, transform_indices = @transform_7, window_bounds = array<i64: 32, 32>}, {pipeline_mode = #tpu.pipeline_mode<synchronous>, transform_indices = @transform_8, window_bounds = array<i64: 1, 32>}, {pipeline_mode = #tpu.pipeline_mode<synchronous>, transform_indices = @transform_9, window_bounds = array<i64: 32, 16>}, {pipeline_mode = #tpu.pipeline_mode<synchronous>, transform_indices = @transform_10, window_bounds = array<i64: 1, 16>}, {pipeline_mode = #tpu.pipeline_mode<synchronous>, transform_indices = @transform_11, window_bounds = array<i64: 1, 16>}, {pipeline_mode = #tpu.pipeline_mode<synchronous>, transform_indices = @transform_12, window_bounds = array<i64: 1, 1>}, {transform_indices = @transform_13, window_bounds = array<i64: 1, 16, 16>}]} {
    %c16_i32 = arith.constant 16 : i32
    %0 = arith.muli %arg1, %c16_i32 : i32
    %1 = tpu.assume_multiple %0, 16 : i32
    %cst = arith.constant 0.000000e+00 : f32
    %2 = vector.broadcast %cst : f32 to vector<256x32xf32>
    %c0_i32 = arith.constant 0 : i32
    %3 = arith.addi %1, %c0_i32 : i32
    %c0 = arith.constant 0 : index
    %4 = arith.index_cast %3 : i32 to index
    %c0_0 = arith.constant 0 : index
    %c0_1 = arith.constant 0 : index
    %5 = vector.load %arg2[%c0, %4, %c0_0, %c0_1] : memref<1x18x18x16xbf16, #tpu.memory_space<vmem>>, vector<1x16x16x16xbf16>
    %6 = vector.shape_cast %5 : vector<1x16x16x16xbf16> to vector<16x16x16xbf16>
    %7 = vector.shape_cast %6 : vector<16x16x16xbf16> to vector<256x16xbf16>
    %c0_2 = arith.constant 0 : index
    %c0_3 = arith.constant 0 : index
    %c0_4 = arith.constant 0 : index
    %8 = vector.load %arg5[%c0_2, %c0_3, %c0_4] : memref<9x16x32xbf16, #tpu.memory_space<vmem>>, vector<1x16x32xbf16>
    %9 = vector.shape_cast %8 : vector<1x16x32xbf16> to vector<16x32xbf16>
    %cst_5 = arith.constant dense<0.000000e+00> : vector<256x32xf32>
    %10 = tpu.matmul %7, %9, %cst_5 {dimension_numbers = #tpu.dot_dimension_numbers<[1], [0], [0], [1], [0, 0, 1, 1], [], []>} : vector<256x16xbf16>, vector<16x32xbf16>, vector<256x32xf32> -> vector<256x32xf32>
    %11 = arith.addf %2, %10 : vector<256x32xf32>
    %c0_i32_6 = arith.constant 0 : i32
    %12 = arith.addi %1, %c0_i32_6 : i32
    %c0_7 = arith.constant 0 : index
    %13 = arith.index_cast %12 : i32 to index
    %c1 = arith.constant 1 : index
    %c0_8 = arith.constant 0 : index
    %14 = vector.load %arg2[%c0_7, %13, %c1, %c0_8] : memref<1x18x18x16xbf16, #tpu.memory_space<vmem>>, vector<1x16x16x16xbf16>
    %15 = vector.shape_cast %14 : vector<1x16x16x16xbf16> to vector<16x16x16xbf16>
    %16 = vector.shape_cast %15 : vector<16x16x16xbf16> to vector<256x16xbf16>
    %c1_9 = arith.constant 1 : index
    %c0_10 = arith.constant 0 : index
    %c0_11 = arith.constant 0 : index
    %17 = vector.load %arg5[%c1_9, %c0_10, %c0_11] : memref<9x16x32xbf16, #tpu.memory_space<vmem>>, vector<1x16x32xbf16>
    %18 = vector.shape_cast %17 : vector<1x16x32xbf16> to vector<16x32xbf16>
    %cst_12 = arith.constant dense<0.000000e+00> : vector<256x32xf32>
    %19 = tpu.matmul %16, %18, %cst_12 {dimension_numbers = #tpu.dot_dimension_numbers<[1], [0], [0], [1], [0, 0, 1, 1], [], []>} : vector<256x16xbf16>, vector<16x32xbf16>, vector<256x32xf32> -> vector<256x32xf32>
    %20 = arith.addf %11, %19 : vector<256x32xf32>
    %c0_i32_13 = arith.constant 0 : i32
    %21 = arith.addi %1, %c0_i32_13 : i32
    %c0_14 = arith.constant 0 : index
    %22 = arith.index_cast %21 : i32 to index
    %c2 = arith.constant 2 : index
    %c0_15 = arith.constant 0 : index
    %23 = vector.load %arg2[%c0_14, %22, %c2, %c0_15] : memref<1x18x18x16xbf16, #tpu.memory_space<vmem>>, vector<1x16x16x16xbf16>
    %24 = vector.shape_cast %23 : vector<1x16x16x16xbf16> to vector<16x16x16xbf16>
    %25 = vector.shape_cast %24 : vector<16x16x16xbf16> to vector<256x16xbf16>
    %c2_16 = arith.constant 2 : index
    %c0_17 = arith.constant 0 : index
    %c0_18 = arith.constant 0 : index
    %26 = vector.load %arg5[%c2_16, %c0_17, %c0_18] : memref<9x16x32xbf16, #tpu.memory_space<vmem>>, vector<1x16x32xbf16>
    %27 = vector.shape_cast %26 : vector<1x16x32xbf16> to vector<16x32xbf16>
    %cst_19 = arith.constant dense<0.000000e+00> : vector<256x32xf32>
    %28 = tpu.matmul %25, %27, %cst_19 {dimension_numbers = #tpu.dot_dimension_numbers<[1], [0], [0], [1], [0, 0, 1, 1], [], []>} : vector<256x16xbf16>, vector<16x32xbf16>, vector<256x32xf32> -> vector<256x32xf32>
    %29 = arith.addf %20, %28 : vector<256x32xf32>
    %c1_i32 = arith.constant 1 : i32
    %30 = arith.addi %1, %c1_i32 : i32
    %c0_20 = arith.constant 0 : index
    %31 = arith.index_cast %30 : i32 to index
    %c0_21 = arith.constant 0 : index
    %c0_22 = arith.constant 0 : index
    %32 = vector.load %arg2[%c0_20, %31, %c0_21, %c0_22] : memref<1x18x18x16xbf16, #tpu.memory_space<vmem>>, vector<1x16x16x16xbf16>
    %33 = vector.shape_cast %32 : vector<1x16x16x16xbf16> to vector<16x16x16xbf16>
    %34 = vector.shape_cast %33 : vector<16x16x16xbf16> to vector<256x16xbf16>
    %c3 = arith.constant 3 : index
    %c0_23 = arith.constant 0 : index
    %c0_24 = arith.constant 0 : index
    %35 = vector.load %arg5[%c3, %c0_23, %c0_24] : memref<9x16x32xbf16, #tpu.memory_space<vmem>>, vector<1x16x32xbf16>
    %36 = vector.shape_cast %35 : vector<1x16x32xbf16> to vector<16x32xbf16>
    %cst_25 = arith.constant dense<0.000000e+00> : vector<256x32xf32>
    %37 = tpu.matmul %34, %36, %cst_25 {dimension_numbers = #tpu.dot_dimension_numbers<[1], [0], [0], [1], [0, 0, 1, 1], [], []>} : vector<256x16xbf16>, vector<16x32xbf16>, vector<256x32xf32> -> vector<256x32xf32>
    %38 = arith.addf %29, %37 : vector<256x32xf32>
    %c1_i32_26 = arith.constant 1 : i32
    %39 = arith.addi %1, %c1_i32_26 : i32
    %c0_27 = arith.constant 0 : index
    %40 = arith.index_cast %39 : i32 to index
    %c1_28 = arith.constant 1 : index
    %c0_29 = arith.constant 0 : index
    %41 = vector.load %arg2[%c0_27, %40, %c1_28, %c0_29] : memref<1x18x18x16xbf16, #tpu.memory_space<vmem>>, vector<1x16x16x16xbf16>
    %42 = vector.shape_cast %41 : vector<1x16x16x16xbf16> to vector<16x16x16xbf16>
    %43 = vector.shape_cast %42 : vector<16x16x16xbf16> to vector<256x16xbf16>
    %c4 = arith.constant 4 : index
    %c0_30 = arith.constant 0 : index
    %c0_31 = arith.constant 0 : index
    %44 = vector.load %arg5[%c4, %c0_30, %c0_31] : memref<9x16x32xbf16, #tpu.memory_space<vmem>>, vector<1x16x32xbf16>
    %45 = vector.shape_cast %44 : vector<1x16x32xbf16> to vector<16x32xbf16>
    %cst_32 = arith.constant dense<0.000000e+00> : vector<256x32xf32>
    %46 = tpu.matmul %43, %45, %cst_32 {dimension_numbers = #tpu.dot_dimension_numbers<[1], [0], [0], [1], [0, 0, 1, 1], [], []>} : vector<256x16xbf16>, vector<16x32xbf16>, vector<256x32xf32> -> vector<256x32xf32>
    %47 = arith.addf %38, %46 : vector<256x32xf32>
    %c1_i32_33 = arith.constant 1 : i32
    %48 = arith.addi %1, %c1_i32_33 : i32
    %c0_34 = arith.constant 0 : index
    %49 = arith.index_cast %48 : i32 to index
    %c2_35 = arith.constant 2 : index
    %c0_36 = arith.constant 0 : index
    %50 = vector.load %arg2[%c0_34, %49, %c2_35, %c0_36] : memref<1x18x18x16xbf16, #tpu.memory_space<vmem>>, vector<1x16x16x16xbf16>
    %51 = vector.shape_cast %50 : vector<1x16x16x16xbf16> to vector<16x16x16xbf16>
    %52 = vector.shape_cast %51 : vector<16x16x16xbf16> to vector<256x16xbf16>
    %c5 = arith.constant 5 : index
    %c0_37 = arith.constant 0 : index
    %c0_38 = arith.constant 0 : index
    %53 = vector.load %arg5[%c5, %c0_37, %c0_38] : memref<9x16x32xbf16, #tpu.memory_space<vmem>>, vector<1x16x32xbf16>
    %54 = vector.shape_cast %53 : vector<1x16x32xbf16> to vector<16x32xbf16>
    %cst_39 = arith.constant dense<0.000000e+00> : vector<256x32xf32>
    %55 = tpu.matmul %52, %54, %cst_39 {dimension_numbers = #tpu.dot_dimension_numbers<[1], [0], [0], [1], [0, 0, 1, 1], [], []>} : vector<256x16xbf16>, vector<16x32xbf16>, vector<256x32xf32> -> vector<256x32xf32>
    %56 = arith.addf %47, %55 : vector<256x32xf32>
    %c2_i32 = arith.constant 2 : i32
    %57 = arith.addi %1, %c2_i32 : i32
    %c0_40 = arith.constant 0 : index
    %58 = arith.index_cast %57 : i32 to index
    %c0_41 = arith.constant 0 : index
    %c0_42 = arith.constant 0 : index
    %59 = vector.load %arg2[%c0_40, %58, %c0_41, %c0_42] : memref<1x18x18x16xbf16, #tpu.memory_space<vmem>>, vector<1x16x16x16xbf16>
    %60 = vector.shape_cast %59 : vector<1x16x16x16xbf16> to vector<16x16x16xbf16>
    %61 = vector.shape_cast %60 : vector<16x16x16xbf16> to vector<256x16xbf16>
    %c6 = arith.constant 6 : index
    %c0_43 = arith.constant 0 : index
    %c0_44 = arith.constant 0 : index
    %62 = vector.load %arg5[%c6, %c0_43, %c0_44] : memref<9x16x32xbf16, #tpu.memory_space<vmem>>, vector<1x16x32xbf16>
    %63 = vector.shape_cast %62 : vector<1x16x32xbf16> to vector<16x32xbf16>
    %cst_45 = arith.constant dense<0.000000e+00> : vector<256x32xf32>
    %64 = tpu.matmul %61, %63, %cst_45 {dimension_numbers = #tpu.dot_dimension_numbers<[1], [0], [0], [1], [0, 0, 1, 1], [], []>} : vector<256x16xbf16>, vector<16x32xbf16>, vector<256x32xf32> -> vector<256x32xf32>
    %65 = arith.addf %56, %64 : vector<256x32xf32>
    %c2_i32_46 = arith.constant 2 : i32
    %66 = arith.addi %1, %c2_i32_46 : i32
    %c0_47 = arith.constant 0 : index
    %67 = arith.index_cast %66 : i32 to index
    %c1_48 = arith.constant 1 : index
    %c0_49 = arith.constant 0 : index
    %68 = vector.load %arg2[%c0_47, %67, %c1_48, %c0_49] : memref<1x18x18x16xbf16, #tpu.memory_space<vmem>>, vector<1x16x16x16xbf16>
    %69 = vector.shape_cast %68 : vector<1x16x16x16xbf16> to vector<16x16x16xbf16>
    %70 = vector.shape_cast %69 : vector<16x16x16xbf16> to vector<256x16xbf16>
    %c7 = arith.constant 7 : index
    %c0_50 = arith.constant 0 : index
    %c0_51 = arith.constant 0 : index
    %71 = vector.load %arg5[%c7, %c0_50, %c0_51] : memref<9x16x32xbf16, #tpu.memory_space<vmem>>, vector<1x16x32xbf16>
    %72 = vector.shape_cast %71 : vector<1x16x32xbf16> to vector<16x32xbf16>
    %cst_52 = arith.constant dense<0.000000e+00> : vector<256x32xf32>
    %73 = tpu.matmul %70, %72, %cst_52 {dimension_numbers = #tpu.dot_dimension_numbers<[1], [0], [0], [1], [0, 0, 1, 1], [], []>} : vector<256x16xbf16>, vector<16x32xbf16>, vector<256x32xf32> -> vector<256x32xf32>
    %74 = arith.addf %65, %73 : vector<256x32xf32>
    %c2_i32_53 = arith.constant 2 : i32
    %75 = arith.addi %1, %c2_i32_53 : i32
    %c0_54 = arith.constant 0 : index
    %76 = arith.index_cast %75 : i32 to index
    %c2_55 = arith.constant 2 : index
    %c0_56 = arith.constant 0 : index
    %77 = vector.load %arg2[%c0_54, %76, %c2_55, %c0_56] : memref<1x18x18x16xbf16, #tpu.memory_space<vmem>>, vector<1x16x16x16xbf16>
    %78 = vector.shape_cast %77 : vector<1x16x16x16xbf16> to vector<16x16x16xbf16>
    %79 = vector.shape_cast %78 : vector<16x16x16xbf16> to vector<256x16xbf16>
    %c8 = arith.constant 8 : index
    %c0_57 = arith.constant 0 : index
    %c0_58 = arith.constant 0 : index
    %80 = vector.load %arg5[%c8, %c0_57, %c0_58] : memref<9x16x32xbf16, #tpu.memory_space<vmem>>, vector<1x16x32xbf16>
    %81 = vector.shape_cast %80 : vector<1x16x32xbf16> to vector<16x32xbf16>
    %cst_59 = arith.constant dense<0.000000e+00> : vector<256x32xf32>
    %82 = tpu.matmul %79, %81, %cst_59 {dimension_numbers = #tpu.dot_dimension_numbers<[1], [0], [0], [1], [0, 0, 1, 1], [], []>} : vector<256x16xbf16>, vector<16x32xbf16>, vector<256x32xf32> -> vector<256x32xf32>
    %83 = arith.addf %74, %82 : vector<256x32xf32>
    %c0_60 = arith.constant 0 : index
    %c0_61 = arith.constant 0 : index
    %84 = vector.load %arg6[%c0_60, %c0_61] : memref<1x32xf32, #tpu.memory_space<vmem>>, vector<1x32xf32>
    %85 = vector.broadcast %84 : vector<1x32xf32> to vector<256x32xf32>
    %86 = arith.addf %83, %85 : vector<256x32xf32>
    %cst_62 = arith.constant 0.000000e+00 : f32
    %87 = vector.broadcast %cst_62 : f32 to vector<256x32xf32>
    %88 = arith.maximumf %86, %87 : vector<256x32xf32>
    %c0_63 = arith.constant 0 : index
    %c0_64 = arith.constant 0 : index
    %c0_65 = arith.constant 0 : index
    %89 = vector.load %arg4[%c0_63, %c0_64, %c0_65] : memref<1x16x32xbf16, #tpu.memory_space<vmem>>, vector<1x16x32xbf16>
    %90 = vector.shape_cast %89 : vector<1x16x32xbf16> to vector<16x32xbf16>
    %c0_66 = arith.constant 0 : index
    %c0_67 = arith.constant 0 : index
    %91 = vector.load %arg7[%c0_66, %c0_67] : memref<32x32xbf16, #tpu.memory_space<vmem>>, vector<32x32xbf16>
    %cst_68 = arith.constant dense<0.000000e+00> : vector<16x32xf32>
    %92 = tpu.matmul %90, %91, %cst_68 {dimension_numbers = #tpu.dot_dimension_numbers<[1], [0], [0], [1], [0, 0, 1, 1], [], []>} : vector<16x32xbf16>, vector<32x32xbf16>, vector<16x32xf32> -> vector<16x32xf32>
    %c0_69 = arith.constant 0 : index
    %c0_70 = arith.constant 0 : index
    %c0_71 = arith.constant 0 : index
    %93 = vector.load %arg3[%c0_69, %c0_70, %c0_71] : memref<1x16x32xbf16, #tpu.memory_space<vmem>>, vector<1x16x32xbf16>
    %94 = vector.shape_cast %93 : vector<1x16x32xbf16> to vector<16x32xbf16>
    %c0_72 = arith.constant 0 : index
    %c0_73 = arith.constant 0 : index
    %95 = vector.load %arg8[%c0_72, %c0_73] : memref<32x32xbf16, #tpu.memory_space<vmem>>, vector<32x32xbf16>
    %cst_74 = arith.constant dense<0.000000e+00> : vector<16x32xf32>
    %96 = tpu.matmul %94, %95, %cst_74 {dimension_numbers = #tpu.dot_dimension_numbers<[1], [0], [0], [1], [0, 0, 1, 1], [], []>} : vector<16x32xbf16>, vector<32x32xbf16>, vector<16x32xf32> -> vector<16x32xf32>
    %97 = arith.truncf %88 : vector<256x32xf32> to vector<256x32xbf16>
    %c0_75 = arith.constant 0 : index
    %c0_76 = arith.constant 0 : index
    %98 = vector.load %arg9[%c0_75, %c0_76] : memref<32x32xbf16, #tpu.memory_space<vmem>>, vector<32x32xbf16>
    %cst_77 = arith.constant dense<0.000000e+00> : vector<256x32xf32>
    %99 = tpu.matmul %97, %98, %cst_77 {dimension_numbers = #tpu.dot_dimension_numbers<[1], [0], [0], [1], [0, 0, 1, 1], [], []>} : vector<256x32xbf16>, vector<32x32xbf16>, vector<256x32xf32> -> vector<256x32xf32>
    %100 = vector.shape_cast %99 : vector<256x32xf32> to vector<16x16x32xf32>
    %101 = vector.shape_cast %92 : vector<16x32xf32> to vector<1x16x32xf32>
    %102 = vector.broadcast %101 : vector<1x16x32xf32> to vector<16x16x32xf32>
    %103 = arith.addf %100, %102 : vector<16x16x32xf32>
    %104 = vector.shape_cast %96 : vector<16x32xf32> to vector<16x1x32xf32>
    %105 = vector.broadcast %104 : vector<16x1x32xf32> to vector<16x16x32xf32>
    %106 = arith.addf %103, %105 : vector<16x16x32xf32>
    %c0_78 = arith.constant 0 : index
    %c0_79 = arith.constant 0 : index
    %107 = vector.load %arg10[%c0_78, %c0_79] : memref<1x32xf32, #tpu.memory_space<vmem>>, vector<1x32xf32>
    %108 = vector.shape_cast %107 : vector<1x32xf32> to vector<1x1x32xf32>
    %109 = vector.broadcast %108 : vector<1x1x32xf32> to vector<16x16x32xf32>
    %110 = arith.addf %106, %109 : vector<16x16x32xf32>
    %cst_80 = arith.constant 0.000000e+00 : f32
    %111 = vector.broadcast %cst_80 : f32 to vector<16x16x32xf32>
    %112 = arith.maximumf %110, %111 : vector<16x16x32xf32>
    %113 = vector.shape_cast %112 : vector<16x16x32xf32> to vector<256x32xf32>
    %114 = arith.truncf %113 : vector<256x32xf32> to vector<256x32xbf16>
    %c0_81 = arith.constant 0 : index
    %c0_82 = arith.constant 0 : index
    %115 = vector.load %arg11[%c0_81, %c0_82] : memref<32x16xbf16, #tpu.memory_space<vmem>>, vector<32x16xbf16>
    %cst_83 = arith.constant dense<0.000000e+00> : vector<256x16xf32>
    %116 = tpu.matmul %114, %115, %cst_83 {dimension_numbers = #tpu.dot_dimension_numbers<[1], [0], [0], [1], [0, 0, 1, 1], [], []>} : vector<256x32xbf16>, vector<32x16xbf16>, vector<256x16xf32> -> vector<256x16xf32>
    %c0_84 = arith.constant 0 : index
    %c0_85 = arith.constant 0 : index
    %117 = vector.load %arg12[%c0_84, %c0_85] : memref<1x16xf32, #tpu.memory_space<vmem>>, vector<1x16xf32>
    %118 = vector.broadcast %117 : vector<1x16xf32> to vector<256x16xf32>
    %119 = arith.addf %116, %118 : vector<256x16xf32>
    %cst_86 = arith.constant 0.000000e+00 : f32
    %120 = vector.broadcast %cst_86 : f32 to vector<256x16xf32>
    %121 = arith.maximumf %119, %120 : vector<256x16xf32>
    %122 = vector.shape_cast %121 : vector<256x16xf32> to vector<16x16x16xf32>
    %c0_87 = arith.constant 0 : index
    %c0_88 = arith.constant 0 : index
    %123 = vector.load %arg13[%c0_87, %c0_88] : memref<1x16xf32, #tpu.memory_space<vmem>>, vector<1x16xf32>
    %124 = vector.shape_cast %123 : vector<1x16xf32> to vector<1x1x16xf32>
    %125 = vector.broadcast %124 : vector<1x1x16xf32> to vector<16x16x16xf32>
    %126 = arith.mulf %122, %125 : vector<16x16x16xf32>
    %cst_89 = arith.constant dense<0.000000e+00> : vector<16x16xf32>
    %127 = vector.multi_reduction <add>, %126, %cst_89 [2] : vector<16x16x16xf32> to vector<16x16xf32>
    %c0_90 = arith.constant 0 : index
    %c0_91 = arith.constant 0 : index
    %128 = vector.load %arg14[%c0_90, %c0_91] : memref<1x1xf32, #tpu.memory_space<vmem>>, vector<1x1xf32>
    %129 = vector.broadcast %128 : vector<1x1xf32> to vector<16x16xf32>
    %130 = arith.addf %127, %129 : vector<16x16xf32>
    %cst_92 = arith.constant 0.000000e+00 : f32
    %131 = vector.broadcast %cst_92 : f32 to vector<16x16xf32>
    %132 = arith.maximumf %130, %131 : vector<16x16xf32>
    %c0_93 = arith.constant 0 : index
    %c0_94 = arith.constant 0 : index
    %c0_95 = arith.constant 0 : index
    %133 = vector.load %arg15[%c0_93, %c0_94, %c0_95] : memref<1x16x16xf32, #tpu.memory_space<vmem>>, vector<1x16x16xf32>
    %134 = vector.shape_cast %133 : vector<1x16x16xf32> to vector<16x16xf32>
    %135 = vector.shape_cast %132 : vector<16x16xf32> to vector<1x16x16xf32>
    tpu.vector_store %arg15[%c0_93, %c0_94, %c0_95], %135 {strides = array<i32>} : memref<1x16x16xf32, #tpu.memory_space<vmem>>, vector<1x16x16xf32>,
    return
  }
  func.func @transform_0(%arg0: i32, %arg1: i32) -> (i32, i32, i32, i32) {
    %c0_i32 = arith.constant 0 : i32
    %c0_i32_0 = arith.constant 0 : i32
    %c0_i32_1 = arith.constant 0 : i32
    %c0_i32_2 = arith.constant 0 : i32
    return %arg0, %c0_i32, %c0_i32_0, %c0_i32_1 : i32, i32, i32, i32
  }
  func.func @transform_1(%arg0: i32, %arg1: i32) -> (i32, i32, i32) {
    %c0_i32 = arith.constant 0 : i32
    %c0_i32_0 = arith.constant 0 : i32
    return %arg0, %arg1, %c0_i32 : i32, i32, i32
  }
  func.func @transform_2(%arg0: i32, %arg1: i32) -> (i32, i32, i32) {
    %c0_i32 = arith.constant 0 : i32
    %c0_i32_0 = arith.constant 0 : i32
    %c0_i32_1 = arith.constant 0 : i32
    return %arg0, %c0_i32, %c0_i32_0 : i32, i32, i32
  }
  func.func @transform_3(%arg0: i32, %arg1: i32) -> (i32, i32, i32) {
    %c0_i32 = arith.constant 0 : i32
    %c0_i32_0 = arith.constant 0 : i32
    %c0_i32_1 = arith.constant 0 : i32
    %c0_i32_2 = arith.constant 0 : i32
    return %c0_i32, %c0_i32_0, %c0_i32_1 : i32, i32, i32
  }
  func.func @transform_4(%arg0: i32, %arg1: i32) -> (i32, i32) {
    %c0_i32 = arith.constant 0 : i32
    %c0_i32_0 = arith.constant 0 : i32
    %c0_i32_1 = arith.constant 0 : i32
    return %c0_i32, %c0_i32_0 : i32, i32
  }
  func.func @transform_5(%arg0: i32, %arg1: i32) -> (i32, i32) {
    %c0_i32 = arith.constant 0 : i32
    %c0_i32_0 = arith.constant 0 : i32
    %c0_i32_1 = arith.constant 0 : i32
    return %c0_i32, %c0_i32_0 : i32, i32
  }
  func.func @transform_6(%arg0: i32, %arg1: i32) -> (i32, i32) {
    %c0_i32 = arith.constant 0 : i32
    %c0_i32_0 = arith.constant 0 : i32
    %c0_i32_1 = arith.constant 0 : i32
    return %c0_i32, %c0_i32_0 : i32, i32
  }
  func.func @transform_7(%arg0: i32, %arg1: i32) -> (i32, i32) {
    %c0_i32 = arith.constant 0 : i32
    %c0_i32_0 = arith.constant 0 : i32
    %c0_i32_1 = arith.constant 0 : i32
    return %c0_i32, %c0_i32_0 : i32, i32
  }
  func.func @transform_8(%arg0: i32, %arg1: i32) -> (i32, i32) {
    %c0_i32 = arith.constant 0 : i32
    %c0_i32_0 = arith.constant 0 : i32
    %c0_i32_1 = arith.constant 0 : i32
    return %c0_i32, %c0_i32_0 : i32, i32
  }
  func.func @transform_9(%arg0: i32, %arg1: i32) -> (i32, i32) {
    %c0_i32 = arith.constant 0 : i32
    %c0_i32_0 = arith.constant 0 : i32
    %c0_i32_1 = arith.constant 0 : i32
    return %c0_i32, %c0_i32_0 : i32, i32
  }
  func.func @transform_10(%arg0: i32, %arg1: i32) -> (i32, i32) {
    %c0_i32 = arith.constant 0 : i32
    %c0_i32_0 = arith.constant 0 : i32
    %c0_i32_1 = arith.constant 0 : i32
    return %c0_i32, %c0_i32_0 : i32, i32
  }
  func.func @transform_11(%arg0: i32, %arg1: i32) -> (i32, i32) {
    %c0_i32 = arith.constant 0 : i32
    %c0_i32_0 = arith.constant 0 : i32
    %c0_i32_1 = arith.constant 0 : i32
    return %c0_i32, %c0_i32_0 : i32, i32
  }
  func.func @transform_12(%arg0: i32, %arg1: i32) -> (i32, i32) {
    %c0_i32 = arith.constant 0 : i32
    %c0_i32_0 = arith.constant 0 : i32
    %c0_i32_1 = arith.constant 0 : i32
    return %c0_i32, %c0_i32_0 : i32, i32
  }
  func.func @transform_13(%arg0: i32, %arg1: i32) -> (i32, i32, i32) {
    %c0_i32 = arith.constant 0 : i32
    %c0_i32_0 = arith.constant 0 : i32
    return %arg0, %arg1, %c0_i32 : i32, i32, i32
  }
}

</mosaic_0001>

<bundles_post_ra>
// kernel: _lambda_.13
= control target key start
LH: loop header
LB: loop body
LE: loop exit
PB: predicated region body
PF: predicated region fallthrough
CT: control target
= control target key end

     0   :  { %vm60_vm0 = vcmask 1046528   ;;  %v152_v1 = vmov 0   ;;  %vm56_vm1 = vcmask 244736   ;;  %s200_s1 = inlined_call_operand.vmem [shape: bf16[30,256], index: 1, kind: input, shape index: {}]   ;;  %s201_s2 = inlined_call_operand.vmem [shape: f32[16,1], index: 2, kind: input, shape index: {}]   ;;  %s202_s0 = inlined_call_operand.vmem [shape: bf16[16,30], index: 0, kind: input, shape index: {}]   ;;  %s203_s3 = inlined_call_operand.vmem [shape: bf16[16,256], index: 3, kind: output, shape index: {}]  }
   0x1   :  { %v145_v0 = vld [vmem:[%s200_s1 + $0x14] ss:$8 sps:$4 sm:$0x7f]   ;;  %99 = vmatprep.mubr.bf16.mxu0 %v152_v1  ;;  %144 = vset.pattern.permute.xlu0 %v152_v1  ;;  %v147_v2 = vld [vmem:[%s200_s1 + $0x10] ss:$8 sps:$4 sm:$0x7f]  }
   0x2   :  { %137 = vmatprep.subr.msk.bf16.mxu0 %vm60_vm0, %v145_v0  ;;  %v148_v3 = vld [vmem:[%s200_s1 + $0x4] ss:$8 sps:$4 sm:$0xff]   ;;  %v62_v4 = vsel %vm60_vm0, %v147_v2, 0  ;;  %v150_v6 = vld [vmem:[%s200_s1] ss:$8 sps:$4 sm:$0xff]  }
   0x3   :  { %v21_v5 = vld [vmem:[%s201_s2] sm:$0xff]  ;;  %80 = vmatpush1.bf16.msra.mxu0 %v62_v4  ;;  %v22_v7 = vld [vmem:[%s201_s2 + $0x8] sm:$0xff] }
   0x4   :  { %25 = vperm.xlu0 %144, %v21_v5   ;;  %81 = vmatprep.subr.bf16.mxu0 %v148_v3  ;;  %v151_v8 = vld [vmem:[%s202_s0] sm:$0xff]  }
   0x7   :  { %82 = vmatpush1.bf16.msra.mxu0 %v150_v6 }
   0x8   :  { %30 = vperm.xlu0 %144, %v22_v7  }
   0xa   :  { %138 = vmatmul.mubr.msk.bf16.vlgmr.msra.gmra.mxu0 %vm56_vm1, %v151_v8 }
  0x7f   :  { %v26_v9 = vpop.permute.xlu0 %25 }
  0x83   :  { %v31_v14 = vpop.permute.xlu0 %30 }
  0xca   :  { %v101_v10 = vpop.f32.mrf.mxu0 }
  0xcb   :  { %v102_v11 = vadd.f32 %v101_v10, %v26_v9 }
  0xcc   :  { %v103_v12 = vpop.f32.mrf.mxu0 }
  0xcd   :  { %v104_v13 = vadd.f32 %v103_v12, %v26_v9  ;;  %v110_v16 = vmax.f32 %v102_v11, 0.0 }
  0xce   :  { %v105_v15 = vpop.f32.mrf.mxu0 }
  0xcf   :  { %v111_v17 = vmax.f32 %v104_v13, 0.0  ;;  %v106_v18 = vadd.f32 %v105_v15, %v31_v14 }
  0xd0   :  { %v107_v19 = vpop.f32.mrf.mxu0 }
  0xd1   :  { %v141_v20 = vpack.c.bf16 %v111_v17, %v110_v16  ;;  %v108_v21 = vadd.f32 %v107_v19, %v31_v14  ;;  %v112_v22 = vmax.f32 %v106_v18, 0.0 }
  0xd3   :  { %126 = vst [vmem:[%s203_s3] sm:$0xff] %v141_v20  ;;  %v113_v23 = vmax.f32 %v108_v21, 0.0 }
  0xd5   :  { %v142_v24 = vpack.c.bf16 %v113_v23, %v112_v22 }
  0xd7   :  { %127 = vst [vmem:[%s203_s3 + $0x8] sm:$0xff] %v142_v24 }

// kernel: _lambda_.14
= control target key start
LH: loop header
LB: loop body
LE: loop exit
PB: predicated region body
PF: predicated region fallthrough
CT: control target
= control target key end

     0   :  { %v181_v0 = vmov 0.0   ;;  %vm182_vm0 = vmmov 0   ;;  %v183_v2 = vmov 0   ;;  %vm74_vm1 = vcmask 654336   ;;  %s231_s1 = inlined_call_operand.vmem [shape: bf16[80,128], index: 1, kind: input, shape index: {}]   ;;  %s232_s2 = inlined_call_operand.vmem [shape: f32[16,1], index: 2, kind: input, shape index: {}]   ;;  %s233_s0 = inlined_call_operand.vmem [shape: bf16[16,80], index: 0, kind: input, shape index: {}]   ;;  %s234_s3 = inlined_call_operand.vmem [shape: bf16[16,128], index: 3, kind: output, shape index: {}]  }
   0x1   :  { %157 = vmatprep.subr.bf16.mxu0 %v181_v0  ;;  %v175_v1 = vld [vmem:[%s231_s1 + $0x20] sm:$0xff]   ;;  %167 = vmatprep.mubr.msk.bf16.mxu0 %vm182_vm0, %v181_v0  ;;  %v176_v3 = vld [vmem:[%s231_s1 + $0x18] sm:$0xff]   ;;  %v177_v4 = vld [vmem:[%s231_s1 + $0x10] sm:$0xff]  }
   0x2   :  { %174 = vset.pattern.permute.xlu0 %v183_v2  ;;  %158 = vmatpush3.bf16.msra.mxu0 %v175_v1  ;;  %v27_v5 = vld [vmem:[%s232_s2] sm:$0xff]  ;;  %v28_v6 = vld [vmem:[%s232_s2 + $0x8] sm:$0xff] }
   0x3   :  { %159 = vmatprep.subr.bf16.mxu0 %v181_v0  ;;  %31 = vperm.xlu0 %174, %v27_v5   ;;  %v178_v7 = vld [vmem:[%s231_s1 + $0x8] sm:$0xff]   ;;  %v179_v8 = vld [vmem:[%s231_s1] sm:$0xff]  }
   0x4   :  { %v180_v9 = vld [vmem:[%s233_s0] sm:$0xff]  }
   0x6   :  { %160 = vmatpush3.bf16.msra.mxu0 %v176_v3 }
   0x7   :  { %161 = vmatprep.subr.bf16.mxu0 %v181_v0  ;;  %36 = vperm.xlu0 %174, %v28_v6  }
   0xa   :  { %162 = vmatpush3.bf16.msra.mxu0 %v177_v4 }
   0xb   :  { %163 = vmatprep.subr.bf16.mxu0 %v181_v0 }
   0xe   :  { %164 = vmatpush3.bf16.msra.mxu0 %v178_v7 }
   0xf   :  { %165 = vmatprep.subr.bf16.mxu0 %v181_v0 }
  0x12   :  { %166 = vmatpush3.bf16.msra.mxu0 %v179_v8 }
  0x15   :  { %168 = vmatmul.mubr.msk.bf16.vlgmr.msra.gmra.mxu0 %vm74_vm1, %v180_v9 }
  0x7e   :  { %v32_v10 = vpop.permute.xlu0 %31 }
  0x82   :  { %v37_v14 = vpop.permute.xlu0 %36 }
  0xd5   :  { %v112_v11 = vpop.f32.mrf.mxu0 }
  0xd6   :  { %v113_v13 = vadd.f32 %v112_v11, %v32_v10 }
  0xd7   :  { %v169_v12 = vpop.f32.mrf.mxu0 }
  0xd8   :  { %v119_v18 = vmax.f32 %v113_v13, 0.0 }
  0xd9   :  { %v115_v15 = vpop.f32.mrf.mxu0 }
  0xda   :  { %v116_v16 = vadd.f32 %v115_v15, %v37_v14 }
  0xdb   :  { %v170_v17 = vpop.f32.mrf.mxu0 }
  0xdc   :  { %v120_v19 = vmax.f32 %v116_v16, 0.0 }
  0xde   :  { %v149_v20 = vpack.c.bf16 %v120_v19, %v119_v18 }
  0xe0   :  { %150 = vst [vmem:[%s234_s3] sm:$0xff] %v149_v20  }

// kernel: _lambda_.15
= control target key start
LH: loop header
LB: loop body
LE: loop exit
PB: predicated region body
PF: predicated region fallthrough
CT: control target
= control target key end

     0   :  { %v188_v0 = vmov 0.0   ;;  %vm189_vm0 = vmmov 0   ;;  %v190_v2 = vmov 0   ;;  %vm77_vm1 = vcmask 654336   ;;  %s249_s1 = inlined_call_operand.vmem [shape: bf16[80,128], index: 1, kind: input, shape index: {}]   ;;  %s250_s2 = inlined_call_operand.vmem [shape: f32[16,1], index: 2, kind: input, shape index: {}]   ;;  %s251_s0 = inlined_call_operand.vmem [shape: bf16[16,80], index: 0, kind: input, shape index: {}]   ;;  %s252_s3 = inlined_call_operand.vmem [shape: f32[16,128], index: 3, kind: input, shape index: {}]   ;;  %s253_s4 = inlined_call_operand.vmem [shape: bf16[16,128], index: 4, kind: output, shape index: {}]  }
   0x1   :  { %164 = vmatprep.subr.bf16.mxu0 %v188_v0  ;;  %v182_v1 = vld [vmem:[%s249_s1 + $0x20] sm:$0xff]   ;;  %174 = vmatprep.mubr.msk.bf16.mxu0 %vm189_vm0, %v188_v0  ;;  %v183_v3 = vld [vmem:[%s249_s1 + $0x18] sm:$0xff]   ;;  %v184_v4 = vld [vmem:[%s249_s1 + $0x10] sm:$0xff]  }
   0x2   :  { %181 = vset.pattern.permute.xlu0 %v190_v2  ;;  %165 = vmatpush3.bf16.msra.mxu0 %v182_v1  ;;  %v30_v5 = vld [vmem:[%s250_s2] sm:$0xff]  ;;  %v31_v6 = vld [vmem:[%s250_s2 + $0x8] sm:$0xff] }
   0x3   :  { %166 = vmatprep.subr.bf16.mxu0 %v188_v0  ;;  %34 = vperm.xlu0 %181, %v30_v5   ;;  %v185_v7 = vld [vmem:[%s249_s1 + $0x8] sm:$0xff]   ;;  %v186_v8 = vld [vmem:[%s249_s1] sm:$0xff]  }
   0x4   :  { %v187_v9 = vld [vmem:[%s251_s0] sm:$0xff]   ;;  %v123_v17 = vld [vmem:[%s252_s3 + $0x8] sm:$0xff] }
   0x5   :  { %v122_v13 = vld [vmem:[%s252_s3] sm:$0xff] }
   0x6   :  { %167 = vmatpush3.bf16.msra.mxu0 %v183_v3 }
   0x7   :  { %168 = vmatprep.subr.bf16.mxu0 %v188_v0  ;;  %39 = vperm.xlu0 %181, %v31_v6  }
   0xa   :  { %169 = vmatpush3.bf16.msra.mxu0 %v184_v4 }
   0xb   :  { %170 = vmatprep.subr.bf16.mxu0 %v188_v0 }
   0xe   :  { %171 = vmatpush3.bf16.msra.mxu0 %v185_v7 }
   0xf   :  { %172 = vmatprep.subr.bf16.mxu0 %v188_v0 }
  0x12   :  { %173 = vmatpush3.bf16.msra.mxu0 %v186_v8 }
  0x15   :  { %175 = vmatmul.mubr.msk.bf16.vlgmr.msra.gmra.mxu0 %vm77_vm1, %v187_v9 }
  0x7e   :  { %v35_v10 = vpop.permute.xlu0 %34 }
  0x82   :  { %v40_v15 = vpop.permute.xlu0 %39 }
  0xd5   :  { %v115_v11 = vpop.f32.mrf.mxu0 }
  0xd6   :  { %v116_v12 = vadd.f32 %v115_v11, %v35_v10 }
  0xd7   :  { %v176_v14 = vpop.f32.mrf.mxu0 }
  0xd8   :  { %v124_v18 = vadd.f32 %v122_v13, %v116_v12 }
  0xd9   :  { %v118_v16 = vpop.f32.mrf.mxu0 }
  0xda   :  { %v119_v19 = vadd.f32 %v118_v16, %v40_v15  ;;  %v126_v22 = vmax.f32 %v124_v18, 0.0 }
  0xdb   :  { %v177_v20 = vpop.f32.mrf.mxu0 }
  0xdc   :  { %v125_v21 = vadd.f32 %v123_v17, %v119_v19 }
  0xde   :  { %v127_v23 = vmax.f32 %v125_v21, 0.0 }
  0xe0   :  { %v156_v24 = vpack.c.bf16 %v127_v23, %v126_v22 }
  0xe2   :  { %157 = vst [vmem:[%s253_s4] sm:$0xff] %v156_v24  }

// kernel: _lambda_.16
= control target key start
LH: loop header
LB: loop body
LE: loop exit
PB: predicated region body
PF: predicated region fallthrough
CT: control target
= control target key end

     0   :  { %vm58_vm0 = vcmask 261120   ;;  %vm209_vm1 = vcmask 257024   ;;  %s336_s1 = inlined_call_operand.vmem [shape: bf16[32,32], index: 1, kind: input, shape index: {}]   ;;  %s337_s0 = inlined_call_operand.vmem [shape: bf16[32,32], index: 0, kind: input, shape index: {}]   ;;  %s338_s2 = inlined_call_operand.vmem [shape: f32[1,32], index: 2, kind: input, shape index: {}]   ;;  %s339_s3 = inlined_call_operand.vmem [shape: f32[1,32], index: 3, kind: input, shape index: {}]   ;;  %s340_s4 = inlined_call_operand.vmem [shape: f32[1,32], index: 4, kind: input, shape index: {}]   ;;  %s341_s5 = inlined_call_operand.vmem [shape: bf16[32,32], index: 5, kind: output, shape index: {}]  }
   0x1   :  { %v247_v0 = vld [vmem:[%s336_s1 + $0x8] sm:$0xff]   ;;  %v248_v1 = vld [vmem:[%s336_s1] sm:$0xff]  }
   0x2   :  { %239 = vmatprep.subr.bf16.mxu0 %v247_v0  ;;  %v249_v2 = vld [vmem:[%s337_s0] sm:$0xff]   ;;  %v250_v3 = vld [vmem:[%s337_s0 + $0x8] sm:$0xff]  }
   0x3   :  { %240 = vmatpush3.bf16.msra.mxu0 %v247_v0  ;;  %243 = vmatprep.mubr.msk.bf16.mxu0 %vm58_vm0, %v249_v2  ;;  %v218_v4 = vld [vmem:[%s338_s2] ss:$0 sm:$0xff] }
   0x4   :  { %241 = vmatprep.subr.bf16.mxu0 %v248_v1  ;;  %v225_v50 = vld [vmem:[%s339_s3] ss:$0 sm:$0xff] }
   0x5   :  { %v226_v52 = vld [vmem:[%s340_s4] ss:$0 sm:$0xff] }
   0x7   :  { %242 = vmatpush3.bf16.msra.mxu0 %v248_v1 }
   0xa   :  { %244 = vmatmul.mubr.msk.bf16.vlgmr.msra.gmra.mxu0 %vm58_vm0, %v250_v3 }
  0xca   :  { %v245_v5 = vpop.f32.mrf.mxu0 }
  0xcb   :  { %v108_v6 = vadd.f32 %v245_v5, %v218_v4 }
  0xcc   :  { %v99_v7 = vpop.f32.mrf.mxu0 }
  0xcd   :  { %v100_v8 = vadd.f32 %v218_v4, %v99_v7  ;;  %v120_v9 = vsel %vm58_vm0, %v108_v6, 0.0 }
  0xce   :  { %121 = vadd.xlane.f32.xlu1 %v120_v9  ;;  %v246_v10 = vpop.f32.mrf.mxu0 }
  0xcf   :  { %v111_v11 = vadd.f32 %v246_v10, %v218_v4  ;;  %v114_v12 = vsel %vm58_vm0, %v100_v8, 0.0 }
  0xd0   :  { %v102_v13 = vpop.f32.mrf.mxu0  ;;  %115 = vadd.xlane.f32.xlu0 %v114_v12 }
  0xd1   :  { %v103_v14 = vadd.f32 %v218_v4, %v102_v13  ;;  %v123_v15 = vsel %vm58_vm0, %v111_v11, 0.0 }
  0xd2   :  { %124 = vadd.xlane.f32.xlu1 %v123_v15 }
  0xd3   :  { %v117_v16 = vsel %vm58_vm0, %v103_v14, 0.0 }
  0xd4   :  { %118 = vadd.xlane.f32.xlu0 %v117_v16 }
 0x157   :  { %v122_v17 = vpop.xlane.xlu1 %121 }
 0x158   :  { %v129_v18 = vmul.f32 0.03125, %v122_v17 }
 0x159   :  { %v116_v19 = vpop.xlane.xlu0 %115 }
 0x15a   :  { %v127_v20 = vmul.f32 0.03125, %v116_v19  ;;  %v133_v22 = vsub.f32 %v108_v6, %v129_v18 }
 0x15b   :  { %v125_v21 = vpop.xlane.xlu1 %124 }
 0x15c   :  { %v131_v23 = vsub.f32 %v100_v8, %v127_v20  ;;  %v130_v24 = vmul.f32 0.03125, %v125_v21  ;;  %v137_v31 = vmul.f32 %v133_v22, %v133_v22 }
 0x15d   :  { %v119_v25 = vpop.xlane.xlu0 %118 }
 0x15e   :  { %v128_v26 = vmul.f32 0.03125, %v119_v25  ;;  %v135_v27 = vmul.f32 %v131_v23, %v131_v23  ;;  %v134_v28 = vsub.f32 %v111_v11, %v130_v24  ;;  %v145_v33 = vsel %vm58_vm0, %v137_v31, 0.0 }
 0x160   :  { %v132_v29 = vsub.f32 %v103_v14, %v128_v26  ;;  %v139_v30 = vsel %vm58_vm0, %v135_v27, 0.0  ;;  %v138_v35 = vmul.f32 %v134_v28, %v134_v28 }
 0x161   :  { %140 = vadd.xlane.f32.xlu0 %v139_v30 }
 0x162   :  { %v136_v32 = vmul.f32 %v132_v29, %v132_v29  ;;  %v148_v36 = vsel %vm58_vm0, %v138_v35, 0.0 }
 0x164   :  { %v142_v34 = vsel %vm58_vm0, %v136_v32, 0.0 }
 0x165   :  { %146 = vadd.xlane.f32.xlu0 %v145_v33  ;;  %143 = vadd.xlane.f32.xlu1 %v142_v34 }
 0x169   :  { %149 = vadd.xlane.f32.xlu1 %v148_v36 }
 0x1ea   :  { %v141_v37 = vpop.xlane.xlu0 %140 }
 0x1eb   :  { %v151_v38 = vmul.f32 0.03125, %v141_v37 }
 0x1ed   :  { %v155_v39 = vadd.f32 1e-05, %v151_v38 }
 0x1ee   :  { %v144_v40 = vpop.xlane.xlu1 %143  ;;  %v147_v41 = vpop.xlane.xlu0 %146 }
 0x1ef   :  { %251 = vrsqrt.f32 %v155_v39  ;;  %v152_v42 = vmul.f32 0.03125, %v144_v40  ;;  %v153_v43 = vmul.f32 0.03125, %v147_v41 }
 0x1f1   :  { %v156_v44 = vadd.f32 1e-05, %v152_v42  ;;  %v157_v45 = vadd.f32 1e-05, %v153_v43 }
 0x1f2   :  { %v150_v46 = vpop.xlane.xlu1 %149 }
 0x1f3   :  { %253 = vrsqrt.f32 %v156_v44  ;;  %v154_v47 = vmul.f32 0.03125, %v150_v46 }
 0x1f4   :  { %255 = vrsqrt.f32 %v157_v45 }
 0x1f5   :  { %v158_v48 = vadd.f32 1e-05, %v154_v47 }
 0x1f7   :  { %257 = vrsqrt.f32 %v158_v48 }
 0x1fc   :  { %v252_v49 = vpop.eup %251 }
 0x1fd   :  { %v163_v51 = vmul.f32 %v252_v49, %v131_v23 }
 0x1ff   :  { %v174_v53 = vmul.f32 %v225_v50, %v163_v51 }
 0x200   :  { %v254_v54 = vpop.eup %253 }
 0x201   :  { %v256_v55 = vpop.eup %255  ;;  %v185_v56 = vadd.f32 %v226_v52, %v174_v53  ;;  %v164_v57 = vmul.f32 %v254_v54, %v132_v29 }
 0x202   :  { %v165_v58 = vmul.f32 %v256_v55, %v133_v22 }
 0x203   :  { %v189_v59 = vmax.f32 %v185_v56, 0.0  ;;  %v175_v60 = vmul.f32 %v225_v50, %v164_v57 }
 0x204   :  { %v258_v61 = vpop.eup %257  ;;  %v176_v62 = vmul.f32 %v225_v50, %v165_v58 }
 0x205   :  { %v231_v63 = vpack.c.bf16 %v189_v59, %v189_v59  ;;  %v186_v0 = vadd.f32 %v226_v52, %v175_v60  ;;  %v166_v1 = vmul.f32 %v258_v61, %v134_v28 }
 0x206   :  { %v187_v2 = vadd.f32 %v226_v52, %v176_v62 }
 0x207   :  { %210 = vst.msk [vmem:[%s341_s5] sm:$0xf] %vm209_vm1, %v231_v63  ;;  %v190_v3 = vmax.f32 %v186_v0, 0.0  ;;  %v177_v4 = vmul.f32 %v225_v50, %v166_v1 }
 0x208   :  { %v191_v5 = vmax.f32 %v187_v2, 0.0 }
 0x209   :  { %v232_v6 = vpack.c.bf16 %v190_v3, %v190_v3  ;;  %v188_v7 = vadd.f32 %v226_v52, %v177_v4 }
 0x20a   :  { %v233_v8 = vpack.c.bf16 %v191_v5, %v191_v5 }
 0x20b   :  { %211 = vst.msk [vmem:[%s341_s5 + $0x4] sm:$0xf] %vm209_vm1, %v232_v6  ;;  %v192_v9 = vmax.f32 %v188_v7, 0.0 }
 0x20c   :  { %212 = vst.msk [vmem:[%s341_s5 + $0x8] sm:$0xf] %vm209_vm1, %v233_v8 }
 0x20d   :  { %v234_v10 = vpack.c.bf16 %v192_v9, %v192_v9 }
 0x20f   :  { %213 = vst.msk [vmem:[%s341_s5 + $0xc] sm:$0xf] %vm209_vm1, %v234_v10 }

// kernel: _lambda_.17
= control target key start
LH: loop header
LB: loop body
LE: loop exit
PB: predicated region body
PF: predicated region fallthrough
CT: control target
= control target key end

     0   :  { %v344_v1 = vmov 0   ;;  %vm101_vm0 = vcmask 261120   ;;  %v31_v11 = vlaneseq  ;;  %vm278_vm1 = vcmask 257024   ;;  %s443_s1 = inlined_call_operand.vmem [shape: bf16[32,416], index: 1, kind: input, shape index: {}]   ;;  %s444_s0 = inlined_call_operand.vmem [shape: bf16[32,32], index: 0, kind: input, shape index: {}]   ;;  %s445_s2 = inlined_call_operand.vmem [shape: f32[1,416], index: 2, kind: input, shape index: {}]   ;;  %s446_s3 = inlined_call_operand.vmem [shape: bf16[32,384], index: 3, kind: output, shape index: {0}]   ;;  %s447_s4 = inlined_call_operand.vmem [shape: bf16[32,32], index: 4, kind: output, shape index: {1}]  }
   0x1   :  { %v330_v0 = vld [vmem:[%s443_s1 + $0x24] ss:$16 sps:$4 sm:$0xff]   ;;  %140 = vmatprep.mubr.bf16.mxu0 %v344_v1  ;;  %193 = vmatprep.mubr.bf16.mxu1 %v344_v1  ;;  %v332_v2 = vld [vmem:[%s443_s1 + $0x2c] ss:$16 sps:$4 sm:$0xff]   ;;  %v334_v3 = vld [vmem:[%s443_s1 + $0x20] ss:$16 sps:$4 sm:$0xff]  }
   0x2   :  { %120 = vmatprep.subr.bf16.mxu0 %v330_v0  ;;  %v335_v4 = vld [vmem:[%s443_s1 + $0x28] ss:$16 sps:$4 sm:$0xff]   ;;  %173 = vmatprep.subr.bf16.mxu1 %v332_v2  ;;  %v336_v5 = vld [vmem:[%s443_s1 + $0x4] ss:$16 sps:$4 sm:$0xff]   ;;  %v338_v6 = vld [vmem:[%s443_s1 + $0xc] ss:$16 sps:$4 sm:$0xff]  }
   0x3   :  { %121 = vmatpush1.bf16.msra.mxu0 %v334_v3  ;;  %174 = vmatpush1.bf16.msra.mxu1 %v335_v4  ;;  %v340_v7 = vld [vmem:[%s443_s1] ss:$16 sps:$4 sm:$0xff]   ;;  %v341_v8 = vld [vmem:[%s443_s1 + $0x8] ss:$16 sps:$4 sm:$0xff]   ;;  %v32_v12 = vshrl.u32 %v31_v11, 7 }
   0x4   :  { %122 = vmatprep.subr.bf16.mxu0 %v336_v5  ;;  %175 = vmatprep.subr.bf16.mxu1 %v338_v6  ;;  %v342_v9 = vld [vmem:[%s444_s0] sm:$0xff]   ;;  %v343_v10 = vld [vmem:[%s444_s0 + $0x8] sm:$0xff]  }
   0x5   :  { %v41_v13 = vsub.s32 2, %v32_v12  ;;  %v29_v14 = vld [vmem:[%s445_s2] sm:$0xf]  ;;  %v33_v15 = vsub.s32 0, %v32_v12  ;;  %v37_v16 = vsub.s32 1, %v32_v12  ;;  %v45_v17 = vsub.s32 3, %v32_v12 }
   0x7   :  { %123 = vmatpush1.bf16.msra.mxu0 %v340_v7  ;;  %176 = vmatpush1.bf16.msra.mxu1 %v341_v8  ;;  %v42_v18 = vrot.slane %v29_v14, %v41_v13  ;;  %v34_v19 = vrot.slane %v29_v14, %v33_v15  ;;  %v38_v20 = vrot.slane %v29_v14, %v37_v16 }
   0x8   :  { %v46_v21 = vrot.slane %v29_v14, %v45_v17 }
   0xa   :  { %301 = vmatmul.mubr.msk.bf16.vlgmr.msra.gmra.mxu0 %vm101_vm0, %v342_v9  ;;  %303 = vmatmul.mubr.msk.bf16.vlgmr.msra.gmra.mxu1 %vm101_vm0, %v342_v9 }
   0xb   :  { %150 = vmatprep.mubr.bf16.mxu0 %v344_v1  ;;  %203 = vmatprep.mubr.bf16.mxu1 %v344_v1 }
  0x12   :  { %302 = vmatmul.mubr.msk.bf16.gmra.mxu0 %vm101_vm0, %v343_v10  ;;  %304 = vmatmul.mubr.msk.bf16.gmra.mxu1 %vm101_vm0, %v343_v10 }
  0xca   :  { %v142_v22 = vpop.f32.mrf.mxu0  ;;  %v195_v23 = vpop.f32.mrf.mxu1 }
  0xcb   :  { %v196_v24 = vadd.f32 %v195_v23, %v42_v18  ;;  %v143_v27 = vadd.f32 %v142_v22, %v34_v19 }
  0xcc   :  { %v144_v25 = vpop.f32.mrf.mxu0  ;;  %v197_v26 = vpop.f32.mrf.mxu1 }
  0xcd   :  { %v318_v28 = vpack.c.bf16 %v196_v24, %v196_v24  ;;  %v145_v29 = vadd.f32 %v144_v25, %v38_v20  ;;  %v198_v30 = vadd.f32 %v197_v26, %v46_v21 }
  0xce   :  { %v146_v31 = vpop.f32.mrf.mxu0  ;;  %v199_v32 = vpop.f32.mrf.mxu1 }
  0xcf   :  { %255 = vst [vmem:[%s446_s3 + $0x8] sm:$0xf] %v318_v28  ;;  %v317_v33 = vpack.c.bf16 %v145_v29, %v143_v27  ;;  %v325_v34 = vpack.c.bf16 %v198_v30, %v198_v30  ;;  %v200_v35 = vadd.f32 %v199_v32, %v42_v18  ;;  %v147_v38 = vadd.f32 %v146_v31, %v34_v19 }
  0xd0   :  { %v148_v36 = vpop.f32.mrf.mxu0  ;;  %v201_v37 = vpop.f32.mrf.mxu1 }
  0xd1   :  { %254 = vst [vmem:[%s446_s3] sm:$0xff] %v317_v33  ;;  %279 = vst.msk [vmem:[%s447_s4] sm:$0xf] %vm278_vm1, %v325_v34  ;;  %v320_v39 = vpack.c.bf16 %v200_v35, %v200_v35  ;;  %v149_v40 = vadd.f32 %v148_v36, %v38_v20  ;;  %v202_v41 = vadd.f32 %v201_v37, %v46_v21 }
  0xd2   :  { %v152_v42 = vpop.f32.mrf.mxu0  ;;  %v205_v43 = vpop.f32.mrf.mxu1 }
  0xd3   :  { %257 = vst [vmem:[%s446_s3 + $0x14] sm:$0xf] %v320_v39  ;;  %v319_v44 = vpack.c.bf16 %v149_v40, %v147_v38  ;;  %v326_v45 = vpack.c.bf16 %v202_v41, %v202_v41  ;;  %v206_v46 = vadd.f32 %v205_v43, %v42_v18  ;;  %v153_v49 = vadd.f32 %v152_v42, %v34_v19 }
  0xd4   :  { %v154_v47 = vpop.f32.mrf.mxu0  ;;  %v207_v48 = vpop.f32.mrf.mxu1 }
  0xd5   :  { %256 = vst [vmem:[%s446_s3 + $0xc] sm:$0xff] %v319_v44  ;;  %280 = vst.msk [vmem:[%s447_s4 + $0x4] sm:$0xf] %vm278_vm1, %v326_v45  ;;  %v322_v50 = vpack.c.bf16 %v206_v46, %v206_v46  ;;  %v155_v51 = vadd.f32 %v154_v47, %v38_v20  ;;  %v208_v52 = vadd.f32 %v207_v48, %v46_v21 }
  0xd6   :  { %v156_v53 = vpop.f32.mrf.mxu0  ;;  %v209_v54 = vpop.f32.mrf.mxu1 }
  0xd7   :  { %259 = vst [vmem:[%s446_s3 + $0x20] sm:$0xf] %v322_v50  ;;  %v321_v55 = vpack.c.bf16 %v155_v51, %v153_v49  ;;  %v327_v56 = vpack.c.bf16 %v208_v52, %v208_v52  ;;  %v210_v57 = vadd.f32 %v209_v54, %v42_v18  ;;  %v157_v60 = vadd.f32 %v156_v53, %v34_v19 }
  0xd8   :  { %v158_v58 = vpop.f32.mrf.mxu0  ;;  %v211_v59 = vpop.f32.mrf.mxu1 }
  0xd9   :  { %258 = vst [vmem:[%s446_s3 + $0x18] sm:$0xff] %v321_v55  ;;  %281 = vst.msk [vmem:[%s447_s4 + $0x8] sm:$0xf] %vm278_vm1, %v327_v56  ;;  %v324_v61 = vpack.c.bf16 %v210_v57, %v210_v57  ;;  %v159_v62 = vadd.f32 %v158_v58, %v38_v20  ;;  %v212_v63 = vadd.f32 %v211_v59, %v46_v21 }
  0xdb   :  { %261 = vst [vmem:[%s446_s3 + $0x2c] sm:$0xf] %v324_v61  ;;  %v323_v0 = vpack.c.bf16 %v159_v62, %v157_v60  ;;  %v328_v1 = vpack.c.bf16 %v212_v63, %v212_v63 }
  0xdd   :  { %260 = vst [vmem:[%s446_s3 + $0x24] sm:$0xff] %v323_v0  ;;  %282 = vst.msk [vmem:[%s447_s4 + $0xc] sm:$0xf] %vm278_vm1, %v328_v1 }

// kernel: _lambda_.18
= control target key start
LH: loop header
LB: loop body
LE: loop exit
PB: predicated region body
PF: predicated region fallthrough
CT: control target
= control target key end

     0   :  { %v617_v2 = vmov 0.0   ;;  %vm315_vm0 = vcmask 1040384   ;;  %vm105_vm1 = vcmask 261120   ;;  %s763_s0 = inlined_call_operand.vmem [shape: bf16[32,384], index: 0, kind: input, shape index: {}]   ;;  %s764_s3 = inlined_call_operand.vmem [shape: f32[1,128], index: 3, kind: output, shape index: {1}]   ;;  %s765_s1 = inlined_call_operand.vmem [shape: f32[128,128], index: 1, kind: input, shape index: {}]   ;;  %s766_s2 = inlined_call_operand.vmem [shape: bf16[128,128], index: 2, kind: output, shape index: {0}]  }
   0x1   :  { %v41_v0 = vld [vmem:[%s763_s0 + $0x4] sm:$0xf]  ;;  %v42_v1 = vld [vmem:[%s763_s0 + $0x10] sm:$0xf]  ;;  %34 = vst [vmem:[#allocation3] sm:$0x1] %v617_v2 }
   0x2   :  { %35 = vst [vmem:[#allocation4] sm:$0x1] %v617_v2  ;;  %36 = vst [vmem:[#allocation5] sm:$0x1] %v617_v2  ;;  %v43_v3 = vld [vmem:[%s763_s0 + $0x1c] sm:$0xf]  ;;  %v484_v4 = vcombine.low %v41_v0, %v42_v1  ;;  %v259_v5 = vunpack.c.l.bf16 %v41_v0  ;;  %v260_v6 = vunpack.c.l.bf16 %v42_v1 }
   0x3   :  { %v44_v7 = vld [vmem:[%s763_s0 + $0x28] sm:$0xf]  ;;  %v261_v8 = vunpack.c.l.bf16 %v43_v3  ;;  %v37_v9 = vld [vmem:[%s763_s0] ss:$12 sps:$4 sm:$0xff]   ;;  %v39_v10 = vld [vmem:[%s763_s0 + $0x18] ss:$12 sps:$4 sm:$0xff]  }
   0x4   :  { %v485_v11 = vcombine.low %v43_v3, %v44_v7  ;;  %v262_v12 = vunpack.c.l.bf16 %v44_v7  ;;  %v263_v13 = vunpack.c.l.bf16 %v37_v9  ;;  %v264_v14 = vunpack.c.h.bf16 %v37_v9  ;;  %v613_v15 = vld [vmem:[%s763_s0 + $0x20] ss:$12 sps:$4 sm:$0xff]   ;;  %77 = vxpose.xlu0.c.b16.start [1/2] (short) %v484_v4, 128  ;;  %v614_v20 = vld [vmem:[%s763_s0 + $0x8] ss:$12 sps:$4 sm:$0xff]  }
   0x5   :  { %v268_v16 = vadd.f32 %v260_v6, %v259_v5  ;;  %v296_v17 = vmul.f32 %v259_v5, %v259_v5  ;;  %v297_v18 = vmul.f32 %v260_v6, %v260_v6  ;;  %v298_v19 = vmul.f32 %v261_v8, %v261_v8  ;;  %585 = vmatprep.subr.bf16.mxu0 %v613_v15 }
   0x6   :  { %v299_v21 = vmul.f32 %v262_v12, %v262_v12  ;;  %v265_v22 = vunpack.c.l.bf16 %v39_v10  ;;  %v266_v23 = vunpack.c.h.bf16 %v39_v10  ;;  %v280_v24 = vmul.f32 %v263_v13, %v263_v13  ;;  %605 = vmatprep.subr.bf16.mxu1 %v613_v15  ;;  %586 = vmatpush3.bf16.msra.mxu0 %v613_v15 }
   0x7   :  { %v300_v25 = vadd.f32 %v297_v18, %v296_v17  ;;  %v269_v26 = vadd.f32 %v268_v16, %v261_v8  ;;  %v281_v27 = vmul.f32 %v264_v14, %v264_v14  ;;  %607 = vmatpush3.bf16.msra.mxu1 %v613_v15  ;;  %587 = vmatprep.subr.bf16.mxu0 %v614_v20  ;;  %v341_v14 = vlaneseq }
   0x8   :  { %v282_v28 = vmul.f32 %v265_v22, %v265_v22  ;;  %606 = vmatprep.subr.bf16.mxu1 %v614_v20  ;;  %78 = vxpose.xlu0.c.b16.end [2/2] (short) %v485_v11, 128  ;;  %v283_v31 = vmul.f32 %v266_v23, %v266_v23  ;;  %v267_v48 = vld [vmem:[#allocation3] sm:$0x1]  ;;  %v364_v23 = vld [vmem:[%s765_s1 + $0x18] sm:$0xff] }
   0x9   :  { %v270_v29 = vadd.f32 %v269_v26, %v262_v12  ;;  %v301_v30 = vadd.f32 %v300_v25, %v298_v19  ;;  %v284_v32 = vadd.f32 %v281_v27, %v280_v24  ;;  %v295_v52 = vld [vmem:[#allocation5] sm:$0x1]  ;;  %v279_v56 = vld [vmem:[#allocation4] sm:$0x1]  ;;  %v342_v15 = vshrl.u32 %v341_v14, 7 }
   0xa   :  { %588 = vmatpush3.bf16.msra.mxu0 %v614_v20  ;;  %v361_v26 = vld [vmem:[%s765_s1] sm:$0xff] }
   0xb   :  { %v271_v33 = vrot.slane %v270_v29, 4  ;;  %v302_v34 = vadd.f32 %v301_v30, %v299_v21  ;;  %v285_v35 = vadd.f32 %v284_v32, %v282_v28  ;;  %608 = vmatpush3.bf16.msra.mxu1 %v614_v20  ;;  %v343_v16 = vsub.s32 0, %v342_v15  ;;  %v363_v21 = vld [vmem:[%s765_s1 + $0x10] sm:$0xff]  ;;  %v362_v28 = vld [vmem:[%s765_s1 + $0x8] sm:$0xff] }
   0xd   :  { %v272_v36 = vadd.f32 %v271_v33, %v270_v29  ;;  %v303_v37 = vrot.slane %v302_v34, 4  ;;  %v286_v38 = vadd.f32 %v285_v35, %v283_v31 }
   0xf   :  { %v273_v39 = vrot.slane %v272_v36, 2  ;;  %v304_v40 = vadd.f32 %v303_v37, %v302_v34  ;;  %v287_v41 = vrot.slane %v286_v38, 4 }
  0x11   :  { %v274_v42 = vadd.f32 %v273_v39, %v272_v36  ;;  %v305_v43 = vrot.slane %v304_v40, 2  ;;  %v288_v44 = vadd.f32 %v287_v41, %v286_v38  ;;  %v367_v39 = vld [vmem:[%s765_s1 + $0x30] sm:$0xff]  ;;  %v368_v41 = vld [vmem:[%s765_s1 + $0x38] sm:$0xff] }
  0x13   :  { %v275_v45 = vrot.slane %v274_v42, 1  ;;  %v306_v46 = vadd.f32 %v305_v43, %v304_v40  ;;  %v289_v47 = vrot.slane %v288_v44, 2 }
  0x15   :  { %v276_v49 = vadd.f32 %v275_v45, %v274_v42  ;;  %v307_v50 = vrot.slane %v306_v46, 1  ;;  %v290_v51 = vadd.f32 %v289_v47, %v288_v44  ;;  %v365_v44 = vld [vmem:[%s765_s1 + $0x20] sm:$0xff] }
  0x17   :  { %v277_v53 = vadd.f32 %v276_v49, %v267_v48  ;;  %v308_v54 = vadd.f32 %v307_v50, %v306_v46  ;;  %v291_v55 = vrot.slane %v290_v51, 1  ;;  %v366_v46 = vld [vmem:[%s765_s1 + $0x28] sm:$0xff] }
  0x19   :  { %278 = vst [vmem:[#allocation3] sm:$0x1] %v277_v53  ;;  %v309_v57 = vadd.f32 %v308_v54, %v295_v52  ;;  %v292_v58 = vadd.f32 %v291_v55, %v290_v51 }
  0x1b   :  { %310 = vst [vmem:[#allocation5] sm:$0x1] %v309_v57  ;;  %v293_v59 = vadd.f32 %v292_v58, %v279_v56  ;;  %v371_v57 = vld [vmem:[%s765_s1 + $0x50] sm:$0xff] }
  0x1d   :  { %294 = vst [vmem:[#allocation4] sm:$0x1] %v293_v59  ;;  %v372_v59 = vld [vmem:[%s765_s1 + $0x58] sm:$0xff] }
  0x20   :  { %v473_v11 = vld [vmem:[#allocation3] sm:$0x1] }
  0x22   :  { %v319_v61 = vld [vmem:[#allocation5] sm:$0x1] }
  0x23   :  { %v320_v63 = vsel %vm315_vm0, %v319_v61, 0.0 }
  0x24   :  { %v314_v60 = vld [vmem:[#allocation4] sm:$0x1] }
  0x25   :  { %v316_v62 = vsel %vm315_vm0, %v314_v60, 0.0 }
  0x26   :  { %317 = vadd.xlane.f32.xlu1 %v316_v62  ;;  %v369_v62 = vld [vmem:[%s765_s1 + $0x40] sm:$0xff] }
  0x2a   :  { %321 = vadd.xlane.f32.xlu1 %v320_v63 }
  0x66   :  { %v85_v0 = vpop.trf.xlu0 }
  0x67   :  { %589 = vmatprep.mubr.msk.bf16.mxu0 %vm105_vm1, %v85_v0  ;;  %v370_v0 = vld [vmem:[%s765_s1 + $0x48] sm:$0xff] }
  0x6a   :  { %v86_v1 = vpop.trf.xlu0 }
  0x6b   :  { %590 = vmatmul.mubr.msk.bf16.vlgmr.msra.gmra.mxu0 %vm105_vm1, %v86_v1 }
  0x6e   :  { %v87_v2 = vpop.trf.xlu0 }
  0x6f   :  { %593 = vmatprep.mubr.msk.bf16.mxu0 %vm105_vm1, %v87_v2 }
  0x72   :  { %v88_v3 = vpop.trf.xlu0 }
  0x73   :  { %594 = vmatmul.mubr.msk.bf16.gmra.mxu0 %vm105_vm1, %v88_v3 }
  0x76   :  { %v89_v4 = vpop.trf.xlu0 }
  0x77   :  { %597 = vmatprep.mubr.msk.bf16.mxu1 %vm105_vm1, %v89_v4 }
  0x7a   :  { %v90_v5 = vpop.trf.xlu0 }
  0x7b   :  { %598 = vmatmul.mubr.msk.bf16.vlgmr.msra.gmra.mxu1 %vm105_vm1, %v90_v5 }
  0x7e   :  { %v91_v6 = vpop.trf.xlu0 }
  0x7f   :  { %601 = vmatprep.mubr.msk.bf16.mxu1 %vm105_vm1, %v91_v6 }
  0x82   :  { %v92_v7 = vpop.trf.xlu0 }
  0x83   :  { %602 = vmatmul.mubr.msk.bf16.gmra.mxu1 %vm105_vm1, %v92_v7 }
  0xaf   :  { %v318_v8 = vpop.xlane.xlu1 %317 }
  0xb3   :  { %v322_v9 = vpop.xlane.xlu1 %321 }
  0xb4   :  { %v323_v10 = vmul.f32 %v322_v9, %v318_v8 }
  0xb6   :  { %615 = vrsqrt.f32 %v323_v10 }
  0xc3   :  { %v616_v12 = vpop.eup %615 }
  0xc4   :  { %v474_v13 = vmul.f32 %v616_v12, %v473_v11  ;;  %v673_v17 = vrot.slane %v616_v12, %v343_v16  ;;  %v375_v11 = vld [vmem:[%s765_s1 + $0x70] sm:$0xff]  ;;  %v373_v16 = vld [vmem:[%s765_s1 + $0x60] sm:$0xff] }
  0xc6   :  { %475 = vst [vmem:[%s764_s3] sm:$0x1] %v474_v13  ;;  %v376_v13 = vld [vmem:[%s765_s1 + $0x78] sm:$0xff] }
 0x12b   :  { %v591_v18 = vpop.f32.mrf.mxu0 }
 0x12c   :  { %v347_v20 = vmul.f32 %v591_v18, %v673_v17 }
 0x12d   :  { %v164_v19 = vpop.f32.mrf.mxu0 }
 0x12e   :  { %v345_v24 = vmul.f32 %v673_v17, %v164_v19  ;;  %v379_v29 = vmul.f32 %v363_v21, %v347_v20  ;;  %v374_v19 = vld [vmem:[%s765_s1 + $0x68] sm:$0xff] }
 0x12f   :  { %v592_v22 = vpop.f32.mrf.mxu0 }
 0x130   :  { %v348_v25 = vmul.f32 %v592_v22, %v673_v17  ;;  %v377_v33 = vmul.f32 %v361_v26, %v345_v24 }
 0x131   :  { %v167_v27 = vpop.f32.mrf.mxu0 }
 0x132   :  { %v380_v30 = vmul.f32 %v364_v23, %v348_v25  ;;  %v346_v31 = vmul.f32 %v673_v17, %v167_v27 }
 0x133   :  { %v595_v32 = vpop.f32.mrf.mxu0 }
 0x134   :  { %v536_v34 = vpack.c.bf16 %v380_v30, %v379_v29  ;;  %v378_v35 = vmul.f32 %v362_v28, %v346_v31  ;;  %v351_v38 = vmul.f32 %v595_v32, %v673_v17 }
 0x135   :  { %v180_v36 = vpop.f32.mrf.mxu0 }
 0x136   :  { %568 = vst [vmem:[%s766_s2 + $0x8] sm:$0xff] %v536_v34   ;;  %v531_v37 = vpack.c.bf16 %v378_v35, %v377_v33  ;;  %v349_v42 = vmul.f32 %v673_v17, %v180_v36  ;;  %v383_v47 = vmul.f32 %v367_v39, %v351_v38 }
 0x137   :  { %v596_v40 = vpop.f32.mrf.mxu0 }
 0x138   :  { %532 = vst [vmem:[%s766_s2] sm:$0xff] %v531_v37   ;;  %v352_v43 = vmul.f32 %v596_v40, %v673_v17  ;;  %v381_v51 = vmul.f32 %v365_v44, %v349_v42 }
 0x139   :  { %v183_v45 = vpop.f32.mrf.mxu0 }
 0x13a   :  { %v384_v48 = vmul.f32 %v368_v41, %v352_v43  ;;  %v350_v49 = vmul.f32 %v673_v17, %v183_v45 }
 0x13b   :  { %v599_v50 = vpop.f32.mrf.mxu1 }
 0x13c   :  { %v546_v52 = vpack.c.bf16 %v384_v48, %v383_v47  ;;  %v382_v53 = vmul.f32 %v366_v46, %v350_v49  ;;  %v355_v56 = vmul.f32 %v599_v50, %v673_v17 }
 0x13d   :  { %v196_v54 = vpop.f32.mrf.mxu1 }
 0x13e   :  { %570 = vst [vmem:[%s766_s2 + $0x18] sm:$0xff] %v546_v52   ;;  %v541_v55 = vpack.c.bf16 %v382_v53, %v381_v51  ;;  %v353_v60 = vmul.f32 %v673_v17, %v196_v54  ;;  %v387_v1 = vmul.f32 %v371_v57, %v355_v56 }
 0x13f   :  { %v600_v58 = vpop.f32.mrf.mxu1 }
 0x140   :  { %569 = vst [vmem:[%s766_s2 + $0x10] sm:$0xff] %v541_v55   ;;  %v356_v61 = vmul.f32 %v600_v58, %v673_v17  ;;  %v385_v5 = vmul.f32 %v369_v62, %v353_v60 }
 0x141   :  { %v199_v63 = vpop.f32.mrf.mxu1 }
 0x142   :  { %v388_v2 = vmul.f32 %v372_v59, %v356_v61  ;;  %v354_v3 = vmul.f32 %v673_v17, %v199_v63 }
 0x143   :  { %v603_v4 = vpop.f32.mrf.mxu1 }
 0x144   :  { %v556_v6 = vpack.c.bf16 %v388_v2, %v387_v1  ;;  %v386_v7 = vmul.f32 %v370_v0, %v354_v3  ;;  %v359_v10 = vmul.f32 %v603_v4, %v673_v17 }
 0x145   :  { %v212_v8 = vpop.f32.mrf.mxu1 }
 0x146   :  { %572 = vst [vmem:[%s766_s2 + $0x28] sm:$0xff] %v556_v6   ;;  %v551_v9 = vpack.c.bf16 %v386_v7, %v385_v5  ;;  %v357_v14 = vmul.f32 %v673_v17, %v212_v8  ;;  %v391_v20 = vmul.f32 %v375_v11, %v359_v10 }
 0x147   :  { %v604_v12 = vpop.f32.mrf.mxu1 }
 0x148   :  { %571 = vst [vmem:[%s766_s2 + $0x20] sm:$0xff] %v551_v9   ;;  %v360_v15 = vmul.f32 %v604_v12, %v673_v17  ;;  %v389_v23 = vmul.f32 %v373_v16, %v357_v14 }
 0x149   :  { %v215_v18 = vpop.f32.mrf.mxu1 }
 0x14a   :  { %v392_v21 = vmul.f32 %v376_v13, %v360_v15  ;;  %v358_v22 = vmul.f32 %v673_v17, %v215_v18 }
 0x14c   :  { %v566_v24 = vpack.c.bf16 %v392_v21, %v391_v20  ;;  %v390_v25 = vmul.f32 %v374_v19, %v358_v22 }
 0x14e   :  { %574 = vst [vmem:[%s766_s2 + $0x38] sm:$0xff] %v566_v24   ;;  %v561_v26 = vpack.c.bf16 %v390_v25, %v389_v23 }
 0x150   :  { %573 = vst [vmem:[%s766_s2 + $0x30] sm:$0xff] %v561_v26  }

// kernel: _lambda_.23
= control target key start
LH: loop header
LB: loop body
LE: loop exit
PB: predicated region body
PF: predicated region fallthrough
CT: control target
= control target key end

     0   :  { %vm52_vm0 = vcmask 261120   ;;  %vm124_vm1 = vcmask 257024   ;;  %s211_s1 = inlined_call_operand.vmem [shape: bf16[32,32], index: 1, kind: input, shape index: {}]   ;;  %s212_s0 = inlined_call_operand.vmem [shape: bf16[32,32], index: 0, kind: input, shape index: {}]   ;;  %s213_s2 = inlined_call_operand.vmem [shape: f32[1,32], index: 2, kind: input, shape index: {}]   ;;  %s214_s3 = inlined_call_operand.vmem [shape: bf16[32,32], index: 3, kind: output, shape index: {}]  }
   0x1   :  { %v160_v0 = vld [vmem:[%s211_s1 + $0x8] sm:$0xff]   ;;  %v161_v1 = vld [vmem:[%s211_s1] sm:$0xff]  }
   0x2   :  { %152 = vmatprep.subr.bf16.mxu0 %v160_v0  ;;  %v162_v2 = vld [vmem:[%s212_s0] sm:$0xff]   ;;  %v163_v3 = vld [vmem:[%s212_s0 + $0x8] sm:$0xff]  }
   0x3   :  { %153 = vmatpush3.bf16.msra.mxu0 %v160_v0  ;;  %156 = vmatprep.mubr.msk.bf16.mxu0 %vm52_vm0, %v162_v2  ;;  %v133_v4 = vld [vmem:[%s213_s2] ss:$0 sm:$0xff] }
   0x4   :  { %154 = vmatprep.subr.bf16.mxu0 %v161_v1 }
   0x7   :  { %155 = vmatpush3.bf16.msra.mxu0 %v161_v1 }
   0xa   :  { %157 = vmatmul.mubr.msk.bf16.vlgmr.msra.gmra.mxu0 %vm52_vm0, %v163_v3 }
  0xca   :  { %v158_v5 = vpop.f32.mrf.mxu0 }
  0xcb   :  { %v102_v6 = vadd.f32 %v158_v5, %v133_v4 }
  0xcc   :  { %v93_v7 = vpop.f32.mrf.mxu0 }
  0xcd   :  { %v146_v8 = vpack.c.bf16 %v102_v6, %v102_v6  ;;  %v94_v9 = vadd.f32 %v133_v4, %v93_v7 }
  0xce   :  { %v159_v10 = vpop.f32.mrf.mxu0 }
  0xcf   :  { %127 = vst.msk [vmem:[%s214_s3 + $0x8] sm:$0xf] %vm124_vm1, %v146_v8  ;;  %v144_v11 = vpack.c.bf16 %v94_v9, %v94_v9  ;;  %v105_v12 = vadd.f32 %v159_v10, %v133_v4 }
  0xd0   :  { %v96_v13 = vpop.f32.mrf.mxu0 }
  0xd1   :  { %125 = vst.msk [vmem:[%s214_s3] sm:$0xf] %vm124_vm1, %v144_v11  ;;  %v147_v14 = vpack.c.bf16 %v105_v12, %v105_v12  ;;  %v97_v15 = vadd.f32 %v133_v4, %v96_v13 }
  0xd3   :  { %128 = vst.msk [vmem:[%s214_s3 + $0xc] sm:$0xf] %vm124_vm1, %v147_v14  ;;  %v145_v16 = vpack.c.bf16 %v97_v15, %v97_v15 }
  0xd5   :  { %126 = vst.msk [vmem:[%s214_s3 + $0x4] sm:$0xf] %vm124_vm1, %v145_v16 }

// kernel: _lambda_.19
= control target key start
LH: loop header
LB: loop body
LE: loop exit
PB: predicated region body
PF: predicated region fallthrough
CT: control target
= control target key end

     0   :  { %v692_v1 = vmov 0   ;;  %vm368_vm0 = vcmask 261120   ;;  %vm535_vm1 = vcmask 257024   ;;  %s875_s4 = inlined_call_operand.vmem [shape: bf16[128,256], index: 4, kind: input, shape index: {}]   ;;  %s876_s0 = inlined_call_operand.vmem [shape: bf16[32,384], index: 0, kind: input, shape index: {}]   ;;  %s877_s5 = inlined_call_operand.vmem [shape: bf16[128,32], index: 5, kind: input, shape index: {}]   ;;  %s878_s3 = inlined_call_operand.vmem [shape: bf16[32,32], index: 3, kind: input, shape index: {}]   ;;  %s879_s2 = inlined_call_operand.vmem [shape: bf16[32,32], index: 2, kind: input, shape index: {}]   ;;  %s880_s1 = inlined_call_operand.vmem [shape: bf16[32,32], index: 1, kind: input, shape index: {}]   ;;  %s881_s6 = inlined_call_operand.vmem [shape: f32[1,32], index: 6, kind: input, shape index: {}]   ;;  %s882_s7 = inlined_call_operand.vmem [shape: f32[1,32], index: 7, kind: input, shape index: {}]   ;;  %s883_s8 = inlined_call_operand.vmem [shape: bf16[32,32], index: 8, kind: output, shape index: {}]  }
   0x1   :  { %v638_v0 = vld [vmem:[%s875_s4 + $0x74] ss:$8 sps:$4 sm:$0xff]   ;;  %182 = vmatprep.mubr.bf16.mxu0 %v692_v1  ;;  %v640_v2 = vld [vmem:[%s875_s4 + $0x70] ss:$8 sps:$4 sm:$0xff]   ;;  %v641_v3 = vld [vmem:[%s875_s4 + $0x64] ss:$8 sps:$4 sm:$0xff]  }
   0x2   :  { %150 = vmatprep.subr.bf16.mxu0 %v638_v0  ;;  %v643_v4 = vld [vmem:[%s875_s4 + $0x60] ss:$8 sps:$4 sm:$0xff]   ;;  %v644_v5 = vld [vmem:[%s875_s4 + $0x54] ss:$8 sps:$4 sm:$0xff]   ;;  %v646_v6 = vld [vmem:[%s875_s4 + $0x50] ss:$8 sps:$4 sm:$0xff]  }
   0x3   :  { %151 = vmatpush1.bf16.msra.mxu0 %v640_v2  ;;  %v647_v7 = vld [vmem:[%s875_s4 + $0x44] ss:$8 sps:$4 sm:$0xff]   ;;  %v649_v8 = vld [vmem:[%s875_s4 + $0x40] ss:$8 sps:$4 sm:$0xff]   ;;  %v650_v9 = vld [vmem:[%s875_s4 + $0x34] ss:$8 sps:$4 sm:$0xff]  }
   0x4   :  { %152 = vmatprep.subr.bf16.mxu0 %v641_v3  ;;  %v652_v10 = vld [vmem:[%s875_s4 + $0x30] ss:$8 sps:$4 sm:$0xff]   ;;  %v653_v11 = vld [vmem:[%s875_s4 + $0x24] ss:$8 sps:$4 sm:$0xff]   ;;  %v655_v12 = vld [vmem:[%s875_s4 + $0x20] ss:$8 sps:$4 sm:$0xff]  }
   0x5   :  { %v656_v13 = vld [vmem:[%s875_s4 + $0x14] ss:$8 sps:$4 sm:$0xff]   ;;  %v658_v14 = vld [vmem:[%s875_s4 + $0x10] ss:$8 sps:$4 sm:$0xff]   ;;  %v659_v15 = vld [vmem:[%s875_s4 + $0x4] ss:$8 sps:$4 sm:$0xff]  }
   0x6   :  { %v661_v16 = vld [vmem:[%s875_s4] ss:$8 sps:$4 sm:$0xff]   ;;  %v663_v18 = vld [vmem:[%s876_s0 + $0x18] ss:$12 sps:$4 sm:$0xff]   ;;  %v665_v20 = vld [vmem:[%s877_s5 + $0x30] sm:$0xff]  }
   0x7   :  { %153 = vmatpush1.bf16.msra.mxu0 %v643_v4  ;;  %v662_v17 = vld [vmem:[%s876_s0] ss:$12 sps:$4 sm:$0xff]   ;;  %v664_v19 = vld [vmem:[%s877_s5 + $0x38] sm:$0xff]   ;;  %v669_v24 = vld [vmem:[%s877_s5 + $0x10] sm:$0xff]  }
   0x8   :  { %154 = vmatprep.subr.bf16.mxu0 %v644_v5  ;;  %609 = vmatprep.subr.bf16.mxu1 %v664_v19  ;;  %v666_v21 = vld [vmem:[%s877_s5 + $0x28] sm:$0xff]   ;;  %v667_v22 = vld [vmem:[%s877_s5 + $0x20] sm:$0xff]   ;;  %v668_v23 = vld [vmem:[%s877_s5 + $0x18] sm:$0xff]  }
   0x9   :  { %610 = vmatpush3.bf16.msra.mxu1 %v664_v19  ;;  %v670_v25 = vld [vmem:[%s877_s5 + $0x8] sm:$0xff]   ;;  %v671_v26 = vld [vmem:[%s877_s5] sm:$0xff]  }
   0xa   :  { %611 = vmatprep.subr.bf16.mxu1 %v665_v20  ;;  %v672_v27 = vld [vmem:[%s878_s3 + $0x8] sm:$0xff]   ;;  %v35_v36 = vld [vmem:[%s876_s0 + $0x14] ss:$12 sps:$4 sm:$0xff]  }
   0xb   :  { %155 = vmatpush1.bf16.msra.mxu0 %v646_v6  ;;  %v34_v35 = vld [vmem:[%s876_s0 + $0x8] sm:$0xf]  ;;  %v39_v41 = vunpack.c.l.bf16 %v35_v36  ;;  %v37_v46 = vld [vmem:[%s876_s0 + $0x2c] sm:$0xf]  ;;  %v40_v50 = vunpack.c.h.bf16 %v35_v36  ;;  %v674_v0 = vld [vmem:[%s879_s2] sm:$0xff]  }
   0xc   :  { %156 = vmatprep.subr.bf16.mxu0 %v647_v7  ;;  %v38_v40 = vunpack.c.l.bf16 %v34_v35  ;;  %v41_v51 = vunpack.c.l.bf16 %v37_v46  ;;  %v673_v2 = vld [vmem:[%s878_s3] sm:$0xff]   ;;  %v675_v3 = vld [vmem:[%s879_s2 + $0x8] sm:$0xff]  }
   0xd   :  { %612 = vmatpush3.bf16.msra.mxu1 %v665_v20  ;;  %v204_v45 = vmul.f32 32.0, %v39_v41  ;;  %v205_v55 = vmul.f32 32.0, %v40_v50  ;;  %v594_v6 = vld [vmem:[%s880_s1 + $0x8] sm:$0xff]  }
   0xe   :  { %613 = vmatprep.subr.bf16.mxu1 %v666_v21  ;;  %v203_v44 = vmul.f32 32.0, %v38_v40  ;;  %v206_v56 = vmul.f32 32.0, %v41_v51 }
   0xf   :  { %157 = vmatpush1.bf16.msra.mxu0 %v649_v8  ;;  %v587_v8 = vld [vmem:[%s880_s1] sm:$0xff]  }
  0x10   :  { %158 = vmatprep.subr.bf16.mxu0 %v650_v9  ;;  %v592_v9 = vunpack.c.l.bf16 %v594_v6 }
  0x11   :  { %614 = vmatpush3.bf16.msra.mxu1 %v666_v21 }
  0x12   :  { %615 = vmatprep.subr.bf16.mxu1 %v667_v22 }
  0x13   :  { %159 = vmatpush1.bf16.msra.mxu0 %v652_v10 }
  0x14   :  { %160 = vmatprep.subr.bf16.mxu0 %v653_v11  ;;  %v588_v11 = vunpack.c.l.bf16 %v587_v8 }
  0x15   :  { %616 = vmatpush3.bf16.msra.mxu1 %v667_v22 }
  0x16   :  { %617 = vmatprep.subr.bf16.mxu1 %v668_v23  ;;  %v436_v20 = vmul.f32 0.5, %v588_v11 }
  0x17   :  { %161 = vmatpush1.bf16.msra.mxu0 %v655_v12 }
  0x18   :  { %162 = vmatprep.subr.bf16.mxu0 %v656_v13 }
  0x19   :  { %618 = vmatpush3.bf16.msra.mxu1 %v668_v23 }
  0x1a   :  { %619 = vmatprep.subr.bf16.mxu1 %v669_v24 }
  0x1b   :  { %163 = vmatpush1.bf16.msra.mxu0 %v658_v14  ;;  %v438_v14 = vmul.f32 0.5, %v592_v9  ;;  %v577_v9 = vld [vmem:[%s882_s7] ss:$0 sm:$0xff] }
  0x1c   :  { %164 = vmatprep.subr.bf16.mxu0 %v659_v15  ;;  %v593_v15 = vunpack.c.h.bf16 %v594_v6 }
  0x1d   :  { %620 = vmatpush3.bf16.msra.mxu1 %v669_v24 }
  0x1e   :  { %621 = vmatprep.subr.bf16.mxu1 %v670_v25 }
  0x1f   :  { %165 = vmatpush1.bf16.msra.mxu0 %v661_v16 }
  0x21   :  { %622 = vmatpush3.bf16.msra.mxu1 %v670_v25  ;;  %v439_v25 = vmul.f32 0.5, %v593_v15 }
  0x22   :  { %183 = vmatmul.mubr.bf16.vlgmr.msra.gmra.mxu0 %v662_v17  ;;  %623 = vmatprep.subr.bf16.mxu1 %v671_v26  ;;  %v589_v17 = vunpack.c.h.bf16 %v587_v8 }
  0x23   :  { %192 = vmatprep.mubr.bf16.mxu0 %v692_v1 }
  0x25   :  { %624 = vmatpush3.bf16.msra.mxu1 %v671_v26 }
  0x26   :  { %629 = vmatprep.subr.bf16.mxu1 %v672_v27 }
  0x2a   :  { %193 = vmatmul.mubr.bf16.gmra.mxu0 %v663_v18 }
  0xe2   :  { %v184_v28 = vpop.f32.mrf.mxu0 }
  0xe3   :  { %v207_v48 = vadd.f32 %v203_v44, %v184_v28 }
  0xe4   :  { %v186_v29 = vpop.f32.mrf.mxu0 }
  0xe5   :  { %v211_v30 = vadd.f32 32.0, %v186_v29 }
  0xe6   :  { %v188_v31 = vpop.f32.mrf.mxu0 }
  0xe7   :  { %676 = vrcp.f32 %v211_v30  ;;  %v208_v49 = vadd.f32 %v204_v45, %v188_v31 }
  0xe8   :  { %v190_v32 = vpop.f32.mrf.mxu0 }
  0xe9   :  { %v212_v33 = vadd.f32 32.0, %v190_v32 }
  0xea   :  { %v194_v34 = vpop.f32.mrf.mxu0 }
  0xeb   :  { %678 = vrcp.f32 %v212_v33  ;;  %v209_v59 = vadd.f32 %v205_v55, %v194_v34 }
  0xec   :  { %v196_v37 = vpop.f32.mrf.mxu0 }
  0xed   :  { %v213_v38 = vadd.f32 32.0, %v196_v37 }
  0xee   :  { %v198_v39 = vpop.f32.mrf.mxu0 }
  0xef   :  { %680 = vrcp.f32 %v213_v38  ;;  %v210_v60 = vadd.f32 %v206_v56, %v198_v39 }
  0xf0   :  { %v200_v42 = vpop.f32.mrf.mxu0 }
  0xf1   :  { %v214_v43 = vadd.f32 32.0, %v200_v42 }
  0xf3   :  { %682 = vrcp.f32 %v214_v43 }
  0xf4   :  { %v677_v47 = vpop.eup %676 }
  0xf5   :  { %v219_v53 = vmul.f32 %v677_v47, %v207_v48 }
  0xf8   :  { %v679_v52 = vpop.eup %678 }
  0xf9   :  { %v220_v54 = vmul.f32 %v679_v52, %v208_v49 }
  0xfb   :  { %v223_v57 = vpack.c.bf16 %v220_v54, %v219_v53 }
  0xfc   :  { %v681_v58 = vpop.eup %680 }
  0xfd   :  { %625 = vmatprep.mubr.bf16.mxu1 %v223_v57  ;;  %v221_v62 = vmul.f32 %v681_v58, %v209_v59 }
 0x100   :  { %v683_v61 = vpop.eup %682 }
 0x101   :  { %v222_v63 = vmul.f32 %v683_v61, %v210_v60 }
 0x103   :  { %v224_v1 = vpack.c.bf16 %v222_v63, %v221_v62 }
 0x105   :  { %626 = vmatmul.mubr.bf16.vlgmr.msra.gmra.mxu1 %v224_v1 }
 0x106   :  { %630 = vmatpush3.bf16.msra.mxu1 %v672_v27  ;;  %633 = vmatprep.mubr.msk.bf16.mxu1 %vm368_vm0, %v674_v0  ;;  %v437_v27 = vmul.f32 0.5, %v589_v17 }
 0x107   :  { %631 = vmatprep.subr.bf16.mxu1 %v673_v2 }
 0x10a   :  { %632 = vmatpush3.bf16.msra.mxu1 %v673_v2 }
 0x10d   :  { %634 = vmatmul.mubr.msk.bf16.vlgmr.msra.gmra.mxu1 %vm368_vm0, %v675_v3 }
 0x1c5   :  { %v627_v4 = vpop.f32.mrf.mxu1 }
 0x1c7   :  { %v323_v5 = vpop.f32.mrf.mxu1 }
 0x1c9   :  { %v628_v7 = vpop.f32.mrf.mxu1 }
 0x1cb   :  { %v326_v10 = vpop.f32.mrf.mxu1 }
 0x1cd   :  { %v635_v12 = vpop.f32.mrf.mxu1 }
 0x1ce   :  { %v418_v13 = vadd.f32 %v635_v12, %v627_v4 }
 0x1cf   :  { %v409_v16 = vpop.f32.mrf.mxu1 }
 0x1d0   :  { %v426_v18 = vmul.f32 0.125, %v418_v13  ;;  %v410_v19 = vadd.f32 %v409_v16, %v323_v5 }
 0x1d1   :  { %v636_v21 = vpop.f32.mrf.mxu1 }
 0x1d2   :  { %v424_v22 = vmul.f32 0.125, %v410_v19  ;;  %v421_v23 = vadd.f32 %v636_v21, %v628_v7  ;;  %v442_v24 = vadd.f32 %v438_v14, %v426_v18  ;;  %v576_v7 = vld [vmem:[%s881_s6] ss:$0 sm:$0xff] }
 0x1d3   :  { %v412_v26 = vpop.f32.mrf.mxu1 }
 0x1d4   :  { %v427_v28 = vmul.f32 0.125, %v421_v23  ;;  %v413_v29 = vadd.f32 %v412_v26, %v326_v10  ;;  %v450_v30 = vsel %vm368_vm0, %v442_v24, 0.0  ;;  %v440_v31 = vadd.f32 %v436_v20, %v424_v22 }
 0x1d5   :  { %451 = vadd.xlane.f32.xlu1 %v450_v30 }
 0x1d6   :  { %v425_v32 = vmul.f32 0.125, %v413_v29  ;;  %v444_v33 = vsel %vm368_vm0, %v440_v31, 0.0  ;;  %v443_v34 = vadd.f32 %v439_v25, %v427_v28 }
 0x1d7   :  { %445 = vadd.xlane.f32.xlu0 %v444_v33 }
 0x1d8   :  { %v453_v35 = vsel %vm368_vm0, %v443_v34, 0.0  ;;  %v441_v36 = vadd.f32 %v437_v27, %v425_v32 }
 0x1d9   :  { %454 = vadd.xlane.f32.xlu1 %v453_v35 }
 0x1da   :  { %v447_v37 = vsel %vm368_vm0, %v441_v36, 0.0 }
 0x1db   :  { %448 = vadd.xlane.f32.xlu0 %v447_v37 }
 0x25e   :  { %v452_v38 = vpop.xlane.xlu1 %451 }
 0x25f   :  { %v459_v39 = vmul.f32 0.03125, %v452_v38 }
 0x260   :  { %v446_v40 = vpop.xlane.xlu0 %445 }
 0x261   :  { %v457_v41 = vmul.f32 0.03125, %v446_v40  ;;  %v463_v43 = vsub.f32 %v442_v24, %v459_v39 }
 0x262   :  { %v455_v42 = vpop.xlane.xlu1 %454 }
 0x263   :  { %v461_v44 = vsub.f32 %v440_v31, %v457_v41  ;;  %v460_v45 = vmul.f32 0.03125, %v455_v42  ;;  %v467_v52 = vmul.f32 %v463_v43, %v463_v43 }
 0x264   :  { %v449_v46 = vpop.xlane.xlu0 %448 }
 0x265   :  { %v458_v47 = vmul.f32 0.03125, %v449_v46  ;;  %v465_v48 = vmul.f32 %v461_v44, %v461_v44  ;;  %v464_v49 = vsub.f32 %v443_v34, %v460_v45  ;;  %v475_v54 = vsel %vm368_vm0, %v467_v52, 0.0 }
 0x267   :  { %v462_v50 = vsub.f32 %v441_v36, %v458_v47  ;;  %v469_v51 = vsel %vm368_vm0, %v465_v48, 0.0  ;;  %v468_v56 = vmul.f32 %v464_v49, %v464_v49 }
 0x268   :  { %470 = vadd.xlane.f32.xlu0 %v469_v51 }
 0x269   :  { %v466_v53 = vmul.f32 %v462_v50, %v462_v50  ;;  %v478_v57 = vsel %vm368_vm0, %v468_v56, 0.0 }
 0x26b   :  { %v472_v55 = vsel %vm368_vm0, %v466_v53, 0.0 }
 0x26c   :  { %476 = vadd.xlane.f32.xlu0 %v475_v54  ;;  %473 = vadd.xlane.f32.xlu1 %v472_v55 }
 0x270   :  { %479 = vadd.xlane.f32.xlu1 %v478_v57 }
 0x2f1   :  { %v471_v58 = vpop.xlane.xlu0 %470 }
 0x2f2   :  { %v481_v59 = vmul.f32 0.03125, %v471_v58 }
 0x2f4   :  { %v485_v60 = vadd.f32 1e-05, %v481_v59 }
 0x2f5   :  { %v474_v61 = vpop.xlane.xlu1 %473  ;;  %v477_v62 = vpop.xlane.xlu0 %476 }
 0x2f6   :  { %684 = vrsqrt.f32 %v485_v60  ;;  %v482_v63 = vmul.f32 0.03125, %v474_v61  ;;  %v483_v0 = vmul.f32 0.03125, %v477_v62 }
 0x2f8   :  { %v486_v1 = vadd.f32 1e-05, %v482_v63  ;;  %v487_v2 = vadd.f32 1e-05, %v483_v0 }
 0x2f9   :  { %v480_v3 = vpop.xlane.xlu1 %479 }
 0x2fa   :  { %686 = vrsqrt.f32 %v486_v1  ;;  %v484_v4 = vmul.f32 0.03125, %v480_v3 }
 0x2fb   :  { %688 = vrsqrt.f32 %v487_v2 }
 0x2fc   :  { %v488_v5 = vadd.f32 1e-05, %v484_v4 }
 0x2fe   :  { %690 = vrsqrt.f32 %v488_v5 }
 0x303   :  { %v685_v6 = vpop.eup %684 }
 0x304   :  { %v493_v8 = vmul.f32 %v685_v6, %v461_v44 }
 0x306   :  { %v504_v10 = vmul.f32 %v576_v7, %v493_v8 }
 0x307   :  { %v687_v11 = vpop.eup %686 }
 0x308   :  { %v689_v12 = vpop.eup %688  ;;  %v515_v13 = vadd.f32 %v577_v9, %v504_v10  ;;  %v494_v14 = vmul.f32 %v687_v11, %v462_v50 }
 0x309   :  { %v495_v15 = vmul.f32 %v689_v12, %v463_v43 }
 0x30a   :  { %v582_v16 = vpack.c.bf16 %v515_v13, %v515_v13  ;;  %v505_v17 = vmul.f32 %v576_v7, %v494_v14 }
 0x30b   :  { %v691_v18 = vpop.eup %690  ;;  %v506_v19 = vmul.f32 %v576_v7, %v495_v15 }
 0x30c   :  { %536 = vst.msk [vmem:[%s883_s8] sm:$0xf] %vm535_vm1, %v582_v16  ;;  %v516_v20 = vadd.f32 %v577_v9, %v505_v17  ;;  %v496_v21 = vmul.f32 %v691_v18, %v464_v49 }
 0x30d   :  { %v517_v22 = vadd.f32 %v577_v9, %v506_v19 }
 0x30e   :  { %v583_v23 = vpack.c.bf16 %v516_v20, %v516_v20  ;;  %v507_v24 = vmul.f32 %v576_v7, %v496_v21 }
 0x30f   :  { %v584_v25 = vpack.c.bf16 %v517_v22, %v517_v22 }
 0x310   :  { %537 = vst.msk [vmem:[%s883_s8 + $0x4] sm:$0xf] %vm535_vm1, %v583_v23  ;;  %v518_v26 = vadd.f32 %v577_v9, %v507_v24 }
 0x311   :  { %538 = vst.msk [vmem:[%s883_s8 + $0x8] sm:$0xf] %vm535_vm1, %v584_v25 }
 0x312   :  { %v585_v27 = vpack.c.bf16 %v518_v26, %v518_v26 }
 0x314   :  { %539 = vst.msk [vmem:[%s883_s8 + $0xc] sm:$0xf] %vm535_vm1, %v585_v27 }

// kernel: _lambda_.24
= control target key start
LH: loop header
LB: loop body
LE: loop exit
PB: predicated region body
PF: predicated region fallthrough
CT: control target
= control target key end

     0   :  { %vm350_vm0 = vcmask 1043456   ;;  %vm351_vm1 = vcmask 1044480   ;;  %vm253_vm2 = vcmask 72704   ;;  %v1364_v1 = vmov 65535   ;;  %s1841_s1 = inlined_call_operand.vmem [shape: bf16[9,16], index: 1, kind: input, shape index: {}]   ;;  %s1842_s0 = inlined_call_operand.vmem [shape: bf16[512,9], index: 0, kind: input, shape index: {}]   ;;  %s1843_s2 = inlined_call_operand.vmem [shape: f32[1,16], index: 2, kind: input, shape index: {}]   ;;  %s1844_s3 = inlined_call_operand.vmem [shape: bf16[512,16], index: 3, kind: output, shape index: {}]  }
   0x1   :  { %v1331_v0 = vld [vmem:[%s1841_s1] sm:$0x1f]   ;;  %v352_v2 = vsel %vm350_vm0, 4294967295, %v1364_v1  ;;  %v1334_v7 = vld [vmem:[%s1842_s0 + $0x8] sm:$0xff]   ;;  %v1336_v9 = vld [vmem:[%s1842_s0 + $0x10] sm:$0xff]   ;;  %vm966_vm3 = vcmask 125952  }
   0x2   :  { %v1332_v3 = vld [vmem:[%s1842_s0] sm:$0xff]   ;;  %v353_v4 = vsel %vm351_vm1, %v352_v2, 0  ;;  %v1335_v8 = vld [vmem:[%s1842_s0 + $0x88] sm:$0xff]   ;;  %v1337_v10 = vld [vmem:[%s1842_s0 + $0x90] sm:$0xff]  }
   0x3   :  { %v1333_v5 = vld [vmem:[%s1842_s0 + $0x80] sm:$0xff]   ;;  %v355_v6 = vand.u32 %v1331_v0, %v353_v4  ;;  %1264 = vmatprep.mubr.msk.bf16.mxu0 %vm253_vm2, %v1332_v3  ;;  %v1338_v11 = vld [vmem:[%s1842_s0 + $0x18] sm:$0xff]   ;;  %v1342_v15 = vld [vmem:[%s1842_s0 + $0x28] sm:$0xff]  }
   0x4   :  { %1296 = vmatprep.mubr.msk.bf16.mxu1 %vm253_vm2, %v1333_v5  ;;  %v1339_v12 = vld [vmem:[%s1842_s0 + $0x98] sm:$0xff]   ;;  %v1340_v13 = vld [vmem:[%s1842_s0 + $0x20] sm:$0xff]   ;;  %v1343_v16 = vld [vmem:[%s1842_s0 + $0xa8] sm:$0xff]  }
   0x5   :  { %1262 = vmatprep.subr.bf16.mxu0 %v355_v6  ;;  %1328 = vmatprep.subr.bf16.mxu1 %v355_v6  ;;  %v1341_v14 = vld [vmem:[%s1842_s0 + $0xa0] sm:$0xff]   ;;  %v1344_v17 = vld [vmem:[%s1842_s0 + $0x30] sm:$0xff]   ;;  %v1346_v19 = vld [vmem:[%s1842_s0 + $0x38] sm:$0xff]  }
   0x6   :  { %1263 = vmatpush3.bf16.msra.mxu0 %v355_v6  ;;  %1329 = vmatpush3.bf16.msra.mxu1 %v355_v6  ;;  %v1345_v18 = vld [vmem:[%s1842_s0 + $0xb0] sm:$0xff]   ;;  %v1347_v20 = vld [vmem:[%s1842_s0 + $0xb8] sm:$0xff]   ;;  %v1348_v21 = vld [vmem:[%s1842_s0 + $0x40] sm:$0xff]  }
   0x7   :  { %v1349_v22 = vld [vmem:[%s1842_s0 + $0xc0] sm:$0xff]   ;;  %v1350_v23 = vld [vmem:[%s1842_s0 + $0x48] sm:$0xff]   ;;  %v1352_v25 = vld [vmem:[%s1842_s0 + $0x50] sm:$0xff]  }
   0x8   :  { %v1351_v24 = vld [vmem:[%s1842_s0 + $0xc8] sm:$0xff]   ;;  %v1353_v26 = vld [vmem:[%s1842_s0 + $0xd0] sm:$0xff]   ;;  %v1354_v27 = vld [vmem:[%s1842_s0 + $0x58] sm:$0xff]  }
   0x9   :  { %1265 = vmatmul.mubr.msk.bf16.vlgmr.msra.gmra.mxu0 %vm253_vm2, %v1334_v7  ;;  %1297 = vmatmul.mubr.msk.bf16.vlgmr.msra.gmra.mxu1 %vm253_vm2, %v1335_v8  ;;  %v1355_v28 = vld [vmem:[%s1842_s0 + $0xd8] sm:$0xff]   ;;  %v1356_v29 = vld [vmem:[%s1842_s0 + $0x60] sm:$0xff]   ;;  %v1358_v31 = vld [vmem:[%s1842_s0 + $0x68] sm:$0xff]  }
   0xa   :  { %1268 = vmatprep.mubr.msk.bf16.mxu0 %vm253_vm2, %v1336_v9  ;;  %1300 = vmatprep.mubr.msk.bf16.mxu1 %vm253_vm2, %v1337_v10  ;;  %v1357_v30 = vld [vmem:[%s1842_s0 + $0xe0] sm:$0xff]   ;;  %v1359_v32 = vld [vmem:[%s1842_s0 + $0xe8] sm:$0xff]   ;;  %v1360_v33 = vld [vmem:[%s1842_s0 + $0x70] sm:$0xff]  }
   0xb   :  { %v1361_v34 = vld [vmem:[%s1842_s0 + $0xf0] sm:$0xff]   ;;  %v1362_v35 = vld [vmem:[%s1842_s0 + $0x78] sm:$0xff]   ;;  %v1519_v37 = vld [vmem:[%s1843_s2] ss:$0 sm:$0xff] }
   0xc   :  { %v1363_v36 = vld [vmem:[%s1842_s0 + $0xf8] sm:$0xff]  }
  0x11   :  { %1269 = vmatmul.mubr.msk.bf16.gmra.mxu0 %vm253_vm2, %v1338_v11  ;;  %1301 = vmatmul.mubr.msk.bf16.gmra.mxu1 %vm253_vm2, %v1339_v12 }
  0x12   :  { %1272 = vmatprep.mubr.msk.bf16.mxu0 %vm253_vm2, %v1340_v13  ;;  %1304 = vmatprep.mubr.msk.bf16.mxu1 %vm253_vm2, %v1341_v14 }
  0x19   :  { %1273 = vmatmul.mubr.msk.bf16.gmra.mxu0 %vm253_vm2, %v1342_v15  ;;  %1305 = vmatmul.mubr.msk.bf16.gmra.mxu1 %vm253_vm2, %v1343_v16 }
  0x1a   :  { %1276 = vmatprep.mubr.msk.bf16.mxu0 %vm253_vm2, %v1344_v17  ;;  %1308 = vmatprep.mubr.msk.bf16.mxu1 %vm253_vm2, %v1345_v18 }
  0x21   :  { %1277 = vmatmul.mubr.msk.bf16.gmra.mxu0 %vm253_vm2, %v1346_v19  ;;  %1309 = vmatmul.mubr.msk.bf16.gmra.mxu1 %vm253_vm2, %v1347_v20 }
  0x22   :  { %1280 = vmatprep.mubr.msk.bf16.mxu0 %vm253_vm2, %v1348_v21  ;;  %1312 = vmatprep.mubr.msk.bf16.mxu1 %vm253_vm2, %v1349_v22 }
  0x29   :  { %1281 = vmatmul.mubr.msk.bf16.gmra.mxu0 %vm253_vm2, %v1350_v23  ;;  %1313 = vmatmul.mubr.msk.bf16.gmra.mxu1 %vm253_vm2, %v1351_v24 }
  0x2a   :  { %1284 = vmatprep.mubr.msk.bf16.mxu0 %vm253_vm2, %v1352_v25  ;;  %1316 = vmatprep.mubr.msk.bf16.mxu1 %vm253_vm2, %v1353_v26 }
  0x31   :  { %1285 = vmatmul.mubr.msk.bf16.gmra.mxu0 %vm253_vm2, %v1354_v27  ;;  %1317 = vmatmul.mubr.msk.bf16.gmra.mxu1 %vm253_vm2, %v1355_v28 }
  0x32   :  { %1288 = vmatprep.mubr.msk.bf16.mxu0 %vm253_vm2, %v1356_v29  ;;  %1320 = vmatprep.mubr.msk.bf16.mxu1 %vm253_vm2, %v1357_v30 }
  0x39   :  { %1289 = vmatmul.mubr.msk.bf16.gmra.mxu0 %vm253_vm2, %v1358_v31  ;;  %1321 = vmatmul.mubr.msk.bf16.gmra.mxu1 %vm253_vm2, %v1359_v32 }
  0x3a   :  { %1292 = vmatprep.mubr.msk.bf16.mxu0 %vm253_vm2, %v1360_v33  ;;  %1324 = vmatprep.mubr.msk.bf16.mxu1 %vm253_vm2, %v1361_v34 }
  0x41   :  { %1293 = vmatmul.mubr.msk.bf16.gmra.mxu0 %vm253_vm2, %v1362_v35  ;;  %1325 = vmatmul.mubr.msk.bf16.gmra.mxu1 %vm253_vm2, %v1363_v36 }
  0xc9   :  { %v1266_v38 = vpop.f32.mrf.mxu0  ;;  %v1298_v39 = vpop.f32.mrf.mxu1 }
  0xca   :  { %v400_v40 = vadd.f32 %v1266_v38, %v1519_v37  ;;  %v528_v41 = vadd.f32 %v1298_v39, %v1519_v37 }
  0xcb   :  { %v391_v42 = vpop.f32.mrf.mxu0  ;;  %v519_v43 = vpop.f32.mrf.mxu1 }
  0xcc   :  { %v648_v44 = vmax.f32 %v400_v40, 0.0  ;;  %v680_v45 = vmax.f32 %v528_v41, 0.0  ;;  %v392_v46 = vadd.f32 %v1519_v37, %v391_v42  ;;  %v520_v47 = vadd.f32 %v1519_v37, %v519_v43 }
  0xcd   :  { %v1267_v48 = vpop.f32.mrf.mxu0  ;;  %v1299_v49 = vpop.f32.mrf.mxu1 }
  0xce   :  { %v1167_v50 = vpack.c.bf16 %v648_v44, %v648_v44  ;;  %v1199_v51 = vpack.c.bf16 %v680_v45, %v680_v45  ;;  %v646_v52 = vmax.f32 %v392_v46, 0.0  ;;  %v678_v53 = vmax.f32 %v520_v47, 0.0 }
  0xcf   :  { %v403_v54 = vadd.f32 %v1267_v48, %v1519_v37  ;;  %v531_v55 = vadd.f32 %v1299_v49, %v1519_v37  ;;  %v394_v56 = vpop.f32.mrf.mxu0  ;;  %v522_v57 = vpop.f32.mrf.mxu1 }
  0xd0   :  { %969 = vst.msk [vmem:[%s1844_s3 + $0x8] sm:$0xf] %vm966_vm3, %v1167_v50  ;;  %1001 = vst.msk [vmem:[%s1844_s3 + $0x88] sm:$0xf] %vm966_vm3, %v1199_v51  ;;  %v1165_v58 = vpack.c.bf16 %v646_v52, %v646_v52  ;;  %v1197_v59 = vpack.c.bf16 %v678_v53, %v678_v53  ;;  %v395_v60 = vadd.f32 %v1519_v37, %v394_v56 }
  0xd1   :  { %v523_v61 = vadd.f32 %v1519_v37, %v522_v57  ;;  %v649_v62 = vmax.f32 %v403_v54, 0.0  ;;  %v681_v63 = vmax.f32 %v531_v55, 0.0  ;;  %v1270_v0 = vpop.f32.mrf.mxu0  ;;  %v1302_v1 = vpop.f32.mrf.mxu1 }
  0xd2   :  { %967 = vst.msk [vmem:[%s1844_s3] sm:$0xf] %vm966_vm3, %v1165_v58  ;;  %999 = vst.msk [vmem:[%s1844_s3 + $0x80] sm:$0xf] %vm966_vm3, %v1197_v59  ;;  %v647_v2 = vmax.f32 %v395_v60, 0.0  ;;  %v416_v4 = vadd.f32 %v1270_v0, %v1519_v37  ;;  %v544_v5 = vadd.f32 %v1302_v1, %v1519_v37 }
  0xd3   :  { %v679_v3 = vmax.f32 %v523_v61, 0.0  ;;  %v1168_v6 = vpack.c.bf16 %v649_v62, %v649_v62  ;;  %v1200_v7 = vpack.c.bf16 %v681_v63, %v681_v63  ;;  %v407_v8 = vpop.f32.mrf.mxu0  ;;  %v535_v9 = vpop.f32.mrf.mxu1 }
  0xd4   :  { %v1166_v10 = vpack.c.bf16 %v647_v2, %v647_v2  ;;  %v652_v12 = vmax.f32 %v416_v4, 0.0  ;;  %v684_v13 = vmax.f32 %v544_v5, 0.0  ;;  %v408_v14 = vadd.f32 %v1519_v37, %v407_v8 }
  0xd5   :  { %v1198_v11 = vpack.c.bf16 %v679_v3, %v679_v3  ;;  %970 = vst.msk [vmem:[%s1844_s3 + $0xc] sm:$0xf] %vm966_vm3, %v1168_v6  ;;  %1002 = vst.msk [vmem:[%s1844_s3 + $0x8c] sm:$0xf] %vm966_vm3, %v1200_v7  ;;  %v536_v15 = vadd.f32 %v1519_v37, %v535_v9  ;;  %v1271_v16 = vpop.f32.mrf.mxu0  ;;  %v1303_v17 = vpop.f32.mrf.mxu1 }
  0xd6   :  { %968 = vst.msk [vmem:[%s1844_s3 + $0x4] sm:$0xf] %vm966_vm3, %v1166_v10  ;;  %v1171_v18 = vpack.c.bf16 %v652_v12, %v652_v12  ;;  %v1203_v19 = vpack.c.bf16 %v684_v13, %v684_v13  ;;  %v419_v20 = vadd.f32 %v1271_v16, %v1519_v37  ;;  %v547_v21 = vadd.f32 %v1303_v17, %v1519_v37 }
  0xd7   :  { %1000 = vst.msk [vmem:[%s1844_s3 + $0x84] sm:$0xf] %vm966_vm3, %v1198_v11  ;;  %v650_v22 = vmax.f32 %v408_v14, 0.0  ;;  %v682_v23 = vmax.f32 %v536_v15, 0.0  ;;  %v410_v24 = vpop.f32.mrf.mxu0  ;;  %v538_v25 = vpop.f32.mrf.mxu1 }
  0xd8   :  { %973 = vst.msk [vmem:[%s1844_s3 + $0x18] sm:$0xf] %vm966_vm3, %v1171_v18  ;;  %1005 = vst.msk [vmem:[%s1844_s3 + $0x98] sm:$0xf] %vm966_vm3, %v1203_v19  ;;  %v653_v26 = vmax.f32 %v419_v20, 0.0  ;;  %v685_v27 = vmax.f32 %v547_v21, 0.0  ;;  %v411_v28 = vadd.f32 %v1519_v37, %v410_v24  ;;  %v539_v29 = vadd.f32 %v1519_v37, %v538_v25 }
  0xd9   :  { %v1169_v30 = vpack.c.bf16 %v650_v22, %v650_v22  ;;  %v1201_v31 = vpack.c.bf16 %v682_v23, %v682_v23  ;;  %v1274_v32 = vpop.f32.mrf.mxu0  ;;  %v1306_v33 = vpop.f32.mrf.mxu1 }
  0xda   :  { %v1172_v34 = vpack.c.bf16 %v653_v26, %v653_v26  ;;  %v1204_v35 = vpack.c.bf16 %v685_v27, %v685_v27  ;;  %v651_v36 = vmax.f32 %v411_v28, 0.0  ;;  %v683_v38 = vmax.f32 %v539_v29, 0.0 }
  0xdb   :  { %971 = vst.msk [vmem:[%s1844_s3 + $0x10] sm:$0xf] %vm966_vm3, %v1169_v30  ;;  %1003 = vst.msk [vmem:[%s1844_s3 + $0x90] sm:$0xf] %vm966_vm3, %v1201_v31  ;;  %v432_v39 = vadd.f32 %v1274_v32, %v1519_v37  ;;  %v560_v40 = vadd.f32 %v1306_v33, %v1519_v37  ;;  %v423_v41 = vpop.f32.mrf.mxu0  ;;  %v551_v42 = vpop.f32.mrf.mxu1 }
  0xdc   :  { %974 = vst.msk [vmem:[%s1844_s3 + $0x1c] sm:$0xf] %vm966_vm3, %v1172_v34  ;;  %1006 = vst.msk [vmem:[%s1844_s3 + $0x9c] sm:$0xf] %vm966_vm3, %v1204_v35  ;;  %v1170_v43 = vpack.c.bf16 %v651_v36, %v651_v36  ;;  %v1202_v44 = vpack.c.bf16 %v683_v38, %v683_v38  ;;  %v424_v45 = vadd.f32 %v1519_v37, %v423_v41 }
  0xdd   :  { %v552_v46 = vadd.f32 %v1519_v37, %v551_v42  ;;  %v656_v47 = vmax.f32 %v432_v39, 0.0  ;;  %v688_v48 = vmax.f32 %v560_v40, 0.0  ;;  %v1275_v49 = vpop.f32.mrf.mxu0  ;;  %v1307_v50 = vpop.f32.mrf.mxu1 }
  0xde   :  { %972 = vst.msk [vmem:[%s1844_s3 + $0x14] sm:$0xf] %vm966_vm3, %v1170_v43  ;;  %1004 = vst.msk [vmem:[%s1844_s3 + $0x94] sm:$0xf] %vm966_vm3, %v1202_v44  ;;  %v654_v51 = vmax.f32 %v424_v45, 0.0  ;;  %v435_v53 = vadd.f32 %v1275_v49, %v1519_v37  ;;  %v563_v54 = vadd.f32 %v1307_v50, %v1519_v37 }
  0xdf   :  { %v686_v52 = vmax.f32 %v552_v46, 0.0  ;;  %v1175_v55 = vpack.c.bf16 %v656_v47, %v656_v47  ;;  %v1207_v56 = vpack.c.bf16 %v688_v48, %v688_v48  ;;  %v426_v57 = vpop.f32.mrf.mxu0  ;;  %v554_v58 = vpop.f32.mrf.mxu1 }
  0xe0   :  { %v1173_v59 = vpack.c.bf16 %v654_v51, %v654_v51  ;;  %v657_v61 = vmax.f32 %v435_v53, 0.0  ;;  %v689_v62 = vmax.f32 %v563_v54, 0.0  ;;  %v427_v63 = vadd.f32 %v1519_v37, %v426_v57 }
  0xe1   :  { %v1205_v60 = vpack.c.bf16 %v686_v52, %v686_v52  ;;  %977 = vst.msk [vmem:[%s1844_s3 + $0x28] sm:$0xf] %vm966_vm3, %v1175_v55  ;;  %1009 = vst.msk [vmem:[%s1844_s3 + $0xa8] sm:$0xf] %vm966_vm3, %v1207_v56  ;;  %v555_v0 = vadd.f32 %v1519_v37, %v554_v58  ;;  %v1278_v1 = vpop.f32.mrf.mxu0  ;;  %v1310_v2 = vpop.f32.mrf.mxu1 }
  0xe2   :  { %975 = vst.msk [vmem:[%s1844_s3 + $0x20] sm:$0xf] %vm966_vm3, %v1173_v59  ;;  %v1176_v3 = vpack.c.bf16 %v657_v61, %v657_v61  ;;  %v1208_v4 = vpack.c.bf16 %v689_v62, %v689_v62  ;;  %v448_v5 = vadd.f32 %v1278_v1, %v1519_v37  ;;  %v576_v6 = vadd.f32 %v1310_v2, %v1519_v37 }
  0xe3   :  { %1007 = vst.msk [vmem:[%s1844_s3 + $0xa0] sm:$0xf] %vm966_vm3, %v1205_v60  ;;  %v655_v7 = vmax.f32 %v427_v63, 0.0  ;;  %v687_v8 = vmax.f32 %v555_v0, 0.0  ;;  %v439_v9 = vpop.f32.mrf.mxu0  ;;  %v567_v10 = vpop.f32.mrf.mxu1 }
  0xe4   :  { %978 = vst.msk [vmem:[%s1844_s3 + $0x2c] sm:$0xf] %vm966_vm3, %v1176_v3  ;;  %1010 = vst.msk [vmem:[%s1844_s3 + $0xac] sm:$0xf] %vm966_vm3, %v1208_v4  ;;  %v660_v11 = vmax.f32 %v448_v5, 0.0  ;;  %v692_v12 = vmax.f32 %v576_v6, 0.0  ;;  %v440_v13 = vadd.f32 %v1519_v37, %v439_v9  ;;  %v568_v14 = vadd.f32 %v1519_v37, %v567_v10 }
  0xe5   :  { %v1174_v15 = vpack.c.bf16 %v655_v7, %v655_v7  ;;  %v1206_v16 = vpack.c.bf16 %v687_v8, %v687_v8  ;;  %v1279_v17 = vpop.f32.mrf.mxu0  ;;  %v1311_v18 = vpop.f32.mrf.mxu1 }
  0xe6   :  { %v1179_v19 = vpack.c.bf16 %v660_v11, %v660_v11  ;;  %v1211_v20 = vpack.c.bf16 %v692_v12, %v692_v12  ;;  %v658_v21 = vmax.f32 %v440_v13, 0.0  ;;  %v690_v22 = vmax.f32 %v568_v14, 0.0 }
  0xe7   :  { %976 = vst.msk [vmem:[%s1844_s3 + $0x24] sm:$0xf] %vm966_vm3, %v1174_v15  ;;  %1008 = vst.msk [vmem:[%s1844_s3 + $0xa4] sm:$0xf] %vm966_vm3, %v1206_v16  ;;  %v451_v23 = vadd.f32 %v1279_v17, %v1519_v37  ;;  %v579_v24 = vadd.f32 %v1311_v18, %v1519_v37  ;;  %v442_v25 = vpop.f32.mrf.mxu0  ;;  %v570_v26 = vpop.f32.mrf.mxu1 }
  0xe8   :  { %981 = vst.msk [vmem:[%s1844_s3 + $0x38] sm:$0xf] %vm966_vm3, %v1179_v19  ;;  %1013 = vst.msk [vmem:[%s1844_s3 + $0xb8] sm:$0xf] %vm966_vm3, %v1211_v20  ;;  %v1177_v27 = vpack.c.bf16 %v658_v21, %v658_v21  ;;  %v1209_v28 = vpack.c.bf16 %v690_v22, %v690_v22  ;;  %v443_v29 = vadd.f32 %v1519_v37, %v442_v25 }
  0xe9   :  { %v571_v30 = vadd.f32 %v1519_v37, %v570_v26  ;;  %v661_v31 = vmax.f32 %v451_v23, 0.0  ;;  %v693_v32 = vmax.f32 %v579_v24, 0.0  ;;  %v1282_v33 = vpop.f32.mrf.mxu0  ;;  %v1314_v34 = vpop.f32.mrf.mxu1 }
  0xea   :  { %979 = vst.msk [vmem:[%s1844_s3 + $0x30] sm:$0xf] %vm966_vm3, %v1177_v27  ;;  %1011 = vst.msk [vmem:[%s1844_s3 + $0xb0] sm:$0xf] %vm966_vm3, %v1209_v28  ;;  %v659_v35 = vmax.f32 %v443_v29, 0.0  ;;  %v464_v38 = vadd.f32 %v1282_v33, %v1519_v37  ;;  %v592_v39 = vadd.f32 %v1314_v34, %v1519_v37 }
  0xeb   :  { %v691_v36 = vmax.f32 %v571_v30, 0.0  ;;  %v1180_v40 = vpack.c.bf16 %v661_v31, %v661_v31  ;;  %v1212_v41 = vpack.c.bf16 %v693_v32, %v693_v32  ;;  %v455_v42 = vpop.f32.mrf.mxu0  ;;  %v583_v43 = vpop.f32.mrf.mxu1 }
  0xec   :  { %v1178_v44 = vpack.c.bf16 %v659_v35, %v659_v35  ;;  %v664_v46 = vmax.f32 %v464_v38, 0.0  ;;  %v696_v47 = vmax.f32 %v592_v39, 0.0  ;;  %v456_v48 = vadd.f32 %v1519_v37, %v455_v42 }
  0xed   :  { %v1210_v45 = vpack.c.bf16 %v691_v36, %v691_v36  ;;  %982 = vst.msk [vmem:[%s1844_s3 + $0x3c] sm:$0xf] %vm966_vm3, %v1180_v40  ;;  %1014 = vst.msk [vmem:[%s1844_s3 + $0xbc] sm:$0xf] %vm966_vm3, %v1212_v41  ;;  %v584_v49 = vadd.f32 %v1519_v37, %v583_v43  ;;  %v1283_v50 = vpop.f32.mrf.mxu0  ;;  %v1315_v51 = vpop.f32.mrf.mxu1 }
  0xee   :  { %980 = vst.msk [vmem:[%s1844_s3 + $0x34] sm:$0xf] %vm966_vm3, %v1178_v44  ;;  %v1183_v52 = vpack.c.bf16 %v664_v46, %v664_v46  ;;  %v1215_v53 = vpack.c.bf16 %v696_v47, %v696_v47  ;;  %v467_v54 = vadd.f32 %v1283_v50, %v1519_v37  ;;  %v595_v55 = vadd.f32 %v1315_v51, %v1519_v37 }
  0xef   :  { %1012 = vst.msk [vmem:[%s1844_s3 + $0xb4] sm:$0xf] %vm966_vm3, %v1210_v45  ;;  %v662_v56 = vmax.f32 %v456_v48, 0.0  ;;  %v694_v57 = vmax.f32 %v584_v49, 0.0  ;;  %v458_v58 = vpop.f32.mrf.mxu0  ;;  %v586_v59 = vpop.f32.mrf.mxu1 }
  0xf0   :  { %985 = vst.msk [vmem:[%s1844_s3 + $0x48] sm:$0xf] %vm966_vm3, %v1183_v52  ;;  %1017 = vst.msk [vmem:[%s1844_s3 + $0xc8] sm:$0xf] %vm966_vm3, %v1215_v53  ;;  %v665_v60 = vmax.f32 %v467_v54, 0.0  ;;  %v697_v61 = vmax.f32 %v595_v55, 0.0  ;;  %v459_v62 = vadd.f32 %v1519_v37, %v458_v58  ;;  %v587_v63 = vadd.f32 %v1519_v37, %v586_v59 }
  0xf1   :  { %v1181_v0 = vpack.c.bf16 %v662_v56, %v662_v56  ;;  %v1213_v1 = vpack.c.bf16 %v694_v57, %v694_v57  ;;  %v1286_v2 = vpop.f32.mrf.mxu0  ;;  %v1318_v3 = vpop.f32.mrf.mxu1 }
  0xf2   :  { %v1184_v4 = vpack.c.bf16 %v665_v60, %v665_v60  ;;  %v1216_v5 = vpack.c.bf16 %v697_v61, %v697_v61  ;;  %v663_v6 = vmax.f32 %v459_v62, 0.0  ;;  %v695_v7 = vmax.f32 %v587_v63, 0.0 }
  0xf3   :  { %983 = vst.msk [vmem:[%s1844_s3 + $0x40] sm:$0xf] %vm966_vm3, %v1181_v0  ;;  %1015 = vst.msk [vmem:[%s1844_s3 + $0xc0] sm:$0xf] %vm966_vm3, %v1213_v1  ;;  %v480_v8 = vadd.f32 %v1286_v2, %v1519_v37  ;;  %v608_v9 = vadd.f32 %v1318_v3, %v1519_v37  ;;  %v471_v10 = vpop.f32.mrf.mxu0  ;;  %v599_v11 = vpop.f32.mrf.mxu1 }
  0xf4   :  { %986 = vst.msk [vmem:[%s1844_s3 + $0x4c] sm:$0xf] %vm966_vm3, %v1184_v4  ;;  %1018 = vst.msk [vmem:[%s1844_s3 + $0xcc] sm:$0xf] %vm966_vm3, %v1216_v5  ;;  %v1182_v12 = vpack.c.bf16 %v663_v6, %v663_v6  ;;  %v1214_v13 = vpack.c.bf16 %v695_v7, %v695_v7  ;;  %v472_v14 = vadd.f32 %v1519_v37, %v471_v10 }
  0xf5   :  { %v600_v15 = vadd.f32 %v1519_v37, %v599_v11  ;;  %v668_v16 = vmax.f32 %v480_v8, 0.0  ;;  %v700_v17 = vmax.f32 %v608_v9, 0.0  ;;  %v1287_v18 = vpop.f32.mrf.mxu0  ;;  %v1319_v19 = vpop.f32.mrf.mxu1 }
  0xf6   :  { %984 = vst.msk [vmem:[%s1844_s3 + $0x44] sm:$0xf] %vm966_vm3, %v1182_v12  ;;  %1016 = vst.msk [vmem:[%s1844_s3 + $0xc4] sm:$0xf] %vm966_vm3, %v1214_v13  ;;  %v666_v20 = vmax.f32 %v472_v14, 0.0  ;;  %v483_v22 = vadd.f32 %v1287_v18, %v1519_v37  ;;  %v611_v23 = vadd.f32 %v1319_v19, %v1519_v37 }
  0xf7   :  { %v698_v21 = vmax.f32 %v600_v15, 0.0  ;;  %v1187_v24 = vpack.c.bf16 %v668_v16, %v668_v16  ;;  %v1219_v25 = vpack.c.bf16 %v700_v17, %v700_v17  ;;  %v474_v26 = vpop.f32.mrf.mxu0  ;;  %v602_v27 = vpop.f32.mrf.mxu1 }
  0xf8   :  { %v1185_v28 = vpack.c.bf16 %v666_v20, %v666_v20  ;;  %v669_v30 = vmax.f32 %v483_v22, 0.0  ;;  %v701_v31 = vmax.f32 %v611_v23, 0.0  ;;  %v475_v32 = vadd.f32 %v1519_v37, %v474_v26 }
  0xf9   :  { %v1217_v29 = vpack.c.bf16 %v698_v21, %v698_v21  ;;  %989 = vst.msk [vmem:[%s1844_s3 + $0x58] sm:$0xf] %vm966_vm3, %v1187_v24  ;;  %1021 = vst.msk [vmem:[%s1844_s3 + $0xd8] sm:$0xf] %vm966_vm3, %v1219_v25  ;;  %v603_v33 = vadd.f32 %v1519_v37, %v602_v27  ;;  %v1290_v34 = vpop.f32.mrf.mxu0  ;;  %v1322_v35 = vpop.f32.mrf.mxu1 }
  0xfa   :  { %987 = vst.msk [vmem:[%s1844_s3 + $0x50] sm:$0xf] %vm966_vm3, %v1185_v28  ;;  %v1188_v36 = vpack.c.bf16 %v669_v30, %v669_v30  ;;  %v1220_v38 = vpack.c.bf16 %v701_v31, %v701_v31  ;;  %v496_v39 = vadd.f32 %v1290_v34, %v1519_v37  ;;  %v624_v40 = vadd.f32 %v1322_v35, %v1519_v37 }
  0xfb   :  { %1019 = vst.msk [vmem:[%s1844_s3 + $0xd0] sm:$0xf] %vm966_vm3, %v1217_v29  ;;  %v667_v41 = vmax.f32 %v475_v32, 0.0  ;;  %v699_v42 = vmax.f32 %v603_v33, 0.0  ;;  %v487_v43 = vpop.f32.mrf.mxu0  ;;  %v615_v44 = vpop.f32.mrf.mxu1 }
  0xfc   :  { %990 = vst.msk [vmem:[%s1844_s3 + $0x5c] sm:$0xf] %vm966_vm3, %v1188_v36  ;;  %1022 = vst.msk [vmem:[%s1844_s3 + $0xdc] sm:$0xf] %vm966_vm3, %v1220_v38  ;;  %v672_v45 = vmax.f32 %v496_v39, 0.0  ;;  %v704_v46 = vmax.f32 %v624_v40, 0.0  ;;  %v488_v47 = vadd.f32 %v1519_v37, %v487_v43  ;;  %v616_v48 = vadd.f32 %v1519_v37, %v615_v44 }
  0xfd   :  { %v1186_v49 = vpack.c.bf16 %v667_v41, %v667_v41  ;;  %v1218_v50 = vpack.c.bf16 %v699_v42, %v699_v42  ;;  %v1291_v51 = vpop.f32.mrf.mxu0  ;;  %v1323_v52 = vpop.f32.mrf.mxu1 }
  0xfe   :  { %v1191_v53 = vpack.c.bf16 %v672_v45, %v672_v45  ;;  %v1223_v54 = vpack.c.bf16 %v704_v46, %v704_v46  ;;  %v670_v55 = vmax.f32 %v488_v47, 0.0  ;;  %v702_v56 = vmax.f32 %v616_v48, 0.0 }
  0xff   :  { %988 = vst.msk [vmem:[%s1844_s3 + $0x54] sm:$0xf] %vm966_vm3, %v1186_v49  ;;  %1020 = vst.msk [vmem:[%s1844_s3 + $0xd4] sm:$0xf] %vm966_vm3, %v1218_v50  ;;  %v499_v57 = vadd.f32 %v1291_v51, %v1519_v37  ;;  %v627_v58 = vadd.f32 %v1323_v52, %v1519_v37  ;;  %v490_v59 = vpop.f32.mrf.mxu0  ;;  %v618_v60 = vpop.f32.mrf.mxu1 }
 0x100   :  { %993 = vst.msk [vmem:[%s1844_s3 + $0x68] sm:$0xf] %vm966_vm3, %v1191_v53  ;;  %1025 = vst.msk [vmem:[%s1844_s3 + $0xe8] sm:$0xf] %vm966_vm3, %v1223_v54  ;;  %v1189_v61 = vpack.c.bf16 %v670_v55, %v670_v55  ;;  %v1221_v62 = vpack.c.bf16 %v702_v56, %v702_v56  ;;  %v491_v63 = vadd.f32 %v1519_v37, %v490_v59 }
 0x101   :  { %v619_v0 = vadd.f32 %v1519_v37, %v618_v60  ;;  %v673_v1 = vmax.f32 %v499_v57, 0.0  ;;  %v705_v2 = vmax.f32 %v627_v58, 0.0  ;;  %v1294_v3 = vpop.f32.mrf.mxu0  ;;  %v1326_v4 = vpop.f32.mrf.mxu1 }
 0x102   :  { %991 = vst.msk [vmem:[%s1844_s3 + $0x60] sm:$0xf] %vm966_vm3, %v1189_v61  ;;  %1023 = vst.msk [vmem:[%s1844_s3 + $0xe0] sm:$0xf] %vm966_vm3, %v1221_v62  ;;  %v671_v5 = vmax.f32 %v491_v63, 0.0  ;;  %v512_v7 = vadd.f32 %v1294_v3, %v1519_v37  ;;  %v640_v8 = vadd.f32 %v1326_v4, %v1519_v37 }
 0x103   :  { %v703_v6 = vmax.f32 %v619_v0, 0.0  ;;  %v1192_v9 = vpack.c.bf16 %v673_v1, %v673_v1  ;;  %v1224_v10 = vpack.c.bf16 %v705_v2, %v705_v2  ;;  %v503_v11 = vpop.f32.mrf.mxu0  ;;  %v631_v12 = vpop.f32.mrf.mxu1 }
 0x104   :  { %v1190_v13 = vpack.c.bf16 %v671_v5, %v671_v5  ;;  %v676_v15 = vmax.f32 %v512_v7, 0.0  ;;  %v708_v16 = vmax.f32 %v640_v8, 0.0  ;;  %v504_v17 = vadd.f32 %v1519_v37, %v503_v11 }
 0x105   :  { %v1222_v14 = vpack.c.bf16 %v703_v6, %v703_v6  ;;  %994 = vst.msk [vmem:[%s1844_s3 + $0x6c] sm:$0xf] %vm966_vm3, %v1192_v9  ;;  %1026 = vst.msk [vmem:[%s1844_s3 + $0xec] sm:$0xf] %vm966_vm3, %v1224_v10  ;;  %v632_v18 = vadd.f32 %v1519_v37, %v631_v12  ;;  %v1295_v19 = vpop.f32.mrf.mxu0  ;;  %v1327_v20 = vpop.f32.mrf.mxu1 }
 0x106   :  { %992 = vst.msk [vmem:[%s1844_s3 + $0x64] sm:$0xf] %vm966_vm3, %v1190_v13  ;;  %v1195_v21 = vpack.c.bf16 %v676_v15, %v676_v15  ;;  %v1227_v22 = vpack.c.bf16 %v708_v16, %v708_v16  ;;  %v515_v23 = vadd.f32 %v1295_v19, %v1519_v37  ;;  %v643_v24 = vadd.f32 %v1327_v20, %v1519_v37 }
 0x107   :  { %1024 = vst.msk [vmem:[%s1844_s3 + $0xe4] sm:$0xf] %vm966_vm3, %v1222_v14  ;;  %v674_v25 = vmax.f32 %v504_v17, 0.0  ;;  %v706_v26 = vmax.f32 %v632_v18, 0.0  ;;  %v506_v27 = vpop.f32.mrf.mxu0  ;;  %v634_v28 = vpop.f32.mrf.mxu1 }
 0x108   :  { %997 = vst.msk [vmem:[%s1844_s3 + $0x78] sm:$0xf] %vm966_vm3, %v1195_v21  ;;  %1029 = vst.msk [vmem:[%s1844_s3 + $0xf8] sm:$0xf] %vm966_vm3, %v1227_v22  ;;  %v677_v29 = vmax.f32 %v515_v23, 0.0  ;;  %v709_v30 = vmax.f32 %v643_v24, 0.0  ;;  %v507_v31 = vadd.f32 %v1519_v37, %v506_v27  ;;  %v635_v32 = vadd.f32 %v1519_v37, %v634_v28 }
 0x109   :  { %v1193_v33 = vpack.c.bf16 %v674_v25, %v674_v25  ;;  %v1225_v34 = vpack.c.bf16 %v706_v26, %v706_v26 }
 0x10a   :  { %v1196_v35 = vpack.c.bf16 %v677_v29, %v677_v29  ;;  %v1228_v36 = vpack.c.bf16 %v709_v30, %v709_v30  ;;  %v675_v38 = vmax.f32 %v507_v31, 0.0  ;;  %v707_v39 = vmax.f32 %v635_v32, 0.0 }
 0x10b   :  { %995 = vst.msk [vmem:[%s1844_s3 + $0x70] sm:$0xf] %vm966_vm3, %v1193_v33  ;;  %1027 = vst.msk [vmem:[%s1844_s3 + $0xf0] sm:$0xf] %vm966_vm3, %v1225_v34 }
 0x10c   :  { %998 = vst.msk [vmem:[%s1844_s3 + $0x7c] sm:$0xf] %vm966_vm3, %v1196_v35  ;;  %1030 = vst.msk [vmem:[%s1844_s3 + $0xfc] sm:$0xf] %vm966_vm3, %v1228_v36  ;;  %v1194_v37 = vpack.c.bf16 %v675_v38, %v675_v38  ;;  %v1226_v40 = vpack.c.bf16 %v707_v39, %v707_v39 }
 0x10e   :  { %996 = vst.msk [vmem:[%s1844_s3 + $0x74] sm:$0xf] %vm966_vm3, %v1194_v37  ;;  %1028 = vst.msk [vmem:[%s1844_s3 + $0xf4] sm:$0xf] %vm966_vm3, %v1226_v40 }

// kernel: _lambda_.25
= control target key start
LH: loop header
LB: loop body
LE: loop exit
PB: predicated region body
PF: predicated region fallthrough
CT: control target
= control target key end

     0   :  { %s11222_s0 = inlined_call_operand.vmem [shape: bf16[2,18,18,16], index: 0, kind: input, shape index: {}]   ;;  %s11223_s1 = inlined_call_operand.vmem [shape: bf16[2,16,32], index: 1, kind: input, shape index: {}, may-alias: {1,2}]   ;;  %s11224_s2 = inlined_call_operand.vmem [shape: bf16[2,16,32], index: 2, kind: input, shape index: {}, may-alias: {1,2}]   ;;  %s11225_s3 = inlined_call_operand.vmem [shape: bf16[9,16,32], index: 3, kind: input, shape index: {}]   ;;  %s11226_s4 = inlined_call_operand.vmem [shape: f32[1,32], index: 4, kind: input, shape index: {}]   ;;  %s11227_s5 = inlined_call_operand.vmem [shape: bf16[32,32], index: 5, kind: input, shape index: {}]   ;;  %s11228_s6 = inlined_call_operand.vmem [shape: bf16[32,32], index: 6, kind: input, shape index: {}]   ;;  %s11229_s7 = inlined_call_operand.vmem [shape: bf16[32,32], index: 7, kind: input, shape index: {}]   ;;  %s11230_s8 = inlined_call_operand.vmem [shape: f32[1,32], index: 8, kind: input, shape index: {}]   ;;  %s11231_s9 = inlined_call_operand.vmem [shape: bf16[32,16], index: 9, kind: input, shape index: {}]   ;;  %s11232_s10 = inlined_call_operand.vmem [shape: f32[1,16], index: 10, kind: input, shape index: {}]   ;;  %s11233_s11 = inlined_call_operand.vmem [shape: f32[1,16], index: 11, kind: input, shape index: {}]   ;;  %s11234_s12 = inlined_call_operand.<no memory space> [shape: f32[1,1], index: 12, kind: input, shape index: {}]   ;;  %s11235_s13 = inlined_call_operand.hbm [shape: f32[2,16,16], index: 13, kind: output, shape index: {}]  }
   0x1   :  { %11265 = sst [smem:[#allocation30_spill]] %s11222_s0  ;;  %v18_v0 = vstv %s11234_s12 }
   0x2   :  { %11266 = sst [smem:[#allocation31_spill]] %s11223_s1  ;;  %19 = vst [vmem:[#allocation2] sm:$0x1] %v18_v0 }
   0x3   :  { %11267 = sst [smem:[#allocation32_spill]] %s11224_s2 }
   0x4   :  { %20 = vsyncpa [#allocation4], 0 }
   0x5   :  { %22 = vsyncpa [#allocation4 + $0x1], 0  ;;  %s8202_s27 = smov 0   ;;  %s8204_s28 = smov 0  }
   0x6   :  { %s8206_s29 = smov 0   ;;  %s8208_s30 = smov 0  }
   0x7   :  { %s8210_s14 = smov 0   ;;  %s8212_s15 = smov 0  }
   0x8 LB: > { %s6702_s12 = sadd.s32 4294967295, %s8120_s15   ;;  %s6703_s16 = sadd.s32 4294967294, %s8120_s15   ;;  %s8120_s15 = sphi %s8212_s15, %s28_s15   ;;  %s8116_s14 = sphi %s8210_s14, %s11411_s14   ;;  %s8112_s30 = sphi %s8208_s30, %s11410_s30   ;;  %s8108_s29 = sphi %s8206_s29, %s11409_s29   ;;  %s8104_s28 = sphi %s8204_s28, %s11408_s28   ;;  %s8100_s27 = sphi %s8202_s27, %s11407_s27  }
   0x9   : > { %s40_s17 = sadd.s32 1, %s8116_s14  ;;  %s339_s18 = sadd.s32 1, %s8108_s29 }
   0xa   : > { %p42_p0 = scmp.ge.s32.totalorder %s40_s17, 2  ;;  %p349_p1 = scmp.ne.s32.totalorder %s8108_s29, %s8104_s28 }
   0xb   : > { %p350_p2 = scmp.eq.s32.totalorder %s6702_s12, 1  ;;  %p355_p3 = scmp.ne.s32.totalorder %s8104_s28, %s8100_s27 }
   0xc   : > { %s11413_s17 = smov (%p42_p0, %s40_s17), 0  ;;  %p356_p5 = scmp.eq.s32.totalorder %s6703_s16, 1 }
   0xd   : > { %p8242_p4 = por %p350_p2, %p349_p1  ;;  %s334_s20 = ssub.s32 %s8116_s14, %s11413_s17 }
   0xe   : > { %p6706_p6 = scmp.ge.s32.totalorder %s8120_s15, 1  ;;  %p337_p7 = scmp.eq.s32.totalorder %s334_s20, 0 }
   0xf   : > { %p8249_p8 = por %p356_p5, %p355_p3  ;;  %p433_p9 = scmp.lt.s32.totalorder %s8120_s15, 3 }
  0x10   : > { %s8255_s22 = scalar_select %p337_p7, %s8108_s29, %s339_s18  }
  0x11   : > { %p434_p10 = pnand %p6706_p6, %p433_p9 }
  0x13   : > { %437 = sbr.rel (%p434_p10) target bundleno = 1182 (0x49e), region = 72 }
  0x18   : > { %v7977_v1 = vld [vmem:[%s11225_s3 + $0x8] sm:$0xff]   ;;  %p491_p11 = scmp.lt.s32.totalorder %s8112_s30, 1  ;;  %v8264_v2 = vld [vmem:[%s11225_s3 + $0x10] sm:$0xff]   ;;  %v8272_v3 = vld [vmem:[%s11225_s3] sm:$0xff]   ;;  %vm567_vm0 = vsmask.f32 3328 }
  0x19   : > { %7518 = vmatprep.subr.bf16.mxu0 %v7977_v1  ;;  %7912 = vmatprep.subr.bf16.mxu1 %v7977_v1  ;;  %s11270_s0 = sld [smem:[#allocation30_spill]]  ;;  %vm568_vm1 = vsmask.f32 7440  ;;  %vm1011_vm3 = vcmask 130048   ;;  %vm1564_vm4 = vcmask 1042432   ;;  %vm1565_vm5 = vcmask 1046532  }
  0x1a   : > { %s8267_s12 = scalar_select %p491_p11, %s8112_s30, 1  ;;  %7519 = vmatpush3.bf16.msra.mxu0 %v7977_v1  ;;  %7913 = vmatpush3.bf16.msra.mxu1 %v7977_v1  ;;  %vm8318_vm2 = vmor %vm567_vm0, %vm568_vm1  ;;  %vm8123_vm7 = vmmov 0   ;;  %vm5211_vm8 = vcmask 261120   ;;  %vm6411_vm9 = vcmask 130112   ;;  %vm6548_vm10 = vcmask 1041409  }
  0x1b   : > { %7586 = vmatprep.subr.bf16.mxu0 %v8264_v2  ;;  %7552 = vmatprep.subr.bf16.mxu1 %v8272_v3  ;;  %vm8623_vm6 = vmor %vm1564_vm4, %vm1565_vm5  ;;  %s11378_s2 = sld [smem:[#allocation32_spill]]  ;;  %vm6550_vm11 = vcmask 1042434   ;;  %vm6552_vm12 = vcmask 1043459   ;;  %vm6554_vm13 = vcmask 1044484   ;;  %vm6556_vm14 = vcmask 1045509   ;;  %s7322_s18 = sshll.u32 %s8112_s30, 8 }
  0x1c   : > { %s7914_s20 = smul.u32 216, %s8267_s12  ;;  %s11380_s1 = sld [smem:[#allocation31_spill]]  ;;  %vm6558_vm15 = vcmask 1046534   ;;  %vm6560_vm0 = vcmask 1047559  }
  0x1d   : > { %s11169_s24 = scalar_lea.hbm %s11235_s13, %s7322_s18  ;;  %s8126_s18 = smov [#allocation3]  }
  0x1e   : > { %s8048_s23 = sshll.u32 %s8126_s18, 4  ;;  %s8049_s23 = int_to_ptr.vmem [resolvable:$false] %s8048_s23 }
  0x1f   : > { %s8280_s25 = scalar_lea.vmem %s11270_s0, %s7914_s20  ;;  %s8050_s30 = scalar_lea.vmem %s8049_s23, 512 }
  0x20   : > { %v8283_v4 = vld [vmem:[%s8280_s25] sm:$0xf]  ;;  %v8286_v5 = vld [vmem:[%s8280_s25 + $0x4] sm:$0xf]  ;;  %v8289_v6 = vld [vmem:[%s8280_s25 + $0x8] sm:$0x1] }
  0x21   : > { %v571_v7 = vshrl.u32 %v8283_v4, 16  ;;  %v574_v8 = vshll.u32 %v8283_v4, 16  ;;  %v580_v9 = vshll.u32 %v8286_v5, 16  ;;  %v584_v10 = vshrl.u32 %v8286_v5, 16  ;;  %v8296_v11 = vld [vmem:[%s8280_s25 + $0x78] sm:$0xf] }
  0x22   : > { %v590_v12 = vshll.u32 %v8289_v6, 16  ;;  %v8300_v13 = vld [vmem:[%s8280_s25 + $0x7c] sm:$0xf]  ;;  %v8303_v14 = vld [vmem:[%s8280_s25 + $0x80] sm:$0x1]  ;;  %v811_v20 = vshrl.u32 %v8296_v11, 16 }
  0x23   : > { %v573_v15 = vrot.slane %v571_v7, 4  ;;  %v576_v16 = vrot.slane %v574_v8, 5  ;;  %v582_v17 = vrot.slane %v580_v9, 5  ;;  %v586_v18 = vrot.slane %v584_v10, 4  ;;  %v8311_v27 = vld [vmem:[%s8280_s25 + $0xc] sm:$0xf] }
  0x24   : > { %v592_v19 = vrot.slane %v590_v12, 5  ;;  %v814_v21 = vshll.u32 %v8296_v11, 16  ;;  %v820_v22 = vshll.u32 %v8300_v13, 16  ;;  %v824_v25 = vshrl.u32 %v8300_v13, 16  ;;  %v8314_v28 = vld [vmem:[%s8280_s25 + $0x10] sm:$0xf] }
  0x25   : > { %v577_v23 = vor.u32 %v576_v16, %v573_v15  ;;  %v587_v24 = vor.u32 %v586_v18, %v582_v17  ;;  %v830_v26 = vshll.u32 %v8303_v14, 16  ;;  %v813_v30 = vrot.slane %v811_v20, 4  ;;  %v8323_v38 = vld [vmem:[%s8280_s25 + $0x14] sm:$0x1]  ;;  %v8334_v50 = vld [vmem:[%s8280_s25 + $0x84] sm:$0xf] }
  0x26   : > { %v816_v31 = vrot.slane %v814_v21, 5  ;;  %v822_v32 = vrot.slane %v820_v22, 5  ;;  %v826_v35 = vrot.slane %v824_v25, 4  ;;  %v595_v39 = vshrl.u32 %v8311_v27, 16  ;;  %11273 = vst [vmem:[#allocation6_spill] sm:$0xff] %v8334_v50 }
  0x27   : > { %v578_v33 = vrot.slane %v577_v23, 4  ;;  %v588_v34 = vrot.slane %v587_v24, 4  ;;  %v832_v36 = vrot.slane %v830_v26, 5  ;;  %v598_v40 = vshll.u32 %v8311_v27, 16  ;;  %v8338_v55 = vld [vmem:[%s8280_s25 + $0x88] sm:$0xf] }
  0x28   : > { %v817_v37 = vor.u32 %v816_v31, %v813_v30  ;;  %v604_v41 = vshll.u32 %v8314_v28, 16  ;;  %v827_v44 = vor.u32 %v826_v35, %v822_v32  ;;  %v608_v45 = vshrl.u32 %v8314_v28, 16  ;;  %11274 = vst [vmem:[#allocation7_spill] sm:$0xff] %v8338_v55  ;;  %v8345_v59 = vld [vmem:[%s8280_s25 + $0x8c] sm:$0x1] }
  0x29   : > { %v583_v42 = vsel %vm8318_vm2, %v578_v33, %v582_v17  ;;  %v593_v43 = vsel %vm8318_vm2, %v588_v34, %v592_v19  ;;  %v597_v48 = vrot.slane %v595_v39, 4  ;;  %v600_v49 = vrot.slane %v598_v40, 5  ;;  %11275 = vst [vmem:[#allocation8_spill] sm:$0xff] %v8345_v59  ;;  %v8353_v1 = vld [vmem:[%s8280_s25 + $0x18] sm:$0xf] }
  0x2a   : > { %v6715_v46 = vcombine.low %v583_v42, %v593_v43  ;;  %v818_v47 = vrot.slane %v817_v37, 4  ;;  %v828_v51 = vrot.slane %v827_v44, 4  ;;  %v606_v52 = vrot.slane %v604_v41, 5  ;;  %v8360_v18 = vld [vmem:[%s8280_s25 + $0x1c] sm:$0xf] }
  0x2b   : > { %v610_v53 = vrot.slane %v608_v45, 4  ;;  %v614_v54 = vshll.u32 %v8323_v38, 16  ;;  %v601_v57 = vor.u32 %v600_v49, %v597_v48  ;;  %v835_v0 = vshrl.u32 %v8334_v50, 16  ;;  %v8366_v22 = vld [vmem:[%s8280_s25 + $0x20] sm:$0x1] }
  0x2c   : > { %7520 = vmatprep.mubr.msk.bf16.mxu0 %vm1011_vm3, %v6715_v46  ;;  %v823_v56 = vsel %vm8318_vm2, %v818_v47, %v822_v32  ;;  %v833_v61 = vsel %vm8318_vm2, %v828_v51, %v832_v36  ;;  %v838_v9 = vshll.u32 %v8334_v50, 16  ;;  %v844_v10 = vshll.u32 %v8338_v55, 16  ;;  %v8373_v31 = vld [vmem:[%s8280_s25 + $0x90] sm:$0xf]  ;;  %v8379_v36 = vld [vmem:[%s11225_s3 + $0x20] sm:$0xff]  }
  0x2d   : > { %v611_v62 = vor.u32 %v610_v53, %v606_v52  ;;  %v616_v63 = vrot.slane %v614_v54, 5  ;;  %v6725_v7 = vcombine.low %v823_v56, %v833_v61  ;;  %v602_v8 = vrot.slane %v601_v57, 4  ;;  %11276 = vst [vmem:[#allocation9_spill] sm:$0xff] %v8373_v31  ;;  %v8384_v42 = vld [vmem:[%s8280_s25 + $0x94] sm:$0xf] }
  0x2e   : > { %v837_v15 = vrot.slane %v835_v0, 4  ;;  %v848_v16 = vshrl.u32 %v8338_v55, 16  ;;  %v854_v17 = vshll.u32 %v8345_v59, 16  ;;  %v840_v20 = vrot.slane %v838_v9, 5  ;;  %11277 = vst [vmem:[#allocation10_spill] sm:$0xff] %v8384_v42 }
  0x2f   : > { %v612_v12 = vrot.slane %v611_v62, 4  ;;  %7540 = vmatprep.mubr.msk.bf16.mxu1 %vm1011_vm3, %v6725_v7  ;;  %v607_v19 = vsel %vm8318_vm2, %v602_v8, %v606_v52  ;;  %v846_v21 = vrot.slane %v844_v10, 5  ;;  %v619_v23 = vshrl.u32 %v8353_v1, 16  ;;  %v8391_v52 = vld [vmem:[%s8280_s25 + $0x98] sm:$0x1] }
  0x30   : > { %v850_v25 = vrot.slane %v848_v16, 4  ;;  %v856_v26 = vrot.slane %v854_v17, 5  ;;  %v622_v30 = vshll.u32 %v8353_v1, 16  ;;  %v841_v33 = vor.u32 %v840_v20, %v837_v15  ;;  %11278 = vst [vmem:[#allocation11_spill] sm:$0xff] %v8391_v52  ;;  %v8397_v61 = vld [vmem:[%s8280_s25 + $0x24] sm:$0xf] }
  0x31   : > { %v617_v24 = vsel %vm8318_vm2, %v612_v12, %v616_v63  ;;  %v621_v34 = vrot.slane %v619_v23, 4  ;;  %v628_v35 = vshll.u32 %v8360_v18, 16  ;;  %v632_v40 = vshrl.u32 %v8360_v18, 16  ;;  %v8404_v7 = vld [vmem:[%s8280_s25 + $0x28] sm:$0xf]  ;;  %v8410_v15 = vld [vmem:[%s11225_s3 + $0x18] sm:$0xff]  }
  0x32   : > { %v6716_v32 = vcombine.low %v607_v19, %v617_v24  ;;  %v851_v37 = vor.u32 %v850_v25, %v846_v21  ;;  %v624_v39 = vrot.slane %v622_v30, 5  ;;  %v638_v41 = vshll.u32 %v8366_v22, 16  ;;  %v8415_v20 = vld [vmem:[%s8280_s25 + $0x2c] sm:$0x1]  ;;  %v8422_v30 = vld [vmem:[%s8280_s25 + $0x9c] sm:$0xf] }
  0x33   : > { %v842_v43 = vrot.slane %v841_v33, 4  ;;  %v630_v44 = vrot.slane %v628_v35, 5  ;;  %v859_v45 = vshrl.u32 %v8373_v31, 16  ;;  %v862_v46 = vshll.u32 %v8373_v31, 16  ;;  %11279 = vst [vmem:[#allocation12_spill] sm:$0xff] %v8422_v30 }
  0x34   : > { %7521 = vmatmul.mubr.msk.bf16.vlgmr.msra.gmra.mxu0 %vm1011_vm3, %v6716_v32  ;;  %v852_v47 = vrot.slane %v851_v37, 4  ;;  %v625_v48 = vor.u32 %v624_v39, %v621_v34  ;;  %v634_v49 = vrot.slane %v632_v40, 4  ;;  %v640_v51 = vrot.slane %v638_v41, 5  ;;  %v8428_v37 = vld [vmem:[%s8280_s25 + $0xa0] sm:$0xf] }
  0x35   : > { %7587 = vmatpush3.bf16.msra.mxu0 %v8264_v2  ;;  %v847_v53 = vsel %vm8318_vm2, %v842_v43, %v846_v21  ;;  %v861_v54 = vrot.slane %v859_v45, 4  ;;  %v864_v56 = vrot.slane %v862_v46, 5  ;;  %v868_v57 = vshll.u32 %v8384_v42, 16  ;;  %11280 = vst [vmem:[#allocation13_spill] sm:$0xff] %v8428_v37  ;;  %v8569_v31 = vld [vmem:[%s8280_s25 + $0x68] sm:$0x1] }
  0x36   : > { %7654 = vmatprep.subr.bf16.mxu0 %v8379_v36  ;;  %v857_v2 = vsel %vm8318_vm2, %v852_v47, %v856_v26  ;;  %v626_v62 = vrot.slane %v625_v48, 4  ;;  %v635_v63 = vor.u32 %v634_v49, %v630_v44  ;;  %v872_v0 = vshrl.u32 %v8384_v42, 16  ;;  %v8436_v47 = vld [vmem:[%s8280_s25 + $0xa4] sm:$0x1] }
  0x37   : > { %v6726_v8 = vcombine.low %v847_v53, %v857_v2  ;;  %v865_v9 = vor.u32 %v864_v56, %v861_v54  ;;  %v870_v10 = vrot.slane %v868_v57, 5  ;;  %v878_v12 = vshll.u32 %v8391_v52, 16  ;;  %11281 = vst [vmem:[#allocation14_spill] sm:$0xff] %v8436_v47  ;;  %v8444_v54 = vld [vmem:[%s8280_s25 + $0x30] sm:$0xf] }
  0x38   : > { %v631_v16 = vsel %vm8318_vm2, %v626_v62, %v630_v44  ;;  %v636_v17 = vrot.slane %v635_v63, 4  ;;  %v874_v19 = vrot.slane %v872_v0, 4  ;;  %v643_v21 = vshrl.u32 %v8397_v61, 16  ;;  %v8449_v63 = vld [vmem:[%s8280_s25 + $0x34] sm:$0xf] }
  0x39   : > { %7541 = vmatmul.mubr.msk.bf16.vlgmr.msra.gmra.mxu1 %vm1011_vm3, %v6726_v8  ;;  %v866_v23 = vrot.slane %v865_v9, 4  ;;  %v880_v24 = vrot.slane %v878_v12, 5  ;;  %v646_v25 = vshll.u32 %v8397_v61, 16  ;;  %v652_v26 = vshll.u32 %v8404_v7, 16 }
  0x3a   : > { %v641_v32 = vsel %vm8318_vm2, %v636_v17, %v640_v51  ;;  %v875_v33 = vor.u32 %v874_v19, %v870_v10  ;;  %v645_v34 = vrot.slane %v643_v21, 4  ;;  %v656_v35 = vshrl.u32 %v8404_v7, 16  ;;  %7553 = vmatpush3.bf16.msra.mxu1 %v8272_v3 }
  0x3b   : > { %v6717_v39 = vcombine.low %v631_v16, %v641_v32  ;;  %v871_v40 = vsel %vm8318_vm2, %v866_v23, %v870_v10  ;;  %v648_v41 = vrot.slane %v646_v25, 5  ;;  %v654_v43 = vrot.slane %v652_v26, 5  ;;  %7620 = vmatprep.subr.bf16.mxu1 %v8410_v15  ;;  %v8462_v32 = vld [vmem:[%s8280_s25 + $0xa8] sm:$0xf] }
  0x3c   : > { %v876_v44 = vrot.slane %v875_v33, 4  ;;  %v658_v45 = vrot.slane %v656_v35, 4  ;;  %v662_v46 = vshll.u32 %v8415_v20, 16  ;;  %v883_v48 = vshrl.u32 %v8422_v30, 16 }
  0x3d   : > { %7524 = vmatprep.mubr.msk.bf16.mxu0 %vm1011_vm3, %v6717_v39  ;;  %v649_v3 = vor.u32 %v648_v41, %v645_v34  ;;  %v886_v49 = vshll.u32 %v8422_v30, 16  ;;  %v892_v51 = vshll.u32 %v8428_v37, 16  ;;  %v896_v53 = vshrl.u32 %v8428_v37, 16 }
  0x3e   : > { %v881_v56 = vsel %vm8318_vm2, %v876_v44, %v880_v24  ;;  %v659_v57 = vor.u32 %v658_v45, %v654_v43  ;;  %v664_v2 = vrot.slane %v662_v46, 5  ;;  %v885_v62 = vrot.slane %v883_v48, 4  ;;  %v8457_v24 = vld [vmem:[%s8280_s25 + $0x38] sm:$0x1] }
  0x3f   : > { %v6727_v0 = vcombine.low %v871_v40, %v881_v56  ;;  %v650_v8 = vrot.slane %v649_v3, 4  ;;  %v888_v9 = vrot.slane %v886_v49, 5  ;;  %v894_v10 = vrot.slane %v892_v51, 5  ;;  %v8467_v40 = vld [vmem:[%s8280_s25 + $0xac] sm:$0xf] }
  0x40   : > { %v660_v12 = vrot.slane %v659_v57, 4  ;;  %v898_v16 = vrot.slane %v896_v53, 4  ;;  %v902_v17 = vshll.u32 %v8436_v47, 16  ;;  %v667_v19 = vshrl.u32 %v8444_v54, 16  ;;  %v8476_v56 = vld [vmem:[%s8280_s25 + $0xb0] sm:$0x1] }
  0x41   : > { %7544 = vmatprep.mubr.msk.bf16.mxu1 %vm1011_vm3, %v6727_v0  ;;  %v655_v21 = vsel %vm8318_vm2, %v650_v8, %v654_v43  ;;  %v889_v23 = vor.u32 %v888_v9, %v885_v62  ;;  %v670_v25 = vshll.u32 %v8444_v54, 16  ;;  %v676_v26 = vshll.u32 %v8449_v63, 16  ;;  %v8481_v62 = vld [vmem:[%s8280_s25 + $0x3c] sm:$0xf] }
  0x42   : > { %v665_v33 = vsel %vm8318_vm2, %v660_v12, %v664_v2  ;;  %v899_v34 = vor.u32 %v898_v16, %v894_v10  ;;  %v904_v35 = vrot.slane %v902_v17, 5  ;;  %v669_v39 = vrot.slane %v667_v19, 4  ;;  %v8486_v16 = vld [vmem:[%s8280_s25 + $0x40] sm:$0xf] }
  0x43   : > { %v6718_v41 = vcombine.low %v655_v21, %v665_v33  ;;  %v890_v43 = vrot.slane %v889_v23, 4  ;;  %v672_v44 = vrot.slane %v670_v25, 5  ;;  %v678_v45 = vrot.slane %v676_v26, 5 }
  0x44   : > { %v900_v46 = vrot.slane %v899_v34, 4  ;;  %v680_v48 = vshrl.u32 %v8449_v63, 16  ;;  %v686_v3 = vshll.u32 %v8457_v24, 16  ;;  %v907_v49 = vshrl.u32 %v8462_v32, 16 }
  0x45   : > { %7525 = vmatmul.mubr.msk.bf16.gmra.mxu0 %vm1011_vm3, %v6718_v41  ;;  %v895_v51 = vsel %vm8318_vm2, %v890_v43, %v894_v10  ;;  %v673_v53 = vor.u32 %v672_v44, %v669_v39  ;;  %v910_v57 = vshll.u32 %v8462_v32, 16  ;;  %v916_v2 = vshll.u32 %v8467_v40, 16  ;;  %v8495_v39 = vld [vmem:[%s8280_s25 + $0x44] sm:$0x1]  ;;  %v8500_v44 = vld [vmem:[%s8280_s25 + $0xb4] sm:$0xf] }
  0x46   : > { %v905_v0 = vsel %vm8318_vm2, %v900_v46, %v904_v35  ;;  %v682_v8 = vrot.slane %v680_v48, 4  ;;  %v688_v9 = vrot.slane %v686_v3, 5  ;;  %v909_v12 = vrot.slane %v907_v49, 4 }
  0x47   : > { %v6728_v10 = vcombine.low %v895_v51, %v905_v0  ;;  %v674_v17 = vrot.slane %v673_v53, 4  ;;  %v912_v19 = vrot.slane %v910_v57, 5  ;;  %v918_v21 = vrot.slane %v916_v2, 5  ;;  %v8503_v51 = vld [vmem:[%s8280_s25 + $0xb8] sm:$0xf] }
  0x48   : > { %v683_v23 = vor.u32 %v682_v8, %v678_v45  ;;  %v920_v25 = vshrl.u32 %v8467_v40, 16  ;;  %v926_v26 = vshll.u32 %v8476_v56, 16  ;;  %v691_v33 = vshrl.u32 %v8481_v62, 16  ;;  %v8507_v0 = vld [vmem:[%s8280_s25 + $0xbc] sm:$0x1] }
  0x49   : > { %7545 = vmatmul.mubr.msk.bf16.gmra.mxu1 %vm1011_vm3, %v6728_v10  ;;  %v679_v34 = vsel %vm8318_vm2, %v674_v17, %v678_v45  ;;  %v913_v35 = vor.u32 %v912_v19, %v909_v12  ;;  %v694_v41 = vshll.u32 %v8481_v62, 16  ;;  %v700_v43 = vshll.u32 %v8486_v16, 16  ;;  %v8514_v19 = vld [vmem:[%s8280_s25 + $0x48] sm:$0xf] }
  0x4a   : > { %v684_v46 = vrot.slane %v683_v23, 4  ;;  %v922_v48 = vrot.slane %v920_v25, 4  ;;  %v928_v3 = vrot.slane %v926_v26, 5  ;;  %v693_v49 = vrot.slane %v691_v33, 4 }
  0x4b   : > { %v914_v53 = vrot.slane %v913_v35, 4  ;;  %v696_v57 = vrot.slane %v694_v41, 5  ;;  %v702_v2 = vrot.slane %v700_v43, 5  ;;  %v704_v45 = vshrl.u32 %v8486_v16, 16 }
  0x4c   : > { %v689_v8 = vsel %vm8318_vm2, %v684_v46, %v688_v9  ;;  %v923_v12 = vor.u32 %v922_v48, %v918_v21  ;;  %v710_v10 = vshll.u32 %v8495_v39, 16  ;;  %v931_v17 = vshrl.u32 %v8500_v44, 16  ;;  %v8520_v9 = vld [vmem:[%s8280_s25 + $0x4c] sm:$0xf] }
  0x4d   : > { %v6719_v23 = vcombine.low %v679_v34, %v689_v8  ;;  %v919_v25 = vsel %vm8318_vm2, %v914_v53, %v918_v21  ;;  %v697_v26 = vor.u32 %v696_v57, %v693_v49  ;;  %v706_v33 = vrot.slane %v704_v45, 4  ;;  %v8526_v8 = vld [vmem:[%s8280_s25 + $0x50] sm:$0x1] }
  0x4e   : > { %v924_v35 = vrot.slane %v923_v12, 4  ;;  %v712_v41 = vrot.slane %v710_v10, 5  ;;  %v933_v43 = vrot.slane %v931_v17, 4  ;;  %v934_v58 = vshll.u32 %v8500_v44, 16 }
  0x4f   : > { %7528 = vmatprep.mubr.msk.bf16.mxu0 %vm1011_vm3, %v6719_v23  ;;  %v698_v46 = vrot.slane %v697_v26, 4  ;;  %v707_v48 = vor.u32 %v706_v33, %v702_v2  ;;  %v940_v60 = vshll.u32 %v8503_v51, 16  ;;  %v944_v34 = vshrl.u32 %v8503_v51, 16  ;;  %v8535_v23 = vld [vmem:[%s8280_s25 + $0x54] sm:$0xf] }
  0x50   : > { %v929_v21 = vsel %vm8318_vm2, %v924_v35, %v928_v3  ;;  %v936_v49 = vrot.slane %v934_v58, 5  ;;  %v950_v53 = vshll.u32 %v8507_v0, 16  ;;  %v715_v57 = vshrl.u32 %v8514_v19, 16 }
  0x51   : > { %v6729_v45 = vcombine.low %v919_v25, %v929_v21  ;;  %v703_v12 = vsel %vm8318_vm2, %v698_v46, %v702_v2  ;;  %v708_v10 = vrot.slane %v707_v48, 4  ;;  %v942_v17 = vrot.slane %v940_v60, 5  ;;  %v8545_v48 = vld [vmem:[%s8280_s25 + $0x58] sm:$0xf] }
  0x52   : > { %v937_v26 = vor.u32 %v936_v49, %v933_v43  ;;  %v946_v33 = vrot.slane %v944_v34, 4  ;;  %v952_v47 = vrot.slane %v950_v53, 5  ;;  %v717_v52 = vrot.slane %v715_v57, 4  ;;  %v8548_v53 = vld [vmem:[%s8280_s25 + $0x5c] sm:$0x1] }
  0x53   : > { %7548 = vmatprep.mubr.msk.bf16.mxu1 %vm1011_vm3, %v6729_v45  ;;  %v713_v58 = vsel %vm8318_vm2, %v708_v10, %v712_v41  ;;  %v718_v3 = vshll.u32 %v8514_v19, 16  ;;  %v724_v25 = vshll.u32 %v8520_v9, 16  ;;  %v728_v2 = vshrl.u32 %v8520_v9, 16 }
  0x54   : > { %v6720_v60 = vcombine.low %v703_v12, %v713_v58  ;;  %v938_v35 = vrot.slane %v937_v26, 4  ;;  %v947_v46 = vor.u32 %v946_v33, %v942_v17  ;;  %v734_v43 = vshll.u32 %v8526_v8, 16  ;;  %v8556_v26 = vld [vmem:[%s8280_s25 + $0x60] sm:$0xf] }
  0x55   : > { %v720_v34 = vrot.slane %v718_v3, 5  ;;  %v726_v21 = vrot.slane %v724_v25, 5  ;;  %v730_v49 = vrot.slane %v728_v2, 4  ;;  %v739_v41 = vshrl.u32 %v8535_v23, 16  ;;  %v8560_v2 = vld [vmem:[%s8280_s25 + $0x64] sm:$0xf] }
  0x56   : > { %7529 = vmatmul.mubr.msk.bf16.gmra.mxu0 %vm1011_vm3, %v6720_v60  ;;  %v943_v57 = vsel %vm8318_vm2, %v938_v35, %v942_v17  ;;  %v948_v45 = vrot.slane %v947_v46, 4  ;;  %v736_v12 = vrot.slane %v734_v43, 5  ;;  %v742_v10 = vshll.u32 %v8535_v23, 16 }
  0x57   : > { %v721_v33 = vor.u32 %v720_v34, %v717_v52  ;;  %v731_v58 = vor.u32 %v730_v49, %v726_v21  ;;  %v741_v3 = vrot.slane %v739_v41, 4  ;;  %v748_v25 = vshll.u32 %v8545_v48, 16 }
  0x58   : > { %v953_v60 = vsel %vm8318_vm2, %v948_v45, %v952_v47  ;;  %v744_v30 = vrot.slane %v742_v10, 5  ;;  %v752_v17 = vshrl.u32 %v8545_v48, 16  ;;  %v758_v35 = vshll.u32 %v8548_v53, 16 }
  0x59   : > { %v6730_v46 = vcombine.low %v943_v57, %v953_v60  ;;  %v722_v43 = vrot.slane %v721_v33, 4  ;;  %v732_v37 = vrot.slane %v731_v58, 4  ;;  %v750_v59 = vrot.slane %v748_v25, 5  ;;  %v8584_v25 = vld [vmem:[%s8280_s25 + $0x6c] sm:$0xf] }
  0x5a   : > { %v745_v52 = vor.u32 %v744_v30, %v741_v3  ;;  %v754_v34 = vrot.slane %v752_v17, 4  ;;  %v760_v49 = vrot.slane %v758_v35, 5  ;;  %v6749_v41 = vcombine.low %v8311_v27, %v8314_v28  ;;  %v8589_v17 = vld [vmem:[%s8280_s25 + $0x70] sm:$0xf] }
  0x5b   : > { %7549 = vmatmul.mubr.msk.bf16.gmra.mxu1 %vm1011_vm3, %v6730_v46  ;;  %v727_v47 = vsel %vm8318_vm2, %v722_v43, %v726_v21  ;;  %v737_v57 = vsel %vm8318_vm2, %v732_v37, %v736_v12  ;;  %v763_v45 = vshrl.u32 %v8556_v26, 16  ;;  %v766_v30 = vshll.u32 %v8556_v26, 16 }
  0x5c   : > { %v6721_v10 = vcombine.low %v727_v47, %v737_v57  ;;  %v11282_v33 = vcombine.low %v8283_v4, %v8286_v5  ;;  %v746_v27 = vrot.slane %v745_v52, 4  ;;  %v755_v58 = vor.u32 %v754_v34, %v750_v59  ;;  %v8597_v52 = vld [vmem:[%s8280_s25 + $0x74] sm:$0x1] }
  0x5d   : > { %v772_v3 = vshll.u32 %v8560_v2, 16  ;;  %v765_v21 = vrot.slane %v763_v45, 4  ;;  %v768_v60 = vrot.slane %v766_v30, 5  ;;  %v776_v37 = vshrl.u32 %v8560_v2, 16 }
  0x5e   : > { %7554 = vmatprep.mubr.msk.bf16.mxu1 %vm1011_vm3, %v11282_v33  ;;  %v782_v12 = vshll.u32 %v8569_v31, 16  ;;  %7532 = vmatprep.mubr.msk.bf16.mxu0 %vm1011_vm3, %v6721_v10  ;;  %v751_v4 = vsel %vm8318_vm2, %v746_v27, %v750_v59  ;;  %v756_v35 = vrot.slane %v755_v58, 4  ;;  %v6750_v43 = vcombine.low %v8353_v1, %v8360_v18  ;;  %v8608_v1 = vld [vmem:[%s11225_s3 + $0x28] sm:$0xff]  }
  0x5f   : > { %v774_v46 = vrot.slane %v772_v3, 5  ;;  %v769_v34 = vor.u32 %v768_v60, %v765_v21  ;;  %v778_v47 = vrot.slane %v776_v37, 4  ;;  %v787_v45 = vshrl.u32 %v8584_v25, 16  ;;  %v1516_v60 = vld [vmem:[%s8280_s25] sm:$0xe] }
  0x60   : > { %v784_v57 = vrot.slane %v782_v12, 5  ;;  %v761_v30 = vsel %vm8318_vm2, %v756_v35, %v760_v49  ;;  %v790_v10 = vshll.u32 %v8584_v25, 16  ;;  %v796_v59 = vshll.u32 %v8589_v17, 16  ;;  %v1517_v37 = vld [vmem:[%s8280_s25 + $0xc] sm:$0xe] }
  0x61   : > { %v800_v33 = vshrl.u32 %v8589_v17, 16  ;;  %v6722_v27 = vcombine.low %v751_v4, %v761_v30  ;;  %v770_v58 = vrot.slane %v769_v34, 4  ;;  %v779_v3 = vor.u32 %v778_v47, %v774_v46 }
  0x62   : > { %v789_v21 = vrot.slane %v787_v45, 4  ;;  %v792_v12 = vrot.slane %v790_v10, 5  ;;  %v798_v42 = vrot.slane %v796_v59, 5  ;;  %v806_v35 = vshll.u32 %v8597_v52, 16 }
  0x63   : > { %v802_v49 = vrot.slane %v800_v33, 4  ;;  %v1572_v50 = vrot.slane %v8289_v6, 5  ;;  %v1579_v55 = vrot.slane %v8323_v38, 5  ;;  %7533 = vmatmul.mubr.msk.bf16.gmra.mxu0 %vm1011_vm3, %v6722_v27  ;;  %7555 = vmatmul.mubr.msk.bf16.vlgmr.msra.gmra.mxu1 %vm1011_vm3, %v6749_v41  ;;  %v775_v4 = vsel %vm8318_vm2, %v770_v58, %v774_v46 }
  0x64   : > { %v780_v34 = vrot.slane %v779_v3, 4  ;;  %7558 = vmatprep.mubr.msk.bf16.mxu1 %vm1011_vm3, %v6750_v43  ;;  %v793_v47 = vor.u32 %v792_v12, %v789_v21  ;;  %v808_v30 = vrot.slane %v806_v35, 5  ;;  %7621 = vmatpush3.bf16.msra.mxu1 %v8410_v15  ;;  %v6781_v38 = vrot.slane %v1516_v60, 9  ;;  %v1518_v60 = vld [vmem:[%s8280_s25 + $0x18] sm:$0xe] }
  0x65   : > { %v803_v45 = vor.u32 %v802_v49, %v798_v42  ;;  %v1569_v46 = vrot.slane %v8286_v5, 5  ;;  %v6782_v10 = vrot.slane %v1517_v37, 9  ;;  %7688 = vmatprep.subr.bf16.mxu1 %v8608_v1  ;;  %v11285_v15 = vrot.slane %v8314_v28, 5 }
  0x66   : > { %v785_v41 = vsel %vm8318_vm2, %v780_v34, %v784_v57  ;;  %v794_v59 = vrot.slane %v793_v47, 4  ;;  %v6751_v58 = vcombine.low %v8397_v61, %v8404_v7  ;;  %v6752_v61 = vcombine.low %v8444_v54, %v8449_v63 }
  0x67   : > { %v6723_v43 = vcombine.low %v775_v4, %v785_v41  ;;  %v804_v33 = vrot.slane %v803_v45, 4  ;;  %v1578_v27 = vrot.slane %v11285_v15, 4  ;;  %v1570_v3 = vsel %vm8623_vm6, %v6781_v38, %v1569_v46  ;;  %v1520_v38 = vld [vmem:[%s8280_s25 + $0x30] sm:$0xe] }
  0x68   : > { %v1571_v21 = vrot.slane %v1569_v46, 4  ;;  %v11286_v57 = vmov %v11285_v15  ;;  %v799_v37 = vsel %vm8318_vm2, %v794_v59, %v798_v42  ;;  %v1583_v34 = vrot.slane %v8360_v18, 5 }
  0x69   : > { %v1577_v5 = vsel %vm8623_vm6, %v6782_v10, %v11286_v57  ;;  %7536 = vmatprep.mubr.msk.bf16.mxu0 %vm1011_vm3, %v6723_v43  ;;  %v809_v12 = vsel %vm8318_vm2, %v804_v33, %v808_v30  ;;  %v1580_v49 = vsel %vm8623_vm6, %v1578_v27, %v1579_v55  ;;  %v6783_v42 = vrot.slane %v1518_v60, 9  ;;  %v8676_v27 = vld [vmem:[%s11225_s3 + $0x30] sm:$0xff]  }
  0x6a   : > { %v6724_v28 = vcombine.low %v799_v37, %v809_v12  ;;  %v1573_v35 = vsel %vm8623_vm6, %v1571_v21, %v1572_v50  ;;  %v6800_v4 = vcombine.low %v1577_v5, %v1580_v49  ;;  %v1586_v45 = vrot.slane %v8366_v22, 5  ;;  %v1519_v50 = vld [vmem:[%s8280_s25 + $0x24] sm:$0xe]  ;;  %v1522_v21 = vld [vmem:[%s8280_s25 + $0x48] sm:$0xe] }
  0x6b   : > { %v6799_v47 = vcombine.low %v1570_v3, %v1573_v35  ;;  %7559 = vmatmul.mubr.msk.bf16.gmra.mxu1 %vm1011_vm3, %v6751_v58  ;;  %v1585_v54 = vrot.slane %v1583_v34, 4  ;;  %v1590_v55 = vrot.slane %v8404_v7, 5  ;;  %v1597_v30 = vrot.slane %v8449_v63, 5  ;;  %v1521_v58 = vld [vmem:[%s8280_s25 + $0x3c] sm:$0xe] }
  0x6c   : > { %7537 = vmatmul.mubr.msk.bf16.gmra.mxu0 %vm1011_vm3, %v6724_v28  ;;  %7562 = vmatprep.mubr.msk.bf16.mxu1 %vm1011_vm3, %v6752_v61  ;;  %v1584_v18 = vsel %vm8623_vm6, %v6783_v42, %v1583_v34  ;;  %v6753_v41 = vcombine.low %v8481_v62, %v8486_v16  ;;  %v6754_v46 = vcombine.low %v8514_v19, %v8520_v9  ;;  %v6784_v10 = vrot.slane %v1519_v50, 9 }
  0x6d   : > { %7588 = vmatprep.mubr.msk.bf16.mxu0 %vm1011_vm3, %v6799_v47  ;;  %v1587_v22 = vsel %vm8623_vm6, %v1585_v54, %v1586_v45  ;;  %v1592_v43 = vrot.slane %v1590_v55, 4  ;;  %v1593_v7 = vrot.slane %v8415_v20, 5  ;;  %v6785_v33 = vrot.slane %v1520_v38, 9  ;;  %v1524_v47 = vld [vmem:[%s8280_s25 + $0x60] sm:$0xe] }
  0x6e   : > { %v6801_v59 = vcombine.low %v1584_v18, %v1587_v22  ;;  %v1599_v63 = vrot.slane %v1597_v30, 4  ;;  %v1600_v15 = vrot.slane %v8457_v24, 5  ;;  %v1604_v62 = vrot.slane %v8486_v16, 5  ;;  %v1530_v54 = vld [vmem:[%s8280_s25 + $0xa8] sm:$0xe] }
  0x6f   : > { %v1591_v20 = vsel %vm8623_vm6, %v6784_v10, %v1590_v55  ;;  %v1594_v24 = vsel %vm8623_vm6, %v1592_v43, %v1593_v7  ;;  %v1611_v19 = vrot.slane %v8520_v9, 5  ;;  %v1598_v3 = vsel %vm8623_vm6, %v6785_v33, %v1597_v30 }
  0x70   : > { %v1601_v16 = vsel %vm8623_vm6, %v1599_v63, %v1600_v15  ;;  %v6756_v57 = vcombine.low %v8556_v26, %v8560_v2  ;;  %v6786_v5 = vrot.slane %v1521_v58, 9  ;;  %v6802_v9 = vcombine.low %v1591_v20, %v1594_v24  ;;  %v1526_v20 = vld [vmem:[%s8280_s25 + $0x78] sm:$0xe] }
  0x71   : > { %v1606_v60 = vrot.slane %v1604_v62, 4  ;;  %v1607_v37 = vrot.slane %v8495_v39, 5  ;;  %v6762_v12 = vcombine.low %v8462_v32, %v8467_v40  ;;  %v6803_v61 = vcombine.low %v1598_v3, %v1601_v16 }
  0x72   : > { %v6787_v49 = vrot.slane %v1522_v21, 9  ;;  %v1613_v28 = vrot.slane %v1611_v19, 4  ;;  %v1614_v35 = vrot.slane %v8526_v8, 5  ;;  %v1605_v26 = vsel %vm8623_vm6, %v6786_v5, %v1604_v62  ;;  %v1527_v21 = vld [vmem:[%s8280_s25 + $0x84] sm:$0xe] }
  0x73   : > { %7563 = vmatmul.mubr.msk.bf16.gmra.mxu1 %vm1011_vm3, %v6753_v41  ;;  %v1608_v39 = vsel %vm8623_vm6, %v1606_v60, %v1607_v37  ;;  %v1618_v34 = vrot.slane %v8545_v48, 5  ;;  %v1625_v45 = vrot.slane %v8560_v2, 5  ;;  %v1642_v55 = vrot.slane %v8303_v14, 5  ;;  %v1531_v41 = vld [vmem:[%s8280_s25 + $0xb4] sm:$0xe]  ;;  %v11292_v14 = vld [vmem:[#allocation13_spill] sm:$0xff] }
  0x74   : > { %7589 = vmatmul.mubr.msk.bf16.vlgmr.msra.gmra.mxu0 %vm1011_vm3, %v6800_v4  ;;  %7566 = vmatprep.mubr.msk.bf16.mxu1 %vm1011_vm3, %v6754_v46  ;;  %v1523_v4 = vld [vmem:[%s8280_s25 + $0x54] sm:$0xe]  ;;  %v1612_v8 = vsel %vm8623_vm6, %v6787_v49, %v1611_v19  ;;  %v1615_v42 = vsel %vm8623_vm6, %v1613_v28, %v1614_v35  ;;  %v6758_v50 = vcombine.low %v8296_v11, %v8300_v13  ;;  %v1621_v22 = vrot.slane %v8548_v53, 5  ;;  %v1525_v11 = vld [vmem:[%s8280_s25 + $0x6c] sm:$0xe] }
  0x75   : > { %7655 = vmatpush3.bf16.msra.mxu0 %v8379_v36  ;;  %7592 = vmatprep.mubr.msk.bf16.mxu0 %vm1011_vm3, %v6801_v59  ;;  %v6755_v36 = vcombine.low %v8535_v23, %v8545_v48  ;;  %v6763_v23 = vcombine.low %v8500_v44, %v8503_v51  ;;  %v6757_v48 = vcombine.low %v8584_v25, %v8589_v17  ;;  %v6788_v18 = vrot.slane %v1523_v4, 9  ;;  %v11287_v28 = vld [vmem:[#allocation7_spill] sm:$0xff] }
  0x76   : > { %7722 = vmatprep.subr.bf16.mxu0 %v8676_v27  ;;  %v6804_v30 = vcombine.low %v1605_v26, %v1608_v39  ;;  %v6789_v38 = vrot.slane %v1524_v47, 9  ;;  %v6805_v46 = vcombine.low %v1612_v8, %v1615_v42  ;;  %v1620_v10 = vrot.slane %v1618_v34, 4  ;;  %v11288_v26 = vld [vmem:[#allocation6_spill] sm:$0xff] }
  0x77   : > { %v6795_v2 = vrot.slane %v1530_v54, 9  ;;  %v1667_v43 = vrot.slane %v8467_v40, 5  ;;  %v1627_v7 = vrot.slane %v1625_v45, 4  ;;  %v1628_v59 = vrot.slane %v8569_v31, 5  ;;  %v11289_v42 = vld [vmem:[#allocation10_spill] sm:$0xff] }
  0x78   : > { %v1632_v25 = vrot.slane %v8589_v17, 5  ;;  %v1670_v33 = vrot.slane %v8476_v56, 5  ;;  %v6796_v15 = vrot.slane %v1531_v41, 9  ;;  %v1674_v58 = vrot.slane %v8503_v51, 5 }
  0x79   : > { %v8737_v63 = vsel %vm8623_vm6, %v6795_v2, %v1667_v43  ;;  %v1669_v53 = vrot.slane %v1667_v43, 4  ;;  %v1619_v62 = vsel %vm8623_vm6, %v6788_v18, %v1618_v34  ;;  %v1639_v31 = vrot.slane %v8300_v13, 5  ;;  %v1528_v34 = vld [vmem:[%s8280_s25 + $0x90] sm:$0xe]  ;;  %v6902_v18 = vld [vmem:[%s8280_s25 + $0x18] sm:$0xf] }
  0x7a   : > { %v1677_v17 = vrot.slane %v8507_v0, 5  ;;  %v1626_v56 = vsel %vm8623_vm6, %v6789_v38, %v1625_v45  ;;  %v8755_v19 = vsel %vm8623_vm6, %v6796_v15, %v1674_v58  ;;  %v1676_v3 = vrot.slane %v1674_v58, 4  ;;  %v11290_v45 = vld [vmem:[#allocation9_spill] sm:$0xff] }
  0x7b   : > { %7567 = vmatmul.mubr.msk.bf16.gmra.mxu1 %vm1011_vm3, %v6755_v36  ;;  %v8751_v24 = vsel %vm8623_vm6, %v1669_v53, %v1670_v33  ;;  %v1622_v13 = vsel %vm8623_vm6, %v1620_v10, %v1621_v22  ;;  %v6790_v0 = vrot.slane %v1525_v11, 9  ;;  %v1635_v16 = vrot.slane %v8597_v52, 5  ;;  %v8792_v10 = vld [vmem:[%s8280_s25 + $0x14] sm:$0x1]  ;;  %v8802_v33 = vld [vmem:[%s8280_s25 + $0x1c] sm:$0xf] }
  0x7c   : > { %7593 = vmatmul.mubr.msk.bf16.gmra.mxu0 %vm1011_vm3, %v6802_v9  ;;  %7570 = vmatprep.mubr.msk.bf16.mxu1 %vm1011_vm3, %v6756_v57  ;;  %v6813_v36 = vcombine.low %v8737_v63, %v8751_v24  ;;  %v6899_v57 = vld [vmem:[%s8280_s25 + $0xc] sm:$0xf]  ;;  %v1629_v5 = vsel %vm8623_vm6, %v1627_v7, %v1628_v59  ;;  %v1634_v9 = vrot.slane %v1632_v25, 4  ;;  %v6791_v60 = vrot.slane %v1526_v20, 9  ;;  %v11291_v59 = vld [vmem:[#allocation8_spill] sm:$0xff] }
  0x7d   : > { %7596 = vmatprep.mubr.msk.bf16.mxu0 %vm1011_vm3, %v6803_v61  ;;  %v8770_v37 = vsel %vm8623_vm6, %v1676_v3, %v1677_v17  ;;  %v8773_v61 = vld [vmem:[%s8280_s25 + $0x10] sm:$0xf]  ;;  %v1641_v49 = vrot.slane %v1639_v31, 4  ;;  %v1646_v52 = vrot.slane %v11287_v28, 5  ;;  %v6759_v39 = vcombine.low %v11288_v26, %v11287_v28  ;;  %v6905_v3 = vld [vmem:[%s8280_s25 + $0x24] sm:$0xf] }
  0x7e   : > { %v6814_v35 = vcombine.low %v8755_v19, %v8770_v37  ;;  %v6806_v4 = vcombine.low %v1619_v62, %v1622_v13  ;;  %v2392_v47 = vshrl.u32 %v6899_v57, 16  ;;  %v2395_v8 = vshll.u32 %v6899_v57, 16  ;;  %v8826_v28 = vld [vmem:[%s8280_s25 + $0x20] sm:$0x1] }
  0x7f   : > { %v6760_v54 = vcombine.low %v11290_v45, %v11289_v42  ;;  %v1633_v22 = vsel %vm8623_vm6, %v6790_v0, %v1632_v25  ;;  %v1640_v38 = vsel %vm8623_vm6, %v6791_v60, %v1639_v31  ;;  %v6792_v41 = vrot.slane %v1527_v21, 9  ;;  %v1529_v31 = vld [vmem:[%s8280_s25 + $0x9c] sm:$0xe] }
  0x80   : > { %v1636_v2 = vsel %vm8623_vm6, %v1634_v9, %v1635_v16  ;;  %v1643_v43 = vsel %vm8623_vm6, %v1641_v49, %v1642_v55  ;;  %v1648_v7 = vrot.slane %v1646_v52, 4  ;;  %v1649_v25 = vrot.slane %v11291_v59, 5  ;;  %v11293_v55 = vld [vmem:[#allocation12_spill] sm:$0xff] }
  0x81   : > { %v2394_v11 = vrot.slane %v2392_v47, 4  ;;  %v2397_v53 = vrot.slane %v2395_v8, 5  ;;  %v2416_v15 = vshrl.u32 %v6902_v18, 16  ;;  %v2419_v58 = vshll.u32 %v6902_v18, 16  ;;  %v8832_v8 = vld [vmem:[%s8280_s25 + $0x28] sm:$0xf] }
  0x82   : > { %v6761_v62 = vcombine.low %v11293_v55, %v11292_v14  ;;  %v6793_v20 = vrot.slane %v1528_v34, 9  ;;  %v6808_v13 = vcombine.low %v1633_v22, %v1636_v2  ;;  %v6809_v0 = vcombine.low %v1640_v38, %v1643_v43  ;;  %v6908_v18 = vld [vmem:[%s8280_s25 + $0x30] sm:$0xf]  ;;  %v8843_v43 = vld [vmem:[%s8280_s25 + $0x34] sm:$0xf] }
  0x83   : > { %7571 = vmatmul.mubr.msk.bf16.gmra.mxu1 %vm1011_vm3, %v6757_v48  ;;  %v6807_v48 = vcombine.low %v1626_v56, %v1629_v5  ;;  %v8816_v16 = vsel %vm8623_vm6, %v6792_v41, %v1646_v52  ;;  %v8820_v57 = vsel %vm8623_vm6, %v1648_v7, %v1649_v25  ;;  %v11294_v5 = vld [vmem:[#allocation11_spill] sm:$0xff]  ;;  %v1660_v60 = vrot.slane %v11292_v14, 5 }
  0x84   : > { %7597 = vmatmul.mubr.msk.bf16.gmra.mxu0 %vm1011_vm3, %v6804_v30  ;;  %7574 = vmatprep.mubr.msk.bf16.mxu1 %vm1011_vm3, %v6758_v50  ;;  %v2401_v50 = vshll.u32 %v8773_v61, 16  ;;  %v2405_v30 = vshrl.u32 %v8773_v61, 16  ;;  %v1656_v9 = vrot.slane %v11294_v5, 5  ;;  %v2411_v49 = vshll.u32 %v8792_v10, 16  ;;  %v7998_v5 = vld [vmem:[%s8280_s25 + $0xc] sm:$0xff]  }
  0x85   : > { %7600 = vmatprep.mubr.msk.bf16.mxu0 %vm1011_vm3, %v6805_v46  ;;  %v1653_v46 = vrot.slane %v11289_v42, 5  ;;  %v2398_v26 = vor.u32 %v2397_v53, %v2394_v11  ;;  %v2425_v52 = vshll.u32 %v8802_v33, 16  ;;  %v2429_v47 = vshrl.u32 %v8802_v33, 16  ;;  %v8851_v11 = vld [vmem:[%s8280_s25 + $0x2c] sm:$0x1] }
  0x86   : > { %v8811_v17 = vrot.slane %v2401_v50, 5  ;;  %v2407_v56 = vrot.slane %v2405_v30, 4  ;;  %v2440_v42 = vshrl.u32 %v6905_v3, 16  ;;  %v2443_v45 = vshll.u32 %v6905_v3, 16  ;;  %v11295_v50 = vld [vmem:[#allocation14_spill] sm:$0xff] }
  0x87   : > { %v1655_v21 = vrot.slane %v1653_v46, 4  ;;  %v1663_v30 = vrot.slane %v11295_v50, 5  ;;  %v6810_v22 = vcombine.low %v8816_v16, %v8820_v57  ;;  %v1662_v41 = vrot.slane %v1660_v60, 4  ;;  %v6911_v3 = vld [vmem:[%s8280_s25 + $0x3c] sm:$0xf] }
  0x88   : > { %v2408_v34 = vor.u32 %v2407_v56, %v8811_v17  ;;  %v2413_v2 = vrot.slane %v2411_v49, 5  ;;  %v2399_v7 = vrot.slane %v2398_v26, 4  ;;  %v8847_v59 = vrot.slane %v2425_v52, 5  ;;  %v8895_v50 = vld [vmem:[%s8280_s25 + $0x4c] sm:$0xf] }
  0x89   : > { %v1657_v38 = vsel %vm8623_vm6, %v1655_v21, %v1656_v9  ;;  %v2435_v25 = vshll.u32 %v8826_v28, 16  ;;  %v2445_v14 = vrot.slane %v2443_v45, 5  ;;  %v2449_v55 = vshll.u32 %v8832_v8, 16 }
  0x8a   : > { %v2409_v53 = vrot.slane %v2408_v34, 4  ;;  %v2473_v40 = vshll.u32 %v8843_v43, 16  ;;  %v2404_v16 = vsel %vm8318_vm2, %v2399_v7, %v8811_v17  ;;  %v2459_v26 = vshll.u32 %v8851_v11, 16  ;;  %v8890_v34 = vld [vmem:[%s8280_s25 + $0x38] sm:$0x1] }
  0x8b   : > { %7575 = vmatmul.mubr.msk.bf16.gmra.mxu1 %vm1011_vm3, %v6759_v39  ;;  %v2418_v39 = vrot.slane %v2416_v15, 4  ;;  %v2431_v15 = vrot.slane %v2429_v47, 4  ;;  %v8879_v57 = vrot.slane %v2435_v25, 5  ;;  %v2521_v25 = vshll.u32 %v8895_v50, 16 }
  0x8c   : > { %7601 = vmatmul.mubr.msk.bf16.gmra.mxu0 %vm1011_vm3, %v6806_v4  ;;  %7578 = vmatprep.mubr.msk.bf16.mxu1 %vm1011_vm3, %v6760_v54  ;;  %v2421_v4 = vrot.slane %v2419_v58, 5  ;;  %v1654_v54 = vsel %vm8623_vm6, %v6793_v20, %v1653_v46  ;;  %v2442_v58 = vrot.slane %v2440_v42, 4  ;;  %v2464_v20 = vshrl.u32 %v6908_v18, 16 }
  0x8d   : > { %7604 = vmatprep.mubr.msk.bf16.mxu0 %vm1011_vm3, %v6807_v48  ;;  %v6794_v48 = vrot.slane %v1529_v31, 9  ;;  %v2467_v31 = vshll.u32 %v6908_v18, 16  ;;  %v6811_v56 = vcombine.low %v1654_v54, %v1657_v38  ;;  %v2414_v9 = vsel %vm8318_vm2, %v2409_v53, %v2413_v2  ;;  %v7999_v2 = vld [vmem:[%s8280_s25 + $0x18] sm:$0xff]  }
  0x8e   : > { %v2422_v46 = vor.u32 %v2421_v4, %v2418_v39  ;;  %v2446_v49 = vor.u32 %v2445_v14, %v2442_v58  ;;  %v6914_v39 = vld [vmem:[%s8280_s25 + $0x48] sm:$0xf]  ;;  %v8887_v4 = vrot.slane %v2449_v55, 5  ;;  %v2466_v17 = vrot.slane %v2464_v20, 4 }
  0x8f   : > { %v8862_v32 = vsel %vm8623_vm6, %v6794_v48, %v1660_v60  ;;  %v2432_v60 = vor.u32 %v2431_v15, %v8847_v59  ;;  %v2469_v47 = vrot.slane %v2467_v31, 5  ;;  %v8892_v42 = vrot.slane %v2473_v40, 5  ;;  %v8920_v15 = vld [vmem:[%s8280_s25 + $0x58] sm:$0xf]  ;;  %v8000_v58 = vld [vmem:[%s8280_s25 + $0x24] sm:$0xff]  }
  0x90   : > { %v8877_v21 = vrot.slane %v2422_v46, 4  ;;  %v2488_v54 = vshrl.u32 %v6911_v3, 16  ;;  %v2491_v48 = vshll.u32 %v6911_v3, 16  ;;  %v2512_v51 = vshrl.u32 %v6914_v39, 16  ;;  %v8935_v3 = vld [vmem:[%s8280_s25 + $0x50] sm:$0x1] }
  0x91   : > { %v8910_v44 = vrot.slane %v2432_v60, 4  ;;  %v8914_v7 = vrot.slane %v2446_v49, 4  ;;  %v2525_v53 = vshrl.u32 %v8895_v50, 16  ;;  %v2470_v14 = vor.u32 %v2469_v47, %v2466_v17 }
  0x92   : > { %v2483_v55 = vshll.u32 %v8890_v34, 16  ;;  %v2490_v20 = vrot.slane %v2488_v54, 4  ;;  %v2493_v31 = vrot.slane %v2491_v48, 5  ;;  %v2461_v49 = vrot.slane %v2459_v26, 5  ;;  %v6920_v54 = vld [vmem:[%s8280_s25 + $0x60] sm:$0xf] }
  0x93   : > { %7579 = vmatmul.mubr.msk.bf16.gmra.mxu1 %vm1011_vm3, %v6761_v62  ;;  %v2453_v62 = vshrl.u32 %v8832_v8, 16  ;;  %v2545_v47 = vshll.u32 %v8920_v15, 16  ;;  %v2438_v26 = vsel %vm8318_vm2, %v8910_v44, %v8879_v57  ;;  %v2531_v44 = vshll.u32 %v8935_v3, 16 }
  0x94   : > { %7605 = vmatmul.mubr.msk.bf16.gmra.mxu0 %vm1011_vm3, %v6808_v13  ;;  %7582 = vmatprep.mubr.msk.bf16.mxu1 %vm1011_vm3, %v6762_v12  ;;  %v2477_v12 = vshrl.u32 %v8843_v43, 16  ;;  %v8868_v13 = vld [vmem:[%s8280_s25 + $0x40] sm:$0xf]  ;;  %v2485_v17 = vrot.slane %v2483_v55, 5  ;;  %v2560_v63 = vshrl.u32 %v6920_v54, 16  ;;  %v2563_v24 = vshll.u32 %v6920_v54, 16 }
  0x95   : > { %7608 = vmatprep.mubr.msk.bf16.mxu0 %vm1011_vm3, %v6809_v0  ;;  %v8872_v0 = vsel %vm8623_vm6, %v1662_v41, %v1663_v30  ;;  %v2455_v52 = vrot.slane %v2453_v62, 4  ;;  %v2497_v18 = vshll.u32 %v8868_v13, 16  ;;  %v2501_v38 = vshrl.u32 %v8868_v13, 16  ;;  %v8925_v62 = vld [vmem:[%s8280_s25 + $0x44] sm:$0x1] }
  0x96   : > { %v2479_v45 = vrot.slane %v2477_v12, 4  ;;  %v6812_v30 = vcombine.low %v8862_v32, %v8872_v0  ;;  %v8908_v41 = vcombine.low %v2404_v16, %v2414_v9  ;;  %v2514_v0 = vrot.slane %v2512_v51, 4 }
  0x97   : > { %v2456_v46 = vor.u32 %v2455_v52, %v8887_v4  ;;  %v8932_v40 = vrot.slane %v2497_v18, 5  ;;  %v2503_v12 = vrot.slane %v2501_v38, 4  ;;  %v2527_v52 = vrot.slane %v2525_v53, 4 }
  0x98   : > { %v2480_v32 = vor.u32 %v2479_v45, %v8892_v42  ;;  %v2549_v45 = vshrl.u32 %v8920_v15, 16  ;;  %v2494_v18 = vor.u32 %v2493_v31, %v2490_v20  ;;  %v2507_v38 = vshll.u32 %v8925_v62, 16 }
  0x99   : > { %v2457_v60 = vrot.slane %v2456_v46, 4  ;;  %v2452_v46 = vsel %vm8318_vm2, %v8914_v7, %v8887_v4  ;;  %v8003_v7 = vld [vmem:[%s8280_s25 + $0x3c] sm:$0xff]  }
  0x9a   : > { %v2481_v48 = vrot.slane %v2480_v32, 4  ;;  %v2551_v53 = vrot.slane %v2549_v45, 4  ;;  %v2495_v20 = vrot.slane %v2494_v18, 4  ;;  %v2509_v4 = vrot.slane %v2507_v38, 5 }
  0x9b   : > { %7583 = vmatmul.mubr.msk.bf16.gmra.mxu1 %vm1011_vm3, %v6763_v23  ;;  %v2515_v23 = vshll.u32 %v6914_v39, 16  ;;  %v8937_v39 = vrot.slane %v2521_v25, 5  ;;  %v2462_v25 = vsel %vm8318_vm2, %v2457_v60, %v2461_v49  ;;  %v2562_v60 = vrot.slane %v2560_v63, 4  ;;  %v9031_v63 = vld [vmem:[%s8280_s25 + $0x74] sm:$0x1] }
  0x9c   : > { %7609 = vmatmul.mubr.msk.bf16.gmra.mxu0 %vm1011_vm3, %v6810_v22  ;;  %7622 = vmatprep.mubr.msk.bf16.mxu1 %vm1011_vm3, %v7998_v5  ;;  %v6917_v22 = vld [vmem:[%s8280_s25 + $0x54] sm:$0xf]  ;;  %v2486_v55 = vsel %vm8318_vm2, %v2481_v48, %v2485_v17  ;;  %v2565_v49 = vrot.slane %v2563_v24, 5  ;;  %v6951_v45 = vcombine.low %v2452_v46, %v2462_v25  ;;  %v2500_v54 = vsel %vm8318_vm2, %v2495_v20, %v8932_v40  ;;  %v9016_v48 = vld [vmem:[%s8280_s25 + $0x70] sm:$0xf] }
  0x9d   : > { %7612 = vmatprep.mubr.msk.bf16.mxu0 %vm1011_vm3, %v6811_v56  ;;  %v2428_v56 = vsel %vm8318_vm2, %v8877_v21, %v8847_v59  ;;  %v2517_v16 = vrot.slane %v2515_v23, 5  ;;  %v2536_v5 = vshrl.u32 %v6917_v22, 16  ;;  %v2539_v9 = vshll.u32 %v6917_v22, 16  ;;  %v8942_v59 = vld [vmem:[%s11225_s3 + $0x38] sm:$0xff]   ;;  %11297 = vst [vmem:[#allocation6_spill] sm:$0xff] %v9031_v63 }
  0x9e   : > { %11296 = vst [vmem:[#allocation7_spill] sm:$0xff] %v8942_v59  ;;  %v2471_v21 = vrot.slane %v2470_v14, 4  ;;  %v2528_v57 = vor.u32 %v2527_v52, %v8937_v39  ;;  %v6950_v52 = vcombine.low %v2428_v56, %v2438_v26  ;;  %v2593_v24 = vshll.u32 %v9016_v48, 16 }
  0x9f   : > { %v2518_v51 = vor.u32 %v2517_v16, %v2514_v0  ;;  %v2538_v23 = vrot.slane %v2536_v5, 4  ;;  %v2541_v22 = vrot.slane %v2539_v9, 5  ;;  %v2533_v5 = vrot.slane %v2531_v44, 5  ;;  %v8987_v9 = vld [vmem:[%s8280_s25 + $0x68] sm:$0x1] }
  0xa0   : > { %v2476_v14 = vsel %vm8318_vm2, %v2471_v21, %v8892_v42  ;;  %v2529_v16 = vrot.slane %v2528_v57, 4  ;;  %v2579_v38 = vshll.u32 %v8987_v9, 16 }
  0xa1   : > { %v2519_v32 = vrot.slane %v2518_v51, 4  ;;  %v8998_v56 = vcombine.low %v2476_v14, %v2486_v55  ;;  %v9023_v51 = vld [vmem:[%s8280_s25 + $0x7c] sm:$0xf] }
  0xa2   : > { %v2534_v18 = vsel %vm8318_vm2, %v2529_v16, %v2533_v5  ;;  %v2617_v20 = vshll.u32 %v9023_v51, 16  ;;  %v9054_v16 = vld [vmem:[%s11225_s3 + $0x40] sm:$0xff]  }
  0xa3   : > { %7623 = vmatmul.mubr.msk.bf16.vlgmr.msra.gmra.mxu1 %vm1011_vm3, %v7999_v2  ;;  %v8964_v2 = vld [vmem:[%s8280_s25 + $0x5c] sm:$0x1]  ;;  %v2524_v37 = vsel %vm8318_vm2, %v2519_v32, %v8937_v39  ;;  %v9048_v32 = vrot.slane %v2579_v38, 5  ;;  %11298 = vst [vmem:[#allocation10_spill] sm:$0xff] %v9054_v16 }
  0xa4   : > { %7613 = vmatmul.mubr.msk.bf16.gmra.mxu0 %vm1011_vm3, %v6812_v30  ;;  %7626 = vmatprep.mubr.msk.bf16.mxu1 %vm1011_vm3, %v8000_v58  ;;  %v2504_v30 = vor.u32 %v2503_v12, %v8932_v40  ;;  %v8976_v58 = vld [vmem:[%s8280_s25 + $0x64] sm:$0xf]  ;;  %v2542_v12 = vor.u32 %v2541_v22, %v2538_v23  ;;  %v2555_v0 = vshll.u32 %v8964_v2, 16  ;;  %v6926_v40 = vld [vmem:[%s8280_s25 + $0x78] sm:$0xf]  ;;  %v8005_v23 = vld [vmem:[%s8280_s25 + $0x48] sm:$0xff]   ;;  %v9038_v55 = vcombine.low %v2524_v37, %v2534_v18 }
  0xa5   : > { %7616 = vmatprep.mubr.msk.bf16.mxu0 %vm1011_vm3, %v6813_v36  ;;  %7689 = vmatpush3.bf16.msra.mxu1 %v8608_v1  ;;  %v8001_v36 = vld [vmem:[%s8280_s25 + $0x30] sm:$0xff]   ;;  %v8973_v1 = vrot.slane %v2545_v47, 5  ;;  %v2569_v21 = vshll.u32 %v8976_v58, 16  ;;  %v2573_v17 = vshrl.u32 %v8976_v58, 16  ;;  %v6923_v47 = vld [vmem:[%s8280_s25 + $0x6c] sm:$0xf] }
  0xa6   : > { %7756 = vmatprep.subr.bf16.mxu1 %v8942_v59  ;;  %v2505_v31 = vrot.slane %v2504_v30, 4  ;;  %v9013_v26 = vrot.slane %v2555_v0, 5  ;;  %v2584_v30 = vshrl.u32 %v6923_v47, 16  ;;  %v2587_v44 = vshll.u32 %v6923_v47, 16  ;;  %v6929_v0 = vld [vmem:[%s8280_s25 + $0x84] sm:$0xf] }
  0xa7   : > { %v2552_v42 = vor.u32 %v2551_v53, %v8973_v1  ;;  %v9028_v39 = vrot.slane %v2569_v21, 5  ;;  %v2575_v57 = vrot.slane %v2573_v17, 4  ;;  %v2608_v46 = vshrl.u32 %v6926_v40, 16  ;;  %v8006_v53 = vld [vmem:[%s8280_s25 + $0x54] sm:$0xff]   ;;  %v9063_v21 = vld [vmem:[%s8280_s25 + $0x88] sm:$0xf] }
  0xa8   : > { %v2510_v19 = vsel %vm8318_vm2, %v2505_v31, %v2509_v4  ;;  %v2611_v25 = vshll.u32 %v6926_v40, 16  ;;  %v2621_v4 = vshrl.u32 %v9023_v51, 16  ;;  %v6932_v17 = vld [vmem:[%s8280_s25 + $0x90] sm:$0xf]  ;;  %v9068_v47 = vrot.slane %v2593_v24, 5 }
  0xa9   : > { %v9026_v22 = vrot.slane %v2552_v42, 4  ;;  %v9036_v14 = vcombine.low %v2500_v54, %v2510_v19  ;;  %v2603_v42 = vshll.u32 %v9031_v63, 16  ;;  %v9071_v19 = vld [vmem:[%s8280_s25 + $0x80] sm:$0x1]  ;;  %v2610_v37 = vrot.slane %v2608_v46, 4 }
  0xaa   : > { %11299 = vst [vmem:[#allocation9_spill] sm:$0xff] %v9071_v19  ;;  %v2613_v40 = vrot.slane %v2611_v25, 5  ;;  %v9075_v18 = vrot.slane %v2617_v20, 5  ;;  %v2632_v38 = vshrl.u32 %v6929_v0, 16  ;;  %v2627_v20 = vshll.u32 %v9071_v19, 16 }
  0xab   : > { %7627 = vmatmul.mubr.msk.bf16.gmra.mxu1 %vm1011_vm3, %v8001_v36  ;;  %v2597_v36 = vshrl.u32 %v9016_v48, 16  ;;  %v9088_v25 = vrot.slane %v2603_v42, 5 }
  0xac   : > { %7617 = vmatmul.mubr.msk.bf16.gmra.mxu0 %vm1011_vm3, %v6814_v35  ;;  %7630 = vmatprep.mubr.msk.bf16.mxu1 %vm1011_vm3, %v8003_v7  ;;  %v9011_v35 = vrot.slane %v2542_v12, 4  ;;  %v2586_v12 = vrot.slane %v2584_v30, 4  ;;  %v2635_v30 = vshll.u32 %v6929_v0, 16  ;;  %v8008_v7 = vld [vmem:[%s8280_s25 + $0x6c] sm:$0xff]   ;;  %v2614_v5 = vor.u32 %v2613_v40, %v2610_v37 }
  0xad   : > { %7656 = vmatprep.mubr.msk.bf16.mxu0 %vm1011_vm3, %v8908_v41  ;;  %v2566_v41 = vor.u32 %v2565_v49, %v2562_v60  ;;  %v2576_v60 = vor.u32 %v2575_v57, %v9028_v39  ;;  %v2589_v49 = vrot.slane %v2587_v44, 5  ;;  %v2599_v54 = vrot.slane %v2597_v36, 4 }
  0xae   : > { %v2645_v57 = vshrl.u32 %v9063_v21, 16  ;;  %v2656_v44 = vshrl.u32 %v6932_v17, 16 }
  0xaf   : > { %v9046_v31 = vrot.slane %v2566_v41, 4  ;;  %v2623_v41 = vrot.slane %v2621_v4, 4  ;;  %v2577_v36 = vrot.slane %v2576_v60, 4  ;;  %v2590_v46 = vor.u32 %v2589_v49, %v2586_v12  ;;  %v9099_v12 = vld [vmem:[%s8280_s25 + $0xa0] sm:$0xf] }
  0xb0   : > { %v2637_v60 = vrot.slane %v2635_v30, 5  ;;  %v9102_v49 = vld [vmem:[%s8280_s25 + $0x8c] sm:$0x1] }
  0xb1   : > { %v2572_v24 = vsel %vm8318_vm2, %v9046_v31, %v9028_v39  ;;  %v2624_v39 = vor.u32 %v2623_v41, %v9075_v18  ;;  %v2634_v31 = vrot.slane %v2632_v38, 4  ;;  %v2582_v19 = vsel %vm8318_vm2, %v2577_v36, %v9048_v32  ;;  %v9113_v41 = vld [vmem:[%s8280_s25 + $0x98] sm:$0x1] }
  0xb2   : > { %v2591_v63 = vrot.slane %v2590_v46, 4 }
  0xb3   : > { %7631 = vmatmul.mubr.msk.bf16.gmra.mxu1 %vm1011_vm3, %v8005_v23  ;;  %v9078_v23 = vld [vmem:[%s8280_s25 + $0x94] sm:$0xf]  ;;  %v2625_v36 = vrot.slane %v2624_v39, 4  ;;  %v2638_v46 = vor.u32 %v2637_v60, %v2634_v31  ;;  %v9136_v39 = vcombine.low %v2572_v24, %v2582_v19  ;;  %v8010_v31 = vld [vmem:[%s8280_s25 + $0x84] sm:$0xff]  }
  0xb4   : > { %7657 = vmatmul.mubr.msk.bf16.vlgmr.msra.gmra.mxu0 %vm1011_vm3, %v6950_v52  ;;  %7634 = vmatprep.mubr.msk.bf16.mxu1 %vm1011_vm3, %v8006_v53  ;;  %v2641_v52 = vshll.u32 %v9063_v21, 16  ;;  %v2600_v53 = vor.u32 %v2599_v54, %v9068_v47  ;;  %v2665_v4 = vshll.u32 %v9078_v23, 16  ;;  %v2669_v0 = vshrl.u32 %v9078_v23, 16  ;;  %v9153_v60 = vld [vmem:[%s8280_s25 + $0xa4] sm:$0x1] }
  0xb5   : > { %7723 = vmatpush3.bf16.msra.mxu0 %v8676_v27  ;;  %7660 = vmatprep.mubr.msk.bf16.mxu0 %vm1011_vm3, %v6951_v45  ;;  %v2659_v27 = vshll.u32 %v6932_v17, 16  ;;  %v8007_v45 = vld [vmem:[%s8280_s25 + $0x60] sm:$0xff]   ;;  %v6935_v17 = vld [vmem:[%s8280_s25 + $0x9c] sm:$0xf]  ;;  %v2647_v54 = vrot.slane %v2645_v57, 4  ;;  %v2693_v57 = vshrl.u32 %v9099_v12, 16 }
  0xb6   : > { %7790 = vmatprep.subr.bf16.mxu0 %v9054_v16  ;;  %v9104_v42 = vrot.slane %v2641_v52, 5  ;;  %v2658_v16 = vrot.slane %v2656_v44, 4  ;;  %v2680_v37 = vshrl.u32 %v6935_v17, 16  ;;  %v2683_v40 = vshll.u32 %v6935_v17, 16  ;;  %v8009_v17 = vld [vmem:[%s8280_s25 + $0x78] sm:$0xff]  }
  0xb7   : > { %v2661_v59 = vrot.slane %v2659_v27, 5  ;;  %v9115_v38 = vrot.slane %v2665_v4, 5  ;;  %v2671_v30 = vrot.slane %v2669_v0, 4  ;;  %v2689_v52 = vshll.u32 %v9099_v12, 16 }
  0xb8   : > { %v2601_v32 = vrot.slane %v2600_v53, 4  ;;  %v2615_v44 = vrot.slane %v2614_v5, 4  ;;  %v2629_v27 = vrot.slane %v2627_v20, 5  ;;  %v2675_v53 = vshll.u32 %v9113_v41, 16 }
  0xb9   : > { %v2662_v4 = vor.u32 %v2661_v59, %v2658_v16  ;;  %v2682_v20 = vrot.slane %v2680_v37, 4  ;;  %v2685_v0 = vrot.slane %v2683_v40, 5  ;;  %v2672_v59 = vor.u32 %v2671_v30, %v9115_v38 }
  0xba   : > { %v9139_v16 = vrot.slane %v2689_v52, 5  ;;  %v2620_v19 = vsel %vm8318_vm2, %v2615_v44, %v9075_v18  ;;  %v2639_v37 = vrot.slane %v2638_v46, 4  ;;  %v9158_v52 = vld [vmem:[%s8280_s25 + $0xac] sm:$0xf] }
  0xbb   : > { %7635 = vmatmul.mubr.msk.bf16.gmra.mxu1 %vm1011_vm3, %v8007_v45  ;;  %v2648_v45 = vor.u32 %v2647_v54, %v9104_v42  ;;  %v2630_v54 = vsel %vm8318_vm2, %v2625_v36, %v2629_v27  ;;  %v2663_v30 = vrot.slane %v2662_v4, 4  ;;  %v2673_v18 = vrot.slane %v2672_v59, 4  ;;  %v8011_v4 = vld [vmem:[%s8280_s25 + $0x90] sm:$0xff]  }
  0xbc   : > { %7661 = vmatmul.mubr.msk.bf16.gmra.mxu0 %vm1011_vm3, %v8998_v56  ;;  %7638 = vmatprep.mubr.msk.bf16.mxu1 %vm1011_vm3, %v8008_v7  ;;  %v2651_v56 = vshll.u32 %v9102_v49, 16  ;;  %v11300_v7 = vsel %vm8318_vm2, %v9026_v22, %v9013_v26  ;;  %v2695_v26 = vrot.slane %v2693_v57, 4  ;;  %v6938_v22 = vld [vmem:[%s8280_s25 + $0xa8] sm:$0xf]  ;;  %v6982_v57 = vld [vmem:[%s8280_s25 + $0xc] sm:$0xe]  ;;  %v9169_v46 = vcombine.low %v2620_v19, %v2630_v54 }
  0xbd   : > { %7664 = vmatprep.mubr.msk.bf16.mxu0 %vm1011_vm3, %v9036_v14  ;;  %v11301_v14 = vsel %vm8318_vm2, %v9011_v35, %v8973_v1  ;;  %v2596_v1 = vsel %vm8318_vm2, %v2591_v63, %v9068_v47  ;;  %v2606_v35 = vsel %vm8318_vm2, %v2601_v32, %v9088_v25  ;;  %v2649_v40 = vrot.slane %v2648_v45, 4  ;;  %v9193_v19 = vld [vmem:[%s8280_s25 + $0xb0] sm:$0x1] }
  0xbe   : > { %v6955_v5 = vcombine.low %v11301_v14, %v11300_v7  ;;  %v2653_v24 = vrot.slane %v2651_v56, 5  ;;  %v2677_v63 = vrot.slane %v2675_v53, 5  ;;  %v2686_v47 = vor.u32 %v2685_v0, %v2682_v20  ;;  %v6941_v53 = vld [vmem:[%s8280_s25 + $0xb4] sm:$0xf] }
  0xbf   : > { %v2704_v25 = vshrl.u32 %v6938_v22, 16  ;;  %v2707_v32 = vshll.u32 %v6938_v22, 16  ;;  %v2696_v44 = vor.u32 %v2695_v26, %v9139_v16  ;;  %v2699_v27 = vshll.u32 %v9153_v60, 16  ;;  %v9187_v26 = vld [vmem:[%s8280_s25 + $0xb8] sm:$0xf] }
  0xc0   : > { %v3139_v56 = vrot.slane %v8773_v61, 5  ;;  %v6957_v36 = vcombine.low %v2596_v1, %v2606_v35  ;;  %v2713_v45 = vshll.u32 %v9158_v52, 16  ;;  %v2644_v7 = vsel %vm8318_vm2, %v2639_v37, %v9104_v42  ;;  %v8012_v42 = vld [vmem:[%s8280_s25 + $0x9c] sm:$0xff]  }
  0xc1   : > { %v2654_v61 = vsel %vm8318_vm2, %v2649_v40, %v2653_v24  ;;  %v2668_v14 = vsel %vm8318_vm2, %v2663_v30, %v9115_v38  ;;  %v9183_v20 = vrot.slane %v2686_v47, 4  ;;  %v3142_v0 = vrot.slane %v8792_v10, 5  ;;  %v6944_v38 = vld [vmem:[%s8280_s25 + $0xc0] sm:$0xf]  ;;  %v9199_v40 = vld [vmem:[%s8280_s25 + $0xc4] sm:$0xf] }
  0xc2   : > { %v2709_v59 = vrot.slane %v2707_v32, 5  ;;  %v2678_v22 = vsel %vm8318_vm2, %v2673_v18, %v2677_v63  ;;  %v2701_v1 = vrot.slane %v2699_v27, 5  ;;  %v3141_v35 = vrot.slane %v3139_v56, 4  ;;  %11302 = vst [vmem:[#allocation8_spill] sm:$0xff] %v9199_v40  ;;  %v6983_v27 = vld [vmem:[%s8280_s25 + $0x18] sm:$0xe] }
  0xc3   : > { %7639 = vmatmul.mubr.msk.bf16.gmra.mxu1 %vm1011_vm3, %v8009_v17  ;;  %v2706_v17 = vrot.slane %v2704_v25, 4  ;;  %v9196_v24 = vrot.slane %v2713_v45, 5  ;;  %v2728_v37 = vshrl.u32 %v6941_v53, 16  ;;  %v2731_v10 = vshll.u32 %v6941_v53, 16 }
  0xc4   : > { %7665 = vmatmul.mubr.msk.bf16.gmra.mxu0 %vm1011_vm3, %v9038_v55  ;;  %7642 = vmatprep.mubr.msk.bf16.mxu1 %vm1011_vm3, %v8010_v31  ;;  %v2717_v55 = vshrl.u32 %v9158_v52, 16  ;;  %v2697_v31 = vrot.slane %v2696_v44, 4  ;;  %v6959_v30 = vcombine.low %v2644_v7, %v2654_v61  ;;  %v2737_v63 = vshll.u32 %v9187_v26, 16  ;;  %v9231_v61 = vld [vmem:[%s8280_s25 + $0xbc] sm:$0x1] }
  0xc5   : > { %7668 = vmatprep.mubr.msk.bf16.mxu0 %vm1011_vm3, %v6955_v5  ;;  %v6998_v5 = vrot.slane %v6982_v57, 9  ;;  %v2741_v57 = vshrl.u32 %v9187_v26, 16  ;;  %v9207_v25 = vcombine.low %v2668_v14, %v2678_v22  ;;  %v2692_v32 = vsel %vm8318_vm2, %v9183_v20, %v9139_v16  ;;  %v9237_v22 = vld [vmem:[%s8280_s25 + $0xc8] sm:$0x1] }
  0xc6   : > { %v2719_v54 = vrot.slane %v2717_v55, 4  ;;  %v2710_v18 = vor.u32 %v2709_v59, %v2706_v17  ;;  %v3146_v44 = vrot.slane %v8802_v33, 5  ;;  %v2755_v45 = vshll.u32 %v6944_v38, 16 }
  0xc7   : > { %v9203_v47 = vsel %vm8623_vm6, %v6998_v5, %v3139_v56  ;;  %v2752_v56 = vshrl.u32 %v6944_v38, 16  ;;  %v2761_v55 = vshll.u32 %v9199_v40, 16  ;;  %v2765_v7 = vshrl.u32 %v9199_v40, 16  ;;  %v6984_v40 = vld [vmem:[%s8280_s25 + $0x24] sm:$0xe] }
  0xc8   : > { %v2702_v33 = vsel %vm8318_vm2, %v2697_v31, %v2701_v1  ;;  %v2720_v16 = vor.u32 %v2719_v54, %v9196_v24  ;;  %v2730_v14 = vrot.slane %v2728_v37, 4  ;;  %v2733_v5 = vrot.slane %v2731_v10, 5  ;;  %v8014_v31 = vld [vmem:[%s8280_s25 + $0xb4] sm:$0xff]  }
  0xc9   : > { %v9233_v53 = vrot.slane %v2737_v63, 5  ;;  %v2711_v20 = vrot.slane %v2710_v18, 4  ;;  %v6999_v17 = vrot.slane %v6983_v27, 9  ;;  %v3148_v59 = vrot.slane %v3146_v44, 4 }
  0xca   : > { %v2754_v1 = vrot.slane %v2752_v56, 4  ;;  %v9241_v38 = vrot.slane %v2761_v55, 5  ;;  %v2767_v54 = vrot.slane %v2765_v7, 4  ;;  %v2721_v37 = vrot.slane %v2720_v16, 4 }
  0xcb   : > { %7643 = vmatmul.mubr.msk.bf16.gmra.mxu1 %vm1011_vm3, %v8011_v4  ;;  %v2723_v4 = vshll.u32 %v9193_v19, 16  ;;  %v2747_v63 = vshll.u32 %v9231_v61, 16  ;;  %v2734_v18 = vor.u32 %v2733_v5, %v2730_v14  ;;  %v2771_v56 = vshll.u32 %v9237_v22, 16  ;;  %v8015_v14 = vld [vmem:[%s8280_s25 + $0xc0] sm:$0xff]  }
  0xcc   : > { %7669 = vmatmul.mubr.msk.bf16.gmra.mxu0 %vm1011_vm3, %v9136_v39  ;;  %7646 = vmatprep.mubr.msk.bf16.mxu1 %vm1011_vm3, %v8012_v42  ;;  %v9226_v39 = vsel %vm8623_vm6, %v3141_v35, %v3142_v0  ;;  %v3149_v42 = vrot.slane %v8826_v28, 5  ;;  %v8013_v0 = vld [vmem:[%s8280_s25 + $0xa8] sm:$0xff]   ;;  %v2757_v35 = vrot.slane %v2755_v45, 5  ;;  %v6961_v45 = vcombine.low %v2692_v32, %v2702_v33 }
  0xcd   : > { %7672 = vmatprep.mubr.msk.bf16.mxu0 %vm1011_vm3, %v6957_v36  ;;  %v2743_v36 = vrot.slane %v2741_v57, 4  ;;  %v2725_v10 = vrot.slane %v2723_v4, 5  ;;  %v3153_v57 = vrot.slane %v8832_v8, 5  ;;  %v7016_v28 = vcombine.low %v9203_v47, %v9226_v39  ;;  %v6985_v39 = vld [vmem:[%s8280_s25 + $0x30] sm:$0xe] }
  0xce   : > { %v2716_v55 = vsel %vm8318_vm2, %v2711_v20, %v9196_v24  ;;  %v9255_v7 = vsel %vm8623_vm6, %v6999_v17, %v3146_v44  ;;  %v3160_v8 = vrot.slane %v8843_v43, 5  ;;  %v9263_v47 = vsel %vm8623_vm6, %v3148_v59, %v3149_v42  ;;  %v6986_v4 = vld [vmem:[%s8280_s25 + $0x3c] sm:$0xe]  ;;  %v6987_v17 = vld [vmem:[%s8280_s25 + $0x48] sm:$0xe] }
  0xcf   : > { %v2744_v27 = vor.u32 %v2743_v36, %v9233_v53  ;;  %v7000_v32 = vrot.slane %v6984_v40, 9  ;;  %v2758_v24 = vor.u32 %v2757_v35, %v2754_v1  ;;  %v2768_v33 = vor.u32 %v2767_v54, %v9241_v38 }
  0xd0   : > { %v2726_v43 = vsel %vm8318_vm2, %v2721_v37, %v2725_v10  ;;  %v2749_v44 = vrot.slane %v2747_v63, 5  ;;  %v3155_v16 = vrot.slane %v3153_v57, 4  ;;  %v2735_v5 = vrot.slane %v2734_v18, 4 }
  0xd1   : > { %v2745_v40 = vrot.slane %v2744_v27, 4  ;;  %v2773_v36 = vrot.slane %v2771_v56, 5  ;;  %v3167_v20 = vrot.slane %v8868_v13, 5  ;;  %v7001_v59 = vrot.slane %v6985_v39, 9  ;;  %v6988_v27 = vld [vmem:[%s8280_s25 + $0x54] sm:$0xe] }
  0xd2   : > { %v3162_v42 = vrot.slane %v3160_v8, 4  ;;  %v7017_v1 = vcombine.low %v9255_v7, %v9263_v47  ;;  %v2769_v35 = vrot.slane %v2768_v33, 4  ;;  %v9282_v54 = vsel %vm8623_vm6, %v7000_v32, %v3153_v57 }
  0xd3   : > { %7647 = vmatmul.mubr.msk.bf16.gmra.mxu1 %vm1011_vm3, %v8013_v0  ;;  %v3174_v0 = vrot.slane %v8895_v50, 5  ;;  %v7002_v37 = vrot.slane %v6986_v4, 9  ;;  %v7003_v10 = vrot.slane %v6987_v17, 9  ;;  %v2750_v50 = vsel %vm8318_vm2, %v2745_v40, %v2749_v44  ;;  %v11303_v17 = vld [vmem:[#allocation6_spill] sm:$0xff] }
  0xd4   : > { %7673 = vmatmul.mubr.msk.bf16.gmra.mxu0 %vm1011_vm3, %v9169_v46  ;;  %7650 = vmatprep.mubr.msk.bf16.mxu1 %vm1011_vm3, %v8014_v31  ;;  %v3156_v46 = vrot.slane %v8851_v11, 5  ;;  %v6962_v31 = vcombine.low %v2716_v55, %v2726_v43  ;;  %v2759_v11 = vrot.slane %v2758_v24, 4  ;;  %v3169_v63 = vrot.slane %v3167_v20, 4 }
  0xd5   : > { %7676 = vmatprep.mubr.msk.bf16.mxu0 %vm1011_vm3, %v6959_v30  ;;  %v3163_v30 = vrot.slane %v8890_v34, 5  ;;  %v2740_v34 = vsel %vm8318_vm2, %v2735_v5, %v9233_v53  ;;  %v3170_v18 = vrot.slane %v8925_v62, 5  ;;  %v9295_v57 = vsel %vm8623_vm6, %v7001_v59, %v3160_v8  ;;  %v6992_v5 = vld [vmem:[%s8280_s25 + $0x84] sm:$0xe] }
  0xd6   : > { %v3157_v13 = vsel %vm8623_vm6, %v3155_v16, %v3156_v46  ;;  %v3176_v55 = vrot.slane %v3174_v0, 4  ;;  %v3177_v7 = vrot.slane %v8935_v3, 5  ;;  %v2764_v53 = vsel %vm8318_vm2, %v2759_v11, %v9241_v38  ;;  %v6989_v38 = vld [vmem:[%s8280_s25 + $0x60] sm:$0xe]  ;;  %v6991_v46 = vld [vmem:[%s8280_s25 + $0x78] sm:$0xe] }
  0xd7   : > { %v9299_v56 = vsel %vm8623_vm6, %v3162_v42, %v3163_v30  ;;  %v7018_v62 = vcombine.low %v9282_v54, %v3157_v13  ;;  %v2774_v8 = vsel %vm8318_vm2, %v2769_v35, %v2773_v36  ;;  %v3181_v47 = vrot.slane %v8920_v15, 5  ;;  %v6993_v42 = vld [vmem:[%s8280_s25 + $0x90] sm:$0xe] }
  0xd8   : > { %v6963_v3 = vcombine.low %v2740_v34, %v2750_v50  ;;  %v9320_v32 = vsel %vm8623_vm6, %v7003_v10, %v3174_v0  ;;  %v3188_v24 = vrot.slane %v8976_v58, 5  ;;  %v7019_v15 = vcombine.low %v9295_v57, %v9299_v56  ;;  %v6994_v50 = vld [vmem:[%s8280_s25 + $0x9c] sm:$0xe] }
  0xd9   : > { %v3195_v33 = vrot.slane %v9016_v48, 5  ;;  %v3202_v39 = vrot.slane %v9023_v51, 5  ;;  %v9333_v43 = vcombine.low %v2764_v53, %v2774_v8  ;;  %v9337_v44 = vsel %vm8623_vm6, %v3176_v55, %v3177_v7 }
  0xda   : > { %v7004_v58 = vrot.slane %v6988_v27, 9  ;;  %v3184_v16 = vrot.slane %v8964_v2, 5  ;;  %v3183_v4 = vrot.slane %v3181_v47, 4  ;;  %v3209_v40 = vrot.slane %v9063_v21, 5  ;;  %v11304_v2 = vld [vmem:[#allocation9_spill] sm:$0xff] }
  0xdb   : > { %7651 = vmatmul.mubr.msk.bf16.gmra.mxu1 %vm1011_vm3, %v8015_v14  ;;  %v7005_v14 = vrot.slane %v6989_v38, 9  ;;  %v3216_v48 = vrot.slane %v9078_v23, 5  ;;  %v3190_v36 = vrot.slane %v3188_v24, 4  ;;  %v3191_v51 = vrot.slane %v8987_v9, 5 }
  0xdc   : > { %7677 = vmatmul.mubr.msk.bf16.gmra.mxu0 %vm1011_vm3, %v9207_v25  ;;  %7690 = vmatprep.mubr.msk.bf16.mxu1 %vm1011_vm3, %v7016_v28  ;;  %v9316_v25 = vsel %vm8623_vm6, %v7002_v37, %v3167_v20  ;;  %v6990_v28 = vld [vmem:[%s8280_s25 + $0x6c] sm:$0xe]  ;;  %v3198_v59 = vrot.slane %v11303_v17, 5  ;;  %v3197_v30 = vrot.slane %v3195_v33, 4  ;;  %v7007_v0 = vrot.slane %v6991_v46, 9 }
  0xdd   : > { %7680 = vmatprep.mubr.msk.bf16.mxu0 %vm1011_vm3, %v6961_v45  ;;  %v9328_v45 = vsel %vm8623_vm6, %v3169_v63, %v3170_v18  ;;  %v7006_v20 = vrot.slane %v6990_v28, 9  ;;  %v3204_v11 = vrot.slane %v3202_v39, 4  ;;  %v3205_v35 = vrot.slane %v11304_v2, 5  ;;  %v11305_v63 = vld [vmem:[#allocation7_spill] sm:$0xff]  ;;  %v7116_v46 = vld [vmem:[%s8280_s25 + $0x18] sm:$0xf] }
  0xde   : > { %v9350_v54 = vsel %vm8623_vm6, %v7004_v58, %v3181_v47  ;;  %v7008_v21 = vrot.slane %v6992_v5, 9  ;;  %v3212_v23 = vrot.slane %v9102_v49, 5  ;;  %v3223_v9 = vrot.slane %v9099_v12, 5  ;;  %v8017_v47 = vld [vmem:[%s8280_s25 + $0x18] sm:$0xff]  }
  0xdf   : > { %v3211_v13 = vrot.slane %v3209_v40, 4  ;;  %v7009_v37 = vrot.slane %v6993_v42, 9  ;;  %v3218_v10 = vrot.slane %v3216_v48, 4  ;;  %v3219_v34 = vrot.slane %v9113_v41, 5  ;;  %v9452_v42 = vld [vmem:[%s8280_s25 + $0x28] sm:$0xf] }
  0xe0   : > { %v9362_v49 = vsel %vm8623_vm6, %v3183_v4, %v3184_v16  ;;  %v9366_v12 = vsel %vm8623_vm6, %v7005_v14, %v3188_v24  ;;  %v3230_v41 = vrot.slane %v9158_v52, 5  ;;  %v9377_v18 = vsel %vm8623_vm6, %v7006_v20, %v3195_v33  ;;  %v6996_v16 = vld [vmem:[%s8280_s25 + $0xb4] sm:$0xe] }
  0xe1   : > { %v9381_v27 = vsel %vm8623_vm6, %v3197_v30, %v3198_v59  ;;  %v9385_v55 = vsel %vm8623_vm6, %v7007_v0, %v3202_v39  ;;  %v9389_v7 = vsel %vm8623_vm6, %v3204_v11, %v3205_v35  ;;  %v9393_v52 = vsel %vm8623_vm6, %v7008_v21, %v3209_v40  ;;  %v7122_v30 = vld [vmem:[%s8280_s25 + $0x30] sm:$0xf] }
  0xe2   : > { %v3225_v53 = vrot.slane %v3223_v9, 4  ;;  %v3226_v8 = vrot.slane %v9153_v60, 5  ;;  %v9403_v38 = vsel %vm8623_vm6, %v7009_v37, %v3216_v48  ;;  %v9407_v24 = vsel %vm8623_vm6, %v3218_v10, %v3219_v34  ;;  %v9438_v48 = vld [vmem:[%s8280_s25 + $0x1c] sm:$0xf]  ;;  %v11306_v11 = vld [vmem:[#allocation8_spill] sm:$0xff]  ;;  %v8019_v10 = vld [vmem:[%s8280_s25 + $0x24] sm:$0xff]  }
  0xe3   : > { %7691 = vmatmul.mubr.msk.bf16.vlgmr.msra.gmra.mxu1 %vm1011_vm3, %v7017_v1  ;;  %v6995_v1 = vld [vmem:[%s8280_s25 + $0xa8] sm:$0xe]  ;;  %v7020_v33 = vcombine.low %v9316_v25, %v9328_v45  ;;  %v7021_v60 = vcombine.low %v9320_v32, %v9337_v44  ;;  %v3232_v39 = vrot.slane %v3230_v41, 4  ;;  %v3233_v58 = vrot.slane %v9193_v19, 5  ;;  %v6997_v45 = vld [vmem:[%s8280_s25 + $0xc0] sm:$0xe] }
  0xe4   : > { %7681 = vmatmul.mubr.msk.bf16.gmra.mxu0 %vm1011_vm3, %v6962_v31  ;;  %7694 = vmatprep.mubr.msk.bf16.mxu1 %vm1011_vm3, %v7018_v62  ;;  %v9370_v31 = vsel %vm8623_vm6, %v3190_v36, %v3191_v51  ;;  %v7010_v62 = vrot.slane %v6994_v50, 9  ;;  %v7011_v28 = vrot.slane %v6995_v1, 9  ;;  %v7022_v4 = vcombine.low %v9350_v54, %v9362_v49  ;;  %v7119_v36 = vld [vmem:[%s8280_s25 + $0x24] sm:$0xf]  ;;  %v9521_v54 = vld [vmem:[%s8280_s25 + $0x38] sm:$0x1] }
  0xe5   : > { %7684 = vmatprep.mubr.msk.bf16.mxu0 %vm1011_vm3, %v6963_v3  ;;  %7757 = vmatpush3.bf16.msra.mxu1 %v11305_v63  ;;  %v9399_v3 = vsel %vm8623_vm6, %v3211_v13, %v3212_v23  ;;  %v7023_v14 = vcombine.low %v9366_v12, %v9370_v31  ;;  %v9435_v40 = vsel %vm8623_vm6, %v3225_v53, %v3226_v8  ;;  %v7012_v20 = vrot.slane %v6996_v16, 9  ;;  %v9469_v23 = vld [vmem:[%s8280_s25 + $0x34] sm:$0xf]  ;;  %v7137_v12 = vld [vmem:[%s8280_s25 + $0x6c] sm:$0xf] }
  0xe6   : > { %v9431_v44 = vsel %vm8623_vm6, %v7010_v62, %v3223_v9  ;;  %v9449_v51 = vsel %vm8623_vm6, %v7011_v28, %v3230_v41  ;;  %v3962_v17 = vshrl.u32 %v7116_v46, 16  ;;  %v3965_v59 = vshll.u32 %v7116_v46, 16  ;;  %v9472_v9 = vld [vmem:[%s8280_s25 + $0x20] sm:$0x1] }
  0xe7   : > { %v9458_v57 = vsel %vm8623_vm6, %v3232_v39, %v3233_v58  ;;  %v3237_v56 = vrot.slane %v9187_v26, 5  ;;  %v3244_v2 = vrot.slane %v11306_v11, 5  ;;  %v3971_v35 = vshll.u32 %v9438_v48, 16 }
  0xe8   : > { %v3975_v21 = vshrl.u32 %v9438_v48, 16  ;;  %v3986_v13 = vshrl.u32 %v7119_v36, 16  ;;  %v3989_v26 = vshll.u32 %v7119_v36, 16  ;;  %v3999_v37 = vshrl.u32 %v9452_v42, 16 }
  0xe9   : > { %v3964_v1 = vrot.slane %v3962_v17, 4  ;;  %v3967_v41 = vrot.slane %v3965_v59, 5  ;;  %v4010_v63 = vshrl.u32 %v7122_v30, 16  ;;  %v4013_v62 = vshll.u32 %v7122_v30, 16  ;;  %v7125_v17 = vld [vmem:[%s8280_s25 + $0x3c] sm:$0xf] }
  0xea   : > { %v4019_v53 = vshll.u32 %v9469_v23, 16  ;;  %v4023_v8 = vshrl.u32 %v9469_v23, 16  ;;  %v3239_v28 = vrot.slane %v3237_v56, 4  ;;  %v3977_v39 = vrot.slane %v3975_v21, 4  ;;  %v9500_v21 = vld [vmem:[%s8280_s25 + $0x2c] sm:$0x1] }
  0xeb   : > { %7695 = vmatmul.mubr.msk.bf16.gmra.mxu1 %vm1011_vm3, %v7019_v15  ;;  %v3240_v15 = vrot.slane %v9231_v61, 5  ;;  %v3995_v61 = vshll.u32 %v9452_v42, 16  ;;  %v3981_v58 = vshll.u32 %v9472_v9, 16  ;;  %v3988_v16 = vrot.slane %v3986_v13, 4  ;;  %v9503_v13 = vld [vmem:[%s8280_s25 + $0x40] sm:$0xf] }
  0xec   : > { %7685 = vmatmul.mubr.msk.bf16.gmra.mxu0 %vm1011_vm3, %v9333_v43  ;;  %7698 = vmatprep.mubr.msk.bf16.mxu1 %vm1011_vm3, %v7020_v33  ;;  %v7013_v43 = vrot.slane %v6997_v45, 9  ;;  %v9483_v33 = vrot.slane %v3971_v35, 5  ;;  %v3991_v46 = vrot.slane %v3989_v26, 5  ;;  %v4001_v36 = vrot.slane %v3999_v37, 4  ;;  %v11307_v26 = vld [vmem:[#allocation10_spill] sm:$0xff] }
  0xed   : > { %7724 = vmatprep.mubr.msk.bf16.mxu0 %vm1011_vm3, %v8017_v47  ;;  %v8020_v47 = vld [vmem:[%s8280_s25 + $0x30] sm:$0xff]   ;;  %v9486_v45 = vrot.slane %v3995_v61, 5  ;;  %v9493_v59 = vsel %vm8623_vm6, %v7012_v20, %v3237_v56  ;;  %v3246_v11 = vrot.slane %v3244_v2, 4  ;;  %v3968_v35 = vor.u32 %v3967_v41, %v3964_v1 }
  0xee   : > { %v9497_v30 = vsel %vm8623_vm6, %v7013_v43, %v3244_v2  ;;  %v4015_v20 = vrot.slane %v4013_v62, 5  ;;  %v9510_v56 = vrot.slane %v4019_v53, 5  ;;  %v4025_v43 = vrot.slane %v4023_v8, 4  ;;  %v7128_v2 = vld [vmem:[%s8280_s25 + $0x48] sm:$0xf] }
  0xef   : > { %v9516_v61 = vsel %vm8623_vm6, %v3239_v28, %v3240_v15  ;;  %v9518_v37 = vrot.slane %v3981_v58, 5  ;;  %v4034_v49 = vshrl.u32 %v7125_v17, 16  ;;  %v3978_v1 = vor.u32 %v3977_v39, %v9483_v33  ;;  %v9529_v53 = vld [vmem:[%s8280_s25 + $0x4c] sm:$0xf]  ;;  %v8021_v15 = vld [vmem:[%s8280_s25 + $0x3c] sm:$0xff]  }
  0xf0   : > { %v3992_v41 = vor.u32 %v3991_v46, %v3988_v16  ;;  %v4005_v62 = vshll.u32 %v9500_v21, 16  ;;  %v4043_v8 = vshll.u32 %v9503_v13, 16  ;;  %v4058_v28 = vshrl.u32 %v7128_v2, 16 }
  0xf1   : > { %v4061_v58 = vshll.u32 %v7128_v2, 16  ;;  %v4026_v39 = vor.u32 %v4025_v43, %v9510_v56  ;;  %v4029_v16 = vshll.u32 %v9521_v54, 16  ;;  %v4036_v46 = vrot.slane %v4034_v49, 4 }
  0xf2   : > { %v4067_v0 = vshll.u32 %v9529_v53, 16  ;;  %v4071_v19 = vshrl.u32 %v9529_v53, 16  ;;  %v3979_v25 = vrot.slane %v3978_v1, 4  ;;  %v3993_v50 = vrot.slane %v3992_v41, 4 }
  0xf3   : > { %7699 = vmatmul.mubr.msk.bf16.gmra.mxu1 %vm1011_vm3, %v7021_v60  ;;  %v4012_v60 = vrot.slane %v4010_v63, 4  ;;  %v4002_v63 = vor.u32 %v4001_v36, %v9486_v45  ;;  %v4007_v2 = vrot.slane %v4005_v62, 5  ;;  %v4060_v49 = vrot.slane %v4058_v28, 4  ;;  %v9581_v28 = vld [vmem:[%s8280_s25 + $0x50] sm:$0x1] }
  0xf4   : > { %7725 = vmatmul.mubr.msk.bf16.vlgmr.msra.gmra.mxu0 %vm1011_vm3, %v8019_v10  ;;  %7702 = vmatprep.mubr.msk.bf16.mxu1 %vm1011_vm3, %v7022_v4  ;;  %v4037_v4 = vshll.u32 %v7125_v17, 16  ;;  %v9523_v10 = vpop.f32.mrf.mxu0  ;;  %v3969_v17 = vrot.slane %v3968_v35, 4  ;;  %v11309_v1 = vcombine.low %v9377_v18, %v9381_v27  ;;  %v11310_v31 = vrot.slane %v9237_v22, 5 }
  0xf5   : > { %7791 = vmatpush3.bf16.msra.mxu0 %v11307_v26  ;;  %7728 = vmatprep.mubr.msk.bf16.mxu0 %vm1011_vm3, %v8020_v47  ;;  %v4047_v47 = vshrl.u32 %v9503_v13, 16  ;;  %v8022_v26 = vld [vmem:[%s8280_s25 + $0x48] sm:$0xff]   ;;  %v4016_v34 = vor.u32 %v4015_v20, %v4012_v60  ;;  %v4003_v5 = vrot.slane %v4002_v63, 4  ;;  %v9549_v60 = vld [vmem:[%s8280_s25 + $0x44] sm:$0x1]  ;;  %v9551_v20 = vrot.slane %v4043_v8, 5 }
  0xf6   : > { %v4039_v36 = vrot.slane %v4037_v4, 5  ;;  %v9539_v32 = vpop.f32.mrf.mxu0  ;;  %v4063_v4 = vrot.slane %v4061_v58, 5  ;;  %v4031_v63 = vrot.slane %v4029_v16, 5  ;;  %v4027_v62 = vrot.slane %v4026_v39, 4 }
  0xf7   : > { %v4049_v43 = vrot.slane %v4047_v47, 4  ;;  %v4017_v41 = vrot.slane %v4016_v34, 4  ;;  %v9566_v27 = vrot.slane %v4067_v0, 5  ;;  %v3974_v47 = vsel %vm8318_vm2, %v3969_v17, %v9483_v33  ;;  %v8023_v0 = vld [vmem:[%s8280_s25 + $0x54] sm:$0xff]   ;;  %v8024_v17 = vld [vmem:[%s8280_s25 + $0x60] sm:$0xff]  }
  0xf8   : > { %v4040_v18 = vor.u32 %v4039_v36, %v4036_v46  ;;  %v9568_v8 = vpop.f32.mrf.mxu0  ;;  %v3984_v22 = vsel %vm8318_vm2, %v3979_v25, %v9518_v37  ;;  %v3998_v34 = vsel %vm8318_vm2, %v3993_v50, %v9486_v45  ;;  %v4008_v33 = vsel %vm8318_vm2, %v4003_v5, %v4007_v2  ;;  %v7199_v25 = vld [vmem:[%s8280_s25 + $0x18] sm:$0xe]  ;;  %v7131_v2 = vld [vmem:[%s8280_s25 + $0x54] sm:$0xf] }
  0xf9   : > { %v9546_v35 = vpop.f32.mrf.mxu1  ;;  %v4050_v58 = vor.u32 %v4049_v43, %v9551_v20  ;;  %v4709_v37 = vrot.slane %v9438_v48, 5  ;;  %v4022_v16 = vsel %vm8318_vm2, %v4017_v41, %v9510_v56  ;;  %v4032_v5 = vsel %vm8318_vm2, %v4027_v62, %v4031_v63  ;;  %v9607_v43 = vld [vmem:[%s8280_s25 + $0x58] sm:$0xf]  ;;  %v7134_v41 = vld [vmem:[%s8280_s25 + $0x60] sm:$0xf] }
  0xfa   : > { %11308 = vst [vmem:[#allocation13_spill] sm:$0xff] %v9546_v35  ;;  %v9601_v46 = vrot.slane %v4040_v18, 4  ;;  %v4077_v36 = vshll.u32 %v9581_v28, 16  ;;  %v11312_v63 = vcombine.low %v9385_v55, %v9389_v7  ;;  %v9632_v55 = vcombine.low %v4022_v16, %v4032_v5 }
  0xfb   : > { %7703 = vmatmul.mubr.msk.bf16.gmra.mxu1 %vm1011_vm3, %v7023_v14  ;;  %v9564_v14 = vsel %vm8623_vm6, %v3246_v11, %v11310_v31  ;;  %v4053_v11 = vshll.u32 %v9549_v60, 16  ;;  %v7215_v31 = vrot.slane %v7199_v25, 9  ;;  %v4051_v18 = vrot.slane %v4050_v58, 4 }
  0xfc   : > { %7729 = vmatmul.mubr.msk.bf16.gmra.mxu0 %vm1011_vm3, %v8021_v15  ;;  %7706 = vmatprep.mubr.msk.bf16.mxu1 %vm1011_vm3, %v11309_v1  ;;  %v4073_v15 = vrot.slane %v4071_v19, 4  ;;  %v9584_v19 = vpop.f32.mrf.mxu1  ;;  %v9613_v1 = vcombine.low %v3998_v34, %v4008_v33  ;;  %v9625_v34 = vld [vmem:[%s8280_s25 + $0x64] sm:$0xf]  ;;  %v4082_v7 = vshrl.u32 %v7131_v2, 16  ;;  %v4091_v33 = vshll.u32 %v9607_v43, 16 }
  0xfd   : > { %7732 = vmatprep.mubr.msk.bf16.mxu0 %vm1011_vm3, %v8022_v26  ;;  %11311 = vst [vmem:[#allocation12_spill] sm:$0xff] %v9584_v19  ;;  %v4064_v26 = vor.u32 %v4063_v4, %v4060_v49  ;;  %v9609_v49 = vpop.f32.mrf.mxu0  ;;  %v9611_v4 = vcombine.low %v3974_v47, %v3984_v22  ;;  %v4055_v56 = vrot.slane %v4053_v11, 5  ;;  %v4711_v47 = vrot.slane %v4709_v37, 4 }
  0xfe   : > { %v4074_v48 = vor.u32 %v4073_v15, %v9566_v27  ;;  %v9621_v62 = vpop.f32.mrf.mxu1  ;;  %v4712_v22 = vrot.slane %v9472_v9, 5  ;;  %v11314_v11 = vcombine.low %v9393_v52, %v9399_v3  ;;  %v4046_v9 = vsel %vm8318_vm2, %v9601_v46, %v9551_v20  ;;  %v9640_v52 = vld [vmem:[%s8280_s25 + $0x5c] sm:$0x1] }
  0xff   : > { %11313 = vst [vmem:[#allocation11_spill] sm:$0xff] %v9621_v62  ;;  %v4065_v15 = vrot.slane %v4064_v26, 4  ;;  %v4079_v26 = vrot.slane %v4077_v36, 5  ;;  %v4095_v3 = vshrl.u32 %v9607_v43, 16  ;;  %v4106_v16 = vshrl.u32 %v7134_v41, 16  ;;  %v8026_v20 = vld [vmem:[%s8280_s25 + $0x78] sm:$0xff]  }
 0x100   : > { %v4075_v58 = vrot.slane %v4074_v48, 4  ;;  %v4109_v5 = vshll.u32 %v7134_v41, 16  ;;  %v9649_v50 = vpop.f32.mrf.mxu1  ;;  %v4056_v46 = vsel %vm8318_vm2, %v4051_v18, %v4055_v56  ;;  %v9659_v36 = vsel %vm8623_vm6, %v7215_v31, %v4709_v37  ;;  %v9670_v56 = vld [vmem:[%s8280_s25 + $0x70] sm:$0xf] }
 0x101   : > { %11315 = vst [vmem:[#allocation14_spill] sm:$0xff] %v9649_v50  ;;  %v4070_v48 = vsel %vm8318_vm2, %v4065_v15, %v9566_v27  ;;  %v9663_v41 = vsel %vm8623_vm6, %v4711_v47, %v4712_v22  ;;  %v4084_v39 = vrot.slane %v4082_v7, 4  ;;  %v9666_v50 = vrot.slane %v4091_v33, 5  ;;  %v9679_v47 = vld [vmem:[%s8280_s25 + $0x68] sm:$0x1] }
 0x102   : > { %v4101_v62 = vshll.u32 %v9640_v52, 16  ;;  %v4080_v27 = vsel %vm8318_vm2, %v4075_v58, %v4079_v26  ;;  %v4097_v18 = vrot.slane %v4095_v3, 4  ;;  %v11316_v37 = vrot.slane %v9452_v42, 5 }
 0x103   : > { %7707 = vmatmul.mubr.msk.bf16.gmra.mxu1 %vm1011_vm3, %v11312_v63  ;;  %v4119_v63 = vshrl.u32 %v9625_v34, 16  ;;  %v4108_v22 = vrot.slane %v4106_v16, 4  ;;  %v4111_v7 = vrot.slane %v4109_v5, 5  ;;  %v11318_v35 = vcombine.low %v9403_v38, %v9407_v24 }
 0x104   : > { %7733 = vmatmul.mubr.msk.bf16.gmra.mxu0 %vm1011_vm3, %v8023_v0  ;;  %7710 = vmatprep.mubr.msk.bf16.mxu1 %vm1011_vm3, %v11314_v11  ;;  %v4085_v0 = vshll.u32 %v7131_v2, 16  ;;  %v4115_v2 = vshll.u32 %v9625_v34, 16  ;;  %v8025_v11 = vld [vmem:[%s8280_s25 + $0x6c] sm:$0xff]   ;;  %v4718_v31 = vrot.slane %v11316_v37, 4  ;;  %v4130_v26 = vshrl.u32 %v7137_v12, 16 }
 0x105   : > { %7736 = vmatprep.mubr.msk.bf16.mxu0 %vm1011_vm3, %v8024_v17  ;;  %v9643_v25 = vpop.f32.mrf.mxu0  ;;  %v7200_v17 = vld [vmem:[%s8280_s25 + $0x24] sm:$0xe]  ;;  %v4121_v33 = vrot.slane %v4119_v63, 4  ;;  %v4133_v3 = vshll.u32 %v7137_v12, 16  ;;  %v4143_v16 = vshrl.u32 %v9670_v56, 16  ;;  %v11320_v5 = vcombine.low %v9431_v44, %v9435_v40 }
 0x106   : > { %v4087_v45 = vrot.slane %v4085_v0, 5  ;;  %v7216_v15 = vrot.slane %v7200_v17, 9  ;;  %v9681_v0 = vrot.slane %v4115_v2, 5  ;;  %v4139_v17 = vshll.u32 %v9670_v56, 16 }
 0x107   : > { %v9676_v19 = vpop.f32.mrf.mxu0  ;;  %v9697_v38 = vcombine.low %v4046_v9, %v4056_v46  ;;  %v9701_v12 = vrot.slane %v4101_v62, 5  ;;  %v9703_v2 = vcombine.low %v4070_v48, %v4080_v27  ;;  %v4098_v63 = vor.u32 %v4097_v18, %v9666_v50  ;;  %v7201_v27 = vld [vmem:[%s8280_s25 + $0x30] sm:$0xe] }
 0x108   : > { %11317 = vst [vmem:[#allocation6_spill] sm:$0xff] %v9676_v19  ;;  %v11321_v44 = vmov %v11316_v37  ;;  %v4125_v9 = vshll.u32 %v9679_v47, 16  ;;  %v11324_v62 = vrot.slane %v9500_v21, 5  ;;  %v4112_v42 = vor.u32 %v4111_v7, %v4108_v22  ;;  %v9732_v37 = vld [vmem:[%s8280_s25 + $0x74] sm:$0x1] }
 0x109   : > { %v9688_v58 = vpop.f32.mrf.mxu1  ;;  %v9710_v40 = vsel %vm8623_vm6, %v7216_v15, %v11321_v44  ;;  %v4122_v48 = vor.u32 %v4121_v33, %v9681_v0  ;;  %v4723_v18 = vrot.slane %v9469_v23, 5  ;;  %v4135_v44 = vrot.slane %v4133_v3, 5  ;;  %v8028_v21 = vld [vmem:[%s8280_s25 + $0x90] sm:$0xff]  }
 0x10a   : > { %11319 = vst [vmem:[#allocation9_spill] sm:$0xff] %v9688_v58  ;;  %v9724_v46 = vsel %vm8623_vm6, %v4718_v31, %v11324_v62  ;;  %v9734_v24 = vrot.slane %v4139_v17, 5  ;;  %v4145_v58 = vrot.slane %v4143_v16, 4  ;;  %v4099_v33 = vrot.slane %v4098_v63, 4 }
 0x10b   : > { %7711 = vmatmul.mubr.msk.bf16.gmra.mxu1 %vm1011_vm3, %v11318_v35  ;;  %v4088_v35 = vor.u32 %v4087_v45, %v4084_v39  ;;  %v8027_v45 = vld [vmem:[%s8280_s25 + $0x84] sm:$0xff]   ;;  %v9718_v39 = vpop.f32.mrf.mxu0  ;;  %v9729_v15 = vpop.f32.mrf.mxu1  ;;  %v9739_v23 = vrot.slane %v4125_v9, 5  ;;  %v7217_v62 = vrot.slane %v7201_v27, 9  ;;  %v4725_v3 = vrot.slane %v4723_v18, 4  ;;  %v7202_v27 = vld [vmem:[%s8280_s25 + $0x3c] sm:$0xe] }
 0x10c   : > { %7737 = vmatmul.mubr.msk.bf16.gmra.mxu0 %vm1011_vm3, %v8025_v11  ;;  %7714 = vmatprep.mubr.msk.bf16.mxu1 %vm1011_vm3, %v11320_v5  ;;  %v7140_v11 = vld [vmem:[%s8280_s25 + $0x78] sm:$0xf]  ;;  %11323 = vst [vmem:[#allocation8_spill] sm:$0xff] %v9718_v39  ;;  %11325 = vst [vmem:[#allocation10_spill] sm:$0xff] %v9729_v15  ;;  %v4132_v5 = vrot.slane %v4130_v26, 4  ;;  %v9743_v26 = vrot.slane %v4112_v42, 4  ;;  %v4146_v42 = vor.u32 %v4145_v58, %v9734_v24 }
 0x10d   : > { %7740 = vmatprep.mubr.msk.bf16.mxu0 %vm1011_vm3, %v8026_v20  ;;  %v9715_v20 = vld [vmem:[%s8280_s25 + $0x7c] sm:$0xf]  ;;  %v4154_v39 = vshrl.u32 %v7140_v11, 16  ;;  %v4157_v19 = vshll.u32 %v7140_v11, 16  ;;  %v4089_v7 = vrot.slane %v4088_v35, 4  ;;  %v9741_v15 = vpop.f32.mrf.mxu0  ;;  %v4726_v17 = vrot.slane %v9521_v54, 5  ;;  %v9752_v35 = vpop.f32.mrf.mxu1 }
 0x10e   : > { %11322 = vst [vmem:[#allocation7_spill] sm:$0xff] %v9715_v20  ;;  %v4163_v31 = vshll.u32 %v9715_v20, 16  ;;  %v4167_v22 = vshrl.u32 %v9715_v20, 16  ;;  %v4149_v16 = vshll.u32 %v9732_v37, 16  ;;  %v11326_v11 = vcombine.low %v9449_v51, %v9458_v57  ;;  %11327 = vst [vmem:[#allocation15_spill] sm:$0xff] %v9752_v35 }
 0x10f   : > { %v4123_v63 = vrot.slane %v4122_v48, 4  ;;  %v4136_v9 = vor.u32 %v4135_v44, %v4132_v5  ;;  %v4730_v20 = vrot.slane %v9503_v13, 5  ;;  %v11328_v54 = vcombine.low %v9493_v59, %v9516_v61  ;;  %v7204_v35 = vld [vmem:[%s8280_s25 + $0x54] sm:$0xe] }
 0x110   : > { %v4156_v51 = vrot.slane %v4154_v39, 4  ;;  %v4159_v57 = vrot.slane %v4157_v19, 5  ;;  %v4169_v48 = vrot.slane %v4167_v22, 4  ;;  %v4094_v58 = vsel %vm8318_vm2, %v4089_v7, %v9666_v50  ;;  %v9777_v19 = vld [vmem:[%s8280_s25 + $0x80] sm:$0x1] }
 0x111   : > { %v4104_v59 = vsel %vm8318_vm2, %v4099_v33, %v9701_v12  ;;  %v9774_v61 = vsel %vm8623_vm6, %v7217_v62, %v4723_v18  ;;  %v4118_v50 = vsel %vm8318_vm2, %v9743_v26, %v9681_v0  ;;  %v9787_v12 = vsel %vm8623_vm6, %v4725_v3, %v4726_v17  ;;  %v9791_v18 = vld [vmem:[%s8280_s25 + $0x88] sm:$0xf]  ;;  %v8029_v22 = vld [vmem:[%s8280_s25 + $0x9c] sm:$0xff]  }
 0x112   : > { %v4151_v5 = vrot.slane %v4149_v16, 5  ;;  %v7218_v44 = vrot.slane %v7202_v27, 9  ;;  %11329 = vst [vmem:[#allocation16_spill] sm:$0xff] %v9791_v18  ;;  %v4137_v7 = vrot.slane %v4136_v9, 4  ;;  %v4147_v33 = vrot.slane %v4146_v42, 4  ;;  %v8030_v0 = vld [vmem:[%s8280_s25 + $0xa8] sm:$0xff]  }
 0x113   : > { %7715 = vmatmul.mubr.msk.bf16.gmra.mxu1 %vm1011_vm3, %v11326_v11  ;;  %v4732_v62 = vrot.slane %v4730_v20, 4  ;;  %v4733_v11 = vrot.slane %v9549_v60, 5  ;;  %v4128_v26 = vsel %vm8318_vm2, %v4123_v63, %v9739_v23  ;;  %v4160_v3 = vor.u32 %v4159_v57, %v4156_v51  ;;  %v7203_v27 = vld [vmem:[%s8280_s25 + $0x48] sm:$0xe] }
 0x114   : > { %7741 = vmatmul.mubr.msk.bf16.gmra.mxu0 %vm1011_vm3, %v8027_v45  ;;  %7718 = vmatprep.mubr.msk.bf16.mxu1 %vm1011_vm3, %v11328_v54  ;;  %v9762_v45 = vrot.slane %v4163_v31, 5  ;;  %v9793_v31 = vpop.f32.mrf.mxu1  ;;  %v4173_v16 = vshll.u32 %v9777_v19, 16  ;;  %v4187_v42 = vshll.u32 %v9791_v18, 16  ;;  %v4191_v60 = vshrl.u32 %v9791_v18, 16 }
 0x115   : > { %7744 = vmatprep.mubr.msk.bf16.mxu0 %vm1011_vm3, %v8028_v21  ;;  %v7143_v21 = vld [vmem:[%s8280_s25 + $0x84] sm:$0xf]  ;;  %11330 = vst [vmem:[#allocation17_spill] sm:$0xff] %v9793_v31  ;;  %v9808_v31 = vcombine.low %v4094_v58, %v4104_v59  ;;  %v9814_v23 = vsel %vm8623_vm6, %v7218_v44, %v4730_v20  ;;  %v4737_v63 = vrot.slane %v9529_v53, 5  ;;  %v11332_v57 = vcombine.low %v9497_v30, %v9564_v14  ;;  %v9836_v30 = vld [vmem:[%s8280_s25 + $0x8c] sm:$0x1] }
 0x116   : > { %v9779_v39 = vpop.f32.mrf.mxu0  ;;  %v4170_v17 = vor.u32 %v4169_v48, %v9762_v45  ;;  %v4178_v13 = vshrl.u32 %v7143_v21, 16  ;;  %v4181_v9 = vshll.u32 %v7143_v21, 16  ;;  %v4142_v58 = vsel %vm8318_vm2, %v4137_v7, %v9734_v24  ;;  %11333 = vst [vmem:[#allocation19_spill] sm:$0xff] %v9836_v30  ;;  %v7146_v21 = vld [vmem:[%s8280_s25 + $0x90] sm:$0xf] }
 0x117   : > { %v4152_v20 = vsel %vm8318_vm2, %v4147_v33, %v4151_v5  ;;  %v9833_v53 = vsel %vm8623_vm6, %v4732_v62, %v4733_v11  ;;  %v7219_v59 = vrot.slane %v7203_v27, 9  ;;  %v9841_v14 = vcombine.low %v4118_v50, %v4128_v26  ;;  %v9855_v11 = vld [vmem:[%s8280_s25 + $0x94] sm:$0xf] }
 0x118   : > { %v9797_v54 = vpop.f32.mrf.mxu0  ;;  %v9843_v24 = vrot.slane %v4160_v3, 4  ;;  %v9845_v44 = vrot.slane %v4170_v17, 4  ;;  %v9847_v5 = vrot.slane %v4173_v16, 5  ;;  %v4180_v7 = vrot.slane %v4178_v13, 4  ;;  %11335 = vst [vmem:[#allocation21_spill] sm:$0xff] %v9855_v11  ;;  %v8031_v27 = vld [vmem:[%s8280_s25 + $0xb4] sm:$0xff]  }
 0x119   : > { %v4183_v33 = vrot.slane %v4181_v9, 5  ;;  %v9852_v62 = vrot.slane %v4187_v42, 5  ;;  %v9857_v50 = vcombine.low %v4142_v58, %v4152_v20  ;;  %v4739_v26 = vrot.slane %v4737_v63, 4  ;;  %v7149_v17 = vld [vmem:[%s8280_s25 + $0x9c] sm:$0xf]  ;;  %v8032_v20 = vld [vmem:[%s8280_s25 + $0xc0] sm:$0xff]  }
 0x11a   : > { %v9824_v48 = vpop.f32.mrf.mxu0  ;;  %v4740_v3 = vrot.slane %v9581_v28, 5  ;;  %v9870_v9 = vsel %vm8623_vm6, %v7219_v59, %v4737_v63  ;;  %v4197_v42 = vshll.u32 %v9836_v30, 16  ;;  %v9874_v58 = vld [vmem:[%s8280_s25 + $0xa0] sm:$0xf]  ;;  %v4166_v28 = vsel %vm8318_vm2, %v9843_v24, %v9762_v45 }
 0x11b   : > { %v9817_v51 = vpop.f32.mrf.mxu1  ;;  %7719 = vmatmul.mubr.msk.bf16.gmra.mxu1 %vm1011_vm3, %v11332_v57  ;;  %v4205_v57 = vshll.u32 %v7146_v21, 16  ;;  %11337 = vst [vmem:[#allocation23_spill] sm:$0xff] %v9874_v58  ;;  %v4211_v63 = vshll.u32 %v9855_v11, 16  ;;  %v4215_v59 = vshrl.u32 %v9855_v11, 16  ;;  %v4226_v30 = vshrl.u32 %v7149_v17, 16 }
 0x11c   : > { %11331 = vst [vmem:[#allocation18_spill] sm:$0xff] %v9817_v51  ;;  %7745 = vmatmul.mubr.msk.bf16.gmra.mxu0 %vm1011_vm3, %v8029_v22  ;;  %7758 = vmatprep.mubr.msk.bf16.mxu1 %vm1011_vm3, %v9611_v4  ;;  %v4193_v4 = vrot.slane %v4191_v60, 4  ;;  %v9865_v13 = vpop.f32.mrf.mxu0  ;;  %v4202_v60 = vshrl.u32 %v7146_v21, 16  ;;  %v4184_v21 = vor.u32 %v4183_v33, %v4180_v7  ;;  %v4744_v51 = vrot.slane %v9607_v43, 5 }
 0x11d   : > { %7748 = vmatprep.mubr.msk.bf16.mxu0 %vm1011_vm3, %v8030_v0  ;;  %v9850_v22 = vpop.f32.mrf.mxu1  ;;  %v4176_v0 = vsel %vm8318_vm2, %v9845_v44, %v9847_v5  ;;  %v9894_v45 = vsel %vm8623_vm6, %v4739_v26, %v4740_v3  ;;  %v4229_v24 = vshll.u32 %v7149_v17, 16  ;;  %v4235_v44 = vshll.u32 %v9874_v58, 16  ;;  %v9913_v17 = vld [vmem:[%s8280_s25 + $0x98] sm:$0x1] }
 0x11e   : > { %11334 = vst [vmem:[#allocation20_spill] sm:$0xff] %v9850_v22  ;;  %v4194_v22 = vor.u32 %v4193_v4, %v9852_v62  ;;  %v4239_v5 = vshrl.u32 %v9874_v58, 16  ;;  %v9903_v43 = vrot.slane %v4197_v42, 5  ;;  %v7220_v7 = vrot.slane %v7204_v35, 9  ;;  %11340 = vst [vmem:[#allocation26_spill] sm:$0xff] %v9913_v17 }
 0x11f   : > { %v9863_v16 = vpop.f32.mrf.mxu1  ;;  %v4204_v33 = vrot.slane %v4202_v60, 4  ;;  %v4207_v4 = vrot.slane %v4205_v57, 5  ;;  %v4747_v3 = vrot.slane %v9640_v52, 5  ;;  %v4185_v60 = vrot.slane %v4184_v21, 4 }
 0x120   : > { %11336 = vst [vmem:[#allocation22_spill] sm:$0xff] %v9863_v16  ;;  %v4228_v57 = vrot.slane %v4226_v30, 4  ;;  %v4231_v52 = vrot.slane %v4229_v24, 5  ;;  %v4241_v58 = vrot.slane %v4239_v5, 4  ;;  %v4221_v30 = vshll.u32 %v9913_v17, 16 }
 0x121   : > { %v9888_v16 = vpop.f32.mrf.mxu1  ;;  %v4208_v21 = vor.u32 %v4207_v4, %v4204_v33  ;;  %v4190_v4 = vsel %vm8318_vm2, %v4185_v60, %v9852_v62  ;;  %v9964_v17 = vld [vmem:[%s8280_s25 + $0xac] sm:$0xf] }
 0x122   : > { %11338 = vst [vmem:[#allocation24_spill] sm:$0xff] %v9888_v16  ;;  %v9923_v16 = vrot.slane %v4235_v44, 5  ;;  %v9941_v44 = vsel %vm8623_vm6, %v7220_v7, %v4744_v51  ;;  %11343 = vst [vmem:[#allocation29_spill] sm:$0xff] %v9964_v17 }
 0x123   : > { %v9898_v18 = vpop.f32.mrf.mxu0  ;;  %v7556_v11 = vpop.f32.mrf.mxu1  ;;  %7759 = vmatmul.mubr.msk.bf16.vlgmr.msra.gmra.mxu1 %vm1011_vm3, %v9613_v1  ;;  %v9915_v1 = vrot.slane %v4211_v63, 5 }
 0x124   : > { %11339 = vst [vmem:[#allocation25_spill] sm:$0xff] %v9898_v18  ;;  %7749 = vmatmul.mubr.msk.bf16.gmra.mxu0 %vm1011_vm3, %v8031_v27  ;;  %v9906_v26 = vadd.f32 %v7556_v11, %v9523_v10  ;;  %7762 = vmatprep.mubr.msk.bf16.mxu1 %vm1011_vm3, %v9632_v55  ;;  %v4217_v27 = vrot.slane %v4215_v59, 4  ;;  %v4195_v10 = vrot.slane %v4194_v22, 4  ;;  %v4746_v11 = vrot.slane %v4744_v51, 4  ;;  %v7205_v55 = vld [vmem:[%s8280_s25 + $0x60] sm:$0xe] }
 0x125   : > { %7752 = vmatprep.mubr.msk.bf16.mxu0 %vm1011_vm3, %v8032_v20  ;;  %v9917_v35 = vpop.f32.mrf.mxu0  ;;  %v1389_v42 = vpop.f32.mrf.mxu1  ;;  %v8033_v18 = vld [vmem:[%s8280_s25 + $0xcc] sm:$0xff]   ;;  %v7221_v7 = vrot.slane %v7205_v55, 9  ;;  %v4754_v55 = vrot.slane %v9679_v47, 5 }
 0x126   : > { %11341 = vst [vmem:[#allocation27_spill] sm:$0xff] %v9917_v35  ;;  %v9920_v20 = vadd.f32 %v1389_v42, %v9539_v32  ;;  %v9928_v35 = vcombine.low %v4166_v28, %v4176_v0  ;;  %v9934_v32 = vld [vmem:[%s8280_s25 + $0xa4] sm:$0x1]  ;;  %v4218_v5 = vor.u32 %v4217_v27, %v9915_v1  ;;  %v4751_v0 = vrot.slane %v9625_v34, 5  ;;  %v7152_v28 = vld [vmem:[%s8280_s25 + $0xa8] sm:$0xf] }
 0x127   : > { %v9925_v63 = vpop.f32.mrf.mxu0  ;;  %v7557_v59 = vpop.f32.mrf.mxu1  ;;  %11342 = vst [vmem:[#allocation28_spill] sm:$0xff] %v9934_v32  ;;  %v9956_v51 = vsel %vm8623_vm6, %v4746_v11, %v4747_v3  ;;  %v4232_v34 = vor.u32 %v4231_v52, %v4228_v57  ;;  %v4245_v22 = vshll.u32 %v9934_v32, 16  ;;  %v4223_v3 = vrot.slane %v4221_v30, 5  ;;  %v7206_v30 = vld [vmem:[%s8280_s25 + $0x6c] sm:$0xe] }
 0x128   : > { %v9937_v24 = vadd.f32 %v7557_v59, %v9568_v8  ;;  %v4200_v8 = vsel %vm8318_vm2, %v4195_v10, %v9903_v43  ;;  %v4242_v59 = vor.u32 %v4241_v58, %v9923_v16  ;;  %v4209_v43 = vrot.slane %v4208_v21, 4 }
 0x129   : > { %v9946_v42 = vpop.f32.mrf.mxu0  ;;  %v1392_v33 = vpop.f32.mrf.mxu1  ;;  %v4253_v10 = vshll.u32 %v7152_v28, 16  ;;  %v11344_v58 = vcombine.low %v9659_v36, %v9663_v41  ;;  %v4219_v57 = vrot.slane %v4218_v5, 4  ;;  %v9983_v21 = vcombine.low %v4190_v4, %v4200_v8  ;;  %v11345_v36 = vld [vmem:[#allocation6_spill] sm:$0xff] }
 0x12a   : > { %v9959_v27 = vadd.f32 %v1392_v33, %v9609_v49  ;;  %v4250_v49 = vshrl.u32 %v7152_v28, 16  ;;  %v4259_v28 = vshll.u32 %v9964_v17, 16  ;;  %v4233_v5 = vrot.slane %v4232_v34, 4 }
 0x12b   : > { %v7560_v60 = vpop.f32.mrf.mxu1  ;;  %7763 = vmatmul.mubr.msk.bf16.gmra.mxu1 %vm1011_vm3, %v9697_v38  ;;  %v4243_v33 = vrot.slane %v4242_v59, 4  ;;  %v4214_v4 = vsel %vm8318_vm2, %v4209_v43, %v9915_v1  ;;  %v4255_v32 = vrot.slane %v4253_v10, 5  ;;  %v7222_v59 = vrot.slane %v7206_v30, 9  ;;  %v7207_v10 = vld [vmem:[%s8280_s25 + $0x78] sm:$0xe] }
 0x12c   : > { %v9966_v62 = vpop.f32.mrf.mxu0  ;;  %7753 = vmatmul.mubr.msk.bf16.gmra.mxu0 %vm1011_vm3, %v8033_v18  ;;  %v9972_v11 = vadd.f32 %v7560_v60, %v9643_v25  ;;  %7766 = vmatprep.mubr.msk.bf16.mxu1 %vm1011_vm3, %v9703_v2  ;;  %v4753_v18 = vrot.slane %v4751_v0, 4  ;;  %v4758_v25 = vrot.slane %v9670_v56, 5  ;;  %v4263_v2 = vshrl.u32 %v9964_v17, 16  ;;  %v11346_v17 = vld [vmem:[#allocation8_spill] sm:$0xff] }
 0x12d   : > { %7792 = vmatprep.mubr.msk.bf16.mxu0 %vm1011_vm3, %v11344_v58  ;;  %v1405_v52 = vpop.f32.mrf.mxu1  ;;  %v4247_v60 = vrot.slane %v4245_v22, 5  ;;  %v9999_v56 = vsel %vm8623_vm6, %v7221_v7, %v4751_v0  ;;  %v4252_v8 = vrot.slane %v4250_v49, 4  ;;  %v4224_v22 = vsel %vm8318_vm2, %v4219_v57, %v4223_v3 }
 0x12e   : > { %v9981_v38 = vpop.f32.mrf.mxu0  ;;  %v9990_v41 = vadd.f32 %v1405_v52, %v11345_v36  ;;  %v10008_v34 = vsel %vm8623_vm6, %v4753_v18, %v4754_v55  ;;  %v10011_v36 = vld [vmem:[%s8280_s25 + $0xb0] sm:$0x1]  ;;  %v4760_v0 = vrot.slane %v4758_v25, 4  ;;  %v4761_v7 = vrot.slane %v9732_v37, 5 }
 0x12f   : > { %v7561_v58 = vpop.f32.mrf.mxu1  ;;  %v10016_v49 = vrot.slane %v4259_v28, 5  ;;  %v4238_v18 = vsel %vm8318_vm2, %v4233_v5, %v9923_v16  ;;  %v4248_v55 = vsel %vm8318_vm2, %v4243_v33, %v4247_v60  ;;  %v11347_v28 = vcombine.low %v9710_v40, %v9724_v46  ;;  %v11348_v16 = vld [vmem:[#allocation7_spill] sm:$0xff]  ;;  %v11356_v46 = vld [vmem:[#allocation16_spill] sm:$0xff] }
 0x130   : > { %v9992_v47 = vpop.f32.mrf.mxu0  ;;  %v10002_v52 = vadd.f32 %v7561_v58, %v11346_v17  ;;  %v4265_v17 = vrot.slane %v4263_v2, 4  ;;  %v4256_v2 = vor.u32 %v4255_v32, %v4252_v8  ;;  %v4269_v58 = vshll.u32 %v10011_v36, 16 }
 0x131   : > { %v1408_v43 = vpop.f32.mrf.mxu1  ;;  %v4765_v5 = vrot.slane %v11348_v16, 5  ;;  %v11349_v40 = vcombine.low %v9774_v61, %v9787_v12  ;;  %v10066_v12 = vld [vmem:[%s8280_s25 + $0xb8] sm:$0xf]  ;;  %v10088_v16 = vld [vmem:[%s8280_s25 + $0xc4] sm:$0xf] }
 0x132   : > { %v10013_v1 = vpop.f32.mrf.mxu0  ;;  %v10020_v3 = vadd.f32 %v1408_v43, %v9741_v15  ;;  %v10035_v15 = vcombine.low %v4214_v4, %v4224_v22  ;;  %v7155_v43 = vld [vmem:[%s8280_s25 + $0xb4] sm:$0xf]  ;;  %v4266_v61 = vor.u32 %v4265_v17, %v10016_v49  ;;  %v4768_v17 = vrot.slane %v9777_v19, 5 }
 0x133   : > { %v7564_v30 = vpop.f32.mrf.mxu1  ;;  %7767 = vmatmul.mubr.msk.bf16.gmra.mxu1 %vm1011_vm3, %v9808_v31  ;;  %v7223_v31 = vrot.slane %v7207_v10, 9  ;;  %v4274_v10 = vshrl.u32 %v7155_v43, 16  ;;  %v4287_v19 = vshrl.u32 %v10066_v12, 16  ;;  %v4807_v29 = vrot.slane %v10088_v16, 5 }
 0x134   : > { %v7590_v37 = vpop.f32.mrf.mxu0  ;;  %7793 = vmatmul.mubr.msk.bf16.vlgmr.msra.gmra.mxu0 %vm1011_vm3, %v11347_v28  ;;  %v10041_v33 = vadd.f32 %v7564_v30, %v9779_v39  ;;  %7770 = vmatprep.mubr.msk.bf16.mxu1 %vm1011_vm3, %v9841_v14  ;;  %v10054_v39 = vcombine.low %v4238_v18, %v4248_v55  ;;  %v10062_v14 = vsel %vm8623_vm6, %v4760_v0, %v4761_v7  ;;  %v4277_v18 = vshll.u32 %v7155_v43, 16 }
 0x135   : > { %v10044_v60 = vadd.f32 %v7590_v37, %v9906_v26  ;;  %7796 = vmatprep.mubr.msk.bf16.mxu0 %vm1011_vm3, %v11349_v40  ;;  %v1421_v32 = vpop.f32.mrf.mxu1  ;;  %v10058_v26 = vsel %vm8623_vm6, %v7222_v59, %v4758_v25  ;;  %v7158_v25 = vld [vmem:[%s8280_s25 + $0xc0] sm:$0xf]  ;;  %v4257_v30 = vrot.slane %v4256_v2, 4  ;;  %v4271_v0 = vrot.slane %v4269_v58, 5  ;;  %v10091_v40 = vld [vmem:[%s8280_s25 + $0xbc] sm:$0x1] }
 0x136   : > { %v1818_v4 = vpop.f32.mrf.mxu0  ;;  %v10069_v8 = vadd.f32 %v1421_v32, %v9797_v54  ;;  %v4767_v7 = vrot.slane %v4765_v5, 4  ;;  %v4283_v28 = vshll.u32 %v10066_v12, 16  ;;  %v4267_v58 = vrot.slane %v4266_v61, 4 }
 0x137   : > { %v10072_v22 = vadd.f32 %v1818_v4, %v9920_v20  ;;  %v7565_v59 = vpop.f32.mrf.mxu1  ;;  %v10084_v20 = vsel %vm8623_vm6, %v7223_v31, %v4765_v5  ;;  %v4301_v32 = vshll.u32 %v7158_v25, 16  ;;  %v4276_v5 = vrot.slane %v4274_v10, 4 }
 0x138   : > { %v7591_v55 = vpop.f32.mrf.mxu0  ;;  %v10077_v37 = vadd.f32 %v7565_v59, %v9824_v48  ;;  %v4298_v48 = vshrl.u32 %v7158_v25, 16  ;;  %v4279_v31 = vrot.slane %v4277_v18, 5  ;;  %v11351_v61 = vcombine.low %v9814_v23, %v9833_v53  ;;  %v11352_v25 = vld [vmem:[#allocation25_spill] sm:$0xff] }
 0x139   : > { %v10080_v54 = vadd.f32 %v7591_v55, %v9937_v24  ;;  %v1424_v43 = vpop.f32.mrf.mxu1  ;;  %v4307_v10 = vshll.u32 %v10088_v16, 16  ;;  %v4311_v18 = vshrl.u32 %v10088_v16, 16  ;;  %v11353_v23 = vcombine.low %v9870_v9, %v9894_v45 }
 0x13a   : > { %v1821_v2 = vpop.f32.mrf.mxu0  ;;  %v10095_v24 = vadd.f32 %v1424_v43, %v9865_v13  ;;  %v4262_v13 = vsel %vm8318_vm2, %v4257_v30, %v10016_v49  ;;  %v10127_v53 = vrot.slane %v4283_v28, 5  ;;  %v4293_v49 = vshll.u32 %v10091_v40, 16  ;;  %v10131_v30 = vld [vmem:[%s8280_s25 + $0x84] sm:$0xe]  ;;  %v11357_v28 = vld [vmem:[#allocation19_spill] sm:$0xff] }
 0x13b   : > { %v10098_v4 = vadd.f32 %v1821_v2, %v9959_v27  ;;  %v7568_v59 = vpop.f32.mrf.mxu1  ;;  %7771 = vmatmul.mubr.msk.bf16.gmra.mxu1 %vm1011_vm3, %v9857_v50  ;;  %v10111_v27 = vsel %vm8623_vm6, %v4767_v7, %v4768_v17  ;;  %v4289_v2 = vrot.slane %v4287_v19, 4  ;;  %v10149_v19 = vrot.slane %v4307_v10, 5 }
 0x13c   : > { %v7594_v55 = vpop.f32.mrf.mxu0  ;;  %7797 = vmatmul.mubr.msk.bf16.gmra.mxu0 %vm1011_vm3, %v11351_v61  ;;  %v10116_v43 = vadd.f32 %v7568_v59, %v11352_v25  ;;  %7774 = vmatprep.mubr.msk.bf16.mxu1 %vm1011_vm3, %v9928_v35  ;;  %v4300_v59 = vrot.slane %v4298_v48, 4  ;;  %v4303_v35 = vrot.slane %v4301_v32, 5  ;;  %v4280_v61 = vor.u32 %v4279_v31, %v4276_v5 }
 0x13d   : > { %11350 = vst [vmem:[#allocation6_spill] sm:$0xff] %v10098_v4  ;;  %v10119_v50 = vadd.f32 %v7594_v55, %v9972_v11  ;;  %7800 = vmatprep.mubr.msk.bf16.mxu0 %vm1011_vm3, %v11353_v23  ;;  %v1437_v7 = vpop.f32.mrf.mxu1  ;;  %v4272_v11 = vsel %vm8318_vm2, %v4267_v58, %v4271_v0  ;;  %v11354_v55 = vld [vmem:[#allocation27_spill] sm:$0xff]  ;;  %v7224_v0 = vrot.slane %v10131_v30, 9  ;;  %v10147_v58 = vld [vmem:[%s8280_s25 + $0xc8] sm:$0x1]  ;;  %v4313_v48 = vrot.slane %v4311_v18, 4 }
 0x13e   : > { %v1834_v17 = vpop.f32.mrf.mxu0  ;;  %v10136_v9 = vadd.f32 %v1437_v7, %v11354_v55  ;;  %v10157_v5 = vcombine.low %v4262_v13, %v4272_v11  ;;  %v10159_v31 = vrot.slane %v4293_v49, 5  ;;  %v7161_v7 = vld [vmem:[%s8280_s25 + $0xcc] sm:$0xf]  ;;  %v4290_v30 = vor.u32 %v4289_v2, %v10127_v53  ;;  %v7209_v11 = vld [vmem:[%s8280_s25 + $0x90] sm:$0xe] }
 0x13f   : > { %v10139_v45 = vadd.f32 %v1834_v17, %v9990_v41  ;;  %v7569_v25 = vpop.f32.mrf.mxu1  ;;  %v4772_v10 = vrot.slane %v11356_v46, 5  ;;  %v4775_v18 = vrot.slane %v11357_v28, 5  ;;  %v4304_v57 = vor.u32 %v4303_v35, %v4300_v59  ;;  %v11360_v59 = vld [vmem:[#allocation21_spill] sm:$0xff] }
 0x140   : > { %v7595_v23 = vpop.f32.mrf.mxu0  ;;  %v10152_v41 = vadd.f32 %v7569_v25, %v9925_v63  ;;  %v10166_v63 = vld [vmem:[%s8280_s25 + $0xd0] sm:$0xf]  ;;  %v10174_v13 = vrot.slane %v4280_v61, 4  ;;  %v4317_v49 = vshll.u32 %v10147_v58, 16  ;;  %v11359_v46 = vcombine.low %v9941_v44, %v9956_v51 }
 0x141   : > { %v10155_v32 = vadd.f32 %v7595_v23, %v10002_v52  ;;  %v1440_v17 = vpop.f32.mrf.mxu1  ;;  %v4322_v35 = vshrl.u32 %v7161_v7, 16  ;;  %v4325_v28 = vshll.u32 %v7161_v7, 16  ;;  %v11362_v44 = vcombine.low %v9999_v56, %v10008_v34  ;;  %v11363_v34 = vld [vmem:[#allocation26_spill] sm:$0xff] }
 0x142   : > { %v1837_v55 = vpop.f32.mrf.mxu0  ;;  %v10169_v25 = vadd.f32 %v1440_v17, %v9946_v42  ;;  %v4314_v42 = vor.u32 %v4313_v48, %v10149_v19  ;;  %v4331_v51 = vshll.u32 %v10166_v63, 16  ;;  %v4319_v56 = vrot.slane %v4317_v49, 5 }
 0x143   : > { %11355 = vst [vmem:[#allocation8_spill] sm:$0xff] %v10155_v32  ;;  %v10172_v52 = vadd.f32 %v1837_v55, %v10020_v3  ;;  %v7572_v23 = vpop.f32.mrf.mxu1  ;;  %7775 = vmatmul.mubr.msk.bf16.gmra.mxu1 %vm1011_vm3, %v9983_v21  ;;  %v4779_v3 = vrot.slane %v11360_v59, 5  ;;  %v4335_v21 = vshrl.u32 %v10166_v63, 16  ;;  %v4291_v55 = vrot.slane %v4290_v30, 4 }
 0x144   : > { %v7598_v2 = vpop.f32.mrf.mxu0  ;;  %7801 = vmatmul.mubr.msk.bf16.gmra.mxu0 %vm1011_vm3, %v11359_v46  ;;  %v10187_v61 = vadd.f32 %v7572_v23, %v9966_v62  ;;  %7778 = vmatprep.mubr.msk.bf16.mxu1 %vm1011_vm3, %v10035_v15  ;;  %v4774_v62 = vrot.slane %v4772_v10, 4  ;;  %v4305_v23 = vrot.slane %v4304_v57, 4  ;;  %v4782_v46 = vrot.slane %v11363_v34, 5 }
 0x145   : > { %11358 = vst [vmem:[#allocation7_spill] sm:$0xff] %v10172_v52  ;;  %v10190_v17 = vadd.f32 %v7598_v2, %v10041_v33  ;;  %7804 = vmatprep.mubr.msk.bf16.mxu0 %vm1011_vm3, %v11362_v44  ;;  %v1453_v48 = vpop.f32.mrf.mxu1  ;;  %v7225_v33 = vrot.slane %v7209_v11, 9  ;;  %v4315_v52 = vrot.slane %v4314_v42, 4  ;;  %v4781_v4 = vrot.slane %v4779_v3, 4 }
 0x146   : > { %v1850_v7 = vpop.f32.mrf.mxu0  ;;  %v10201_v2 = vadd.f32 %v1453_v48, %v9981_v38  ;;  %v4327_v32 = vrot.slane %v4325_v28, 5  ;;  %v10214_v38 = vld [vmem:[%s8280_s25 + $0xd4] sm:$0x1]  ;;  %v10216_v11 = vrot.slane %v4331_v51, 5  ;;  %v4286_v42 = vsel %vm8318_vm2, %v10174_v13, %v10127_v53 }
 0x147   : > { %11361 = vst [vmem:[#allocation25_spill] sm:$0xff] %v10190_v17  ;;  %v10204_v15 = vadd.f32 %v1850_v7, %v10069_v8  ;;  %v7573_v59 = vpop.f32.mrf.mxu1  ;;  %v4324_v17 = vrot.slane %v4322_v35, 4  ;;  %v4337_v8 = vrot.slane %v4335_v21, 4  ;;  %v4776_v35 = vsel %vm8623_vm6, %v4774_v62, %v4775_v18  ;;  %v11367_v7 = vld [vmem:[#allocation29_spill] sm:$0xff] }
 0x148   : > { %v7599_v44 = vpop.f32.mrf.mxu0  ;;  %v10208_v30 = vadd.f32 %v7573_v59, %v9992_v47  ;;  %v4296_v47 = vsel %vm8318_vm2, %v4291_v55, %v10159_v31  ;;  %v4310_v53 = vsel %vm8318_vm2, %v4305_v23, %v10149_v19  ;;  %v4780_v31 = vsel %vm8623_vm6, %v7225_v33, %v4779_v3 }
 0x149   : > { %v10211_v57 = vadd.f32 %v7599_v44, %v10077_v37  ;;  %v1456_v49 = vpop.f32.mrf.mxu1  ;;  %v4773_v37 = vsel %vm8623_vm6, %v7224_v0, %v4772_v10  ;;  %v8034_v0 = vld [vmem:[%s11227_s5 + $0x8] sm:$0xff]   ;;  %v4328_v19 = vor.u32 %v4327_v32, %v4324_v17  ;;  %v4341_v13 = vshll.u32 %v10214_v38, 16  ;;  %v7210_v32 = vld [vmem:[%s8280_s25 + $0x9c] sm:$0xe] }
 0x14a   : > { %v1853_v48 = vpop.f32.mrf.mxu0  ;;  %v10230_v28 = vadd.f32 %v1456_v49, %v10013_v1  ;;  %v11364_v1 = vcombine.low %v10058_v26, %v10062_v14  ;;  %v4783_v26 = vsel %vm8623_vm6, %v4781_v4, %v4782_v46  ;;  %v4338_v14 = vor.u32 %v4337_v8, %v10216_v11  ;;  %v7211_v4 = vld [vmem:[%s8280_s25 + $0xa8] sm:$0xe] }
 0x14b   : > { %v10233_v51 = vadd.f32 %v1853_v48, %v10095_v24  ;;  %v10243_v10 = vpop.f32.mrf.mxu1  ;;  %7779 = vmatmul.mubr.msk.bf16.gmra.mxu1 %vm1011_vm3, %v10054_v39  ;;  %v4320_v24 = vsel %vm8318_vm2, %v4315_v52, %v4319_v56  ;;  %v11365_v39 = vcombine.low %v10084_v20, %v10111_v27  ;;  %v11366_v52 = vld [vmem:[#allocation23_spill] sm:$0xff]  ;;  %v4793_v55 = vrot.slane %v11367_v7, 5  ;;  %v11368_v48 = vld [vmem:[#allocation28_spill] sm:$0xff] }
 0x14c   : > { %v7602_v18 = vpop.f32.mrf.mxu0  ;;  %7805 = vmatmul.mubr.msk.bf16.gmra.mxu0 %vm1011_vm3, %v11364_v1  ;;  %7782 = vmatprep.mubr.msk.bf16.mxu1 %vm1011_vm3, %v10157_v5  ;;  %v4786_v17 = vrot.slane %v11366_v52, 5  ;;  %v8122_v62 = vmov 0.0   ;;  %v7179_v27 = vcombine.low %v4286_v42, %v4296_v47  ;;  %v7242_v5 = vcombine.low %v4773_v37, %v4776_v35 }
 0x14d   : > { %v10255_v3 = vadd.f32 %v7602_v18, %v10116_v43  ;;  %7808 = vmatprep.mubr.msk.bf16.mxu0 %vm1011_vm3, %v11365_v39  ;;  %v10268_v21 = vpop.f32.mrf.mxu1  ;;  %7824 = vmatprep.subr.bf16.mxu1 %v8122_v62  ;;  %v7180_v23 = vcombine.low %v4310_v53, %v4320_v24  ;;  %v7243_v34 = vcombine.low %v4780_v31, %v4783_v26  ;;  %v4329_v46 = vrot.slane %v4328_v19, 4  ;;  %v8035_v39 = vld [vmem:[%s11227_s5] sm:$0xff]  }
 0x14e   : > { %v1866_v43 = vpop.f32.mrf.mxu0  ;;  %7825 = vmatpush3.bf16.msra.mxu1 %v8034_v0  ;;  %v4343_v59 = vrot.slane %v4341_v13, 5  ;;  %v7226_v44 = vrot.slane %v7210_v32, 9  ;;  %v4339_v49 = vrot.slane %v4338_v14, 4  ;;  %v4789_v42 = vrot.slane %v11368_v48, 5  ;;  %v7212_v13 = vld [vmem:[%s8280_s25 + $0xb4] sm:$0xe] }
 0x14f   : > { %v10273_v20 = vadd.f32 %v1866_v43, %v10136_v9  ;;  %v10276_v33 = vpop.f32.mrf.mxu1  ;;  %7826 = vmatprep.subr.bf16.mxu1 %v8122_v62  ;;  %v4788_v9 = vrot.slane %v4786_v17, 4  ;;  %v7227_v35 = vrot.slane %v7211_v4, 9  ;;  %v4795_v53 = vrot.slane %v4793_v55, 4 }
 0x150   : > { %v7603_v56 = vpop.f32.mrf.mxu0  ;;  %v4796_v31 = vrot.slane %v10011_v36, 5  ;;  %v4787_v24 = vsel %vm8623_vm6, %v7226_v44, %v4786_v17  ;;  %v7213_v17 = vld [vmem:[%s8280_s25 + $0xc0] sm:$0xe]  ;;  %v11369_v44 = vld [vmem:[#allocation13_spill] sm:$0xff] }
 0x151   : > { %v10280_v8 = vadd.f32 %v7603_v56, %v10152_v41  ;;  %v10283_v47 = vpop.f32.mrf.mxu1  ;;  %v4334_v41 = vsel %vm8318_vm2, %v4329_v46, %v10216_v11  ;;  %v4790_v19 = vsel %vm8623_vm6, %v4788_v9, %v4789_v42  ;;  %v4800_v11 = vrot.slane %v10066_v12, 5  ;;  %v11370_v42 = vld [vmem:[#allocation12_spill] sm:$0xff] }
 0x152   : > { %v1869_v37 = vpop.f32.mrf.mxu0  ;;  %v4794_v14 = vsel %vm8623_vm6, %v7227_v35, %v4793_v55  ;;  %v4797_v32 = vsel %vm8623_vm6, %v4795_v53, %v4796_v31  ;;  %7827 = vmatpush3.bf16.msra.mxu1 %v8035_v39  ;;  %v4803_v56 = vrot.slane %v10091_v40, 5  ;;  %v4809_v46 = vrot.slane %v4807_v29, 4  ;;  %v11371_v35 = vld [vmem:[#allocation18_spill] sm:$0xff]  ;;  %v7214_v31 = vld [vmem:[%s8280_s25 + $0xcc] sm:$0xe]  ;;  %s7320_s25 = sshll.u32 %s8267_s12, 3 }
 0x153   : > { %v10287_v0 = vadd.f32 %v1869_v37, %v10169_v25  ;;  %v10289_v18 = vpop.f32.mrf.mxu1  ;;  %7783 = vmatmul.mubr.msk.bf16.gmra.mxu1 %vm1011_vm3, %v7179_v27  ;;  %v4344_v25 = vsel %vm8318_vm2, %v4339_v49, %v4343_v59  ;;  %v7244_v27 = vcombine.low %v4787_v24, %v4790_v19  ;;  %7832 = vmatprep.subr.bf16.mxu1 %v8122_v62  ;;  %v4802_v4 = vrot.slane %v4800_v11, 4  ;;  %v11373_v19 = vld [vmem:[#allocation20_spill] sm:$0xff]  ;;  %s510_s26 = scalar_lea.vmem %s11378_s2, %s7320_s25 }
 0x154   : > { %v7606_v1 = vpop.f32.mrf.mxu0  ;;  %7809 = vmatmul.mubr.msk.bf16.gmra.mxu0 %vm1011_vm3, %v7242_v5  ;;  %7786 = vmatprep.mubr.msk.bf16.mxu1 %vm1011_vm3, %v7180_v23  ;;  %v7181_v7 = vcombine.low %v4334_v41, %v4344_v25  ;;  %v7228_v5 = vrot.slane %v7212_v13, 9  ;;  %v7245_v55 = vcombine.low %v4794_v14, %v4797_v32  ;;  %v4810_v59 = vrot.slane %v10147_v58, 5  ;;  %v11372_v25 = vld [vmem:[#allocation11_spill] sm:$0xff] }
 0x155   : > { %v10299_v36 = vadd.f32 %v7606_v1, %v10187_v61  ;;  %7812 = vmatprep.mubr.msk.bf16.mxu0 %vm1011_vm3, %v7243_v34  ;;  %v1485_v26 = vpop.f32.mrf.mxu1  ;;  %v7229_v34 = vrot.slane %v7213_v17, 9  ;;  %v1478_v49 = vadd.f32 %v10243_v10, %v11369_v44  ;;  %v1470_v37 = vadd.f32 %v10268_v21, %v11370_v42  ;;  %v11377_v42 = vld [vmem:[#allocation15_spill] sm:$0xff] }
 0x156   : > { %v1882_v61 = vpop.f32.mrf.mxu0  ;;  %v4801_v40 = vsel %vm8623_vm6, %v7228_v5, %v4800_v11  ;;  %v4804_v10 = vsel %vm8623_vm6, %v4802_v4, %v4803_v56  ;;  %v1481_v21 = vadd.f32 %v10276_v33, %v11372_v25  ;;  %v7230_v32 = vrot.slane %v7214_v31, 9  ;;  %v11375_v33 = vld [vmem:[#allocation9_spill] sm:$0xff] }
 0x157   : > { %v10318_v52 = vadd.f32 %v1882_v61, %v10201_v2  ;;  %v7581_v12 = vpop.f32.mrf.mxu1  ;;  %v4808_v24 = vsel %vm8623_vm6, %v7229_v34, %v4807_v29  ;;  %v7246_v14 = vcombine.low %v4801_v40, %v4804_v10  ;;  %v4817_v17 = vrot.slane %v10214_v38, 5 }
 0x158   : > { %v7607_v43 = vpop.f32.mrf.mxu0  ;;  %v1494_v56 = vadd.f32 %v10289_v18, %v11375_v33 }
 0x159   : > { %v10323_v23 = vadd.f32 %v7607_v43, %v10208_v30  ;;  %v10326_v16 = vpop.f32.mrf.mxu1  ;;  %v4814_v30 = vrot.slane %v10166_v63, 5  ;;  %v4811_v63 = vsel %vm8623_vm6, %v4809_v46, %v4810_v59  ;;  %v11374_v43 = vld [vmem:[#allocation22_spill] sm:$0xff] }
 0x15a   : > { %v10328_v2 = vpop.f32.mrf.mxu0  ;;  %v7247_v29 = vcombine.low %v4808_v24, %v4811_v63  ;;  %v11376_v59 = vld [vmem:[#allocation10_spill] sm:$0xff] }
 0x15b   : > { %v7584_v9 = vpop.f32.mrf.mxu1  ;;  %7787 = vmatmul.mubr.msk.bf16.gmra.mxu1 %vm1011_vm3, %v7181_v7  ;;  %v4816_v5 = vrot.slane %v4814_v30, 4  ;;  %v4815_v38 = vsel %vm8623_vm6, %v7230_v32, %v4814_v30  ;;  %v1486_v44 = vadd.f32 %v1485_v26, %v11376_v59  ;;  %v11379_v32 = vld [vmem:[#allocation8_spill] sm:$0xff] }
 0x15c   : > { %v7610_v48 = vpop.f32.mrf.mxu0  ;;  %7813 = vmatmul.mubr.msk.bf16.gmra.mxu0 %vm1011_vm3, %v7244_v27  ;;  %v1510_v53 = vadd.f32 %v7584_v9, %v11371_v35  ;;  %7828 = vmatprep.mubr.msk.bf16.mxu1 %vm8123_vm7, %v8122_v62 }
 0x15d   : > { %v10341_v58 = vadd.f32 %v7610_v48, %v1478_v49  ;;  %7816 = vmatprep.mubr.msk.bf16.mxu0 %vm1011_vm3, %v7245_v55  ;;  %v1501_v1 = vpop.f32.mrf.mxu1  ;;  %v4818_v48 = vsel %vm8623_vm6, %v4816_v5, %v4817_v17 }
 0x15e   : > { %v1898_v41 = vpop.f32.mrf.mxu0  ;;  %v1502_v13 = vadd.f32 %v1501_v1, %v11373_v19  ;;  %v7248_v31 = vcombine.low %v4815_v38, %v4818_v48 }
 0x15f   : > { %v10354_v11 = vadd.f32 %v1898_v41, %v1470_v37  ;;  %v7585_v39 = vpop.f32.mrf.mxu1  ;;  %v1497_v37 = vadd.f32 %v7581_v12, %v11377_v42 }
 0x160   : > { %v7611_v61 = vpop.f32.mrf.mxu0  ;;  %v1513_v7 = vadd.f32 %v7585_v39, %v11374_v43  ;;  %v8038_v43 = vld [vmem:[%s11228_s6] sm:$0xff]  }
 0x161   : > { %v10358_v27 = vadd.f32 %v7611_v61, %v1481_v21  ;;  %v10360_v55 = vpop.f32.mrf.mxu1 }
 0x162   : > { %v10362_v4 = vpop.f32.mrf.mxu0 }
 0x163   : > { %v7624_v46 = vpop.f32.mrf.mxu1 }
 0x164   : > { %v7614_v34 = vpop.f32.mrf.mxu0  ;;  %7817 = vmatmul.mubr.msk.bf16.gmra.mxu0 %vm1011_vm3, %v7246_v14  ;;  %v2313_v9 = vadd.f32 %v7624_v46, %v10044_v60 }
 0x165   : > { %v10370_v49 = vadd.f32 %v7614_v34, %v1494_v56  ;;  %7820 = vmatprep.mubr.msk.bf16.mxu0 %vm1011_vm3, %v7247_v29  ;;  %v2184_v40 = vpop.f32.mrf.mxu1 }
 0x166   : > { %v1914_v18 = vpop.f32.mrf.mxu0  ;;  %v2311_v30 = vadd.f32 %v2184_v40, %v10072_v22  ;;  %v8036_v22 = vld [vmem:[%s510_s26] sm:$0xff]   ;;  %s504_s26 = scalar_lea.vmem %s11380_s1, %s7320_s25  ;;  %s488_s25 = sand.u32 1, %s8104_s28  }
 0x167   : > { %v10377_v35 = vadd.f32 %v1914_v18, %v1486_v44  ;;  %v7625_v26 = vpop.f32.mrf.mxu1  ;;  %7829 = vmatmul.mubr.msk.bf16.vlgmr.msra.gmra.mxu1 %vm5211_vm8, %v8036_v22  ;;  %s11130_s16 = sshll.u32 %s488_s25, 4 }
 0x168   : > { %v7615_v10 = vpop.f32.mrf.mxu0  ;;  %v2314_v60 = vadd.f32 %v7625_v26, %v10080_v54  ;;  %v8037_v54 = vld [vmem:[%s11228_s6 + $0x8] sm:$0xff]   ;;  %7836 = vmatprep.mubr.msk.bf16.mxu1 %vm8123_vm7, %v8122_v62  ;;  %s490_s12 = scalar_lea.vmem [#allocation3], %s11130_s16 }
 0x169   : > { %v10380_v1 = vadd.f32 %v7615_v10, %v1497_v37  ;;  %v10385_v24 = vpop.f32.mrf.mxu1  ;;  %7833 = vmatpush3.bf16.msra.mxu1 %v8037_v54  ;;  %s6589_s20 = sshll.u32 %s490_s12, 4  ;;  %s11171_s20 = int_to_ptr.vmem [resolvable:$true] %s6589_s20 }
 0x16a   : > { %v10383_v41 = vpop.f32.mrf.mxu0  ;;  %7834 = vmatprep.subr.bf16.mxu1 %v8122_v62  ;;  %v8039_v62 = vld [vmem:[%s504_s26] sm:$0xff]   ;;  %s11177_s26 = scalar_lea.sflag [#allocation4], %s488_s25  ;;  %s8044_s16 = scalar_lea.vmem %s11171_s20, 256 }
 0x16b   : > { %v7628_v12 = vpop.f32.mrf.mxu1  ;;  %p8045_p12 = scmp.ne.s32.totalorder %s11171_s20, %s8044_s16  ;;  %p8051_p1 = scmp.lt.s32.totalorder %s11171_s20, %s8049_s23 }
 0x16c   : > { %v7618_v6 = vpop.f32.mrf.mxu0  ;;  %7821 = vmatmul.mubr.msk.bf16.gmra.mxu0 %vm1011_vm3, %v7248_v31  ;;  %v2317_v25 = vadd.f32 %v7628_v12, %v10119_v50  ;;  %v8041_v12 = vld [vmem:[%s11229_s7] sm:$0xff]   ;;  %p8052_p2 = scmp.lt.s32.totalorder %s8050_s30, %s8044_s16 }
 0x16d   : > { %v10392_v63 = vadd.f32 %v7618_v6, %v1510_v53  ;;  %v2200_v19 = vpop.f32.mrf.mxu1  ;;  %7835 = vmatpush3.bf16.msra.mxu1 %v8038_v43  ;;  %p8046_p13 = pnand %p8045_p12, %p8242_p4 }
 0x16e   : > { %v1930_v21 = vpop.f32.mrf.mxu0  ;;  %v2315_v61 = vadd.f32 %v2200_v19, %v10139_v45  ;;  %p8053_p3 = por %p8052_p2, %p8051_p1 }
 0x16f   : > { %v10400_v39 = vadd.f32 %v1930_v21, %v1502_v13  ;;  %v7629_v53 = vpop.f32.mrf.mxu1  ;;  %p8047_p0 = pneg %p8046_p13 }
 0x170   : > { %v7619_v50 = vpop.f32.mrf.mxu0  ;;  %v2318_v17 = vadd.f32 %v7629_v53, %v11379_v32  ;;  %7837 = vmatmul.mubr.msk.bf16.vlgmr.msra.gmra.mxu1 %vm5211_vm8, %v8039_v62 }
 0x171   : > { %v10405_v14 = vadd.f32 %v7619_v50, %v1513_v7  ;;  %v10413_v13 = vpop.f32.mrf.mxu1  ;;  %v11381_v7 = vld [vmem:[#allocation25_spill] sm:$0xff]  ;;  %p8054_p5 = pnand %p8053_p3, %p8047_p0 }
 0x172   : > { %v10411_v29 = vpop.f32.mrf.mxu0 }
 0x173   : > { %v7632_v45 = vpop.f32.mrf.mxu1 }
 0x174   : > { %v7658_v5 = vpop.f32.mrf.mxu0  ;;  %v2321_v33 = vadd.f32 %v7632_v45, %v11381_v7 }
 0x175   : > { %v10419_v56 = vadd.f32 %v7658_v5, %v2313_v9  ;;  %v2216_v34 = vpop.f32.mrf.mxu1  ;;  %v8040_v9 = vld [vmem:[%s11229_s7 + $0x8] sm:$0xff]  }
 0x176   : > { %v2914_v46 = vpop.f32.mrf.mxu0  ;;  %v2319_v38 = vadd.f32 %v2216_v34, %v10204_v15  ;;  %7840 = vmatprep.subr.bf16.mxu1 %v8040_v9 }
 0x177   : > { %v10423_v59 = vadd.f32 %v2914_v46, %v2311_v30  ;;  %v7633_v44 = vpop.f32.mrf.mxu1  ;;  %7841 = vmatpush3.bf16.msra.mxu1 %v8040_v9 }
 0x178   : > { %v7659_v48 = vpop.f32.mrf.mxu0  ;;  %v2322_v18 = vadd.f32 %v7633_v44, %v10211_v57  ;;  %7842 = vmatprep.subr.bf16.mxu1 %v8041_v12 }
 0x179   : > { %v10426_v40 = vadd.f32 %v7659_v48, %v2314_v60  ;;  %v10428_v42 = vpop.f32.mrf.mxu1 }
 0x17a   : > { %v10430_v37 = vpop.f32.mrf.mxu0 }
 0x17b   : > { %v7636_v10 = vpop.f32.mrf.mxu1  ;;  %7843 = vmatpush3.bf16.msra.mxu1 %v8041_v12 }
 0x17c   : > { %v7662_v26 = vpop.f32.mrf.mxu0  ;;  %v2325_v15 = vadd.f32 %v7636_v10, %v10255_v3 }
 0x17d   : > { %v10436_v30 = vadd.f32 %v7662_v26, %v2317_v25  ;;  %v2232_v31 = vpop.f32.mrf.mxu1 }
 0x17e   : > { %v2930_v57 = vpop.f32.mrf.mxu0  ;;  %v2323_v60 = vadd.f32 %v2232_v31, %v10273_v20 }
 0x17f   : > { %v10439_v6 = vadd.f32 %v2930_v57, %v2315_v61  ;;  %v7637_v22 = vpop.f32.mrf.mxu1 }
 0x180   : > { %v7663_v54 = vpop.f32.mrf.mxu0  ;;  %v2326_v21 = vadd.f32 %v7637_v22, %v10280_v8 }
 0x181   : > { %v10445_v19 = vadd.f32 %v7663_v54, %v2318_v17  ;;  %v10447_v3 = vpop.f32.mrf.mxu1 }
 0x182   : > { %v10449_v25 = vpop.f32.mrf.mxu0 }
 0x183   : > { %v7640_v50 = vpop.f32.mrf.mxu1 }
 0x184   : > { %v7666_v20 = vpop.f32.mrf.mxu0  ;;  %v2329_v61 = vadd.f32 %v7640_v50, %v10299_v36 }
 0x185   : > { %v10452_v53 = vadd.f32 %v7666_v20, %v2321_v33  ;;  %v2248_v32 = vpop.f32.mrf.mxu1 }
 0x186   : > { %v2946_v43 = vpop.f32.mrf.mxu0  ;;  %v2327_v45 = vadd.f32 %v2248_v32, %v10318_v52  ;;  %v1962_v32 = vadd.f32 %v10328_v2, %v10230_v28  ;;  %v11383_v2 = vld [vmem:[#allocation14_spill] sm:$0xff] }
 0x187   : > { %v10455_v5 = vadd.f32 %v2946_v43, %v2319_v38  ;;  %v7641_v8 = vpop.f32.mrf.mxu1 }
 0x188   : > { %v7667_v17 = vpop.f32.mrf.mxu0  ;;  %v2330_v62 = vadd.f32 %v7641_v8, %v10323_v23 }
 0x189   : > { %v10458_v7 = vadd.f32 %v7667_v17, %v2322_v18  ;;  %v2251_v34 = vpop.f32.mrf.mxu1 }
 0x18a   : > { %v10460_v46 = vpop.f32.mrf.mxu0 }
 0x18b   : > { %v7644_v44 = vpop.f32.mrf.mxu1 }
 0x18c   : > { %v7670_v48 = vpop.f32.mrf.mxu0  ;;  %v2333_v36 = vadd.f32 %v7644_v44, %v10341_v58  ;;  %v2328_v44 = vadd.f32 %v2251_v34, %v1962_v32 }
 0x18d   : > { %v10463_v33 = vadd.f32 %v7670_v48, %v2325_v15  ;;  %v2264_v9 = vpop.f32.mrf.mxu1 }
 0x18e   : > { %v2962_v10 = vpop.f32.mrf.mxu0  ;;  %v2331_v52 = vadd.f32 %v2264_v9, %v10354_v11  ;;  %v11382_v11 = vld [vmem:[#allocation17_spill] sm:$0xff] }
 0x18f   : > { %v10466_v38 = vadd.f32 %v2962_v10, %v2323_v60  ;;  %v7645_v26 = vpop.f32.mrf.mxu1  ;;  %v1489_v60 = vadd.f32 %v10326_v16, %v11382_v11 }
 0x190   : > { %v7671_v31 = vpop.f32.mrf.mxu0  ;;  %v2334_v23 = vadd.f32 %v7645_v26, %v10358_v27 }
 0x191   : > { %v10469_v18 = vadd.f32 %v7671_v31, %v2326_v21  ;;  %v2267_v57 = vpop.f32.mrf.mxu1  ;;  %v1970_v17 = vadd.f32 %v10383_v41, %v1489_v60 }
 0x192   : > { %v10471_v12 = vpop.f32.mrf.mxu0 }
 0x193   : > { %v7648_v22 = vpop.f32.mrf.mxu1 }
 0x194   : > { %v7674_v54 = vpop.f32.mrf.mxu0  ;;  %v2337_v58 = vadd.f32 %v7648_v22, %v10370_v49  ;;  %v11384_v22 = vld [vmem:[#allocation24_spill] sm:$0xff] }
 0x195   : > { %v10474_v15 = vadd.f32 %v7674_v54, %v2329_v61  ;;  %v2280_v50 = vpop.f32.mrf.mxu1 }
 0x196   : > { %v2978_v20 = vpop.f32.mrf.mxu0  ;;  %v2335_v27 = vadd.f32 %v2280_v50, %v10377_v35  ;;  %v1473_v35 = vadd.f32 %v10283_v47, %v11383_v2 }
 0x197   : > { %v10481_v21 = vadd.f32 %v2978_v20, %v2327_v45  ;;  %v7649_v43 = vpop.f32.mrf.mxu1 }
 0x198   : > { %v7675_v8 = vpop.f32.mrf.mxu0  ;;  %v2338_v49 = vadd.f32 %v7649_v43, %v10380_v1  ;;  %v1505_v1 = vadd.f32 %v10360_v55, %v11384_v22 }
 0x199   : > { %v10485_v61 = vadd.f32 %v7675_v8, %v2330_v62  ;;  %v2283_v48 = vpop.f32.mrf.mxu1  ;;  %v1966_v62 = vadd.f32 %v10362_v4, %v1473_v35 }
 0x19a   : > { %v2981_v9 = vpop.f32.mrf.mxu0  ;;  %v2336_v10 = vadd.f32 %v2283_v48, %v1970_v17  ;;  %v1974_v60 = vadd.f32 %v10411_v29, %v1505_v1 }
 0x19b   : > { %v10487_v16 = vadd.f32 %v2981_v9, %v2328_v44  ;;  %v7652_v26 = vpop.f32.mrf.mxu1  ;;  %v2332_v47 = vadd.f32 %v2267_v57, %v1966_v62  ;;  %v11385_v9 = vld [vmem:[#allocation6_spill] sm:$0xff] }
 0x19c   : > { %v7678_v28 = vpop.f32.mrf.mxu0  ;;  %v2341_v45 = vadd.f32 %v7652_v26, %v10392_v63  ;;  %v2312_v29 = vadd.f32 %v10385_v24, %v11385_v9 }
 0x19d   : > { %v10492_v31 = vadd.f32 %v7678_v28, %v2333_v36  ;;  %v2296_v41 = vpop.f32.mrf.mxu1 }
 0x19e   : > { %v2994_v34 = vpop.f32.mrf.mxu0  ;;  %v2339_v54 = vadd.f32 %v2296_v41, %v10400_v39  ;;  %v3042_v28 = vadd.f32 %v10430_v37, %v2312_v29  ;;  %v11386_v37 = vld [vmem:[#allocation7_spill] sm:$0xff] }
 0x19f   : > { %v10498_v50 = vadd.f32 %v2994_v34, %v2331_v52  ;;  %v7653_v20 = vpop.f32.mrf.mxu1 }
 0x1a0   : > { %v7679_v11 = vpop.f32.mrf.mxu0  ;;  %v2342_v63 = vadd.f32 %v7653_v20, %v10405_v14 }
 0x1a1   : > { %v10502_v36 = vadd.f32 %v7679_v11, %v2334_v23  ;;  %v2299_v32 = vpop.f32.mrf.mxu1 }
 0x1a2   : > { %v2997_v43 = vpop.f32.mrf.mxu0  ;;  %v2340_v8 = vadd.f32 %v2299_v32, %v1974_v60 }
 0x1a3   : > { %v10504_v17 = vadd.f32 %v2997_v43, %v2332_v47  ;;  %v7692_v4 = vpop.f32.mrf.mxu1 }
 0x1a4   : > { %v7682_v55 = vpop.f32.mrf.mxu0  ;;  %v3517_v39 = vadd.f32 %v7692_v4, %v10419_v56 }
 0x1a5   : > { %v10506_v44 = vadd.f32 %v7682_v55, %v2337_v58  ;;  %v3388_v48 = vpop.f32.mrf.mxu1 }
 0x1a6   : > { %v3010_v52 = vpop.f32.mrf.mxu0  ;;  %v3515_v14 = vadd.f32 %v3388_v48, %v10423_v59 }
 0x1a7   : > { %v10511_v57 = vadd.f32 %v3010_v52, %v2335_v27  ;;  %v7693_v26 = vpop.f32.mrf.mxu1 }
 0x1a8   : > { %v7683_v23 = vpop.f32.mrf.mxu0  ;;  %v10518_v58 = vadd.f32 %v7693_v26, %v10426_v40 }
 0x1a9   : > { %v10515_v2 = vadd.f32 %v7683_v23, %v2338_v49  ;;  %v3391_v56 = vpop.f32.mrf.mxu1  ;;  %v2316_v49 = vadd.f32 %v10413_v13, %v11386_v37 }
 0x1aa   : > { %v3013_v35 = vpop.f32.mrf.mxu0  ;;  %v10522_v34 = vadd.f32 %v3391_v56, %v3042_v28 }
 0x1ab   : > { %v10520_v41 = vadd.f32 %v3013_v35, %v2336_v10  ;;  %v7696_v27 = vpop.f32.mrf.mxu1  ;;  %v3046_v60 = vadd.f32 %v10449_v25, %v2316_v49  ;;  %v2320_v25 = vadd.f32 %v10428_v42, %v10233_v51  ;;  %v8042_v51 = vld [vmem:[%s11231_s9 + $0x8] sm:$0xff]   ;;  %v8043_v42 = vld [vmem:[%s11231_s9] sm:$0xff]  }
 0x1ac   : > { %v7686_v24 = vpop.f32.mrf.mxu0  ;;  %v3521_v59 = vadd.f32 %v7696_v27, %v10436_v30  ;;  %7876 = vmatprep.subr.bf16.mxu0 %v8042_v51 }
 0x1ad   : > { %v10524_v22 = vadd.f32 %v7686_v24, %v2341_v45  ;;  %v3404_v62 = vpop.f32.mrf.mxu1  ;;  %v3050_v29 = vadd.f32 %v10460_v46, %v2320_v25  ;;  %7877 = vmatpush3.bf16.msra.mxu0 %v8042_v51 }
 0x1ae   : > { %v3026_v1 = vpop.f32.mrf.mxu0  ;;  %v3519_v40 = vadd.f32 %v3404_v62, %v10439_v6  ;;  %7878 = vmatprep.subr.bf16.mxu0 %v8043_v42 }
 0x1af   : > { %v10529_v20 = vadd.f32 %v3026_v1, %v2339_v54  ;;  %v7697_v10 = vpop.f32.mrf.mxu1  ;;  %v2324_v1 = vadd.f32 %v10447_v3, %v10287_v0 }
 0x1b0   : > { %v7687_v11 = vpop.f32.mrf.mxu0  ;;  %v10536_v45 = vadd.f32 %v7697_v10, %v10445_v19 }
 0x1b1   : > { %v10533_v47 = vadd.f32 %v7687_v11, %v2342_v63  ;;  %v3407_v30 = vpop.f32.mrf.mxu1  ;;  %v3054_v10 = vadd.f32 %v10471_v12, %v2324_v1  ;;  %7879 = vmatpush3.bf16.msra.mxu0 %v8043_v42 }
 0x1b2   : > { %v3029_v32 = vpop.f32.mrf.mxu0  ;;  %v10540_v55 = vadd.f32 %v3407_v30, %v3046_v60 }
 0x1b3   : > { %v10538_v43 = vadd.f32 %v3029_v32, %v2340_v8  ;;  %v7700_v13 = vpop.f32.mrf.mxu1 }
 0x1b4   : > { %v7726_v54 = vpop.f32.mrf.mxu0  ;;  %v3525_v4 = vadd.f32 %v7700_v13, %v10452_v53 }
 0x1b5   : > { %v10543_v6 = vadd.f32 %v7726_v54, %v3517_v39  ;;  %v3420_v52 = vpop.f32.mrf.mxu1 }
 0x1b6   : > { %v3754_v48 = vpop.f32.mrf.mxu0  ;;  %v3523_v19 = vadd.f32 %v3420_v52, %v10455_v5  ;;  %v5602_v5 = vlaneseq }
 0x1b7   : > { %v10548_v63 = vadd.f32 %v3754_v48, %v3515_v14  ;;  %v7701_v9 = vpop.f32.mrf.mxu1 }
 0x1b8   : > { %v10550_v8 = vpop.f32.mrf.mxu0  ;;  %v10554_v23 = vadd.f32 %v7701_v9, %v10458_v7  ;;  %v10569_v24 = vshrl.u32 %v5602_v5, 7  ;;  %v6401_v27 = vand.u32 127, %v5602_v5 }
 0x1b9   : > { %v3423_v53 = vpop.f32.mrf.mxu1 }
 0x1ba   : > { %v10556_v39 = vpop.f32.mrf.mxu0  ;;  %v10558_v26 = vadd.f32 %v3423_v53, %v3050_v29  ;;  %11387 = vst [vmem:[#allocation27_spill] sm:$0xff] %v10569_v24 }
 0x1bb   : > { %v7704_v28 = vpop.f32.mrf.mxu1 }
 0x1bc   : > { %v7730_v35 = vpop.f32.mrf.mxu0  ;;  %v3529_v46 = vadd.f32 %v7704_v28, %v10463_v33  ;;  %v10579_v33 = vsub.s32 %v6401_v27, %v10569_v24 }
 0x1bd   : > { %v10567_v7 = vadd.f32 %v7730_v35, %v3521_v59  ;;  %v3436_v14 = vpop.f32.mrf.mxu1  ;;  %v6406_v59 = vadd.s32 4294967288, %v6401_v27 }
 0x1be   : > { %v3770_v56 = vpop.f32.mrf.mxu0  ;;  %v3527_v62 = vadd.f32 %v3436_v14, %v10466_v38  ;;  %11388 = vst [vmem:[#allocation16_spill] sm:$0xff] %v10579_v33 }
 0x1bf   : > { %v10574_v37 = vadd.f32 %v3770_v56, %v3519_v40  ;;  %v7705_v49 = vpop.f32.mrf.mxu1  ;;  %v10588_v3 = vsub.s32 %v6406_v59, %v10569_v24  ;;  %v3884_v24 = vadd.f32 %v10550_v8, %v10518_v58 }
 0x1c0   : > { %v10576_v11 = vpop.f32.mrf.mxu0  ;;  %v10583_v60 = vadd.f32 %v7705_v49, %v10469_v18 }
 0x1c1   : > { %v3439_v32 = vpop.f32.mrf.mxu1  ;;  %11389 = vst [vmem:[#allocation19_spill] sm:$0xff] %v10588_v3 }
 0x1c2   : > { %v10585_v0 = vpop.f32.mrf.mxu0  ;;  %v10590_v38 = vadd.f32 %v3439_v32, %v3054_v10 }
 0x1c3   : > { %v7708_v40 = vpop.f32.mrf.mxu1 }
 0x1c4   : > { %v7734_v30 = vpop.f32.mrf.mxu0  ;;  %v3533_v13 = vadd.f32 %v7708_v40, %v10474_v15 }
 0x1c5   : > { %v10593_v54 = vadd.f32 %v7734_v30, %v3525_v4  ;;  %v3452_v52 = vpop.f32.mrf.mxu1 }
 0x1c6   : > { %v3786_v12 = vpop.f32.mrf.mxu0  ;;  %v3531_v18 = vadd.f32 %v3452_v52, %v10481_v21 }
 0x1c7   : > { %v10596_v48 = vadd.f32 %v3786_v12, %v3523_v19  ;;  %v7709_v25 = vpop.f32.mrf.mxu1 }
 0x1c8   : > { %v10598_v9 = vpop.f32.mrf.mxu0  ;;  %v10601_v29 = vadd.f32 %v7709_v25, %v10485_v61 }
 0x1c9   : > { %v3455_v53 = vpop.f32.mrf.mxu1 }
 0x1ca   : > { %v10603_v28 = vpop.f32.mrf.mxu0  ;;  %v10606_v35 = vadd.f32 %v3455_v53, %v10487_v16 }
 0x1cb   : > { %v7712_v15 = vpop.f32.mrf.mxu1 }
 0x1cc   : > { %v7738_v4 = vpop.f32.mrf.mxu0  ;;  %v3537_v51 = vadd.f32 %v7712_v15, %v10492_v31 }
 0x1cd   : > { %v10609_v42 = vadd.f32 %v7738_v4, %v3529_v46  ;;  %v3468_v21 = vpop.f32.mrf.mxu1 }
 0x1ce   : > { %v3802_v19 = vpop.f32.mrf.mxu0  ;;  %v3535_v5 = vadd.f32 %v3468_v21, %v10498_v50 }
 0x1cf   : > { %v10612_v14 = vadd.f32 %v3802_v19, %v3527_v62  ;;  %v7713_v61 = vpop.f32.mrf.mxu1 }
 0x1d0   : > { %v10614_v56 = vpop.f32.mrf.mxu0  ;;  %v10617_v27 = vadd.f32 %v7713_v61, %v10502_v36 }
 0x1d1   : > { %v3471_v16 = vpop.f32.mrf.mxu1 }
 0x1d2   : > { %v10619_v1 = vpop.f32.mrf.mxu0  ;;  %v10622_v49 = vadd.f32 %v3471_v16, %v10504_v17 }
 0x1d3   : > { %v7716_v31 = vpop.f32.mrf.mxu1 }
 0x1d4   : > { %v7742_v46 = vpop.f32.mrf.mxu0  ;;  %v3541_v59 = vadd.f32 %v7716_v31, %v10506_v44 }
 0x1d5   : > { %v10625_v10 = vadd.f32 %v7742_v46, %v3533_v13  ;;  %v3484_v50 = vpop.f32.mrf.mxu1 }
 0x1d6   : > { %v3818_v62 = vpop.f32.mrf.mxu0  ;;  %v3539_v32 = vadd.f32 %v3484_v50, %v10511_v57 }
 0x1d7   : > { %v10628_v40 = vadd.f32 %v3818_v62, %v3531_v18  ;;  %v7717_v36 = vpop.f32.mrf.mxu1 }
 0x1d8   : > { %v10630_v30 = vpop.f32.mrf.mxu0  ;;  %v10633_v52 = vadd.f32 %v7717_v36, %v10515_v2 }
 0x1d9   : > { %v3487_v17 = vpop.f32.mrf.mxu1 }
 0x1da   : > { %v10635_v12 = vpop.f32.mrf.mxu0  ;;  %v10638_v25 = vadd.f32 %v3487_v17, %v10520_v41 }
 0x1db   : > { %v7720_v44 = vpop.f32.mrf.mxu1 }
 0x1dc   : > { %v7746_v13 = vpop.f32.mrf.mxu0  ;;  %v3545_v53 = vadd.f32 %v7720_v44, %v10524_v22 }
 0x1dd   : > { %v10641_v15 = vadd.f32 %v7746_v13, %v3537_v51  ;;  %v3500_v57 = vpop.f32.mrf.mxu1 }
 0x1de   : > { %v3834_v18 = vpop.f32.mrf.mxu0  ;;  %v3543_v4 = vadd.f32 %v3500_v57, %v10529_v20 }
 0x1df   : > { %v10644_v21 = vadd.f32 %v3834_v18, %v3535_v5  ;;  %v7721_v2 = vpop.f32.mrf.mxu1 }
 0x1e0   : > { %v10646_v19 = vpop.f32.mrf.mxu0  ;;  %v10649_v61 = vadd.f32 %v7721_v2, %v10533_v47 }
 0x1e1   : > { %v3503_v41 = vpop.f32.mrf.mxu1 }
 0x1e2   : > { %11390 = vst [vmem:[#allocation21_spill] sm:$0xff] %v10649_v61  ;;  %v10651_v16 = vpop.f32.mrf.mxu0  ;;  %v10654_v31 = vadd.f32 %v3503_v41, %v10538_v43 }
 0x1e3   : > { %v7760_v51 = vpop.f32.mrf.mxu1 }
 0x1e4   : > { %11391 = vst [vmem:[#allocation26_spill] sm:$0xff] %v10654_v31  ;;  %v7750_v22 = vpop.f32.mrf.mxu0 }
 0x1e5   : > { %v10656_v46 = vadd.f32 %v7750_v22, %v3541_v59  ;;  %v4484_v20 = vpop.f32.mrf.mxu1 }
 0x1e6   : > { %v3850_v50 = vpop.f32.mrf.mxu0 }
 0x1e7   : > { %v10658_v5 = vadd.f32 %v3850_v50, %v3539_v32  ;;  %v7761_v36 = vpop.f32.mrf.mxu1  ;;  %v4613_v50 = vadd.f32 %v7760_v51, %v10543_v6 }
 0x1e8   : > { %v10660_v62 = vpop.f32.mrf.mxu0 }
 0x1e9   : > { %v4487_v47 = vpop.f32.mrf.mxu1 }
 0x1ea   : > { %v10662_v17 = vpop.f32.mrf.mxu0 }
 0x1eb   : > { %11392 = vst [vmem:[#allocation23_spill] sm:$0xff] %v10662_v17  ;;  %v7764_v13 = vpop.f32.mrf.mxu1 }
 0x1ec   : > { %v7754_v44 = vpop.f32.mrf.mxu0 }
 0x1ed   : > { %v10664_v57 = vadd.f32 %v7754_v44, %v3545_v53  ;;  %v4500_v18 = vpop.f32.mrf.mxu1  ;;  %v4611_v53 = vadd.f32 %v4484_v20, %v10548_v63  ;;  %v4617_v20 = vadd.f32 %v7764_v13, %v10567_v7 }
 0x1ee   : > { %v3866_v43 = vpop.f32.mrf.mxu0  ;;  %v4615_v7 = vadd.f32 %v4500_v18, %v10574_v37 }
 0x1ef   : > { %11393 = vst [vmem:[#allocation29_spill] sm:$0xff] %v10664_v57  ;;  %v10666_v2 = vadd.f32 %v3866_v43, %v3543_v4  ;;  %v7765_v41 = vpop.f32.mrf.mxu1  ;;  %v10679_v4 = vld [vmem:[%s11226_s4] ss:$0 sm:$0xff] }
 0x1f0   : > { %v10668_v59 = vpop.f32.mrf.mxu0 }
 0x1f1   : > { %11394 = vst [vmem:[#allocation28_spill] sm:$0xff] %v10666_v2  ;;  %11395 = vst [vmem:[#allocation13_spill] sm:$0xff] %v10668_v59  ;;  %v4503_v32 = vpop.f32.mrf.mxu1  ;;  %v4614_v2 = vadd.f32 %v7761_v36, %v3884_v24 }
 0x1f2   : > { %v10670_v22 = vpop.f32.mrf.mxu0 }
 0x1f3   : > { %11396 = vst [vmem:[#allocation12_spill] sm:$0xff] %v10670_v22  ;;  %v7768_v3 = vpop.f32.mrf.mxu1  ;;  %v3882_v22 = vadd.f32 %v10556_v39, %v10522_v34  ;;  %v3888_v34 = vadd.f32 %v10576_v11, %v10536_v45 }
 0x1f4   : > { %v7794_v33 = vpop.f32.mrf.mxu0 }
 0x1f5   : > { %v5087_v44 = vadd.f32 %v7794_v33, %v4613_v50  ;;  %v4516_v43 = vpop.f32.mrf.mxu1  ;;  %v4612_v61 = vadd.f32 %v4487_v47, %v3882_v22 }
 0x1f6   : > { %v4958_v31 = vpop.f32.mrf.mxu0 }
 0x1f7   : > { %v5085_v6 = vadd.f32 %v4958_v31, %v4611_v53  ;;  %v7769_v51 = vpop.f32.mrf.mxu1  ;;  %v5126_v58 = vadd.f32 %v10679_v4, %v5087_v44  ;;  %v4618_v53 = vadd.f32 %v7765_v41, %v3888_v34  ;;  %v3892_v41 = vadd.f32 %v10598_v9, %v10554_v23 }
 0x1f8   : > { %v7795_v59 = vpop.f32.mrf.mxu0 }
 0x1f9   : > { %v5088_v8 = vadd.f32 %v7795_v59, %v4614_v2  ;;  %v4519_v63 = vpop.f32.mrf.mxu1  ;;  %v5124_v50 = vadd.f32 %v10679_v4, %v5085_v6  ;;  %v5158_v31 = vmax.f32 %v5126_v58, 0.0  ;;  %v3886_v2 = vadd.f32 %v10585_v0, %v10540_v55 }
 0x1fa   : > { %v4961_v33 = vpop.f32.mrf.mxu0  ;;  %v4621_v55 = vadd.f32 %v7768_v3, %v10593_v54  ;;  %v3890_v3 = vadd.f32 %v10603_v28, %v10558_v26  ;;  %v4619_v54 = vadd.f32 %v4516_v43, %v10596_v48 }
 0x1fb   : > { %v5127_v57 = vadd.f32 %v10679_v4, %v5088_v8  ;;  %v5086_v17 = vadd.f32 %v4961_v33, %v4612_v61  ;;  %v7772_v39 = vpop.f32.mrf.mxu1  ;;  %v5156_v44 = vmax.f32 %v5124_v50, 0.0  ;;  %v4616_v33 = vadd.f32 %v4503_v32, %v3886_v2 }
 0x1fc   : > { %v7798_v24 = vpop.f32.mrf.mxu0  ;;  %v4625_v26 = vadd.f32 %v7772_v39, %v10609_v42  ;;  %v3894_v42 = vadd.f32 %v10619_v1, %v10590_v38 }
 0x1fd   : > { %v5159_v36 = vmax.f32 %v5127_v57, 0.0  ;;  %v5125_v47 = vadd.f32 %v10679_v4, %v5086_v17  ;;  %v5091_v22 = vadd.f32 %v7798_v24, %v4617_v20  ;;  %v4532_v13 = vpop.f32.mrf.mxu1 }
 0x1fe   : > { %v4974_v59 = vpop.f32.mrf.mxu0  ;;  %v4623_v39 = vadd.f32 %v4532_v13, %v10612_v14 }
 0x1ff   : > { %v5324_v61 = vpack.c.bf16 %v5159_v36, %v5158_v31  ;;  %v5157_v6 = vmax.f32 %v5125_v47, 0.0  ;;  %v5089_v8 = vadd.f32 %v4974_v59, %v4615_v7  ;;  %v7773_v45 = vpop.f32.mrf.mxu1  ;;  %v5130_v57 = vadd.f32 %v10679_v4, %v5091_v22 }
 0x200   : > { %v7799_v11 = vpop.f32.mrf.mxu0  ;;  %v4622_v7 = vadd.f32 %v7769_v51, %v3892_v41  ;;  %v3896_v51 = vadd.f32 %v10614_v56, %v10583_v60 }
 0x201   : > { %v5323_v58 = vpack.c.bf16 %v5157_v6, %v5156_v44  ;;  %v5092_v17 = vadd.f32 %v7799_v11, %v4618_v53  ;;  %v4535_v20 = vpop.f32.mrf.mxu1  ;;  %v5128_v37 = vadd.f32 %v10679_v4, %v5089_v8  ;;  %v5162_v34 = vmax.f32 %v5130_v57, 0.0 }
 0x202   : > { %v4977_v24 = vpop.f32.mrf.mxu0 }
 0x203   : > { %v5131_v0 = vadd.f32 %v10679_v4, %v5092_v17  ;;  %v5090_v18 = vadd.f32 %v4977_v24, %v4616_v33  ;;  %7844 = vmatprep.mubr.msk.bf16.mxu1 %vm5211_vm8, %v5323_v58  ;;  %v7776_v50 = vpop.f32.mrf.mxu1  ;;  %v5160_v59 = vmax.f32 %v5128_v37, 0.0 }
 0x204   : > { %v7802_v32 = vpop.f32.mrf.mxu0  ;;  %7845 = vmatmul.mubr.msk.bf16.vlgmr.msra.gmra.mxu1 %vm5211_vm8, %v5324_v61  ;;  %v4620_v61 = vadd.f32 %v4519_v63, %v3890_v3  ;;  %v4624_v3 = vadd.f32 %v4535_v20, %v3894_v42  ;;  %v4629_v38 = vadd.f32 %v7776_v50, %v10625_v10  ;;  %v3898_v10 = vadd.f32 %v10635_v12, %v10606_v35 }
 0x205   : > { %v5163_v31 = vmax.f32 %v5131_v0, 0.0  ;;  %v5129_v36 = vadd.f32 %v10679_v4, %v5090_v18  ;;  %v5095_v47 = vadd.f32 %v7802_v32, %v4621_v55  ;;  %v4548_v22 = vpop.f32.mrf.mxu1  ;;  %v4626_v32 = vadd.f32 %v7773_v45, %v3896_v51 }
 0x206   : > { %v4990_v2 = vpop.f32.mrf.mxu0  ;;  %v3900_v45 = vadd.f32 %v10630_v30, %v10601_v29  ;;  %v4627_v50 = vadd.f32 %v4548_v22, %v10628_v40  ;;  %v3904_v22 = vadd.f32 %v10646_v19, %v10617_v27 }
 0x207   : > { %v5326_v53 = vpack.c.bf16 %v5163_v31, %v5162_v34  ;;  %v5161_v23 = vmax.f32 %v5129_v36, 0.0  ;;  %v5093_v9 = vadd.f32 %v4990_v2, %v4619_v54  ;;  %v7777_v44 = vpop.f32.mrf.mxu1  ;;  %v5134_v11 = vadd.f32 %v10679_v4, %v5095_v47 }
 0x208   : > { %v7803_v6 = vpop.f32.mrf.mxu0 }
 0x209   : > { %v5325_v8 = vpack.c.bf16 %v5161_v23, %v5160_v59  ;;  %v5096_v33 = vadd.f32 %v7803_v6, %v4622_v7  ;;  %v4551_v58 = vpop.f32.mrf.mxu1  ;;  %v5132_v48 = vadd.f32 %v10679_v4, %v5093_v9  ;;  %v5166_v24 = vmax.f32 %v5134_v11, 0.0 }
 0x20a   : > { %v4993_v57 = vpop.f32.mrf.mxu0  ;;  %v4628_v51 = vadd.f32 %v4551_v58, %v3898_v10 }
 0x20b   : > { %v5135_v28 = vadd.f32 %v10679_v4, %v5096_v33  ;;  %v5094_v43 = vadd.f32 %v4993_v57, %v4620_v61  ;;  %7848 = vmatprep.mubr.msk.bf16.mxu1 %vm5211_vm8, %v5325_v8  ;;  %v7780_v17 = vpop.f32.mrf.mxu1  ;;  %v5164_v34 = vmax.f32 %v5132_v48, 0.0  ;;  %v4630_v57 = vadd.f32 %v7777_v44, %v3900_v45 }
 0x20c   : > { %v7806_v63 = vpop.f32.mrf.mxu0  ;;  %7849 = vmatmul.mubr.msk.bf16.gmra.mxu1 %vm5211_vm8, %v5326_v53 }
 0x20d   : > { %v5167_v55 = vmax.f32 %v5135_v28, 0.0  ;;  %v5133_v37 = vadd.f32 %v10679_v4, %v5094_v43  ;;  %v5099_v0 = vadd.f32 %v7806_v63, %v4625_v26  ;;  %v4564_v18 = vpop.f32.mrf.mxu1 }
 0x20e   : > { %v5006_v41 = vpop.f32.mrf.mxu0 }
 0x20f   : > { %v5328_v31 = vpack.c.bf16 %v5167_v55, %v5166_v24  ;;  %v5165_v60 = vmax.f32 %v5133_v37, 0.0  ;;  %v5097_v56 = vadd.f32 %v5006_v41, %v4623_v39  ;;  %v7781_v36 = vpop.f32.mrf.mxu1  ;;  %v5138_v2 = vadd.f32 %v10679_v4, %v5099_v0 }
 0x210   : > { %v7807_v47 = vpop.f32.mrf.mxu0  ;;  %v4633_v0 = vadd.f32 %v7780_v17, %v10641_v15  ;;  %v3902_v15 = vadd.f32 %v10651_v16, %v10622_v49  ;;  %v4631_v17 = vadd.f32 %v4564_v18, %v10644_v21  ;;  %v3908_v18 = vadd.f32 %v10660_v62, %v10633_v52 }
 0x211   : > { %v5327_v54 = vpack.c.bf16 %v5165_v60, %v5164_v34  ;;  %v5100_v7 = vadd.f32 %v7807_v47, %v4626_v32  ;;  %v4567_v59 = vpop.f32.mrf.mxu1  ;;  %v5136_v14 = vadd.f32 %v10679_v4, %v5097_v56  ;;  %v5170_v9 = vmax.f32 %v5138_v2, 0.0 }
 0x212   : > { %v5009_v53 = vpop.f32.mrf.mxu0 }
 0x213   : > { %v5139_v1 = vadd.f32 %v10679_v4, %v5100_v7  ;;  %v5098_v13 = vadd.f32 %v5009_v53, %v4624_v3  ;;  %7852 = vmatprep.mubr.msk.bf16.mxu1 %vm5211_vm8, %v5327_v54  ;;  %v7784_v23 = vpop.f32.mrf.mxu1  ;;  %v5168_v26 = vmax.f32 %v5136_v14, 0.0  ;;  %v4632_v54 = vadd.f32 %v4567_v59, %v3902_v15 }
 0x214   : > { %v7810_v20 = vpop.f32.mrf.mxu0  ;;  %7853 = vmatmul.mubr.msk.bf16.gmra.mxu1 %vm5211_vm8, %v5328_v31  ;;  %v4634_v31 = vadd.f32 %v7781_v36, %v3904_v22  ;;  %v4637_v14 = vadd.f32 %v7784_v23, %v10656_v46 }
 0x215   : > { %v5171_v6 = vmax.f32 %v5139_v1, 0.0  ;;  %v5137_v61 = vadd.f32 %v10679_v4, %v5098_v13  ;;  %v5103_v8 = vadd.f32 %v7810_v20, %v4629_v38  ;;  %v4580_v11 = vpop.f32.mrf.mxu1  ;;  %v11397_v20 = vld [vmem:[#allocation23_spill] sm:$0xff] }
 0x216   : > { %v5022_v33 = vpop.f32.mrf.mxu0  ;;  %v4635_v36 = vadd.f32 %v4580_v11, %v10658_v5 }
 0x217   : > { %v5330_v48 = vpack.c.bf16 %v5171_v6, %v5170_v9  ;;  %v5169_v29 = vmax.f32 %v5137_v61, 0.0  ;;  %v5101_v30 = vadd.f32 %v5022_v33, %v4627_v50  ;;  %v7785_v28 = vpop.f32.mrf.mxu1  ;;  %v5142_v24 = vadd.f32 %v10679_v4, %v5103_v8 }
 0x218   : > { %v7811_v43 = vpop.f32.mrf.mxu0  ;;  %v3906_v9 = vadd.f32 %v11397_v20, %v10638_v25  ;;  %v4638_v6 = vadd.f32 %v7785_v28, %v3908_v18 }
 0x219   : > { %v5329_v63 = vpack.c.bf16 %v5169_v29, %v5168_v26  ;;  %v5104_v55 = vadd.f32 %v7811_v43, %v4630_v57  ;;  %v5140_v35 = vadd.f32 %v10679_v4, %v5101_v30  ;;  %v4583_v44 = vpop.f32.mrf.mxu1  ;;  %v5174_v58 = vmax.f32 %v5142_v24, 0.0  ;;  %v11398_v29 = vld [vmem:[#allocation29_spill] sm:$0xff] }
 0x21a   : > { %v5025_v37 = vpop.f32.mrf.mxu0  ;;  %v4636_v11 = vadd.f32 %v4583_v44, %v3906_v9  ;;  %v8124_v9 = vmov 1966171168  }
 0x21b   : > { %v5143_v40 = vadd.f32 %v10679_v4, %v5104_v55  ;;  %v5102_v12 = vadd.f32 %v5025_v37, %v4628_v51  ;;  %7856 = vmatprep.mubr.msk.bf16.mxu1 %vm5211_vm8, %v5329_v63  ;;  %v5172_v60 = vmax.f32 %v5140_v35, 0.0  ;;  %v7788_v27 = vpop.f32.mrf.mxu1  ;;  %v11399_v51 = vld [vmem:[#allocation21_spill] sm:$0xff]  ;;  %v11401_v55 = vld [vmem:[#allocation28_spill] sm:$0xff] }
 0x21c   : > { %v7814_v42 = vpop.f32.mrf.mxu0  ;;  %7857 = vmatmul.mubr.msk.bf16.gmra.mxu1 %vm5211_vm8, %v5330_v48  ;;  %v4641_v30 = vadd.f32 %v7788_v27, %v11398_v29  ;;  %v11400_v63 = vld [vmem:[#allocation13_spill] sm:$0xff] }
 0x21d   : > { %v5175_v39 = vmax.f32 %v5143_v40, 0.0  ;;  %v5141_v41 = vadd.f32 %v10679_v4, %v5102_v12  ;;  %v5107_v32 = vadd.f32 %v7814_v42, %v4633_v0  ;;  %v4596_v59 = vpop.f32.mrf.mxu1  ;;  %v3912_v24 = vadd.f32 %v11400_v63, %v11399_v51  ;;  %v11402_v42 = vld [vmem:[#allocation26_spill] sm:$0xff] }
 0x21e   : > { %v5038_v34 = vpop.f32.mrf.mxu0  ;;  %v4639_v37 = vadd.f32 %v4596_v59, %v11401_v55  ;;  %v10796_v55 = vld [vmem:[%s11230_s8] ss:$0 sm:$0xff] }
 0x21f   : > { %v5332_v56 = vpack.c.bf16 %v5175_v39, %v5174_v58  ;;  %v5173_v47 = vmax.f32 %v5141_v41, 0.0  ;;  %v5105_v19 = vadd.f32 %v5038_v34, %v4631_v17  ;;  %v5146_v7 = vadd.f32 %v10679_v4, %v5107_v32  ;;  %v7789_v62 = vpop.f32.mrf.mxu1  ;;  %v11403_v58 = vld [vmem:[#allocation12_spill] sm:$0xff] }
 0x220   : > { %v7815_v3 = vpop.f32.mrf.mxu0  ;;  %v3910_v39 = vadd.f32 %v11403_v58, %v11402_v42  ;;  %v4642_v41 = vadd.f32 %v7789_v62, %v3912_v24 }
 0x221   : > { %v5331_v2 = vpack.c.bf16 %v5173_v47, %v5172_v60  ;;  %v5108_v53 = vadd.f32 %v7815_v3, %v4634_v31  ;;  %v5144_v49 = vadd.f32 %v10679_v4, %v5105_v19  ;;  %v5178_v13 = vmax.f32 %v5146_v7, 0.0  ;;  %v4599_v0 = vpop.f32.mrf.mxu1 }
 0x222   : > { %v5041_v38 = vpop.f32.mrf.mxu0  ;;  %v4640_v27 = vadd.f32 %v4599_v0, %v3910_v39 }
 0x223   : > { %v5147_v21 = vadd.f32 %v10679_v4, %v5108_v53  ;;  %v5106_v16 = vadd.f32 %v5041_v38, %v4632_v54  ;;  %7860 = vmatprep.mubr.msk.bf16.mxu1 %vm5211_vm8, %v5331_v2  ;;  %v5176_v8 = vmax.f32 %v5144_v49, 0.0 }
 0x224   : > { %v7818_v1 = vpop.f32.mrf.mxu0  ;;  %7861 = vmatmul.mubr.msk.bf16.gmra.mxu1 %vm5211_vm8, %v5332_v56 }
 0x225   : > { %v5179_v45 = vmax.f32 %v5147_v21, 0.0  ;;  %v5145_v46 = vadd.f32 %v10679_v4, %v5106_v16  ;;  %v5111_v23 = vadd.f32 %v7818_v1, %v4637_v14 }
 0x226   : > { %v5054_v61 = vpop.f32.mrf.mxu0 }
 0x227   : > { %v5334_v10 = vpack.c.bf16 %v5179_v45, %v5178_v13  ;;  %v5177_v50 = vmax.f32 %v5145_v46, 0.0  ;;  %v5109_v52 = vadd.f32 %v5054_v61, %v4635_v36  ;;  %v5150_v57 = vadd.f32 %v10679_v4, %v5111_v23  ;;  %v10765_v15 = vpop.f32.mrf.mxu1 }
 0x228   : > { %v7819_v5 = vpop.f32.mrf.mxu0 }
 0x229   : > { %v5333_v33 = vpack.c.bf16 %v5177_v50, %v5176_v8  ;;  %v5112_v26 = vadd.f32 %v7819_v5, %v4638_v6  ;;  %v5148_v43 = vadd.f32 %v10679_v4, %v5109_v52  ;;  %v5182_v40 = vmax.f32 %v5150_v57, 0.0  ;;  %v7830_v47 = vpop.f32.mrf.mxu1  ;;  %v11404_v8 = vld [vmem:[#allocation27_spill] sm:$0xff] }
 0x22a   : > { %v5057_v48 = vpop.f32.mrf.mxu0  ;;  %v5600_v6 = vunpack.c.l.s4 %v8124_v9  ;;  %v10785_v62 = vsub.s32 0, %v11404_v8 }
 0x22b   : > { %v5151_v25 = vadd.f32 %v10679_v4, %v5112_v26  ;;  %v5110_v28 = vadd.f32 %v5057_v48, %v4636_v11  ;;  %7864 = vmatprep.mubr.msk.bf16.mxu1 %vm5211_vm8, %v5333_v33  ;;  %v5180_v17 = vmax.f32 %v5148_v43, 0.0  ;;  %v10768_v7 = vpop.f32.mrf.mxu1 }
 0x22c   : > { %v7822_v35 = vpop.f32.mrf.mxu0  ;;  %7865 = vmatmul.mubr.msk.bf16.gmra.mxu1 %vm5211_vm8, %v5334_v10  ;;  %v5601_v61 = vunpack.c.0.s8 %v5600_v6 }
 0x22d   : > { %v5183_v12 = vmax.f32 %v5151_v25, 0.0  ;;  %v5149_v22 = vadd.f32 %v10679_v4, %v5110_v28  ;;  %v5115_v44 = vadd.f32 %v7822_v35, %v4641_v30  ;;  %v7831_v49 = vpop.f32.mrf.mxu1 }
 0x22e   : > { %v5070_v32 = vpop.f32.mrf.mxu0  ;;  %v10780_v10 = vsub.s32 %v5601_v61, %v11404_v8 }
 0x22f   : > { %v5336_v34 = vpack.c.bf16 %v5183_v12, %v5182_v40  ;;  %v5181_v31 = vmax.f32 %v5149_v22, 0.0  ;;  %v5113_v60 = vadd.f32 %v5070_v32, %v4639_v37  ;;  %v5154_v3 = vadd.f32 %v10679_v4, %v5115_v44 }
 0x230   : > { %v7823_v56 = vpop.f32.mrf.mxu0  ;;  %v5316_v36 = vpop.f32.mrf.mxu1 }
 0x231   : > { %v5335_v19 = vpack.c.bf16 %v5181_v31, %v5180_v17  ;;  %v5116_v54 = vadd.f32 %v7823_v56, %v4642_v41  ;;  %v5152_v53 = vadd.f32 %v10679_v4, %v5113_v60  ;;  %v5186_v21 = vmax.f32 %v5154_v3, 0.0 }
 0x232   : > { %v5073_v2 = vpop.f32.mrf.mxu0  ;;  %v7838_v45 = vpop.f32.mrf.mxu1  ;;  %v5598_v43 = vcombine.high %v5316_v36, %v5316_v36 }
 0x233   : > { %v5155_v38 = vadd.f32 %v10679_v4, %v5116_v54  ;;  %v5114_v14 = vadd.f32 %v5073_v2, %v4640_v27  ;;  %7868 = vmatprep.mubr.msk.bf16.mxu1 %vm5211_vm8, %v5335_v19  ;;  %v5184_v59 = vmax.f32 %v5152_v53, 0.0 }
 0x234   : > { %7869 = vmatmul.mubr.msk.bf16.gmra.mxu1 %vm5211_vm8, %v5336_v34  ;;  %v10775_v23 = vpop.f32.mrf.mxu1  ;;  %v5612_v12 = vrot.slane %v5598_v43, %v10780_v10 }
 0x235   : > { %v5187_v16 = vmax.f32 %v5155_v38, 0.0  ;;  %v5153_v18 = vadd.f32 %v10679_v4, %v5114_v14  ;;  %v5605_v4 = vrot.slane %v5316_v36, %v10780_v10 }
 0x236   : > { %v7839_v20 = vpop.f32.mrf.mxu1  ;;  %v5614_v47 = vcombine.high %v5612_v12, %v5612_v12 }
 0x237   : > { %v5338_v1 = vpack.c.bf16 %v5187_v16, %v5186_v21  ;;  %v5185_v13 = vmax.f32 %v5153_v18, 0.0  ;;  %v5613_v50 = vcombine.high %v5605_v4, %v5605_v4  ;;  %v5621_v52 = vrot.slane %v5605_v4, %v10780_v10 }
 0x238   : > { %v5628_v21 = vrot.slane %v5612_v12, %v10780_v10 }
 0x239   : > { %v5337_v46 = vpack.c.bf16 %v5185_v13, %v5184_v59  ;;  %v5635_v5 = vrot.slane %v5613_v50, %v10780_v10  ;;  %v5699_v48 = vrot.slane %v5621_v52, %v10785_v62  ;;  %v5643_v24 = vcombine.high %v5621_v52, %v5621_v52 }
 0x23a   : > { %v5642_v13 = vrot.slane %v5614_v47, %v10780_v10  ;;  %v5715_v4 = vrot.slane %v5628_v21, %v10785_v62 }
 0x23b   : > { %7872 = vmatprep.mubr.msk.bf16.mxu1 %vm5211_vm8, %v5337_v46  ;;  %v5703_v29 = vrot.slane %v5635_v5, %v10785_v62  ;;  %v5645_v40 = vcombine.high %v5635_v5, %v5635_v5  ;;  %v5707_v34 = vrot.slane %v5643_v24, %v10785_v62 }
 0x23c   : > { %7873 = vmatmul.mubr.msk.bf16.gmra.mxu1 %vm5211_vm8, %v5338_v1 }
 0x23d   : > { %v5711_v60 = vrot.slane %v5645_v40, %v10785_v62 }
 0x2c4   : > { %v7846_v11 = vpop.f32.mrf.mxu1 }
 0x2c5   : > { %v5566_v33 = vadd.f32 %v7846_v11, %v10765_v15  ;;  %v5719_v11 = vrot.slane %v5642_v13, %v10785_v62 }
 0x2c6   : > { %v5437_v57 = vpop.f32.mrf.mxu1 }
 0x2c7   : > { %v5564_v26 = vadd.f32 %v5437_v57, %v10765_v15  ;;  %v5778_v51 = vadd.f32 %v5703_v29, %v5566_v33 }
 0x2c8   : > { %v7847_v30 = vpop.f32.mrf.mxu1 }
 0x2c9   : > { %v5776_v25 = vadd.f32 %v5699_v48, %v5564_v26  ;;  %v5567_v28 = vadd.f32 %v7847_v30, %v10768_v7  ;;  %v5817_v58 = vadd.f32 %v10796_v55, %v5778_v51 }
 0x2ca   : > { %v5440_v63 = vpop.f32.mrf.mxu1 }
 0x2cb   : > { %v5779_v37 = vadd.f32 %v5703_v29, %v5567_v28  ;;  %v5565_v0 = vadd.f32 %v5440_v63, %v10768_v7  ;;  %v5815_v22 = vadd.f32 %v10796_v55, %v5776_v25  ;;  %v5849_v54 = vmax.f32 %v5817_v58, 0.0 }
 0x2cc   : > { %v7850_v35 = vpop.f32.mrf.mxu1  ;;  %v5644_v25 = vcombine.high %v5628_v21, %v5628_v21  ;;  %v5654_v28 = vrot.slane %v10775_v23, %v10780_v10 }
 0x2cd   : > { %v5818_v44 = vadd.f32 %v10796_v55, %v5779_v37  ;;  %v5777_v42 = vadd.f32 %v5699_v48, %v5565_v0  ;;  %v5570_v39 = vadd.f32 %v7850_v35, %v10765_v15  ;;  %v5847_v27 = vmax.f32 %v5815_v22, 0.0 }
 0x2ce   : > { %v5453_v41 = vpop.f32.mrf.mxu1  ;;  %v5646_v0 = vcombine.high %v5642_v13, %v5642_v13  ;;  %v5723_v58 = vrot.slane %v5644_v25, %v10785_v62 }
 0x2cf   : > { %v5816_v32 = vadd.f32 %v10796_v55, %v5777_v42  ;;  %v5568_v17 = vadd.f32 %v5453_v41, %v10765_v15  ;;  %v5850_v31 = vmax.f32 %v5818_v44, 0.0  ;;  %v5782_v2 = vadd.f32 %v5711_v60, %v5570_v39 }
 0x2d0   : > { %v7851_v56 = vpop.f32.mrf.mxu1  ;;  %v5662_v39 = vcombine.high %v5654_v28, %v5654_v28 }
 0x2d1   : > { %v5848_v19 = vmax.f32 %v5816_v32, 0.0  ;;  %v5780_v3 = vadd.f32 %v5707_v34, %v5568_v17  ;;  %v5571_v53 = vadd.f32 %v7851_v56, %v10768_v7  ;;  %v5880_v16 = vpack.c.bf16 %v5850_v31, %v5849_v54 }
 0x2d2   : > { %v5456_v38 = vpop.f32.mrf.mxu1  ;;  %v5821_v45 = vadd.f32 %v10796_v55, %v5782_v2  ;;  %v5670_v56 = vrot.slane %v5654_v28, %v10780_v10 }
 0x2d3   : > { %v5879_v14 = vpack.c.bf16 %v5848_v19, %v5847_v27  ;;  %v5569_v49 = vadd.f32 %v5456_v38, %v10768_v7  ;;  %v5783_v18 = vadd.f32 %v5711_v60, %v5571_v53  ;;  %v5819_v59 = vadd.f32 %v10796_v55, %v5780_v3 }
 0x2d4   : > { %v7854_v36 = vpop.f32.mrf.mxu1  ;;  %v5853_v57 = vmax.f32 %v5821_v45, 0.0  ;;  %v5684_v38 = vrot.slane %v5662_v39, %v10780_v10 }
 0x2d5   : > { %v5781_v1 = vadd.f32 %v5707_v34, %v5569_v49  ;;  %7880 = vmatprep.mubr.msk.bf16.mxu0 %vm5211_vm8, %v5879_v14  ;;  %v5822_v46 = vadd.f32 %v10796_v55, %v5783_v18  ;;  %v5574_v6 = vadd.f32 %v7854_v36, %v10765_v15  ;;  %v5851_v52 = vmax.f32 %v5819_v59, 0.0 }
 0x2d6   : > { %v5469_v20 = vpop.f32.mrf.mxu1  ;;  %7881 = vmatmul.mubr.msk.bf16.vlgmr.msra.gmra.mxu0 %vm5211_vm8, %v5880_v16  ;;  %v5727_v34 = vrot.slane %v5646_v0, %v10785_v62  ;;  %v5694_v25 = vcombine.high %v5684_v38, %v5684_v38 }
 0x2d7   : > { %v5820_v9 = vadd.f32 %v10796_v55, %v5781_v1  ;;  %v5572_v61 = vadd.f32 %v5469_v20, %v10765_v15  ;;  %v5854_v8 = vmax.f32 %v5822_v46, 0.0  ;;  %v5786_v30 = vadd.f32 %v5719_v11, %v5574_v6 }
 0x2d8   : > { %v7855_v50 = vpop.f32.mrf.mxu1  ;;  %v5731_v1 = vrot.slane %v5670_v56, %v10785_v62  ;;  %v5735_v6 = vrot.slane %v5684_v38, %v10785_v62 }
 0x2d9   : > { %v5852_v5 = vmax.f32 %v5820_v9, 0.0  ;;  %v5575_v33 = vadd.f32 %v7855_v50, %v10768_v7  ;;  %v5784_v26 = vadd.f32 %v5715_v4, %v5572_v61  ;;  %v5882_v51 = vpack.c.bf16 %v5854_v8, %v5853_v57 }
 0x2da   : > { %v5472_v48 = vpop.f32.mrf.mxu1  ;;  %v5825_v22 = vadd.f32 %v10796_v55, %v5786_v30  ;;  %v5647_v9 = vcombine.high %v10775_v23, %v10775_v23  ;;  %v5692_v30 = vcombine.high %v5670_v56, %v5670_v56 }
 0x2db   : > { %v5881_v29 = vpack.c.bf16 %v5852_v5, %v5851_v52  ;;  %v5787_v43 = vadd.f32 %v5719_v11, %v5575_v33  ;;  %v5573_v63 = vadd.f32 %v5472_v48, %v10768_v7  ;;  %v5823_v35 = vadd.f32 %v10796_v55, %v5784_v26 }
 0x2dc   : > { %v7858_v24 = vpop.f32.mrf.mxu1  ;;  %v5857_v3 = vmax.f32 %v5825_v22, 0.0 }
 0x2dd   : > { %v5826_v37 = vadd.f32 %v10796_v55, %v5787_v43  ;;  %7884 = vmatprep.mubr.msk.bf16.mxu0 %vm5211_vm8, %v5881_v29  ;;  %v5785_v40 = vadd.f32 %v5715_v4, %v5573_v63  ;;  %v5578_v44 = vadd.f32 %v7858_v24, %v10765_v15  ;;  %v5855_v47 = vmax.f32 %v5823_v35, 0.0 }
 0x2de   : > { %v5485_v12 = vpop.f32.mrf.mxu1  ;;  %7885 = vmatmul.mubr.msk.bf16.gmra.mxu0 %vm5211_vm8, %v5882_v51  ;;  %v5661_v29 = vrot.slane %v5647_v9, %v10780_v10 }
 0x2df   : > { %v5576_v42 = vadd.f32 %v5485_v12, %v10765_v15  ;;  %v5824_v41 = vadd.f32 %v10796_v55, %v5785_v40  ;;  %v5858_v17 = vmax.f32 %v5826_v37, 0.0  ;;  %v5790_v54 = vadd.f32 %v5727_v34, %v5578_v44 }
 0x2e0   : > { %v7859_v32 = vpop.f32.mrf.mxu1  ;;  %v5663_v22 = vcombine.high %v5661_v29, %v5661_v29  ;;  %v5743_v44 = vrot.slane %v5694_v25, %v10785_v62 }
 0x2e1   : > { %v5788_v31 = vadd.f32 %v5723_v58, %v5576_v42  ;;  %v5579_v60 = vadd.f32 %v7859_v32, %v10768_v7  ;;  %v5856_v27 = vmax.f32 %v5824_v41, 0.0  ;;  %v5884_v21 = vpack.c.bf16 %v5858_v17, %v5857_v3 }
 0x2e2   : > { %v5488_v19 = vpop.f32.mrf.mxu1  ;;  %v5829_v13 = vadd.f32 %v10796_v55, %v5790_v54  ;;  %v5739_v42 = vrot.slane %v5692_v30, %v10785_v62  ;;  %v5691_v38 = vrot.slane %v5663_v22, %v10780_v10 }
 0x2e3   : > { %v5791_v2 = vadd.f32 %v5727_v34, %v5579_v60  ;;  %v5577_v53 = vadd.f32 %v5488_v19, %v10768_v7  ;;  %v5883_v14 = vpack.c.bf16 %v5856_v27, %v5855_v47  ;;  %v5827_v16 = vadd.f32 %v10796_v55, %v5788_v31 }
 0x2e4   : > { %v7862_v49 = vpop.f32.mrf.mxu1  ;;  %v5861_v33 = vmax.f32 %v5829_v13, 0.0  ;;  %v5677_v34 = vrot.slane %v5661_v29, %v10780_v10 }
 0x2e5   : > { %v5830_v18 = vadd.f32 %v10796_v55, %v5791_v2  ;;  %v5789_v36 = vadd.f32 %v5723_v58, %v5577_v53  ;;  %7888 = vmatprep.mubr.msk.bf16.mxu0 %vm5211_vm8, %v5883_v14  ;;  %v5582_v46 = vadd.f32 %v7862_v49, %v10765_v15  ;;  %v5859_v8 = vmax.f32 %v5827_v16, 0.0 }
 0x2e6   : > { %v5501_v59 = vpop.f32.mrf.mxu1  ;;  %7889 = vmatmul.mubr.msk.bf16.gmra.mxu0 %vm5211_vm8, %v5884_v21 }
 0x2e7   : > { %v5828_v45 = vadd.f32 %v10796_v55, %v5789_v36  ;;  %v5580_v20 = vadd.f32 %v5501_v59, %v10765_v15  ;;  %v5862_v4 = vmax.f32 %v5830_v18, 0.0  ;;  %v5794_v26 = vadd.f32 %v5735_v6, %v5582_v46 }
 0x2e8   : > { %v7863_v61 = vpop.f32.mrf.mxu1  ;;  %v5747_v59 = vrot.slane %v5677_v34, %v10785_v62 }
 0x2e9   : > { %v5860_v50 = vmax.f32 %v5828_v45, 0.0  ;;  %v5792_v52 = vadd.f32 %v5731_v1, %v5580_v20  ;;  %v5583_v5 = vadd.f32 %v7863_v61, %v10768_v7  ;;  %v5886_v28 = vpack.c.bf16 %v5862_v4, %v5861_v33 }
 0x2ea   : > { %v5504_v11 = vpop.f32.mrf.mxu1  ;;  %v5833_v0 = vadd.f32 %v10796_v55, %v5794_v26  ;;  %v5751_v45 = vrot.slane %v5691_v38, %v10785_v62 }
 0x2eb   : > { %v5885_v57 = vpack.c.bf16 %v5860_v50, %v5859_v8  ;;  %v5581_v48 = vadd.f32 %v5504_v11, %v10768_v7  ;;  %v5795_v43 = vadd.f32 %v5735_v6, %v5583_v5  ;;  %v5831_v51 = vadd.f32 %v10796_v55, %v5792_v52 }
 0x2ec   : > { %v7866_v23 = vpop.f32.mrf.mxu1  ;;  %v5865_v56 = vmax.f32 %v5833_v0, 0.0  ;;  %v5693_v8 = vcombine.high %v5677_v34, %v5677_v34 }
 0x2ed   : > { %v5793_v63 = vadd.f32 %v5731_v1, %v5581_v48  ;;  %7892 = vmatprep.mubr.msk.bf16.mxu0 %vm5211_vm8, %v5885_v57  ;;  %v5834_v24 = vadd.f32 %v10796_v55, %v5795_v43  ;;  %v5586_v40 = vadd.f32 %v7866_v23, %v10765_v15  ;;  %v5863_v39 = vmax.f32 %v5831_v51, 0.0 }
 0x2ee   : > { %v5517_v37 = vpop.f32.mrf.mxu1  ;;  %7893 = vmatmul.mubr.msk.bf16.gmra.mxu0 %vm5211_vm8, %v5886_v28  ;;  %v5695_v57 = vcombine.high %v5691_v38, %v5691_v38  ;;  %v5755_v23 = vrot.slane %v5693_v8, %v10785_v62 }
 0x2ef   : > { %v5832_v35 = vadd.f32 %v10796_v55, %v5793_v63  ;;  %v5584_v12 = vadd.f32 %v5517_v37, %v10765_v15  ;;  %v5866_v41 = vmax.f32 %v5834_v24, 0.0  ;;  %v5798_v27 = vadd.f32 %v5743_v44, %v5586_v40 }
 0x2f0   : > { %v7867_v58 = vpop.f32.mrf.mxu1  ;;  %v5759_v24 = vrot.slane %v5695_v57, %v10785_v62 }
 0x2f1   : > { %v5864_v32 = vmax.f32 %v5832_v35, 0.0  ;;  %v5587_v17 = vadd.f32 %v7867_v58, %v10768_v7  ;;  %v5796_v31 = vadd.f32 %v5739_v42, %v5584_v12  ;;  %v5888_v2 = vpack.c.bf16 %v5866_v41, %v5865_v56 }
 0x2f2   : > { %v5520_v60 = vpop.f32.mrf.mxu1  ;;  %v5837_v16 = vadd.f32 %v10796_v55, %v5798_v27 }
 0x2f3   : > { %v5887_v47 = vpack.c.bf16 %v5864_v32, %v5863_v39  ;;  %v5799_v19 = vadd.f32 %v5743_v44, %v5587_v17  ;;  %v5585_v3 = vadd.f32 %v5520_v60, %v10768_v7  ;;  %v5835_v14 = vadd.f32 %v10796_v55, %v5796_v31 }
 0x2f4   : > { %v7870_v54 = vpop.f32.mrf.mxu1  ;;  %v5869_v4 = vmax.f32 %v5837_v16, 0.0 }
 0x2f5   : > { %v5838_v53 = vadd.f32 %v10796_v55, %v5799_v19  ;;  %7896 = vmatprep.mubr.msk.bf16.mxu0 %vm5211_vm8, %v5887_v47  ;;  %v5797_v49 = vadd.f32 %v5739_v42, %v5585_v3  ;;  %v5590_v18 = vadd.f32 %v7870_v54, %v10765_v15  ;;  %v5867_v9 = vmax.f32 %v5835_v14, 0.0  ;;  %v10910_v14 = vld [vmem:[%s11233_s11] ss:$0 sm:$0xff] }
 0x2f6   : > { %v5533_v21 = vpop.f32.mrf.mxu1  ;;  %7897 = vmatmul.mubr.msk.bf16.gmra.mxu0 %vm5211_vm8, %v5888_v2  ;;  %v8125_v54 = vmov 0   ;;  %v10904_v2 = vld [vmem:[%s11232_s10] ss:$0 sm:$0xff] }
 0x2f7   : > { %v5588_v36 = vadd.f32 %v5533_v21, %v10765_v15  ;;  %v5836_v1 = vadd.f32 %v10796_v55, %v5797_v49  ;;  %v5870_v10 = vmax.f32 %v5838_v53, 0.0  ;;  %v5802_v50 = vadd.f32 %v5751_v45, %v5590_v18  ;;  %7976 = vset.pattern.permute.xlu0 %v8125_v54 }
 0x2f8   : > { %v7871_v13 = vpop.f32.mrf.mxu1 }
 0x2f9   : > { %v5800_v46 = vadd.f32 %v5747_v59, %v5588_v36  ;;  %v5591_v20 = vadd.f32 %v7871_v13, %v10768_v7  ;;  %v5868_v6 = vmax.f32 %v5836_v1, 0.0  ;;  %v5890_v26 = vpack.c.bf16 %v5870_v10, %v5869_v4 }
 0x2fa   : > { %v5536_v61 = vpop.f32.mrf.mxu1  ;;  %v5841_v25 = vadd.f32 %v10796_v55, %v5802_v50 }
 0x2fb   : > { %v5803_v52 = vadd.f32 %v5751_v45, %v5591_v20  ;;  %v5589_v5 = vadd.f32 %v5536_v61, %v10768_v7  ;;  %v5889_v11 = vpack.c.bf16 %v5868_v6, %v5867_v9  ;;  %v5839_v48 = vadd.f32 %v10796_v55, %v5800_v46 }
 0x2fc   : > { %v7874_v33 = vpop.f32.mrf.mxu1  ;;  %v5873_v42 = vmax.f32 %v5841_v25, 0.0 }
 0x2fd   : > { %v5842_v29 = vadd.f32 %v10796_v55, %v5803_v52  ;;  %v5801_v30 = vadd.f32 %v5747_v59, %v5589_v5  ;;  %7900 = vmatprep.mubr.msk.bf16.mxu0 %vm5211_vm8, %v5889_v11  ;;  %v5594_v51 = vadd.f32 %v7874_v33, %v10765_v15  ;;  %v5871_v0 = vmax.f32 %v5839_v48, 0.0 }
 0x2fe   : > { %v5549_v43 = vpop.f32.mrf.mxu1  ;;  %7901 = vmatmul.mubr.msk.bf16.gmra.mxu0 %vm5211_vm8, %v5890_v26 }
 0x2ff   : > { %v5840_v28 = vadd.f32 %v10796_v55, %v5801_v30  ;;  %v5592_v63 = vadd.f32 %v5549_v43, %v10765_v15  ;;  %v5874_v35 = vmax.f32 %v5842_v29, 0.0  ;;  %v5806_v39 = vadd.f32 %v5759_v24, %v5594_v51 }
 0x300   : > { %v7875_v37 = vpop.f32.mrf.mxu1 }
 0x301   : > { %v5872_v40 = vmax.f32 %v5840_v28, 0.0  ;;  %v5804_v12 = vadd.f32 %v5755_v23, %v5592_v63  ;;  %v5595_v22 = vadd.f32 %v7875_v37, %v10768_v7  ;;  %v5892_v17 = vpack.c.bf16 %v5874_v35, %v5873_v42 }
 0x302   : > { %v5552_v44 = vpop.f32.mrf.mxu1  ;;  %v5845_v31 = vadd.f32 %v10796_v55, %v5806_v39 }
 0x303   : > { %v5891_v58 = vpack.c.bf16 %v5872_v40, %v5871_v0  ;;  %v5593_v41 = vadd.f32 %v5552_v44, %v10768_v7  ;;  %v5807_v32 = vadd.f32 %v5759_v24, %v5595_v22  ;;  %v5843_v15 = vadd.f32 %v10796_v55, %v5804_v12 }
 0x304   : > { %v5877_v19 = vmax.f32 %v5845_v31, 0.0 }
 0x305   : > { %v5805_v34 = vadd.f32 %v5755_v23, %v5593_v41  ;;  %7904 = vmatprep.mubr.msk.bf16.mxu0 %vm5211_vm8, %v5891_v58  ;;  %v5846_v62 = vadd.f32 %v10796_v55, %v5807_v32  ;;  %v5875_v56 = vmax.f32 %v5843_v15, 0.0 }
 0x306   : > { %7905 = vmatmul.mubr.msk.bf16.gmra.mxu0 %vm5211_vm8, %v5892_v17 }
 0x307   : > { %v5844_v60 = vadd.f32 %v10796_v55, %v5805_v34  ;;  %v5878_v47 = vmax.f32 %v5846_v62, 0.0 }
 0x309   : > { %v5876_v27 = vmax.f32 %v5844_v60, 0.0  ;;  %v5894_v3 = vpack.c.bf16 %v5878_v47, %v5877_v19 }
 0x30b   : > { %v5893_v7 = vpack.c.bf16 %v5876_v27, %v5875_v56 }
 0x30d   : > { %7908 = vmatprep.mubr.msk.bf16.mxu0 %vm5211_vm8, %v5893_v7 }
 0x30e   : > { %7909 = vmatmul.mubr.msk.bf16.gmra.mxu0 %vm5211_vm8, %v5894_v3 }
 0x396   : > { %v7882_v55 = vpop.f32.mrf.mxu0 }
 0x397   : > { %v6009_v53 = vadd.f32 %v7882_v55, %v10904_v2 }
 0x398   : > { %v6000_v38 = vpop.f32.mrf.mxu0 }
 0x399   : > { %v6129_v49 = vmax.f32 %v6009_v53, 0.0  ;;  %v6001_v21 = vadd.f32 %v10904_v2, %v6000_v38 }
 0x39a   : > { %v7883_v16 = vpop.f32.mrf.mxu0 }
 0x39b   : > { %v6127_v18 = vmax.f32 %v6001_v21, 0.0  ;;  %v6012_v36 = vadd.f32 %v7883_v16, %v10904_v2  ;;  %v6168_v59 = vmul.f32 %v10910_v14, %v6129_v49 }
 0x39c   : > { %v6003_v1 = vpop.f32.mrf.mxu0 }
 0x39d   : > { %v6130_v13 = vmax.f32 %v6012_v36, 0.0  ;;  %v6004_v10 = vadd.f32 %v10904_v2, %v6003_v1  ;;  %v6204_v45 = vsel %vm1011_vm3, %v6168_v59, 0.0  ;;  %v6166_v46 = vmul.f32 %v10910_v14, %v6127_v18 }
 0x39e   : > { %6205 = vadd.xlane.f32.xlu1 %v6204_v45  ;;  %v7886_v20 = vpop.f32.mrf.mxu0 }
 0x39f   : > { %v6128_v9 = vmax.f32 %v6004_v10, 0.0  ;;  %v6025_v6 = vadd.f32 %v7886_v20, %v10904_v2  ;;  %v6198_v61 = vsel %vm1011_vm3, %v6166_v46, 0.0  ;;  %v6169_v8 = vmul.f32 %v10910_v14, %v6130_v13 }
 0x3a0   : > { %v6016_v4 = vpop.f32.mrf.mxu0  ;;  %6199 = vadd.xlane.f32.xlu0 %v6198_v61 }
 0x3a1   : > { %v6133_v50 = vmax.f32 %v6025_v6, 0.0  ;;  %v6017_v52 = vadd.f32 %v10904_v2, %v6016_v4  ;;  %v6207_v5 = vsel %vm1011_vm3, %v6169_v8, 0.0  ;;  %v6167_v11 = vmul.f32 %v10910_v14, %v6128_v9 }
 0x3a2   : > { %6208 = vadd.xlane.f32.xlu1 %v6207_v5  ;;  %v7887_v33 = vpop.f32.mrf.mxu0 }
 0x3a3   : > { %v6131_v57 = vmax.f32 %v6017_v52, 0.0  ;;  %v6028_v26 = vadd.f32 %v7887_v33, %v10904_v2  ;;  %v6201_v48 = vsel %vm1011_vm3, %v6167_v11, 0.0  ;;  %v6172_v29 = vmul.f32 %v10910_v14, %v6133_v50 }
 0x3a4   : > { %v6019_v30 = vpop.f32.mrf.mxu0  ;;  %6202 = vadd.xlane.f32.xlu0 %v6201_v48 }
 0x3a5   : > { %v6134_v43 = vmax.f32 %v6028_v26, 0.0  ;;  %v6020_v23 = vadd.f32 %v10904_v2, %v6019_v30  ;;  %v6216_v51 = vsel %vm1011_vm3, %v6172_v29, 0.0  ;;  %v6170_v24 = vmul.f32 %v10910_v14, %v6131_v57 }
 0x3a6   : > { %v7890_v28 = vpop.f32.mrf.mxu0 }
 0x3a7   : > { %v6132_v25 = vmax.f32 %v6020_v23, 0.0  ;;  %v6173_v63 = vmul.f32 %v10910_v14, %v6134_v43  ;;  %v6041_v37 = vadd.f32 %v7890_v28, %v10904_v2  ;;  %v6210_v42 = vsel %vm1011_vm3, %v6170_v24, 0.0 }
 0x3a8   : > { %6217 = vadd.xlane.f32.xlu0 %v6216_v51  ;;  %v6032_v0 = vpop.f32.mrf.mxu0 }
 0x3a9   : > { %v6219_v35 = vsel %vm1011_vm3, %v6173_v63, 0.0  ;;  %v6171_v40 = vmul.f32 %v10910_v14, %v6132_v25  ;;  %v6137_v12 = vmax.f32 %v6041_v37, 0.0  ;;  %v6033_v22 = vadd.f32 %v10904_v2, %v6032_v0 }
 0x3aa   : > { %6220 = vadd.xlane.f32.xlu1 %v6219_v35  ;;  %v7891_v44 = vpop.f32.mrf.mxu0 }
 0x3ab   : > { %v6135_v58 = vmax.f32 %v6033_v22, 0.0  ;;  %v6044_v39 = vadd.f32 %v7891_v44, %v10904_v2  ;;  %v6176_v41 = vmul.f32 %v10910_v14, %v6137_v12  ;;  %v6213_v17 = vsel %vm1011_vm3, %v6171_v40, 0.0 }
 0x3ac   : > { %6211 = vadd.xlane.f32.xlu0 %v6210_v42  ;;  %v6035_v32 = vpop.f32.mrf.mxu0 }
 0x3ad   : > { %v6138_v15 = vmax.f32 %v6044_v39, 0.0  ;;  %v6036_v34 = vadd.f32 %v10904_v2, %v6035_v32  ;;  %v6228_v31 = vsel %vm1011_vm3, %v6176_v41, 0.0  ;;  %v6174_v60 = vmul.f32 %v10910_v14, %v6135_v58 }
 0x3ae   : > { %6214 = vadd.xlane.f32.xlu1 %v6213_v17  ;;  %v7894_v62 = vpop.f32.mrf.mxu0 }
 0x3af   : > { %v6136_v56 = vmax.f32 %v6036_v34, 0.0  ;;  %v6057_v47 = vadd.f32 %v7894_v62, %v10904_v2  ;;  %v6177_v27 = vmul.f32 %v10910_v14, %v6138_v15  ;;  %v6222_v38 = vsel %vm1011_vm3, %v6174_v60, 0.0 }
 0x3b0   : > { %6229 = vadd.xlane.f32.xlu0 %v6228_v31  ;;  %v6048_v19 = vpop.f32.mrf.mxu0 }
 0x3b1   : > { %v6141_v7 = vmax.f32 %v6057_v47, 0.0  ;;  %v6049_v3 = vadd.f32 %v10904_v2, %v6048_v19  ;;  %v6231_v54 = vsel %vm1011_vm3, %v6177_v27, 0.0  ;;  %v6175_v55 = vmul.f32 %v10910_v14, %v6136_v56 }
 0x3b2   : > { %v7895_v53 = vpop.f32.mrf.mxu0  ;;  %6232 = vadd.xlane.f32.xlu1 %v6231_v54 }
 0x3b3   : > { %v6139_v49 = vmax.f32 %v6049_v3, 0.0  ;;  %v6060_v21 = vadd.f32 %v7895_v53, %v10904_v2  ;;  %v6180_v16 = vmul.f32 %v10910_v14, %v6141_v7  ;;  %v6225_v1 = vsel %vm1011_vm3, %v6175_v55, 0.0 }
 0x3b4   : > { %6223 = vadd.xlane.f32.xlu0 %v6222_v38  ;;  %v6051_v18 = vpop.f32.mrf.mxu0 }
 0x3b5   : > { %v6142_v36 = vmax.f32 %v6060_v21, 0.0  ;;  %v6052_v59 = vadd.f32 %v10904_v2, %v6051_v18  ;;  %v6240_v10 = vsel %vm1011_vm3, %v6180_v16, 0.0  ;;  %v6178_v45 = vmul.f32 %v10910_v14, %v6139_v49 }
 0x3b6   : > { %6226 = vadd.xlane.f32.xlu1 %v6225_v1  ;;  %v7898_v13 = vpop.f32.mrf.mxu0 }
 0x3b7   : > { %v6140_v46 = vmax.f32 %v6052_v59, 0.0  ;;  %v6073_v20 = vadd.f32 %v7898_v13, %v10904_v2  ;;  %v6181_v9 = vmul.f32 %v10910_v14, %v6142_v36  ;;  %v6234_v5 = vsel %vm1011_vm3, %v6178_v45, 0.0 }
 0x3b8   : > { %6241 = vadd.xlane.f32.xlu0 %v6240_v10  ;;  %v6064_v6 = vpop.f32.mrf.mxu0 }
 0x3b9   : > { %v6145_v61 = vmax.f32 %v6073_v20, 0.0  ;;  %v6065_v8 = vadd.f32 %v10904_v2, %v6064_v6  ;;  %v6243_v4 = vsel %vm1011_vm3, %v6181_v9, 0.0  ;;  %v6179_v50 = vmul.f32 %v10910_v14, %v6140_v46 }
 0x3ba   : > { %6244 = vadd.xlane.f32.xlu1 %v6243_v4  ;;  %v7899_v52 = vpop.f32.mrf.mxu0 }
 0x3bb   : > { %v6143_v11 = vmax.f32 %v6065_v8, 0.0  ;;  %v6076_v33 = vadd.f32 %v7899_v52, %v10904_v2  ;;  %v6184_v57 = vmul.f32 %v10910_v14, %v6145_v61  ;;  %v6237_v30 = vsel %vm1011_vm3, %v6179_v50, 0.0 }
 0x3bc   : > { %6235 = vadd.xlane.f32.xlu0 %v6234_v5  ;;  %v6067_v26 = vpop.f32.mrf.mxu0 }
 0x3bd   : > { %v6146_v48 = vmax.f32 %v6076_v33, 0.0  ;;  %v6068_v29 = vadd.f32 %v10904_v2, %v6067_v26  ;;  %v6252_v23 = vsel %vm1011_vm3, %v6184_v57, 0.0  ;;  %v6182_v25 = vmul.f32 %v10910_v14, %v6143_v11 }
 0x3be   : > { %6238 = vadd.xlane.f32.xlu1 %v6237_v30  ;;  %v7902_v43 = vpop.f32.mrf.mxu0 }
 0x3bf   : > { %v6144_v28 = vmax.f32 %v6068_v29, 0.0  ;;  %v6089_v51 = vadd.f32 %v7902_v43, %v10904_v2  ;;  %v6185_v63 = vmul.f32 %v10910_v14, %v6146_v48  ;;  %v6246_v22 = vsel %vm1011_vm3, %v6182_v25, 0.0 }
 0x3c0   : > { %6253 = vadd.xlane.f32.xlu0 %v6252_v23  ;;  %v6080_v24 = vpop.f32.mrf.mxu0 }
 0x3c1   : > { %v6149_v37 = vmax.f32 %v6089_v51, 0.0  ;;  %v6081_v0 = vadd.f32 %v10904_v2, %v6080_v24  ;;  %v6255_v35 = vsel %vm1011_vm3, %v6185_v63, 0.0  ;;  %v6183_v40 = vmul.f32 %v10910_v14, %v6144_v28  ;;  %v7314_v63 = vld [vmem:[#allocation2] ss:$0 sm:$0xff] }
 0x3c2   : > { %6256 = vadd.xlane.f32.xlu1 %v6255_v35  ;;  %v7903_v12 = vpop.f32.mrf.mxu0 }
 0x3c3   : > { %v6147_v44 = vmax.f32 %v6081_v0, 0.0  ;;  %v6092_v42 = vadd.f32 %v7903_v12, %v10904_v2  ;;  %v6188_v58 = vmul.f32 %v10910_v14, %v6149_v37  ;;  %v6249_v17 = vsel %vm1011_vm3, %v6183_v40, 0.0 }
 0x3c4   : > { %6247 = vadd.xlane.f32.xlu0 %v6246_v22  ;;  %v6083_v39 = vpop.f32.mrf.mxu0 }
 0x3c5   : > { %v6150_v41 = vmax.f32 %v6092_v42, 0.0  ;;  %v6084_v32 = vadd.f32 %v10904_v2, %v6083_v39  ;;  %v6264_v34 = vsel %vm1011_vm3, %v6188_v58, 0.0  ;;  %v6186_v62 = vmul.f32 %v10910_v14, %v6147_v44 }
 0x3c6   : > { %6250 = vadd.xlane.f32.xlu1 %v6249_v17  ;;  %v7906_v15 = vpop.f32.mrf.mxu0 }
 0x3c7   : > { %v6148_v31 = vmax.f32 %v6084_v32, 0.0  ;;  %v6105_v60 = vadd.f32 %v7906_v15, %v10904_v2  ;;  %v6189_v56 = vmul.f32 %v10910_v14, %v6150_v41  ;;  %v6258_v55 = vsel %vm1011_vm3, %v6186_v62, 0.0 }
 0x3c8   : > { %6265 = vadd.xlane.f32.xlu0 %v6264_v34  ;;  %v6096_v47 = vpop.f32.mrf.mxu0 }
 0x3c9   : > { %v6153_v27 = vmax.f32 %v6105_v60, 0.0  ;;  %v6097_v19 = vadd.f32 %v10904_v2, %v6096_v47  ;;  %v6267_v7 = vsel %vm1011_vm3, %v6189_v56, 0.0  ;;  %v6187_v3 = vmul.f32 %v10910_v14, %v6148_v31 }
 0x3ca   : > { %6268 = vadd.xlane.f32.xlu1 %v6267_v7  ;;  %v7907_v54 = vpop.f32.mrf.mxu0 }
 0x3cb   : > { %v6151_v53 = vmax.f32 %v6097_v19, 0.0  ;;  %v6108_v38 = vadd.f32 %v7907_v54, %v10904_v2  ;;  %v6192_v49 = vmul.f32 %v10910_v14, %v6153_v27  ;;  %v6261_v36 = vsel %vm1011_vm3, %v6187_v3, 0.0 }
 0x3cc   : > { %6259 = vadd.xlane.f32.xlu0 %v6258_v55  ;;  %v6099_v21 = vpop.f32.mrf.mxu0 }
 0x3cd   : > { %v6154_v16 = vmax.f32 %v6108_v38, 0.0  ;;  %v6100_v18 = vadd.f32 %v10904_v2, %v6099_v21  ;;  %v6276_v1 = vsel %vm1011_vm3, %v6192_v49, 0.0  ;;  %v6190_v13 = vmul.f32 %v10910_v14, %v6151_v53 }
 0x3ce   : > { %6262 = vadd.xlane.f32.xlu1 %v6261_v36  ;;  %v7910_v59 = vpop.f32.mrf.mxu0 }
 0x3cf   : > { %v6152_v10 = vmax.f32 %v6100_v18, 0.0  ;;  %v6121_v45 = vadd.f32 %v7910_v59, %v10904_v2  ;;  %v6193_v46 = vmul.f32 %v10910_v14, %v6154_v16  ;;  %v6270_v50 = vsel %vm1011_vm3, %v6190_v13, 0.0 }
 0x3d0   : > { %6277 = vadd.xlane.f32.xlu0 %v6276_v1  ;;  %v6112_v20 = vpop.f32.mrf.mxu0 }
 0x3d1   : > { %v6157_v9 = vmax.f32 %v6121_v45, 0.0  ;;  %v6113_v6 = vadd.f32 %v10904_v2, %v6112_v20  ;;  %v6279_v61 = vsel %vm1011_vm3, %v6193_v46, 0.0  ;;  %v6191_v8 = vmul.f32 %v10910_v14, %v6152_v10 }
 0x3d2   : > { %6280 = vadd.xlane.f32.xlu1 %v6279_v61  ;;  %v7911_v4 = vpop.f32.mrf.mxu0 }
 0x3d3   : > { %v6155_v52 = vmax.f32 %v6113_v6, 0.0  ;;  %v6124_v5 = vadd.f32 %v7911_v4, %v10904_v2  ;;  %v6196_v11 = vmul.f32 %v10910_v14, %v6157_v9  ;;  %v6273_v48 = vsel %vm1011_vm3, %v6191_v8, 0.0 }
 0x3d4   : > { %6271 = vadd.xlane.f32.xlu0 %v6270_v50  ;;  %v6115_v33 = vpop.f32.mrf.mxu0 }
 0x3d5   : > { %v6158_v57 = vmax.f32 %v6124_v5, 0.0  ;;  %v6116_v26 = vadd.f32 %v10904_v2, %v6115_v33  ;;  %v6288_v29 = vsel %vm1011_vm3, %v6196_v11, 0.0  ;;  %v6194_v30 = vmul.f32 %v10910_v14, %v6155_v52 }
 0x3d6   : > { %6274 = vadd.xlane.f32.xlu1 %v6273_v48 }
 0x3d7   : > { %v6156_v43 = vmax.f32 %v6116_v26, 0.0  ;;  %v6197_v23 = vmul.f32 %v10910_v14, %v6158_v57  ;;  %v6282_v28 = vsel %vm1011_vm3, %v6194_v30, 0.0 }
 0x3d8   : > { %6289 = vadd.xlane.f32.xlu0 %v6288_v29 }
 0x3d9   : > { %v6195_v25 = vmul.f32 %v10910_v14, %v6156_v43  ;;  %v6291_v2 = vsel %vm1011_vm3, %v6197_v23, 0.0 }
 0x3db   : > { %v6285_v51 = vsel %vm1011_vm3, %v6195_v25, 0.0 }
 0x3dc   : > { %6283 = vadd.xlane.f32.xlu0 %v6282_v28  ;;  %6286 = vadd.xlane.f32.xlu1 %v6285_v51 }
 0x3e0   : > { %6292 = vadd.xlane.f32.xlu1 %v6291_v2 }
 0x3f2   : > { %6301 = vperm.xlu0 %7976, %v7314_v63  }
 0x427   : > { %v6206_v24 = vpop.xlane.xlu1 %6205 }
 0x429   : > { %v6200_v37 = vpop.xlane.xlu0 %6199 }
 0x42b   : > { %v6209_v35 = vpop.xlane.xlu1 %6208 }
 0x42d   : > { %v6203_v0 = vpop.xlane.xlu0 %6202 }
 0x431   : > { %v6218_v40 = vpop.xlane.xlu0 %6217 }
 0x433   : > { %v6221_v12 = vpop.xlane.xlu1 %6220 }
 0x435   : > { %v6212_v22 = vpop.xlane.xlu0 %6211 }
 0x437   : > { %v6215_v44 = vpop.xlane.xlu1 %6214 }
 0x439   : > { %v6230_v14 = vpop.xlane.xlu0 %6229 }
 0x43b   : > { %v6233_v42 = vpop.xlane.xlu1 %6232 }
 0x43d   : > { %v6224_v58 = vpop.xlane.xlu0 %6223 }
 0x43f   : > { %v6227_v39 = vpop.xlane.xlu1 %6226 }
 0x441   : > { %v6242_v41 = vpop.xlane.xlu0 %6241 }
 0x443   : > { %v6245_v32 = vpop.xlane.xlu1 %6244 }
 0x445   : > { %v6236_v17 = vpop.xlane.xlu0 %6235 }
 0x447   : > { %v6239_v15 = vpop.xlane.xlu1 %6238 }
 0x449   : > { %v6254_v34 = vpop.xlane.xlu0 %6253 }
 0x44b   : > { %v6257_v62 = vpop.xlane.xlu1 %6256 }
 0x44d   : > { %v6248_v31 = vpop.xlane.xlu0 %6247 }
 0x44f   : > { %v6251_v56 = vpop.xlane.xlu1 %6250 }
 0x451   : > { %v6266_v60 = vpop.xlane.xlu0 %6265 }
 0x453   : > { %v6269_v27 = vpop.xlane.xlu1 %6268 }
 0x455   : > { %v6260_v47 = vpop.xlane.xlu0 %6259 }
 0x457   : > { %v6263_v3 = vpop.xlane.xlu1 %6262 }
 0x459   : > { %v6278_v19 = vpop.xlane.xlu0 %6277 }
 0x45b   : > { %v6281_v55 = vpop.xlane.xlu1 %6280 }
 0x45d   : > { %v6272_v7 = vpop.xlane.xlu0 %6271 }
 0x45f   : > { %v6275_v38 = vpop.xlane.xlu1 %6274 }
 0x461   : > { %v6290_v54 = vpop.xlane.xlu0 %6289 }
 0x465   : > { %v6284_v53 = vpop.xlane.xlu0 %6283  ;;  %v6287_v21 = vpop.xlane.xlu1 %6286 }
 0x469   : > { %v6293_v30 = vpop.xlane.xlu1 %6292 }
 0x46d   : > { %v6302_v49 = vpop.permute.xlu0 %6301 }
 0x46e   : > { %v11007_v16 = vadd.f32 %v6302_v49, %v6200_v37  ;;  %v11009_v18 = vadd.f32 %v6302_v49, %v6203_v0  ;;  %v11011_v36 = vadd.f32 %v6302_v49, %v6206_v24  ;;  %v11013_v59 = vadd.f32 %v6302_v49, %v6209_v35 }
 0x46f   : > { %v11015_v1 = vadd.f32 %v6302_v49, %v6212_v22  ;;  %v11017_v13 = vadd.f32 %v6302_v49, %v6215_v44  ;;  %v11019_v10 = vadd.f32 %v6302_v49, %v6218_v40  ;;  %v11021_v45 = vadd.f32 %v6302_v49, %v6221_v12 }
 0x470   : > { %v11023_v46 = vadd.f32 %v6302_v49, %v6224_v58  ;;  %v11025_v20 = vadd.f32 %v6302_v49, %v6227_v39  ;;  %v11027_v9 = vadd.f32 %v6302_v49, %v6230_v14  ;;  %v11029_v6 = vadd.f32 %v6302_v49, %v6233_v42 }
 0x471   : > { %v11031_v61 = vadd.f32 %v6302_v49, %v6236_v17  ;;  %v11033_v8 = vadd.f32 %v6302_v49, %v6239_v15  ;;  %v11035_v4 = vadd.f32 %v6302_v49, %v6242_v41  ;;  %v11037_v50 = vadd.f32 %v6302_v49, %v6245_v32 }
 0x472   : > { %v11039_v52 = vadd.f32 %v6302_v49, %v6248_v31  ;;  %v11041_v5 = vadd.f32 %v6302_v49, %v6251_v56  ;;  %v11043_v11 = vadd.f32 %v6302_v49, %v6254_v34  ;;  %v11045_v33 = vadd.f32 %v6302_v49, %v6257_v62 }
 0x473   : > { %v11047_v57 = vadd.f32 %v6302_v49, %v6260_v47  ;;  %v11049_v26 = vadd.f32 %v6302_v49, %v6263_v3  ;;  %v11051_v48 = vadd.f32 %v6302_v49, %v6266_v60  ;;  %v11053_v29 = vadd.f32 %v6302_v49, %v6269_v27 }
 0x474   : > { %v11055_v43 = vadd.f32 %v6302_v49, %v6272_v7  ;;  %v11057_v23 = vadd.f32 %v6302_v49, %v6275_v38  ;;  %v11059_v25 = vadd.f32 %v6302_v49, %v6278_v19  ;;  %v11061_v28 = vadd.f32 %v6302_v49, %v6281_v55 }
 0x475   : > { %v11063_v51 = vadd.f32 %v6302_v49, %v6284_v53  ;;  %v11065_v2 = vadd.f32 %v6302_v49, %v6287_v21  ;;  %v11067_v63 = vadd.f32 %v6302_v49, %v6290_v54  ;;  %v11069_v24 = vadd.f32 %v6302_v49, %v6293_v30 }
 0x476   : > { %v6336_v37 = vmax.f32 %v11007_v16, 0.0  ;;  %v6337_v0 = vmax.f32 %v11009_v18, 0.0  ;;  %v6338_v35 = vmax.f32 %v11011_v36, 0.0  ;;  %v6339_v40 = vmax.f32 %v11013_v59, 0.0  ;;  %v11405_v18 = vld [vmem:[#allocation16_spill] sm:$0xff]  ;;  %v11406_v59 = vld [vmem:[#allocation19_spill] sm:$0xff] }
 0x477   : > { %v6340_v12 = vmax.f32 %v11015_v1, 0.0  ;;  %v6341_v22 = vmax.f32 %v11017_v13, 0.0  ;;  %v6342_v44 = vmax.f32 %v11019_v10, 0.0  ;;  %v6343_v14 = vmax.f32 %v11021_v45, 0.0 }
 0x478   : > { %v6344_v42 = vmax.f32 %v11023_v46, 0.0  ;;  %v6345_v58 = vmax.f32 %v11025_v20, 0.0  ;;  %v6346_v39 = vmax.f32 %v11027_v9, 0.0  ;;  %v6347_v41 = vmax.f32 %v11029_v6, 0.0 }
 0x479   : > { %v6348_v32 = vmax.f32 %v11031_v61, 0.0  ;;  %v6349_v17 = vmax.f32 %v11033_v8, 0.0  ;;  %v6350_v15 = vmax.f32 %v11035_v4, 0.0  ;;  %v6351_v34 = vmax.f32 %v11037_v50, 0.0 }
 0x47a   : > { %v6352_v62 = vmax.f32 %v11039_v52, 0.0  ;;  %v6353_v31 = vmax.f32 %v11041_v5, 0.0  ;;  %v6354_v60 = vmax.f32 %v11043_v11, 0.0  ;;  %v6355_v56 = vmax.f32 %v11045_v33, 0.0 }
 0x47b   : > { %v6356_v47 = vmax.f32 %v11047_v57, 0.0  ;;  %v6357_v27 = vmax.f32 %v11049_v26, 0.0  ;;  %v6358_v19 = vmax.f32 %v11051_v48, 0.0  ;;  %v6359_v7 = vmax.f32 %v11053_v29, 0.0 }
 0x47c   : > { %v6360_v3 = vmax.f32 %v11055_v43, 0.0  ;;  %v6361_v54 = vmax.f32 %v11057_v23, 0.0  ;;  %v6362_v55 = vmax.f32 %v11059_v25, 0.0  ;;  %v6363_v53 = vmax.f32 %v11061_v28, 0.0 }
 0x47d   : > { %v6364_v38 = vmax.f32 %v11063_v51, 0.0  ;;  %v6365_v49 = vmax.f32 %v11065_v2, 0.0  ;;  %v6366_v21 = vmax.f32 %v11067_v63, 0.0  ;;  %v6367_v16 = vmax.f32 %v11069_v24, 0.0 }
 0x47e   : > { %v6405_v36 = vrot.slane %v6336_v37, %v11405_v18  ;;  %v6410_v1 = vrot.slane %v6337_v0, %v11406_v59  ;;  %v6416_v13 = vrot.slane %v6338_v35, %v11405_v18  ;;  %v6420_v10 = vrot.slane %v6339_v40, %v11406_v59 }
 0x47f   : > { %v6425_v45 = vrot.slane %v6340_v12, %v11405_v18  ;;  %v6429_v46 = vrot.slane %v6341_v22, %v11406_v59  ;;  %v6434_v20 = vrot.slane %v6342_v44, %v11405_v18  ;;  %v6438_v9 = vrot.slane %v6343_v14, %v11406_v59 }
 0x480   : > { %v6412_v6 = vsel %vm6411_vm9, %v6410_v1, %v6405_v36  ;;  %v6421_v61 = vsel %vm6411_vm9, %v6420_v10, %v6416_v13  ;;  %v6443_v8 = vrot.slane %v6344_v42, %v11405_v18  ;;  %v6447_v4 = vrot.slane %v6345_v58, %v11406_v59 }
 0x481   : > { %v6430_v50 = vsel %vm6411_vm9, %v6429_v46, %v6425_v45  ;;  %v6439_v52 = vsel %vm6411_vm9, %v6438_v9, %v6434_v20  ;;  %v6452_v5 = vrot.slane %v6346_v39, %v11405_v18  ;;  %v6456_v11 = vrot.slane %v6347_v41, %v11406_v59 }
 0x482   : > { %v6448_v33 = vsel %vm6411_vm9, %v6447_v4, %v6443_v8  ;;  %v6461_v57 = vrot.slane %v6348_v32, %v11405_v18  ;;  %v6465_v26 = vrot.slane %v6349_v17, %v11406_v59  ;;  %v6470_v48 = vrot.slane %v6350_v15, %v11405_v18 }
 0x483   : > { %v6457_v29 = vsel %vm6411_vm9, %v6456_v11, %v6452_v5  ;;  %v6474_v30 = vrot.slane %v6351_v34, %v11406_v59  ;;  %v6479_v43 = vrot.slane %v6352_v62, %v11405_v18  ;;  %v6483_v23 = vrot.slane %v6353_v31, %v11406_v59 }
 0x484   : > { %v6466_v25 = vsel %vm6411_vm9, %v6465_v26, %v6461_v57  ;;  %v6488_v28 = vrot.slane %v6354_v60, %v11405_v18  ;;  %v6492_v51 = vrot.slane %v6355_v56, %v11406_v59  ;;  %v6497_v2 = vrot.slane %v6356_v47, %v11405_v18 }
 0x485   : > { %v6475_v63 = vsel %vm6411_vm9, %v6474_v30, %v6470_v48  ;;  %v6484_v24 = vsel %vm6411_vm9, %v6483_v23, %v6479_v43  ;;  %v6501_v37 = vrot.slane %v6357_v27, %v11406_v59  ;;  %v6506_v0 = vrot.slane %v6358_v19, %v11405_v18 }
 0x486   : > { %v6493_v35 = vsel %vm6411_vm9, %v6492_v51, %v6488_v28  ;;  %v6510_v40 = vrot.slane %v6359_v7, %v11406_v59  ;;  %v6515_v12 = vrot.slane %v6360_v3, %v11405_v18  ;;  %v6519_v22 = vrot.slane %v6361_v54, %v11406_v59 }
 0x487   : > { %v6502_v44 = vsel %vm6411_vm9, %v6501_v37, %v6497_v2  ;;  %v6524_v14 = vrot.slane %v6362_v55, %v11405_v18  ;;  %v6528_v42 = vrot.slane %v6363_v53, %v11406_v59  ;;  %v6533_v58 = vrot.slane %v6364_v38, %v11405_v18 }
 0x488   : > { %v6511_v39 = vsel %vm6411_vm9, %v6510_v40, %v6506_v0  ;;  %v6520_v41 = vsel %vm6411_vm9, %v6519_v22, %v6515_v12  ;;  %v6537_v32 = vrot.slane %v6365_v49, %v11406_v59  ;;  %v6542_v17 = vrot.slane %v6366_v21, %v11405_v18 }
 0x489   : > { %v6529_v15 = vsel %vm6411_vm9, %v6528_v42, %v6524_v14  ;;  %v6546_v34 = vrot.slane %v6367_v16, %v11406_v59  ;;  %v6549_v62 = vsel %vm6548_vm10, %v6421_v61, %v6412_v6  ;;  %v6562_v31 = vsel %vm6548_vm10, %v6493_v35, %v6484_v24 }
 0x48a   : > { %v6538_v60 = vsel %vm6411_vm9, %v6537_v32, %v6533_v58  ;;  %v6551_v56 = vsel %vm6550_vm11, %v6430_v50, %v6549_v62  ;;  %v6563_v47 = vsel %vm6550_vm11, %v6502_v44, %v6562_v31 }
 0x48b   : > { %v6547_v27 = vsel %vm6411_vm9, %v6546_v34, %v6542_v17  ;;  %v6553_v19 = vsel %vm6552_vm12, %v6439_v52, %v6551_v56  ;;  %v6564_v7 = vsel %vm6552_vm12, %v6511_v39, %v6563_v47 }
 0x48c   : > { %v6555_v3 = vsel %vm6554_vm13, %v6448_v33, %v6553_v19  ;;  %v6565_v54 = vsel %vm6554_vm13, %v6520_v41, %v6564_v7 }
 0x48d   : > { %v6557_v55 = vsel %vm6556_vm14, %v6457_v29, %v6555_v3  ;;  %v6566_v53 = vsel %vm6556_vm14, %v6529_v15, %v6565_v54 }
 0x48e   : > { %v6559_v38 = vsel %vm6558_vm15, %v6466_v25, %v6557_v55  ;;  %v6567_v49 = vsel %vm6558_vm15, %v6538_v60, %v6566_v53 }
 0x48f   : > { %v6561_v21 = vsel %vm6560_vm0, %v6475_v63, %v6559_v38  ;;  %v6568_v16 = vsel %vm6560_vm0, %v6547_v27, %v6567_v49 }
 0x490   : > { %6571 = vst.msk [vmem:[%s490_s12] sm:$0xff] %vm1011_vm3, %v6561_v21  ;;  %6572 = vst.msk [vmem:[%s490_s12 + $0x8] sm:$0xff] %vm1011_vm3, %v6568_v16 }
 0x491   : > { %8057 = shalt.err (!%p8054_p5)
}
 0x492   : > { %s8058_s25 = scalar_lea.hbm %s11169_s24, 256  ;;  %s8062_s18 = scalar_lea.hbm %s11235_s13, 512 }
 0x493   : > { %p8059_p6 = scmp.ne.s32.totalorder %s11169_s24, %s8058_s25  ;;  %p8063_p10 = scmp.lt.s32.totalorder %s11169_s24, %s11235_s13 }
 0x494   : > { %p8064_p11 = scmp.lt.s32.totalorder %s8062_s18, %s8058_s25 }
 0x495   : > { %p8060_p7 = pnand %p8059_p6, %p8242_p4 }
 0x496   : > { %p8065_p12 = por %p8064_p11, %p8063_p10 }
 0x497   : > { %p8061_p9 = pneg %p8060_p7 }
 0x499   : > { %p8066_p13 = pnand %p8065_p12, %p8061_p9 }
 0x49b   : > { %8069 = shalt.err (!%p8066_p13)
}
 0x49c   : > { %s8127_s16 = smov 128   ;;  %s8128_s23 = smov 8  }
 0x49d   : > { %7915 = dma.vmem_to_hbm [thread:$0]  (%p8242_p4), %s11171_s20, 256, %s11169_s24, %s11177_s26, %s8127_s16, %s8127_s16, %s8128_s23  }
 0x49e PF: > { %p7921_p0 = scmp.ge.s32.totalorder %s8120_s15, 2  ;;  %s6604_s0 = sand.u32 1, %s8100_s27  }
 0x49f   : > { %s6605_s1 = scalar_lea.sflag [#allocation4], %s6604_s0 }
 0x4a0   : > { %p7918_p1 = pnand %p7921_p0, %p8249_p8 }
 0x4a2   : > { %p7919_p2 = pneg %p7918_p1 }
 0x4a4   : > { %8095 = dma.done.wait (%p7919_p2), %s6605_s1, 256  }
 0x4a5   : > { %8097 = vsyncadd (%p7919_p2), %s6605_s1, 4294967040  ;;  %s28_s15 = sadd.s32 1, %s8120_s15   ;;  %s11407_s27 = smov %s8104_s28 }
 0x4a6   : > { %p25_p3 = scmp.ge.s32.totalorder %s28_s15, 4   ;;  %s11408_s28 = smov %s8108_s29 }
 0x4a7   : > { %s11409_s29 = smov %s8255_s22  ;;  %s11410_s30 = smov %s8116_s14 }
 0x4a8   : > { %s11411_s14 = smov %s11413_s17  ;;  %27 = sbr.rel (!%p25_p3) target bundleno = 8 (0x8), region = 124 }
 0x4ad   :  { %6610 = vsyncpa [#allocation4], 1 }
 0x4ae   :  { %6612 = vsyncpa [#allocation4 + $0x1], 1 }

</bundles_post_ra>
